<compile_context>
chip_gen: v7x
topology: tpu7x:2x2x1
jax: 0.10.0
libtpu: 0.0.40
codegen_flags: <defaults>
</compile_context>

<pallas_src>
import functools

import jax
import jax.numpy as jnp
from jax.experimental import pallas as pl
from jax.experimental.pallas import tpu as pltpu


def _round_up(x, m):
    return (x + m - 1) // m * m


def _cdiv(a, b):
    return (a + b - 1) // b


# ----------------------------------------------------------------------------
# Pallas kernel 1: full-K-resident GEMM with fused bias + ReLU epilogue.
#   A: (tm, Kp) bf16,  B: (Kp, tn) bf16,  bias: (1, tn) f32  ->  out (tm, tn).
# ----------------------------------------------------------------------------
def _gemm_bias_act_kernel(a_ref, b_ref, bias_ref, o_ref, *, apply_relu):
    acc = jnp.dot(a_ref[...], b_ref[...], preferred_element_type=jnp.float32)
    acc = acc + bias_ref[...]
    if apply_relu:
        acc = jnp.maximum(acc, 0.0)
    o_ref[...] = acc.astype(o_ref.dtype)


def _pick_tm(m):
    """Largest M tile <= 256, halved until >=2 M tiles exist (2-TC occupancy)."""
    tm = min(256, _round_up(m, 8))
    while tm >= 32 and _cdiv(m, tm) < 2:
        tm //= 2
    return tm


def gemm_bias_relu(a, w_p, bias_p, *, n_valid, apply_relu=True,
                   out_dtype=jnp.bfloat16):
    """out[:M, :n_valid] = act(a @ w + bias).

    a: (M, K) float.  w_p: (Kp, Np) bf16, pre-padded at init.  bias_p: (1, Np) f32.
    """
    M, K = a.shape
    Kp, Np = w_p.shape
    a = a.astype(jnp.bfloat16)
    tm = _pick_tm(M)
    Mp = _round_up(M, tm)
    if (Mp - M) or (Kp - K):
        a = jnp.pad(a, ((0, Mp - M), (0, Kp - K)))
    tn = 256 if Np % 256 == 0 else 128

    out = pl.pallas_call(
        functools.partial(_gemm_bias_act_kernel, apply_relu=apply_relu),
        out_shape=jax.ShapeDtypeStruct((Mp, Np), out_dtype),
        grid_spec=pltpu.PrefetchScalarGridSpec(
            num_scalar_prefetch=0,
            grid=(Mp // tm, Np // tn),
            in_specs=[
                pl.BlockSpec((tm, Kp), lambda i, j: (i, 0)),   # A: full K resident
                pl.BlockSpec((Kp, tn), lambda i, j: (0, j)),   # B: full K resident
                pl.BlockSpec((1, tn), lambda i, j: (0, j)),    # bias row
            ],
            out_specs=pl.BlockSpec((tm, tn), lambda i, j: (i, j)),
        ),
        compiler_params=pltpu.CompilerParams(
            dimension_semantics=("parallel", "parallel"),
            vmem_limit_bytes=48 * 1024 * 1024,
        ),
    )(a, w_p, bias_p)
    return out[:M, :n_valid]


# ----------------------------------------------------------------------------
# Pallas kernel 2: row-tiled log_softmax over the last axis of a 2-D array.
# ----------------------------------------------------------------------------
def _log_softmax_kernel(x_ref, o_ref):
    x = x_ref[...].astype(jnp.float32)
    m = jnp.max(x, axis=-1, keepdims=True)
    s = x - m
    lse = jnp.log(jnp.sum(jnp.exp(s), axis=-1, keepdims=True))
    o_ref[...] = s - lse


def log_softmax_rows(x, row_tile=256):
    R, C = x.shape
    rt = min(row_tile, _round_up(R, 8))
    Rp = _round_up(R, rt)
    if Rp > R:
        x = jnp.pad(x, ((0, Rp - R), (0, 0)))
    out = pl.pallas_call(
        _log_softmax_kernel,
        out_shape=jax.ShapeDtypeStruct((Rp, C), jnp.float32),
        grid_spec=pltpu.PrefetchScalarGridSpec(
            num_scalar_prefetch=0,
            grid=(Rp // rt,),
            in_specs=[pl.BlockSpec((rt, C), lambda i: (i, 0))],
            out_specs=pl.BlockSpec((rt, C), lambda i: (i, 0)),
        ),
        compiler_params=pltpu.CompilerParams(
            dimension_semantics=("parallel",),
            vmem_limit_bytes=48 * 1024 * 1024,
        ),
    )(x)
    return out[:R]


# ----------------------------------------------------------------------------
# JAX glue: channels-last patch extraction (K order = (kd, kh, kw, c)).
# ----------------------------------------------------------------------------
def _extract_patches(x, k, stride, pad):
    """x: (B,T,H,W,C) -> (B*To*Ho*Wo, k^3*C)."""
    B, T, H, W, C = x.shape
    xp = jnp.pad(x, ((0, 0), (pad, pad), (pad, pad), (pad, pad), (0, 0)))
    To = (T + 2 * pad - k) // stride + 1
    Ho = (H + 2 * pad - k) // stride + 1
    Wo = (W + 2 * pad - k) // stride + 1
    taps = []
    for kd in range(k):
        for kh in range(k):
            for kw in range(k):
                taps.append(xp[:, kd:kd + To * stride:stride,
                                  kh:kh + Ho * stride:stride,
                                  kw:kw + Wo * stride:stride, :])
    cols = jnp.concatenate(taps, axis=-1)            # (B,To,Ho,Wo,k^3*C)
    return cols.reshape(B * To * Ho * Wo, k * k * k * C), (B, To, Ho, Wo)


def conv3d_relu(x, layer, out_dtype=jnp.bfloat16):
    """PyTorch Conv3d + ReLU on a channels-last activation."""
    patches, (B, To, Ho, Wo) = _extract_patches(
        x, layer["k"], layer["stride"], layer["pad"])
    out = gemm_bias_relu(patches, layer["wmat"], layer["bias"],
                         n_valid=layer["cout"], out_dtype=out_dtype)
    return out.reshape(B, To, Ho, Wo, layer["cout"])


def conv_transpose3d_relu_subpixel(x, layer):
    """ConvTranspose3d(k=4, s=2, p=1) + ReLU via 8-phase sub-pixel decomposition.

    One stride-1 GEMM over 3x3x3 patches of the (pad=1) input produces all 8
    output phases (rd, rh, rw) as GEMM columns; phases are interleaved afterwards.
    """
    B, T, H, W, _ = x.shape
    cout = layer["cout"]
    patches, _ = _extract_patches(x, k=3, stride=1, pad=1)
    out = gemm_bias_relu(patches, layer["wmat"], layer["bias"],
                         n_valid=layer["n_valid"], out_dtype=jnp.float32)
    out = out.reshape(B, T, H, W, 2, 2, 2, cout)        # phases (rd, rh, rw)
    out = jnp.transpose(out, (0, 1, 4, 2, 5, 3, 6, 7))  # (B, T,rd, H,rh, W,rw, co)
    return out.reshape(B, 2 * T, 2 * H, 2 * W, cout)


# ----------------------------------------------------------------------------
# Parameter init + one-time weight layout (transpose, pad, bf16 cast).
# ----------------------------------------------------------------------------
# Per-dim map from patch tap t (over xp[j..j+2]) to ConvTranspose kernel index kk:
#   output phase r=0 (even index):  t=0 -> kk=3,  t=1 -> kk=1
#   output phase r=1 (odd  index):  t=1 -> kk=2,  t=2 -> kk=0
_TAP_TO_KK = ({0: 3, 1: 1}, {1: 2, 2: 0})


def _subpixel_deconv_weight(w):
    """w: (Cin, Cout, 4, 4, 4) ConvTranspose3d (s=2, p=1) -> (27*Cin, 8*Cout)."""
    cin, cout = w.shape[0], w.shape[1]
    wsub = jnp.zeros((3, 3, 3, cin, 8 * cout), jnp.float32)
    for rd in (0, 1):
        for rh in (0, 1):
            for rw in (0, 1):
                ph = (rd * 2 + rh) * 2 + rw
                for td, kd in _TAP_TO_KK[rd].items():
                    for th, kh in _TAP_TO_KK[rh].items():
                        for tw, kw in _TAP_TO_KK[rw].items():
                            wsub = wsub.at[td, th, tw, :,
                                           ph * cout:(ph + 1) * cout].set(
                                w[:, :, kd, kh, kw])
    return wsub.reshape(27 * cin, 8 * cout)


def _pad_gemm_operands(wmat, bias_row):
    K, N = wmat.shape
    Kp, Np = _round_up(K, 128), _round_up(N, 128)
    wmat_p = jnp.pad(wmat, ((0, Kp - K), (0, Np - N))).astype(jnp.bfloat16)
    bias_p = jnp.pad(bias_row.reshape(1, -1).astype(jnp.float32),
                     ((0, 0), (0, Np - N)))
    return wmat_p, bias_p


def init_params(key):
    # (kind, cin, cout, k, stride, pad)
    specs = [("conv",  3,   128, 3, 1, 1),
             ("conv",  128, 256, 4, 2, 1),
             ("conv",  256, 256, 3, 1, 1),
             ("conv",  256, 256, 3, 1, 1),
             ("convT", 256, 1,   4, 2, 1)]
    params = []
    keys = jax.random.split(key, len(specs))
    for kk, (kind, cin, cout, k, stride, pad) in zip(keys, specs):
        wk, bk = jax.random.split(kk)
        fan_in = cin * k ** 3
        std = (2.0 / fan_in) ** 0.5
        if kind == "conv":
            w = jax.random.normal(wk, (cout, cin, k, k, k), jnp.float32) * std
        else:
            w = jax.random.normal(wk, (cin, cout, k, k, k), jnp.float32) * std
        b = jax.random.normal(bk, (cout,), jnp.float32) * 0.01

        if kind == "conv":
            wmat = jnp.transpose(w, (2, 3, 4, 1, 0)).reshape(k ** 3 * cin, cout)
            bias_row = b
            n_valid = cout
        else:
            wmat = _subpixel_deconv_weight(w)          # (27*cin, 8*cout)
            bias_row = jnp.tile(b, 8)                  # one copy per output phase
            n_valid = 8 * cout
        wmat_p, bias_p = _pad_gemm_operands(wmat, bias_row)
        params.append(dict(kind=kind, k=k, stride=stride, pad=pad,
                           cin=cin, cout=cout, n_valid=n_valid,
                           wmat=wmat_p, bias=bias_p, w_raw=w, b_raw=b))
    return params


# ----------------------------------------------------------------------------
# Forward pass (Pallas path) and pure-JAX reference.
# ----------------------------------------------------------------------------
def temporal_saliency_forward(params, x_ncdhw):
    B, _, T, H, W = x_ncdhw.shape
    # Single NCDHW -> NDHWC relayout at the module boundary; channels-last after.
    y = jnp.transpose(x_ncdhw, (0, 2, 3, 4, 1)).astype(jnp.bfloat16)
    for layer in params:
        if layer["kind"] == "conv":
            y = conv3d_relu(y, layer)
        else:
            y = conv_transpose3d_relu_subpixel(y, layer)
    # y: (B, T, H, W, 1) f32.  torch: squeeze -> view(B,T,-1) -> transpose(0,2) ->
    # log_softmax (implicit dim=0 == the H*W axis) -> transpose back ->
    # view(B, 1, T, img_width, img_height)  (a pure byte relabeling).
    logits = y.reshape(B * T, H * W)
    logp = log_softmax_rows(logits).reshape(B, T, H * W)
    return logp.reshape(B, 1, T, W, H)


def reference_forward(params, x_ncdhw):
    """Pure-JAX (XLA conv) f32 reference, returns (B, T, H*W) log-probs."""
    B, _, T, H, W = x_ncdhw.shape
    y = jnp.transpose(x_ncdhw, (0, 2, 3, 4, 1)).astype(jnp.float32)
    for layer in params:
        w, b = layer["w_raw"], layer["b_raw"]
        k, s, p = layer["k"], layer["stride"], layer["pad"]
        if layer["kind"] == "conv":
            rhs = jnp.transpose(w, (2, 3, 4, 1, 0))               # DHWIO
            y = jax.lax.conv_general_dilated(
                y, rhs, window_strides=(s, s, s), padding=[(p, p)] * 3,
                dimension_numbers=("NDHWC", "DHWIO", "NDHWC"))
        else:
            rhs = jnp.transpose(jnp.flip(w, axis=(2, 3, 4)), (2, 3, 4, 0, 1))
            y = jax.lax.conv_general_dilated(
                y, rhs, window_strides=(1, 1, 1),
                padding=[(k - 1 - p, k - 1 - p)] * 3, lhs_dilation=(s, s, s),
                dimension_numbers=("NDHWC", "DHWIO", "NDHWC"))
        y = jax.nn.relu(y + b)
    return jax.nn.log_softmax(y.reshape(B, T, H * W), axis=-1)


if __name__ == "__main__":
    B, C, T, H, W = 2, 3, 4, 8, 8
    x = jax.random.normal(jax.random.PRNGKey(0), (B, C, T, H, W), jnp.float32)
    params = init_params(jax.random.PRNGKey(42))

    fwd = jax.jit(lambda inp: temporal_saliency_forward(params, inp))
    out = jax.block_until_ready(fwd(x))

    assert out.shape == (B, 1, T, W, H), out.shape
    assert bool(jnp.all(jnp.isfinite(out)))
    # log_softmax property: logsumexp over the flattened spatial axis == 0
    lse = jax.scipy.special.logsumexp(out.reshape(B, T, H * W), axis=-1)
    assert bool(jnp.all(jnp.abs(lse) < 1e-3)), lse
    # numerical check vs. a pure-JAX f32 reference (bf16 GEMM inputs -> loose tol)
    ref = reference_forward(params, x)
    err = float(jnp.max(jnp.abs(out.reshape(B, T, H * W) - ref)))
    assert err < 0.15, err

    print("KERNEL_OK")
</pallas_src>

<mosaic_0001>
module attributes {stable_mosaic.version = 11 : i64} {
  func.func @_gemm_bias_act_kernel(%arg0: i32, %arg1: i32, %arg2: memref<256x128xbf16, #tpu.memory_space<vmem>>, %arg3: memref<128x128xbf16, #tpu.memory_space<vmem>>, %arg4: memref<1x128xf32, #tpu.memory_space<vmem>>, %arg5: memref<256x128xbf16, #tpu.memory_space<vmem>>) attributes {dimension_semantics = [#tpu.dimension_semantics<parallel>, #tpu.dimension_semantics<parallel>], iteration_bounds = array<i64: 2, 1>, scalar_prefetch = 0 : i64, scratch_operands = 0 : i64, tpu.core_type = #tpu.core_type<tc>, window_params = [{transform_indices = @transform_0, window_bounds = array<i64: 256, 128>}, {transform_indices = @transform_1, window_bounds = array<i64: 128, 128>}, {transform_indices = @transform_2, window_bounds = array<i64: 1, 128>}, {transform_indices = @transform_3, window_bounds = array<i64: 256, 128>}]} {
    %c0 = arith.constant 0 : index
    %c0_0 = arith.constant 0 : index
    %0 = vector.load %arg2[%c0, %c0_0] : memref<256x128xbf16, #tpu.memory_space<vmem>>, vector<256x128xbf16>
    %c0_1 = arith.constant 0 : index
    %c0_2 = arith.constant 0 : index
    %1 = vector.load %arg3[%c0_1, %c0_2] : memref<128x128xbf16, #tpu.memory_space<vmem>>, vector<128x128xbf16>
    %cst = arith.constant dense<0.000000e+00> : vector<256x128xf32>
    %2 = tpu.matmul %0, %1, %cst {dimension_numbers = #tpu.dot_dimension_numbers<[1], [0], [0], [1], [0, 0, 1, 1], [], []>} : vector<256x128xbf16>, vector<128x128xbf16>, vector<256x128xf32> -> vector<256x128xf32>
    %c0_3 = arith.constant 0 : index
    %c0_4 = arith.constant 0 : index
    %3 = vector.load %arg4[%c0_3, %c0_4] : memref<1x128xf32, #tpu.memory_space<vmem>>, vector<1x128xf32>
    %4 = vector.broadcast %3 : vector<1x128xf32> to vector<256x128xf32>
    %5 = arith.addf %2, %4 : vector<256x128xf32>
    %cst_5 = arith.constant 0.000000e+00 : f32
    %6 = vector.broadcast %cst_5 : f32 to vector<256x128xf32>
    %7 = arith.maximumf %5, %6 : vector<256x128xf32>
    %8 = arith.truncf %7 : vector<256x128xf32> to vector<256x128xbf16>
    %c0_6 = arith.constant 0 : index
    %c0_7 = arith.constant 0 : index
    %9 = vector.load %arg5[%c0_6, %c0_7] : memref<256x128xbf16, #tpu.memory_space<vmem>>, vector<256x128xbf16>
    tpu.vector_store %arg5[%c0_6, %c0_7], %8 {strides = array<i32>} : memref<256x128xbf16, #tpu.memory_space<vmem>>, vector<256x128xbf16>,
    return
  }
  func.func @transform_0(%arg0: i32, %arg1: i32) -> (i32, i32) {
    %c0_i32 = arith.constant 0 : i32
    %c0_i32_0 = arith.constant 0 : i32
    return %arg0, %c0_i32 : i32, i32
  }
  func.func @transform_1(%arg0: i32, %arg1: i32) -> (i32, i32) {
    %c0_i32 = arith.constant 0 : i32
    %c0_i32_0 = arith.constant 0 : i32
    return %c0_i32, %arg1 : i32, i32
  }
  func.func @transform_2(%arg0: i32, %arg1: i32) -> (i32, i32) {
    %c0_i32 = arith.constant 0 : i32
    %c0_i32_0 = arith.constant 0 : i32
    return %c0_i32, %arg1 : i32, i32
  }
  func.func @transform_3(%arg0: i32, %arg1: i32) -> (i32, i32) {
    %c0_i32 = arith.constant 0 : i32
    return %arg0, %arg1 : i32, i32
  }
}

module attributes {stable_mosaic.version = 11 : i64} {
  func.func @_gemm_bias_act_kernel(%arg0: i32, %arg1: i32, %arg2: memref<32x8192xbf16, #tpu.memory_space<vmem>>, %arg3: memref<8192x256xbf16, #tpu.memory_space<vmem>>, %arg4: memref<1x256xf32, #tpu.memory_space<vmem>>, %arg5: memref<32x256xbf16, #tpu.memory_space<vmem>>) attributes {dimension_semantics = [#tpu.dimension_semantics<parallel>, #tpu.dimension_semantics<parallel>], iteration_bounds = array<i64: 2, 1>, scalar_prefetch = 0 : i64, scratch_operands = 0 : i64, tpu.core_type = #tpu.core_type<tc>, window_params = [{transform_indices = @transform_0, window_bounds = array<i64: 32, 8192>}, {transform_indices = @transform_1, window_bounds = array<i64: 8192, 256>}, {transform_indices = @transform_2, window_bounds = array<i64: 1, 256>}, {transform_indices = @transform_3, window_bounds = array<i64: 32, 256>}]} {
    %c0 = arith.constant 0 : index
    %c0_0 = arith.constant 0 : index
    %0 = vector.load %arg2[%c0, %c0_0] : memref<32x8192xbf16, #tpu.memory_space<vmem>>, vector<32x8192xbf16>
    %c0_1 = arith.constant 0 : index
    %c0_2 = arith.constant 0 : index
    %1 = vector.load %arg3[%c0_1, %c0_2] : memref<8192x256xbf16, #tpu.memory_space<vmem>>, vector<8192x256xbf16>
    %cst = arith.constant dense<0.000000e+00> : vector<32x256xf32>
    %2 = tpu.matmul %0, %1, %cst {dimension_numbers = #tpu.dot_dimension_numbers<[1], [0], [0], [1], [0, 0, 1, 1], [], []>} : vector<32x8192xbf16>, vector<8192x256xbf16>, vector<32x256xf32> -> vector<32x256xf32>
    %c0_3 = arith.constant 0 : index
    %c0_4 = arith.constant 0 : index
    %3 = vector.load %arg4[%c0_3, %c0_4] : memref<1x256xf32, #tpu.memory_space<vmem>>, vector<1x256xf32>
    %4 = vector.broadcast %3 : vector<1x256xf32> to vector<32x256xf32>
    %5 = arith.addf %2, %4 : vector<32x256xf32>
    %cst_5 = arith.constant 0.000000e+00 : f32
    %6 = vector.broadcast %cst_5 : f32 to vector<32x256xf32>
    %7 = arith.maximumf %5, %6 : vector<32x256xf32>
    %8 = arith.truncf %7 : vector<32x256xf32> to vector<32x256xbf16>
    %c0_6 = arith.constant 0 : index
    %c0_7 = arith.constant 0 : index
    %9 = vector.load %arg5[%c0_6, %c0_7] : memref<32x256xbf16, #tpu.memory_space<vmem>>, vector<32x256xbf16>
    tpu.vector_store %arg5[%c0_6, %c0_7], %8 {strides = array<i32>} : memref<32x256xbf16, #tpu.memory_space<vmem>>, vector<32x256xbf16>,
    return
  }
  func.func @transform_0(%arg0: i32, %arg1: i32) -> (i32, i32) {
    %c0_i32 = arith.constant 0 : i32
    %c0_i32_0 = arith.constant 0 : i32
    return %arg0, %c0_i32 : i32, i32
  }
  func.func @transform_1(%arg0: i32, %arg1: i32) -> (i32, i32) {
    %c0_i32 = arith.constant 0 : i32
    %c0_i32_0 = arith.constant 0 : i32
    return %c0_i32, %arg1 : i32, i32
  }
  func.func @transform_2(%arg0: i32, %arg1: i32) -> (i32, i32) {
    %c0_i32 = arith.constant 0 : i32
    %c0_i32_0 = arith.constant 0 : i32
    return %c0_i32, %arg1 : i32, i32
  }
  func.func @transform_3(%arg0: i32, %arg1: i32) -> (i32, i32) {
    %c0_i32 = arith.constant 0 : i32
    return %arg0, %arg1 : i32, i32
  }
}

module attributes {stable_mosaic.version = 11 : i64} {
  func.func @_gemm_bias_act_kernel(%arg0: i32, %arg1: i32, %arg2: memref<32x6912xbf16, #tpu.memory_space<vmem>>, %arg3: memref<6912x256xbf16, #tpu.memory_space<vmem>>, %arg4: memref<1x256xf32, #tpu.memory_space<vmem>>, %arg5: memref<32x256xbf16, #tpu.memory_space<vmem>>) attributes {dimension_semantics = [#tpu.dimension_semantics<parallel>, #tpu.dimension_semantics<parallel>], iteration_bounds = array<i64: 2, 1>, scalar_prefetch = 0 : i64, scratch_operands = 0 : i64, tpu.core_type = #tpu.core_type<tc>, window_params = [{transform_indices = @transform_0, window_bounds = array<i64: 32, 6912>}, {transform_indices = @transform_1, window_bounds = array<i64: 6912, 256>}, {transform_indices = @transform_2, window_bounds = array<i64: 1, 256>}, {transform_indices = @transform_3, window_bounds = array<i64: 32, 256>}]} {
    %c0 = arith.constant 0 : index
    %c0_0 = arith.constant 0 : index
    %0 = vector.load %arg2[%c0, %c0_0] : memref<32x6912xbf16, #tpu.memory_space<vmem>>, vector<32x6912xbf16>
    %c0_1 = arith.constant 0 : index
    %c0_2 = arith.constant 0 : index
    %1 = vector.load %arg3[%c0_1, %c0_2] : memref<6912x256xbf16, #tpu.memory_space<vmem>>, vector<6912x256xbf16>
    %cst = arith.constant dense<0.000000e+00> : vector<32x256xf32>
    %2 = tpu.matmul %0, %1, %cst {dimension_numbers = #tpu.dot_dimension_numbers<[1], [0], [0], [1], [0, 0, 1, 1], [], []>} : vector<32x6912xbf16>, vector<6912x256xbf16>, vector<32x256xf32> -> vector<32x256xf32>
    %c0_3 = arith.constant 0 : index
    %c0_4 = arith.constant 0 : index
    %3 = vector.load %arg4[%c0_3, %c0_4] : memref<1x256xf32, #tpu.memory_space<vmem>>, vector<1x256xf32>
    %4 = vector.broadcast %3 : vector<1x256xf32> to vector<32x256xf32>
    %5 = arith.addf %2, %4 : vector<32x256xf32>
    %cst_5 = arith.constant 0.000000e+00 : f32
    %6 = vector.broadcast %cst_5 : f32 to vector<32x256xf32>
    %7 = arith.maximumf %5, %6 : vector<32x256xf32>
    %8 = arith.truncf %7 : vector<32x256xf32> to vector<32x256xbf16>
    %c0_6 = arith.constant 0 : index
    %c0_7 = arith.constant 0 : index
    %9 = vector.load %arg5[%c0_6, %c0_7] : memref<32x256xbf16, #tpu.memory_space<vmem>>, vector<32x256xbf16>
    tpu.vector_store %arg5[%c0_6, %c0_7], %8 {strides = array<i32>} : memref<32x256xbf16, #tpu.memory_space<vmem>>, vector<32x256xbf16>,
    return
  }
  func.func @transform_0(%arg0: i32, %arg1: i32) -> (i32, i32) {
    %c0_i32 = arith.constant 0 : i32
    %c0_i32_0 = arith.constant 0 : i32
    return %arg0, %c0_i32 : i32, i32
  }
  func.func @transform_1(%arg0: i32, %arg1: i32) -> (i32, i32) {
    %c0_i32 = arith.constant 0 : i32
    %c0_i32_0 = arith.constant 0 : i32
    return %c0_i32, %arg1 : i32, i32
  }
  func.func @transform_2(%arg0: i32, %arg1: i32) -> (i32, i32) {
    %c0_i32 = arith.constant 0 : i32
    %c0_i32_0 = arith.constant 0 : i32
    return %c0_i32, %arg1 : i32, i32
  }
  func.func @transform_3(%arg0: i32, %arg1: i32) -> (i32, i32) {
    %c0_i32 = arith.constant 0 : i32
    return %arg0, %arg1 : i32, i32
  }
}

module attributes {stable_mosaic.version = 11 : i64} {
  func.func @_gemm_bias_act_kernel(%arg0: i32, %arg1: i32, %arg2: memref<32x6912xbf16, #tpu.memory_space<vmem>>, %arg3: memref<6912x128xbf16, #tpu.memory_space<vmem>>, %arg4: memref<1x128xf32, #tpu.memory_space<vmem>>, %arg5: memref<32x128xf32, #tpu.memory_space<vmem>>) attributes {dimension_semantics = [#tpu.dimension_semantics<parallel>, #tpu.dimension_semantics<parallel>], iteration_bounds = array<i64: 2, 1>, scalar_prefetch = 0 : i64, scratch_operands = 0 : i64, tpu.core_type = #tpu.core_type<tc>, window_params = [{transform_indices = @transform_0, window_bounds = array<i64: 32, 6912>}, {transform_indices = @transform_1, window_bounds = array<i64: 6912, 128>}, {transform_indices = @transform_2, window_bounds = array<i64: 1, 128>}, {transform_indices = @transform_3, window_bounds = array<i64: 32, 128>}]} {
    %c0 = arith.constant 0 : index
    %c0_0 = arith.constant 0 : index
    %0 = vector.load %arg2[%c0, %c0_0] : memref<32x6912xbf16, #tpu.memory_space<vmem>>, vector<32x6912xbf16>
    %c0_1 = arith.constant 0 : index
    %c0_2 = arith.constant 0 : index
    %1 = vector.load %arg3[%c0_1, %c0_2] : memref<6912x128xbf16, #tpu.memory_space<vmem>>, vector<6912x128xbf16>
    %cst = arith.constant dense<0.000000e+00> : vector<32x128xf32>
    %2 = tpu.matmul %0, %1, %cst {dimension_numbers = #tpu.dot_dimension_numbers<[1], [0], [0], [1], [0, 0, 1, 1], [], []>} : vector<32x6912xbf16>, vector<6912x128xbf16>, vector<32x128xf32> -> vector<32x128xf32>
    %c0_3 = arith.constant 0 : index
    %c0_4 = arith.constant 0 : index
    %3 = vector.load %arg4[%c0_3, %c0_4] : memref<1x128xf32, #tpu.memory_space<vmem>>, vector<1x128xf32>
    %4 = vector.broadcast %3 : vector<1x128xf32> to vector<32x128xf32>
    %5 = arith.addf %2, %4 : vector<32x128xf32>
    %cst_5 = arith.constant 0.000000e+00 : f32
    %6 = vector.broadcast %cst_5 : f32 to vector<32x128xf32>
    %7 = arith.maximumf %5, %6 : vector<32x128xf32>
    %c0_6 = arith.constant 0 : index
    %c0_7 = arith.constant 0 : index
    %8 = vector.load %arg5[%c0_6, %c0_7] : memref<32x128xf32, #tpu.memory_space<vmem>>, vector<32x128xf32>
    tpu.vector_store %arg5[%c0_6, %c0_7], %7 {strides = array<i32>} : memref<32x128xf32, #tpu.memory_space<vmem>>, vector<32x128xf32>,
    return
  }
  func.func @transform_0(%arg0: i32, %arg1: i32) -> (i32, i32) {
    %c0_i32 = arith.constant 0 : i32
    %c0_i32_0 = arith.constant 0 : i32
    return %arg0, %c0_i32 : i32, i32
  }
  func.func @transform_1(%arg0: i32, %arg1: i32) -> (i32, i32) {
    %c0_i32 = arith.constant 0 : i32
    %c0_i32_0 = arith.constant 0 : i32
    return %c0_i32, %arg1 : i32, i32
  }
  func.func @transform_2(%arg0: i32, %arg1: i32) -> (i32, i32) {
    %c0_i32 = arith.constant 0 : i32
    %c0_i32_0 = arith.constant 0 : i32
    return %c0_i32, %arg1 : i32, i32
  }
  func.func @transform_3(%arg0: i32, %arg1: i32) -> (i32, i32) {
    %c0_i32 = arith.constant 0 : i32
    return %arg0, %arg1 : i32, i32
  }
}

module attributes {stable_mosaic.version = 11 : i64} {
  func.func @_log_softmax_kernel(%arg0: i32, %arg1: memref<8x64xf32, #tpu.memory_space<vmem>>, %arg2: memref<8x64xf32, #tpu.memory_space<vmem>>) attributes {dimension_semantics = [#tpu.dimension_semantics<parallel>], iteration_bounds = array<i64: 1>, scalar_prefetch = 0 : i64, scratch_operands = 0 : i64, tpu.core_type = #tpu.core_type<tc>, window_params = [{transform_indices = @transform_0, window_bounds = array<i64: 8, 64>}, {transform_indices = @transform_1, window_bounds = array<i64: 8, 64>}]} {
    %c0 = arith.constant 0 : index
    %c0_0 = arith.constant 0 : index
    %0 = vector.load %arg1[%c0, %c0_0] : memref<8x64xf32, #tpu.memory_space<vmem>>, vector<8x64xf32>
    %cst = arith.constant dense<0xFF800000> : vector<8xf32>
    %1 = vector.multi_reduction <maximumf>, %0, %cst [1] : vector<8x64xf32> to vector<8xf32>
    %2 = vector.shape_cast %1 : vector<8xf32> to vector<8x1xf32>
    %3 = vector.broadcast %2 : vector<8x1xf32> to vector<8x64xf32>
    %4 = arith.subf %0, %3 : vector<8x64xf32>
    %5 = math.exp %4 : vector<8x64xf32>
    %cst_1 = arith.constant dense<0.000000e+00> : vector<8xf32>
    %6 = vector.multi_reduction <add>, %5, %cst_1 [1] : vector<8x64xf32> to vector<8xf32>
    %7 = vector.shape_cast %6 : vector<8xf32> to vector<8x1xf32>
    %8 = math.log %7 : vector<8x1xf32>
    %9 = vector.broadcast %8 : vector<8x1xf32> to vector<8x64xf32>
    %10 = arith.subf %4, %9 : vector<8x64xf32>
    %c0_2 = arith.constant 0 : index
    %c0_3 = arith.constant 0 : index
    %11 = vector.load %arg2[%c0_2, %c0_3] : memref<8x64xf32, #tpu.memory_space<vmem>>, vector<8x64xf32>
    tpu.vector_store %arg2[%c0_2, %c0_3], %10 {strides = array<i32>} : memref<8x64xf32, #tpu.memory_space<vmem>>, vector<8x64xf32>,
    return
  }
  func.func @transform_0(%arg0: i32) -> (i32, i32) {
    %c0_i32 = arith.constant 0 : i32
    %c0_i32_0 = arith.constant 0 : i32
    return %arg0, %c0_i32 : i32, i32
  }
  func.func @transform_1(%arg0: i32) -> (i32, i32) {
    %c0_i32 = arith.constant 0 : i32
    %c0_i32_0 = arith.constant 0 : i32
    return %arg0, %c0_i32 : i32, i32
  }
}

</mosaic_0001>

<bundles_post_ra>
// kernel: _lambda_.6
= control target key start
LH: loop header
LB: loop body
LE: loop exit
PB: predicated region body
PF: predicated region fallthrough
CT: control target
= control target key end

     0   :  { %s1257_s12 = smov 0   ;;  %s1259_s13 = smov 0   ;;  %s1394_s0 = inlined_call_operand.vmem [shape: bf16[512,128], index: 0, kind: input, shape index: {}]   ;;  %s1395_s1 = inlined_call_operand.vmem [shape: bf16[128,128], index: 1, kind: input, shape index: {}]   ;;  %s1396_s2 = inlined_call_operand.vmem [shape: f32[1,128], index: 2, kind: input, shape index: {}]   ;;  %s1397_s3 = inlined_call_operand.vmem [shape: bf16[512,128], index: 3, kind: output, shape index: {}]  }
   0x1   :  { %s1261_s14 = smov 0  }
   0x2 LB: > { %s25_s15 = sadd.s32 1, %s1231_s13  ;;  %p886_p0 = scmp.ge.s32.totalorder %s1235_s14, 1  ;;  %s1235_s14 = sphi %s1261_s14, %s13_s14   ;;  %s1231_s13 = sphi %s1259_s13, %s1399_s13   ;;  %s1227_s12 = sphi %s1257_s12, %s1398_s12  }
   0x3   : > { %p27_p1 = scmp.ge.s32.totalorder %s25_s15, 2  ;;  %p169_p2 = scmp.lt.s32.totalorder %s1235_s14, 3 }
   0x5   : > { %s1401_s15 = smov (%p27_p1, %s25_s15), 0  ;;  %p170_p3 = pnand %p886_p0, %p169_p2 }
   0x6   : > { %v1189_v0 = vld [vmem:[%s1395_s1] sm:$0xff] (!%p170_p3)   ;;  %s887_s18 = sshll.u32 (!%p170_p3), %s1227_s12, 5  ;;  %v1190_v1 = vld [vmem:[%s1395_s1 + $0x8] sm:$0xff] (!%p170_p3)   ;;  %v1191_v2 = vld [vmem:[%s1395_s1 + $0x10] sm:$0xff] (!%p170_p3)  }
   0x7   : > { %173 = sbr.rel (%p170_p3) target bundleno = 285 (0x11d), region = 32  ;;  %p204_p4 = scmp.lt.s32.totalorder (!%p170_p3), %s887_s18, 63  ;;  %1101 = vmatprep.subr.bf16.mxu0 (!%p170_p3), %v1189_v0  ;;  %1149 = vmatprep.subr.bf16.mxu1 (!%p170_p3), %v1189_v0  ;;  %v1192_v3 = vld [vmem:[%s1395_s1 + $0x18] sm:$0xff] (!%p170_p3)   ;;  %v1193_v6 = vld [vmem:[%s1395_s1 + $0x20] sm:$0xff] (!%p170_p3)   ;;  %v1194_v7 = vld [vmem:[%s1395_s1 + $0x28] sm:$0xff] (!%p170_p3)  }
   0x8   : > { %1102 = vmatpush3.bf16.msra.mxu0 (!%p170_p3), %v1189_v0  ;;  %1157 = vmatpush3.bf16.msra.mxu1 (!%p170_p3), %v1189_v0  ;;  %v1195_v8 = vld [vmem:[%s1395_s1 + $0x30] sm:$0xff] (!%p170_p3)   ;;  %v1196_v9 = vld [vmem:[%s1395_s1 + $0x38] sm:$0xff] (!%p170_p3)   ;;  %v1328_v24 = vld [vmem:[%s1396_s2] ss:$0 sm:$0xff] (!%p170_p3) }
   0x9   : > { %1103 = vmatprep.subr.bf16.mxu0 (!%p170_p3), %v1190_v1  ;;  %1150 = vmatprep.subr.bf16.mxu1 (!%p170_p3), %v1190_v1 }
   0xc   : > { %1104 = vmatpush3.bf16.msra.mxu0 (!%p170_p3), %v1190_v1  ;;  %1158 = vmatpush3.bf16.msra.mxu1 (!%p170_p3), %v1190_v1 }
   0xd   : > { %1105 = vmatprep.subr.bf16.mxu0 (!%p170_p3), %v1191_v2  ;;  %1151 = vmatprep.subr.bf16.mxu1 (!%p170_p3), %v1191_v2 }
   0xe   : > { %s1403_s18 = smov (!%p204_p4, %s887_s18), 63 }
   0xf   : > { %s888_s23 = sshll.u32 %s1403_s18, 2 }
  0x10   : > { %s1292_s26 = scalar_lea.vmem %s1394_s0, %s888_s23  ;;  %1106 = vmatpush3.bf16.msra.mxu0 %v1191_v2  ;;  %1159 = vmatpush3.bf16.msra.mxu1 %v1191_v2  ;;  %s1343_s17 = scalar_lea.vmem %s1397_s3, %s888_s23 }
  0x11   : > { %v1197_v4 = vld [vmem:[%s1292_s26] sm:$0xff]   ;;  %1107 = vmatprep.subr.bf16.mxu0 %v1192_v3  ;;  %1152 = vmatprep.subr.bf16.mxu1 %v1192_v3  ;;  %v1199_v10 = vld [vmem:[%s1292_s26 + $0x8] sm:$0xff]   ;;  %v1201_v12 = vld [vmem:[%s1292_s26 + $0x10] sm:$0xff]  }
  0x12   : > { %v1198_v5 = vld [vmem:[%s1292_s26 + $0x40] sm:$0xff]   ;;  %1117 = vmatprep.mubr.bf16.mxu0 %v1197_v4  ;;  %v1200_v11 = vld [vmem:[%s1292_s26 + $0x48] sm:$0xff]   ;;  %v1202_v13 = vld [vmem:[%s1292_s26 + $0x50] sm:$0xff]  }
  0x13   : > { %1133 = vmatprep.mubr.bf16.mxu1 %v1198_v5  ;;  %v1203_v14 = vld [vmem:[%s1292_s26 + $0x18] sm:$0xff]   ;;  %v1205_v16 = vld [vmem:[%s1292_s26 + $0x20] sm:$0xff]   ;;  %v1207_v18 = vld [vmem:[%s1292_s26 + $0x28] sm:$0xff]  }
  0x14   : > { %1108 = vmatpush3.bf16.msra.mxu0 %v1192_v3  ;;  %1160 = vmatpush3.bf16.msra.mxu1 %v1192_v3  ;;  %v1204_v15 = vld [vmem:[%s1292_s26 + $0x58] sm:$0xff]   ;;  %v1206_v17 = vld [vmem:[%s1292_s26 + $0x60] sm:$0xff]   ;;  %v1208_v19 = vld [vmem:[%s1292_s26 + $0x68] sm:$0xff]  }
  0x15   : > { %1109 = vmatprep.subr.bf16.mxu0 %v1193_v6  ;;  %1153 = vmatprep.subr.bf16.mxu1 %v1193_v6  ;;  %v1209_v20 = vld [vmem:[%s1292_s26 + $0x30] sm:$0xff]   ;;  %v1211_v22 = vld [vmem:[%s1292_s26 + $0x38] sm:$0xff]  }
  0x16   : > { %v1210_v21 = vld [vmem:[%s1292_s26 + $0x70] sm:$0xff]   ;;  %v1212_v23 = vld [vmem:[%s1292_s26 + $0x78] sm:$0xff]  }
  0x18   : > { %1110 = vmatpush3.bf16.msra.mxu0 %v1193_v6  ;;  %1161 = vmatpush3.bf16.msra.mxu1 %v1193_v6 }
  0x19   : > { %1111 = vmatprep.subr.bf16.mxu0 %v1194_v7  ;;  %1154 = vmatprep.subr.bf16.mxu1 %v1194_v7 }
  0x1c   : > { %1112 = vmatpush3.bf16.msra.mxu0 %v1194_v7  ;;  %1162 = vmatpush3.bf16.msra.mxu1 %v1194_v7 }
  0x1d   : > { %1113 = vmatprep.subr.bf16.mxu0 %v1195_v8  ;;  %1155 = vmatprep.subr.bf16.mxu1 %v1195_v8 }
  0x20   : > { %1114 = vmatpush3.bf16.msra.mxu0 %v1195_v8  ;;  %1163 = vmatpush3.bf16.msra.mxu1 %v1195_v8 }
  0x21   : > { %1115 = vmatprep.subr.bf16.mxu0 %v1196_v9  ;;  %1156 = vmatprep.subr.bf16.mxu1 %v1196_v9 }
  0x24   : > { %1116 = vmatpush3.bf16.msra.mxu0 %v1196_v9  ;;  %1164 = vmatpush3.bf16.msra.mxu1 %v1196_v9 }
  0x27   : > { %1118 = vmatmul.mubr.bf16.vlgmr.msra.gmra.mrb[0].mxu0 %v1199_v10  ;;  %1134 = vmatmul.mubr.bf16.vlgmr.msra.gmra.mrb[0].mxu1 %v1200_v11 }
  0x28   : > { %1121 = vmatprep.mubr.bf16.mxu0 %v1201_v12  ;;  %1137 = vmatprep.mubr.bf16.mxu1 %v1202_v13 }
  0x2f   : > { %1122 = vmatmul.mubr.bf16.gmra.mrb[4].mxu0 %v1203_v14  ;;  %1138 = vmatmul.mubr.bf16.gmra.mrb[4].mxu1 %v1204_v15 }
  0x30   : > { %1125 = vmatprep.mubr.bf16.mxu0 %v1205_v16  ;;  %1141 = vmatprep.mubr.bf16.mxu1 %v1206_v17 }
  0x37   : > { %1126 = vmatmul.mubr.bf16.gmra.mrb[8].mxu0 %v1207_v18  ;;  %1142 = vmatmul.mubr.bf16.gmra.mrb[8].mxu1 %v1208_v19 }
  0x38   : > { %1129 = vmatprep.mubr.bf16.mxu0 %v1209_v20  ;;  %1145 = vmatprep.mubr.bf16.mxu1 %v1210_v21 }
  0x3f   : > { %1130 = vmatmul.mubr.bf16.gmra.mrb[12].mxu0 %v1211_v22  ;;  %1146 = vmatmul.mubr.bf16.gmra.mrb[12].mxu1 %v1212_v23 }
  0xfa   : > { %v1119_v25 = vpop.f32.mrb[0].mxu0  ;;  %v1135_v26 = vpop.f32.mrb[0].mxu1 }
  0xfb   : > { %v468_v27 = vadd.f32 %v1119_v25, %v1328_v24  ;;  %v532_v28 = vadd.f32 %v1135_v26, %v1328_v24  ;;  %v459_v29 = vpop.f32.mrb[1].mxu0  ;;  %v523_v30 = vpop.f32.mrb[1].mxu1 }
  0xfc   : > { %v460_v31 = vadd.f32 %v1328_v24, %v459_v29  ;;  %v524_v32 = vadd.f32 %v1328_v24, %v523_v30  ;;  %v1120_v33 = vpop.f32.mrb[2].mxu0  ;;  %v1136_v34 = vpop.f32.mrb[2].mxu1 }
  0xfd   : > { %v471_v35 = vadd.f32 %v1120_v33, %v1328_v24  ;;  %v535_v36 = vadd.f32 %v1136_v34, %v1328_v24  ;;  %v462_v37 = vpop.f32.mrb[3].mxu0  ;;  %v526_v38 = vpop.f32.mrb[3].mxu1  ;;  %v588_v41 = vmax.f32 %v468_v27, 0.0  ;;  %v604_v42 = vmax.f32 %v532_v28, 0.0 }
  0xfe   : > { %v463_v39 = vadd.f32 %v1328_v24, %v462_v37  ;;  %v527_v40 = vadd.f32 %v1328_v24, %v526_v38  ;;  %v586_v45 = vmax.f32 %v460_v31, 0.0  ;;  %v602_v46 = vmax.f32 %v524_v32, 0.0 }
  0xff   : > { %v589_v43 = vmax.f32 %v471_v35, 0.0  ;;  %v605_v44 = vmax.f32 %v535_v36, 0.0 }
 0x100   : > { %v587_v47 = vmax.f32 %v463_v39, 0.0  ;;  %v603_v48 = vmax.f32 %v527_v40, 0.0 }
 0x101   : > { %v990_v49 = vpack.c.bf16 %v589_v43, %v588_v41  ;;  %v1030_v50 = vpack.c.bf16 %v605_v44, %v604_v42 }
 0x102   : > { %v985_v51 = vpack.c.bf16 %v587_v47, %v586_v45  ;;  %v1025_v52 = vpack.c.bf16 %v603_v48, %v602_v46  ;;  %v1123_v53 = vpop.f32.mrb[4].mxu0  ;;  %v1139_v54 = vpop.f32.mrb[4].mxu1 }
 0x103   : > { %1062 = vst [vmem:[%s1343_s17 + $0x8] sm:$0xff] %v990_v49   ;;  %1070 = vst [vmem:[%s1343_s17 + $0x48] sm:$0xff] %v1030_v50   ;;  %v484_v55 = vadd.f32 %v1123_v53, %v1328_v24  ;;  %v548_v56 = vadd.f32 %v1139_v54, %v1328_v24  ;;  %v475_v57 = vpop.f32.mrb[5].mxu0  ;;  %v539_v58 = vpop.f32.mrb[5].mxu1 }
 0x104   : > { %986 = vst [vmem:[%s1343_s17] sm:$0xff] %v985_v51   ;;  %1069 = vst [vmem:[%s1343_s17 + $0x40] sm:$0xff] %v1025_v52   ;;  %v476_v59 = vadd.f32 %v1328_v24, %v475_v57  ;;  %v540_v60 = vadd.f32 %v1328_v24, %v539_v58  ;;  %v1124_v61 = vpop.f32.mrb[6].mxu0  ;;  %v1140_v62 = vpop.f32.mrb[6].mxu1 }
 0x105   : > { %v487_v63 = vadd.f32 %v1124_v61, %v1328_v24  ;;  %v551_v0 = vadd.f32 %v1140_v62, %v1328_v24  ;;  %v478_v1 = vpop.f32.mrb[7].mxu0  ;;  %v542_v2 = vpop.f32.mrb[7].mxu1  ;;  %v592_v5 = vmax.f32 %v484_v55, 0.0  ;;  %v608_v6 = vmax.f32 %v548_v56, 0.0 }
 0x106   : > { %v479_v3 = vadd.f32 %v1328_v24, %v478_v1  ;;  %v543_v4 = vadd.f32 %v1328_v24, %v542_v2  ;;  %v590_v9 = vmax.f32 %v476_v59, 0.0  ;;  %v606_v10 = vmax.f32 %v540_v60, 0.0 }
 0x107   : > { %v593_v7 = vmax.f32 %v487_v63, 0.0  ;;  %v609_v8 = vmax.f32 %v551_v0, 0.0 }
 0x108   : > { %v591_v11 = vmax.f32 %v479_v3, 0.0  ;;  %v607_v12 = vmax.f32 %v543_v4, 0.0 }
 0x109   : > { %v1000_v13 = vpack.c.bf16 %v593_v7, %v592_v5  ;;  %v1040_v14 = vpack.c.bf16 %v609_v8, %v608_v6 }
 0x10a   : > { %v995_v15 = vpack.c.bf16 %v591_v11, %v590_v9  ;;  %v1035_v16 = vpack.c.bf16 %v607_v12, %v606_v10  ;;  %v1127_v17 = vpop.f32.mrb[8].mxu0  ;;  %v1143_v18 = vpop.f32.mrb[8].mxu1 }
 0x10b   : > { %1064 = vst [vmem:[%s1343_s17 + $0x18] sm:$0xff] %v1000_v13   ;;  %1072 = vst [vmem:[%s1343_s17 + $0x58] sm:$0xff] %v1040_v14   ;;  %v500_v19 = vadd.f32 %v1127_v17, %v1328_v24  ;;  %v564_v20 = vadd.f32 %v1143_v18, %v1328_v24  ;;  %v491_v21 = vpop.f32.mrb[9].mxu0  ;;  %v555_v22 = vpop.f32.mrb[9].mxu1 }
 0x10c   : > { %1063 = vst [vmem:[%s1343_s17 + $0x10] sm:$0xff] %v995_v15   ;;  %1071 = vst [vmem:[%s1343_s17 + $0x50] sm:$0xff] %v1035_v16   ;;  %v492_v23 = vadd.f32 %v1328_v24, %v491_v21  ;;  %v556_v25 = vadd.f32 %v1328_v24, %v555_v22  ;;  %v1128_v26 = vpop.f32.mrb[10].mxu0  ;;  %v1144_v27 = vpop.f32.mrb[10].mxu1 }
 0x10d   : > { %v503_v28 = vadd.f32 %v1128_v26, %v1328_v24  ;;  %v567_v29 = vadd.f32 %v1144_v27, %v1328_v24  ;;  %v494_v30 = vpop.f32.mrb[11].mxu0  ;;  %v558_v31 = vpop.f32.mrb[11].mxu1  ;;  %v596_v34 = vmax.f32 %v500_v19, 0.0  ;;  %v612_v35 = vmax.f32 %v564_v20, 0.0 }
 0x10e   : > { %v495_v32 = vadd.f32 %v1328_v24, %v494_v30  ;;  %v559_v33 = vadd.f32 %v1328_v24, %v558_v31  ;;  %v594_v38 = vmax.f32 %v492_v23, 0.0  ;;  %v610_v39 = vmax.f32 %v556_v25, 0.0 }
 0x10f   : > { %v597_v36 = vmax.f32 %v503_v28, 0.0  ;;  %v613_v37 = vmax.f32 %v567_v29, 0.0 }
 0x110   : > { %v595_v40 = vmax.f32 %v495_v32, 0.0  ;;  %v611_v41 = vmax.f32 %v559_v33, 0.0 }
 0x111   : > { %v1010_v42 = vpack.c.bf16 %v597_v36, %v596_v34  ;;  %v1050_v43 = vpack.c.bf16 %v613_v37, %v612_v35 }
 0x112   : > { %v1005_v44 = vpack.c.bf16 %v595_v40, %v594_v38  ;;  %v1045_v45 = vpack.c.bf16 %v611_v41, %v610_v39  ;;  %v1131_v46 = vpop.f32.mrb[12].mxu0  ;;  %v1147_v47 = vpop.f32.mrb[12].mxu1 }
 0x113   : > { %1066 = vst [vmem:[%s1343_s17 + $0x28] sm:$0xff] %v1010_v42   ;;  %1074 = vst [vmem:[%s1343_s17 + $0x68] sm:$0xff] %v1050_v43   ;;  %v516_v48 = vadd.f32 %v1131_v46, %v1328_v24  ;;  %v580_v49 = vadd.f32 %v1147_v47, %v1328_v24  ;;  %v507_v50 = vpop.f32.mrb[13].mxu0  ;;  %v571_v51 = vpop.f32.mrb[13].mxu1 }
 0x114   : > { %1065 = vst [vmem:[%s1343_s17 + $0x20] sm:$0xff] %v1005_v44   ;;  %1073 = vst [vmem:[%s1343_s17 + $0x60] sm:$0xff] %v1045_v45   ;;  %v508_v52 = vadd.f32 %v1328_v24, %v507_v50  ;;  %v572_v53 = vadd.f32 %v1328_v24, %v571_v51  ;;  %v1132_v54 = vpop.f32.mrb[14].mxu0  ;;  %v1148_v55 = vpop.f32.mrb[14].mxu1 }
 0x115   : > { %v519_v56 = vadd.f32 %v1132_v54, %v1328_v24  ;;  %v583_v57 = vadd.f32 %v1148_v55, %v1328_v24  ;;  %v510_v58 = vpop.f32.mrb[15].mxu0  ;;  %v574_v59 = vpop.f32.mrb[15].mxu1  ;;  %v600_v62 = vmax.f32 %v516_v48, 0.0  ;;  %v616_v63 = vmax.f32 %v580_v49, 0.0 }
 0x116   : > { %v511_v60 = vadd.f32 %v1328_v24, %v510_v58  ;;  %v575_v61 = vadd.f32 %v1328_v24, %v574_v59  ;;  %v598_v2 = vmax.f32 %v508_v52, 0.0  ;;  %v614_v3 = vmax.f32 %v572_v53, 0.0 }
 0x117   : > { %v601_v0 = vmax.f32 %v519_v56, 0.0  ;;  %v617_v1 = vmax.f32 %v583_v57, 0.0 }
 0x118   : > { %v599_v4 = vmax.f32 %v511_v60, 0.0  ;;  %v615_v5 = vmax.f32 %v575_v61, 0.0 }
 0x119   : > { %v1020_v6 = vpack.c.bf16 %v601_v0, %v600_v62  ;;  %v1060_v7 = vpack.c.bf16 %v617_v1, %v616_v63 }
 0x11a   : > { %v1015_v8 = vpack.c.bf16 %v599_v4, %v598_v2  ;;  %v1055_v9 = vpack.c.bf16 %v615_v5, %v614_v3 }
 0x11b   : > { %1068 = vst [vmem:[%s1343_s17 + $0x38] sm:$0xff] %v1020_v6   ;;  %1076 = vst [vmem:[%s1343_s17 + $0x78] sm:$0xff] %v1060_v7  }
 0x11c   : > { %1067 = vst [vmem:[%s1343_s17 + $0x30] sm:$0xff] %v1015_v8   ;;  %1075 = vst [vmem:[%s1343_s17 + $0x70] sm:$0xff] %v1055_v9  }
 0x11d PF: > { %s13_s14 = sadd.s32 1, %s1235_s14   ;;  %s1398_s12 = smov %s1231_s13 }
 0x11e   : > { %p10_p5 = scmp.ge.s32.totalorder %s13_s14, 4   ;;  %s1399_s13 = smov %s1401_s15 }
 0x120   :  { %12 = sbr.rel (!%p10_p5) target bundleno = 2 (0x2), region = 68 }

// kernel: _lambda_.7
= control target key start
LH: loop header
LB: loop body
LE: loop exit
PB: predicated region body
PF: predicated region fallthrough
CT: control target
= control target key end

     0   :  { %s12047_s12 = smov 0   ;;  %s12049_s13 = smov 0   ;;  %s15532_s0 = inlined_call_operand.vmem [shape: bf16[64,8192], index: 0, kind: input, shape index: {}]   ;;  %s15533_s1 = inlined_call_operand.vmem [shape: bf16[8192,256], index: 1, kind: input, shape index: {}]   ;;  %s15534_s2 = inlined_call_operand.vmem [shape: f32[1,256], index: 2, kind: input, shape index: {}]   ;;  %s15535_s3 = inlined_call_operand.vmem [shape: bf16[64,256], index: 3, kind: output, shape index: {}]  }
   0x1   :  { %s12051_s14 = smov 0  }
   0x2 LB: > { %s25_s15 = sadd.s32 1, %s12021_s13  ;;  %p9016_p0 = scmp.ge.s32.totalorder %s12025_s14, 1  ;;  %s12025_s14 = sphi %s12051_s14, %s13_s14   ;;  %s12021_s13 = sphi %s12049_s13, %s15537_s13   ;;  %s12017_s12 = sphi %s12047_s12, %s15536_s12  }
   0x3   : > { %p27_p1 = scmp.ge.s32.totalorder %s25_s15, 2  ;;  %p174_p2 = scmp.lt.s32.totalorder %s12025_s14, 3 }
   0x5   : > { %s15539_s15 = smov (%p27_p1, %s25_s15), 0  ;;  %p175_p3 = pnand %p9016_p0, %p174_p2 }
   0x6   : > { %v10467_v0 = vld [vmem:[%s15533_s1 + $0x4] ss:$8 sps:$4 sm:$0xff] (!%p175_p3)   ;;  %v10471_v2 = vld [vmem:[%s15533_s1] ss:$8 sps:$4 sm:$0xff] (!%p175_p3)   ;;  %v10473_v4 = vld [vmem:[%s15533_s1 + $0x14] ss:$8 sps:$4 sm:$0xff] (!%p175_p3)  }
   0x7   : > { %178 = sbr.rel (%p175_p3) target bundleno = 1263 (0x4ef), region = 32  ;;  %v10469_v1 = vld [vmem:[%s15533_s1 + $0x1004] ss:$8 sps:$4 sm:$0xff] (!%p175_p3)   ;;  %7167 = vmatprep.subr.bf16.mxu1 (!%p175_p3), %v10467_v0  ;;  %v10472_v3 = vld [vmem:[%s15533_s1 + $0x1000] ss:$8 sps:$4 sm:$0xff] (!%p175_p3)   ;;  %s9017_s30 = sshll.u32 (!%p175_p3), %s12017_s12, 2 }
   0x8   : > { %8015 = vmatprep.subr.bf16.mxu0 (!%p175_p3), %v10469_v1  ;;  %7168 = vmatpush1.bf16.msra.mxu1 (!%p175_p3), %v10471_v2  ;;  %v10475_v5 = vld [vmem:[%s15533_s1 + $0x1014] ss:$8 sps:$4 sm:$0xff] (!%p175_p3)   ;;  %v10477_v6 = vld [vmem:[%s15533_s1 + $0x10] ss:$8 sps:$4 sm:$0xff] (!%p175_p3)   ;;  %v10479_v8 = vld [vmem:[%s15533_s1 + $0x24] ss:$8 sps:$4 sm:$0xff] (!%p175_p3)  }
   0x9   : > { %8016 = vmatpush1.bf16.msra.mxu0 (!%p175_p3), %v10472_v3  ;;  %7169 = vmatprep.subr.bf16.mxu1 (!%p175_p3), %v10473_v4  ;;  %v10478_v7 = vld [vmem:[%s15533_s1 + $0x1010] ss:$8 sps:$4 sm:$0xff] (!%p175_p3)   ;;  %v10481_v9 = vld [vmem:[%s15533_s1 + $0x1024] ss:$8 sps:$4 sm:$0xff] (!%p175_p3)   ;;  %v10483_v10 = vld [vmem:[%s15533_s1 + $0x20] ss:$8 sps:$4 sm:$0xff] (!%p175_p3)  }
   0xa   : > { %8017 = vmatprep.subr.bf16.mxu0 (!%p175_p3), %v10475_v5  ;;  %v10484_v11 = vld [vmem:[%s15533_s1 + $0x1020] ss:$8 sps:$4 sm:$0xff] (!%p175_p3)   ;;  %v10485_v12 = vld [vmem:[%s15533_s1 + $0x34] ss:$8 sps:$4 sm:$0xff] (!%p175_p3)   ;;  %v10489_v14 = vld [vmem:[%s15533_s1 + $0x30] ss:$8 sps:$4 sm:$0xff] (!%p175_p3)  }
   0xb   : > { %v10487_v13 = vld [vmem:[%s15533_s1 + $0x1034] ss:$8 sps:$4 sm:$0xff] (!%p175_p3)   ;;  %v10490_v15 = vld [vmem:[%s15533_s1 + $0x1030] ss:$8 sps:$4 sm:$0xff] (!%p175_p3)   ;;  %v10491_v16 = vld [vmem:[%s15533_s1 + $0x44] ss:$8 sps:$4 sm:$0xff] (!%p175_p3)  }
   0xc   : > { %7170 = vmatpush1.bf16.msra.mxu1 (!%p175_p3), %v10477_v6  ;;  %v10493_v17 = vld [vmem:[%s15533_s1 + $0x1044] ss:$8 sps:$4 sm:$0xff] (!%p175_p3)   ;;  %v10495_v18 = vld [vmem:[%s15533_s1 + $0x40] ss:$8 sps:$4 sm:$0xff] (!%p175_p3)   ;;  %v10497_v20 = vld [vmem:[%s15533_s1 + $0x54] ss:$8 sps:$4 sm:$0xff] (!%p175_p3)  }
   0xd   : > { %8018 = vmatpush1.bf16.msra.mxu0 (!%p175_p3), %v10478_v7  ;;  %7171 = vmatprep.subr.bf16.mxu1 (!%p175_p3), %v10479_v8  ;;  %v10496_v19 = vld [vmem:[%s15533_s1 + $0x1040] ss:$8 sps:$4 sm:$0xff] (!%p175_p3)   ;;  %v10499_v21 = vld [vmem:[%s15533_s1 + $0x1054] ss:$8 sps:$4 sm:$0xff] (!%p175_p3)   ;;  %v10501_v22 = vld [vmem:[%s15533_s1 + $0x50] ss:$8 sps:$4 sm:$0xff] (!%p175_p3)  }
   0xe   : > { %8019 = vmatprep.subr.bf16.mxu0 %v10481_v9  ;;  %v10502_v23 = vld [vmem:[%s15533_s1 + $0x1050] ss:$8 sps:$4 sm:$0xff]   ;;  %v10503_v24 = vld [vmem:[%s15533_s1 + $0x64] ss:$8 sps:$4 sm:$0xff]   ;;  %v10507_v26 = vld [vmem:[%s15533_s1 + $0x60] ss:$8 sps:$4 sm:$0xff]  }
   0xf   : > { %v10505_v25 = vld [vmem:[%s15533_s1 + $0x1064] ss:$8 sps:$4 sm:$0xff]   ;;  %v10508_v27 = vld [vmem:[%s15533_s1 + $0x1060] ss:$8 sps:$4 sm:$0xff]   ;;  %v10509_v28 = vld [vmem:[%s15533_s1 + $0x74] ss:$8 sps:$4 sm:$0xff]  }
  0x10   : > { %7172 = vmatpush1.bf16.msra.mxu1 %v10483_v10  ;;  %v10511_v29 = vld [vmem:[%s15533_s1 + $0x1074] ss:$8 sps:$4 sm:$0xff]   ;;  %v10513_v30 = vld [vmem:[%s15533_s1 + $0x70] ss:$8 sps:$4 sm:$0xff]   ;;  %v10515_v32 = vld [vmem:[%s15533_s1 + $0x84] ss:$8 sps:$4 sm:$0xff]  }
  0x11   : > { %8020 = vmatpush1.bf16.msra.mxu0 %v10484_v11  ;;  %7173 = vmatprep.subr.bf16.mxu1 %v10485_v12  ;;  %v10514_v31 = vld [vmem:[%s15533_s1 + $0x1070] ss:$8 sps:$4 sm:$0xff]   ;;  %p214_p4 = scmp.lt.s32.totalorder %s9017_s30, 7  ;;  %v10517_v33 = vld [vmem:[%s15533_s1 + $0x1084] ss:$8 sps:$4 sm:$0xff]  }
  0x12   : > { %8021 = vmatprep.subr.bf16.mxu0 %v10487_v13  ;;  %v10519_v34 = vld [vmem:[%s15533_s1 + $0x80] ss:$8 sps:$4 sm:$0xff]   ;;  %v10521_v36 = vld [vmem:[%s15533_s1 + $0x94] ss:$8 sps:$4 sm:$0xff]   ;;  %v10525_v38 = vld [vmem:[%s15533_s1 + $0x90] ss:$8 sps:$4 sm:$0xff]  }
  0x13   : > { %v10520_v35 = vld [vmem:[%s15533_s1 + $0x1080] ss:$8 sps:$4 sm:$0xff]   ;;  %s15541_s30 = smov (!%p214_p4, %s9017_s30), 7  ;;  %v10523_v37 = vld [vmem:[%s15533_s1 + $0x1094] ss:$8 sps:$4 sm:$0xff]  }
  0x14   : > { %7174 = vmatpush1.bf16.msra.mxu1 %v10489_v14  ;;  %v10526_v39 = vld [vmem:[%s15533_s1 + $0x1090] ss:$8 sps:$4 sm:$0xff]   ;;  %v10527_v40 = vld [vmem:[%s15533_s1 + $0xa4] ss:$8 sps:$4 sm:$0xff]   ;;  %s10181_s29 = sshll.u32 %s15541_s30, 8  ;;  %s10182_s19 = sshll.u32 %s15541_s30, 3 }
  0x15   : > { %8022 = vmatpush1.bf16.msra.mxu0 %v10490_v15  ;;  %7175 = vmatprep.subr.bf16.mxu1 %v10491_v16  ;;  %v10529_v41 = vld [vmem:[%s15533_s1 + $0x10a4] ss:$8 sps:$4 sm:$0xff]   ;;  %v10531_v42 = vld [vmem:[%s15533_s1 + $0xa0] ss:$8 sps:$4 sm:$0xff]   ;;  %s12206_s12 = scalar_lea.vmem %s15532_s0, %s10181_s29  ;;  %v10533_v44 = vld [vmem:[%s15533_s1 + $0xb4] ss:$8 sps:$4 sm:$0xff]   ;;  %s240_s22 = scalar_lea.vmem %s15535_s3, %s10182_s19 }
  0x16   : > { %8023 = vmatprep.subr.bf16.mxu0 %v10493_v17  ;;  %v10532_v43 = vld [vmem:[%s15533_s1 + $0x10a0] ss:$8 sps:$4 sm:$0xff]   ;;  %v10535_v45 = vld [vmem:[%s15533_s1 + $0x10b4] ss:$8 sps:$4 sm:$0xff]   ;;  %v10537_v46 = vld [vmem:[%s15533_s1 + $0xb0] ss:$8 sps:$4 sm:$0xff]  }
  0x17   : > { %v10538_v47 = vld [vmem:[%s15533_s1 + $0x10b0] ss:$8 sps:$4 sm:$0xff]   ;;  %v243_v48 = vld [vmem:[%s12206_s12] sm:$0xff]  ;;  %v10545_v58 = vld [vmem:[%s15533_s1 + $0xd4] ss:$8 sps:$4 sm:$0xff]  }
  0x18   : > { %7176 = vmatpush1.bf16.msra.mxu1 %v10495_v18  ;;  %v275_v49 = vld [vmem:[%s12206_s12 + $0x100] sm:$0xff]  ;;  %v10547_v59 = vld [vmem:[%s15533_s1 + $0x10d4] ss:$8 sps:$4 sm:$0xff]   ;;  %v10549_v60 = vld [vmem:[%s15533_s1 + $0xd0] ss:$8 sps:$4 sm:$0xff]  }
  0x19   : > { %8024 = vmatpush1.bf16.msra.mxu0 %v10496_v19  ;;  %7177 = vmatprep.subr.bf16.mxu1 %v10497_v20  ;;  %v10539_v50 = vld [vmem:[%s15533_s1 + $0xc4] ss:$8 sps:$4 sm:$0xff]   ;;  %v9024_v52 = vcombine.high %v243_v48, %v275_v49  ;;  %v10543_v56 = vld [vmem:[%s15533_s1 + $0xc0] ss:$8 sps:$4 sm:$0xff]   ;;  %v10550_v61 = vld [vmem:[%s15533_s1 + $0x10d0] ss:$8 sps:$4 sm:$0xff]   ;;  %v9023_v8 = vcombine.low %v243_v48, %v275_v49 }
  0x1a   : > { %8025 = vmatprep.subr.bf16.mxu0 %v10499_v21  ;;  %v10541_v51 = vld [vmem:[%s15533_s1 + $0x10c4] ss:$8 sps:$4 sm:$0xff]   ;;  %v10544_v57 = vld [vmem:[%s15533_s1 + $0x10c0] ss:$8 sps:$4 sm:$0xff]   ;;  %v10557_v2 = vld [vmem:[%s15533_s1 + $0xf4] ss:$8 sps:$4 sm:$0xff]  }
  0x1b   : > { %v259_v53 = vld [vmem:[%s12206_s12 + $0x80] sm:$0xff]  ;;  %7199 = vmatprep.mubr.bf16.mxu1 %v9024_v52  ;;  %v10559_v3 = vld [vmem:[%s15533_s1 + $0x10f4] ss:$8 sps:$4 sm:$0xff]   ;;  %v10561_v4 = vld [vmem:[%s15533_s1 + $0xf0] ss:$8 sps:$4 sm:$0xff]  }
  0x1c   : > { %7178 = vmatpush1.bf16.msra.mxu1 %v10501_v22  ;;  %v291_v54 = vld [vmem:[%s12206_s12 + $0x180] sm:$0xff]  ;;  %v10562_v5 = vld [vmem:[%s15533_s1 + $0x10f0] ss:$8 sps:$4 sm:$0xff]   ;;  %v10571_v12 = vld [vmem:[%s15533_s1 + $0x114] ss:$8 sps:$4 sm:$0xff]  }
  0x1d   : > { %8026 = vmatpush1.bf16.msra.mxu0 %v10502_v23  ;;  %7179 = vmatprep.subr.bf16.mxu1 %v10503_v24  ;;  %v9056_v55 = vcombine.high %v259_v53, %v291_v54  ;;  %v10551_v62 = vld [vmem:[%s15533_s1 + $0xe4] ss:$8 sps:$4 sm:$0xff]   ;;  %v10555_v0 = vld [vmem:[%s15533_s1 + $0xe0] ss:$8 sps:$4 sm:$0xff]   ;;  %v9055_v10 = vcombine.low %v259_v53, %v291_v54  ;;  %v10574_v13 = vld [vmem:[%s15533_s1 + $0x1114] ss:$8 sps:$4 sm:$0xff]  }
  0x1e   : > { %8027 = vmatprep.subr.bf16.mxu0 %v10505_v25  ;;  %v10553_v63 = vld [vmem:[%s15533_s1 + $0x10e4] ss:$8 sps:$4 sm:$0xff]   ;;  %v10556_v1 = vld [vmem:[%s15533_s1 + $0x10e0] ss:$8 sps:$4 sm:$0xff]   ;;  %v10569_v14 = vld [vmem:[%s15533_s1 + $0x110] ss:$8 sps:$4 sm:$0xff]  }
  0x1f   : > { %8047 = vmatprep.mubr.bf16.mxu0 %v9056_v55  ;;  %v10565_v6 = vld [vmem:[%s15533_s1 + $0x104] ss:$8 sps:$4 sm:$0xff]   ;;  %v10563_v9 = vld [vmem:[%s15533_s1 + $0x100] ss:$8 sps:$4 sm:$0xff]   ;;  %v10572_v15 = vld [vmem:[%s15533_s1 + $0x1110] ss:$8 sps:$4 sm:$0xff]  }
  0x20   : > { %7180 = vmatpush1.bf16.msra.mxu1 %v10507_v26  ;;  %v10568_v7 = vld [vmem:[%s15533_s1 + $0x1104] ss:$8 sps:$4 sm:$0xff]   ;;  %v10566_v11 = vld [vmem:[%s15533_s1 + $0x1100] ss:$8 sps:$4 sm:$0xff]   ;;  %v10583_v20 = vld [vmem:[%s15533_s1 + $0x134] ss:$8 sps:$4 sm:$0xff]  }
  0x21   : > { %8028 = vmatpush1.bf16.msra.mxu0 %v10508_v27  ;;  %7181 = vmatprep.subr.bf16.mxu1 %v10509_v28  ;;  %v10577_v16 = vld [vmem:[%s15533_s1 + $0x124] ss:$8 sps:$4 sm:$0xff]   ;;  %v10575_v18 = vld [vmem:[%s15533_s1 + $0x120] ss:$8 sps:$4 sm:$0xff]   ;;  %v10586_v21 = vld [vmem:[%s15533_s1 + $0x1134] ss:$8 sps:$4 sm:$0xff]  }
  0x22   : > { %8029 = vmatprep.subr.bf16.mxu0 %v10511_v29  ;;  %v10580_v17 = vld [vmem:[%s15533_s1 + $0x1124] ss:$8 sps:$4 sm:$0xff]   ;;  %v10578_v19 = vld [vmem:[%s15533_s1 + $0x1120] ss:$8 sps:$4 sm:$0xff]   ;;  %v10581_v22 = vld [vmem:[%s15533_s1 + $0x130] ss:$8 sps:$4 sm:$0xff]  }
  0x23   : > { %v10584_v23 = vld [vmem:[%s15533_s1 + $0x1130] ss:$8 sps:$4 sm:$0xff]   ;;  %v10589_v24 = vld [vmem:[%s15533_s1 + $0x144] ss:$8 sps:$4 sm:$0xff]   ;;  %v10587_v26 = vld [vmem:[%s15533_s1 + $0x140] ss:$8 sps:$4 sm:$0xff]  }
  0x24   : > { %7182 = vmatpush1.bf16.msra.mxu1 %v10513_v30  ;;  %v10592_v25 = vld [vmem:[%s15533_s1 + $0x1144] ss:$8 sps:$4 sm:$0xff]   ;;  %v10590_v27 = vld [vmem:[%s15533_s1 + $0x1140] ss:$8 sps:$4 sm:$0xff]   ;;  %v10595_v28 = vld [vmem:[%s15533_s1 + $0x154] ss:$8 sps:$4 sm:$0xff]  }
  0x25   : > { %8030 = vmatpush1.bf16.msra.mxu0 %v10514_v31  ;;  %7183 = vmatprep.subr.bf16.mxu1 %v10515_v32  ;;  %v10598_v29 = vld [vmem:[%s15533_s1 + $0x1154] ss:$8 sps:$4 sm:$0xff]   ;;  %v307_v30 = vld [vmem:[%s12206_s12 + $0x200] sm:$0xff]  ;;  %v10593_v32 = vld [vmem:[%s15533_s1 + $0x150] ss:$8 sps:$4 sm:$0xff]  }
  0x26   : > { %8031 = vmatprep.subr.bf16.mxu0 %v10517_v33  ;;  %v339_v31 = vld [vmem:[%s12206_s12 + $0x300] sm:$0xff]  ;;  %v12375_v49 = vld [vmem:[%s12206_s12 + $0x88] sm:$0xff]  ;;  %v10608_v52 = vld [vmem:[%s15533_s1 + $0x1170] ss:$8 sps:$4 sm:$0xff]  }
  0x27   : > { %v9088_v33 = vcombine.high %v307_v30, %v339_v31  ;;  %v10613_v54 = vld [vmem:[%s15533_s1 + $0x184] ss:$8 sps:$4 sm:$0xff]  }
  0x28   : > { %7184 = vmatpush1.bf16.msra.mxu1 %v10519_v34  ;;  %v10596_v34 = vld [vmem:[%s15533_s1 + $0x1150] ss:$8 sps:$4 sm:$0xff]   ;;  %v10616_v55 = vld [vmem:[%s15533_s1 + $0x1184] ss:$8 sps:$4 sm:$0xff]  }
  0x29   : > { %8032 = vmatpush1.bf16.msra.mxu0 %v10520_v35  ;;  %7185 = vmatprep.subr.bf16.mxu1 %v10521_v36  ;;  %v323_v35 = vld [vmem:[%s12206_s12 + $0x280] sm:$0xff] }
  0x2a   : > { %8033 = vmatprep.subr.bf16.mxu0 %v10523_v37  ;;  %v355_v36 = vld [vmem:[%s12206_s12 + $0x380] sm:$0xff]  ;;  %v9087_v37 = vcombine.low %v307_v30, %v339_v31  ;;  %v10667_v30 = vld [vmem:[%s15533_s1 + $0x214] ss:$8 sps:$4 sm:$0xff]  }
  0x2b   : > { %v10670_v31 = vld [vmem:[%s15533_s1 + $0x1214] ss:$8 sps:$4 sm:$0xff]  }
  0x2c   : > { %7186 = vmatpush1.bf16.msra.mxu1 %v10525_v38  ;;  %v10601_v38 = vld [vmem:[%s15533_s1 + $0x164] ss:$8 sps:$4 sm:$0xff]  }
  0x2d   : > { %8034 = vmatpush1.bf16.msra.mxu0 %v10526_v39  ;;  %7187 = vmatprep.subr.bf16.mxu1 %v10527_v40  ;;  %v9120_v39 = vcombine.high %v323_v35, %v355_v36  ;;  %v9119_v40 = vcombine.low %v323_v35, %v355_v36  ;;  %v10665_v36 = vld [vmem:[%s15533_s1 + $0x210] ss:$8 sps:$4 sm:$0xff]  }
  0x2e   : > { %8035 = vmatprep.subr.bf16.mxu0 %v10529_v41  ;;  %v10604_v41 = vld [vmem:[%s15533_s1 + $0x1164] ss:$8 sps:$4 sm:$0xff]  }
  0x30   : > { %7188 = vmatpush1.bf16.msra.mxu1 %v10531_v42  ;;  %v10599_v42 = vld [vmem:[%s15533_s1 + $0x160] ss:$8 sps:$4 sm:$0xff]  }
  0x31   : > { %8036 = vmatpush1.bf16.msra.mxu0 %v10532_v43  ;;  %7189 = vmatprep.subr.bf16.mxu1 %v10533_v44  ;;  %v10602_v43 = vld [vmem:[%s15533_s1 + $0x1160] ss:$8 sps:$4 sm:$0xff]  }
  0x32   : > { %8037 = vmatprep.subr.bf16.mxu0 %v10535_v45  ;;  %v12361_v44 = vld [vmem:[%s12206_s12 + $0x8] sm:$0xff] }
  0x33   : > { %v12364_v45 = vld [vmem:[%s12206_s12 + $0x108] sm:$0xff] }
  0x34   : > { %7190 = vmatpush1.bf16.msra.mxu1 %v10537_v46  ;;  %v10607_v46 = vld [vmem:[%s15533_s1 + $0x174] ss:$8 sps:$4 sm:$0xff]   ;;  %v9026_v48 = vcombine.high %v12361_v44, %v12364_v45 }
  0x35   : > { %8038 = vmatpush1.bf16.msra.mxu0 %v10538_v47  ;;  %7191 = vmatprep.subr.bf16.mxu1 %v10539_v50  ;;  %v10610_v47 = vld [vmem:[%s15533_s1 + $0x1174] ss:$8 sps:$4 sm:$0xff]   ;;  %v12378_v50 = vld [vmem:[%s12206_s12 + $0x188] sm:$0xff] }
  0x36   : > { %8039 = vmatprep.subr.bf16.mxu0 %v10541_v51  ;;  %v10605_v51 = vld [vmem:[%s15533_s1 + $0x170] ss:$8 sps:$4 sm:$0xff]   ;;  %v9058_v53 = vcombine.high %v12375_v49, %v12378_v50 }
  0x38   : > { %7192 = vmatpush1.bf16.msra.mxu1 %v10543_v56  ;;  %v10611_v56 = vld [vmem:[%s15533_s1 + $0x180] ss:$8 sps:$4 sm:$0xff]  }
  0x39   : > { %8040 = vmatpush1.bf16.msra.mxu0 %v10544_v57  ;;  %7193 = vmatprep.subr.bf16.mxu1 %v10545_v58  ;;  %v10614_v57 = vld [vmem:[%s15533_s1 + $0x1180] ss:$8 sps:$4 sm:$0xff]   ;;  %v10619_v58 = vld [vmem:[%s15533_s1 + $0x194] ss:$8 sps:$4 sm:$0xff]  }
  0x3a   : > { %8041 = vmatprep.subr.bf16.mxu0 %v10547_v59  ;;  %v10622_v59 = vld [vmem:[%s15533_s1 + $0x1194] ss:$8 sps:$4 sm:$0xff]  }
  0x3c   : > { %7194 = vmatpush1.bf16.msra.mxu1 %v10549_v60  ;;  %v10617_v60 = vld [vmem:[%s15533_s1 + $0x190] ss:$8 sps:$4 sm:$0xff]  }
  0x3d   : > { %8042 = vmatpush1.bf16.msra.mxu0 %v10550_v61  ;;  %7195 = vmatprep.subr.bf16.mxu1 %v10551_v62  ;;  %v10620_v61 = vld [vmem:[%s15533_s1 + $0x1190] ss:$8 sps:$4 sm:$0xff]   ;;  %v10625_v62 = vld [vmem:[%s15533_s1 + $0x1a4] ss:$8 sps:$4 sm:$0xff]  }
  0x3e   : > { %8043 = vmatprep.subr.bf16.mxu0 %v10553_v63  ;;  %v10628_v63 = vld [vmem:[%s15533_s1 + $0x11a4] ss:$8 sps:$4 sm:$0xff]  }
  0x40   : > { %7196 = vmatpush1.bf16.msra.mxu1 %v10555_v0  ;;  %v10623_v0 = vld [vmem:[%s15533_s1 + $0x1a0] ss:$8 sps:$4 sm:$0xff]  }
  0x41   : > { %8044 = vmatpush1.bf16.msra.mxu0 %v10556_v1  ;;  %7197 = vmatprep.subr.bf16.mxu1 %v10557_v2  ;;  %v10626_v1 = vld [vmem:[%s15533_s1 + $0x11a0] ss:$8 sps:$4 sm:$0xff]   ;;  %v10631_v2 = vld [vmem:[%s15533_s1 + $0x1b4] ss:$8 sps:$4 sm:$0xff]  }
  0x42   : > { %8045 = vmatprep.subr.bf16.mxu0 %v10559_v3  ;;  %v10634_v3 = vld [vmem:[%s15533_s1 + $0x11b4] ss:$8 sps:$4 sm:$0xff]  }
  0x44   : > { %7198 = vmatpush1.bf16.msra.mxu1 %v10561_v4  ;;  %v10629_v4 = vld [vmem:[%s15533_s1 + $0x1b0] ss:$8 sps:$4 sm:$0xff]  }
  0x45   : > { %8046 = vmatpush1.bf16.msra.mxu0 %v10562_v5  ;;  %7220 = vmatprep.subr.bf16.mxu1 %v10565_v6  ;;  %v10632_v5 = vld [vmem:[%s15533_s1 + $0x11b0] ss:$8 sps:$4 sm:$0xff]   ;;  %v10637_v6 = vld [vmem:[%s15533_s1 + $0x1c4] ss:$8 sps:$4 sm:$0xff]  }
  0x46   : > { %8068 = vmatprep.subr.bf16.mxu0 %v10568_v7  ;;  %v10640_v7 = vld [vmem:[%s15533_s1 + $0x11c4] ss:$8 sps:$4 sm:$0xff]  }
  0x47   : > { %7200 = vmatmul.mubr.bf16.vlgmr.msra.gmra.mrb[0].mxu1 %v9023_v8  ;;  %v10635_v8 = vld [vmem:[%s15533_s1 + $0x1c0] ss:$8 sps:$4 sm:$0xff]  }
  0x48   : > { %8048 = vmatmul.mubr.bf16.vlgmr.msra.gmra.mrb[0].mxu0 %v9055_v10  ;;  %7221 = vmatpush1.bf16.msra.mxu1 %v10563_v9  ;;  %v10638_v9 = vld [vmem:[%s15533_s1 + $0x11c0] ss:$8 sps:$4 sm:$0xff]   ;;  %v10643_v10 = vld [vmem:[%s15533_s1 + $0x1d4] ss:$8 sps:$4 sm:$0xff]  }
  0x49   : > { %8069 = vmatpush1.bf16.msra.mxu0 %v10566_v11  ;;  %7222 = vmatprep.subr.bf16.mxu1 %v10571_v12  ;;  %v10646_v11 = vld [vmem:[%s15533_s1 + $0x11d4] ss:$8 sps:$4 sm:$0xff]   ;;  %v10641_v12 = vld [vmem:[%s15533_s1 + $0x1d0] ss:$8 sps:$4 sm:$0xff]  }
  0x4a   : > { %8070 = vmatprep.subr.bf16.mxu0 %v10574_v13  ;;  %7209 = vmatprep.mubr.bf16.mxu1 %v9088_v33  ;;  %v10644_v13 = vld [vmem:[%s15533_s1 + $0x11d0] ss:$8 sps:$4 sm:$0xff]   ;;  %v356_v33 = vld [vmem:[%s12206_s12 + $0x388] sm:$0xff] }
  0x4b   : > { %8057 = vmatprep.mubr.bf16.mxu0 %v9120_v39  ;;  %v10676_v39 = vld [vmem:[%s15533_s1 + $0x1224] ss:$8 sps:$4 sm:$0xff]  }
  0x4c   : > { %7223 = vmatpush1.bf16.msra.mxu1 %v10569_v14  ;;  %v10649_v14 = vld [vmem:[%s15533_s1 + $0x1e4] ss:$8 sps:$4 sm:$0xff]  }
  0x4d   : > { %8071 = vmatpush1.bf16.msra.mxu0 %v10572_v15  ;;  %7224 = vmatprep.subr.bf16.mxu1 %v10577_v16  ;;  %v10652_v15 = vld [vmem:[%s15533_s1 + $0x11e4] ss:$8 sps:$4 sm:$0xff]   ;;  %v10647_v16 = vld [vmem:[%s15533_s1 + $0x1e0] ss:$8 sps:$4 sm:$0xff]  }
  0x4e   : > { %8072 = vmatprep.subr.bf16.mxu0 %v10580_v17  ;;  %v10650_v17 = vld [vmem:[%s15533_s1 + $0x11e0] ss:$8 sps:$4 sm:$0xff]  }
  0x4f   : > { %7210 = vmatmul.mubr.bf16.gmra.mrb[4].mxu1 %v9087_v37  ;;  %v10668_v37 = vld [vmem:[%s15533_s1 + $0x1210] ss:$8 sps:$4 sm:$0xff]  }
  0x50   : > { %7225 = vmatpush1.bf16.msra.mxu1 %v10575_v18  ;;  %8058 = vmatmul.mubr.bf16.gmra.mrb[4].mxu0 %v9119_v40  ;;  %v10655_v18 = vld [vmem:[%s15533_s1 + $0x1f4] ss:$8 sps:$4 sm:$0xff]   ;;  %v10671_v40 = vld [vmem:[%s15533_s1 + $0x220] ss:$8 sps:$4 sm:$0xff]  }
  0x51   : > { %8073 = vmatpush1.bf16.msra.mxu0 %v10578_v19  ;;  %7226 = vmatprep.subr.bf16.mxu1 %v10583_v20  ;;  %v10658_v19 = vld [vmem:[%s15533_s1 + $0x11f4] ss:$8 sps:$4 sm:$0xff]   ;;  %v10653_v20 = vld [vmem:[%s15533_s1 + $0x1f0] ss:$8 sps:$4 sm:$0xff]  }
  0x52   : > { %8074 = vmatprep.subr.bf16.mxu0 %v10586_v21  ;;  %7252 = vmatprep.mubr.bf16.mxu1 %v9026_v48  ;;  %v10656_v21 = vld [vmem:[%s15533_s1 + $0x11f0] ss:$8 sps:$4 sm:$0xff]   ;;  %v10679_v48 = vld [vmem:[%s15533_s1 + $0x234] ss:$8 sps:$4 sm:$0xff]  }
  0x53   : > { %8100 = vmatprep.mubr.bf16.mxu0 %v9058_v53  ;;  %v10680_v53 = vld [vmem:[%s15533_s1 + $0x1230] ss:$8 sps:$4 sm:$0xff]  }
  0x54   : > { %7227 = vmatpush1.bf16.msra.mxu1 %v10581_v22  ;;  %v10661_v22 = vld [vmem:[%s15533_s1 + $0x204] ss:$8 sps:$4 sm:$0xff]  }
  0x55   : > { %8075 = vmatpush1.bf16.msra.mxu0 %v10584_v23  ;;  %7228 = vmatprep.subr.bf16.mxu1 %v10589_v24  ;;  %v10664_v23 = vld [vmem:[%s15533_s1 + $0x1204] ss:$8 sps:$4 sm:$0xff]   ;;  %v10659_v24 = vld [vmem:[%s15533_s1 + $0x200] ss:$8 sps:$4 sm:$0xff]  }
  0x56   : > { %8076 = vmatprep.subr.bf16.mxu0 %v10592_v25  ;;  %v10662_v25 = vld [vmem:[%s15533_s1 + $0x1200] ss:$8 sps:$4 sm:$0xff]  }
  0x58   : > { %7229 = vmatpush1.bf16.msra.mxu1 %v10587_v26  ;;  %v308_v26 = vld [vmem:[%s12206_s12 + $0x208] sm:$0xff] }
  0x59   : > { %8077 = vmatpush1.bf16.msra.mxu0 %v10590_v27  ;;  %7230 = vmatprep.subr.bf16.mxu1 %v10595_v28  ;;  %v9025_v27 = vcombine.low %v12361_v44, %v12364_v45  ;;  %v9057_v28 = vcombine.low %v12375_v49, %v12378_v50  ;;  %v12532_v45 = vld [vmem:[%s12206_s12 + $0x110] sm:$0xff] }
  0x5a   : > { %8078 = vmatprep.subr.bf16.mxu0 %v10598_v29  ;;  %v340_v29 = vld [vmem:[%s12206_s12 + $0x308] sm:$0xff]  ;;  %v10682_v49 = vld [vmem:[%s15533_s1 + $0x1234] ss:$8 sps:$4 sm:$0xff]  }
  0x5c   : > { %7231 = vmatpush1.bf16.msra.mxu1 %v10593_v32  ;;  %v324_v32 = vld [vmem:[%s12206_s12 + $0x288] sm:$0xff] }
  0x5d   : > { %8079 = vmatpush1.bf16.msra.mxu0 %v10596_v34  ;;  %7232 = vmatprep.subr.bf16.mxu1 %v10601_v38  ;;  %v9090_v34 = vcombine.high %v308_v26, %v340_v29  ;;  %v9122_v35 = vcombine.high %v324_v32, %v356_v33  ;;  %v10673_v38 = vld [vmem:[%s15533_s1 + $0x224] ss:$8 sps:$4 sm:$0xff]   ;;  %v9121_v44 = vcombine.low %v324_v32, %v356_v33  ;;  %v10743_v32 = vld [vmem:[%s15533_s1 + $0x2e0] ss:$8 sps:$4 sm:$0xff]  }
  0x5e   : > { %8080 = vmatprep.subr.bf16.mxu0 %v10604_v41  ;;  %v10674_v41 = vld [vmem:[%s15533_s1 + $0x1220] ss:$8 sps:$4 sm:$0xff]  }
  0x5f   : > { %v10746_v33 = vld [vmem:[%s15533_s1 + $0x12e0] ss:$8 sps:$4 sm:$0xff]  }
  0x60   : > { %7233 = vmatpush1.bf16.msra.mxu1 %v10599_v42  ;;  %v12529_v42 = vld [vmem:[%s12206_s12 + $0x10] sm:$0xff] }
  0x61   : > { %8081 = vmatpush1.bf16.msra.mxu0 %v10602_v43  ;;  %7234 = vmatprep.subr.bf16.mxu1 %v10607_v46  ;;  %v9089_v43 = vcombine.low %v308_v26, %v340_v29  ;;  %v12535_v46 = vld [vmem:[%s12206_s12 + $0x90] sm:$0xff]  ;;  %v9028_v50 = vcombine.high %v12529_v42, %v12532_v45 }
  0x62   : > { %8082 = vmatprep.subr.bf16.mxu0 %v10610_v47  ;;  %v12538_v47 = vld [vmem:[%s12206_s12 + $0x190] sm:$0xff] }
  0x63   : > { %v10739_v26 = vld [vmem:[%s15533_s1 + $0x2d4] ss:$8 sps:$4 sm:$0xff]   ;;  %v10740_v29 = vld [vmem:[%s15533_s1 + $0x12d0] ss:$8 sps:$4 sm:$0xff]  }
  0x64   : > { %7235 = vmatpush1.bf16.msra.mxu1 %v10605_v51  ;;  %v9060_v51 = vcombine.high %v12535_v46, %v12538_v47 }
  0x65   : > { %8083 = vmatpush1.bf16.msra.mxu0 %v10608_v52  ;;  %7236 = vmatprep.subr.bf16.mxu1 %v10613_v54  ;;  %v10677_v52 = vld [vmem:[%s15533_s1 + $0x230] ss:$8 sps:$4 sm:$0xff]   ;;  %v10685_v54 = vld [vmem:[%s15533_s1 + $0x244] ss:$8 sps:$4 sm:$0xff]  }
  0x66   : > { %8084 = vmatprep.subr.bf16.mxu0 %v10616_v55  ;;  %v10688_v55 = vld [vmem:[%s15533_s1 + $0x1244] ss:$8 sps:$4 sm:$0xff]  }
  0x68   : > { %7237 = vmatpush1.bf16.msra.mxu1 %v10611_v56  ;;  %v10683_v56 = vld [vmem:[%s15533_s1 + $0x240] ss:$8 sps:$4 sm:$0xff]  }
  0x69   : > { %8085 = vmatpush1.bf16.msra.mxu0 %v10614_v57  ;;  %7238 = vmatprep.subr.bf16.mxu1 %v10619_v58  ;;  %v10686_v57 = vld [vmem:[%s15533_s1 + $0x1240] ss:$8 sps:$4 sm:$0xff]   ;;  %v10691_v58 = vld [vmem:[%s15533_s1 + $0x254] ss:$8 sps:$4 sm:$0xff]  }
  0x6a   : > { %8086 = vmatprep.subr.bf16.mxu0 %v10622_v59  ;;  %v10694_v59 = vld [vmem:[%s15533_s1 + $0x1254] ss:$8 sps:$4 sm:$0xff]  }
  0x6c   : > { %7239 = vmatpush1.bf16.msra.mxu1 %v10617_v60  ;;  %v10689_v60 = vld [vmem:[%s15533_s1 + $0x250] ss:$8 sps:$4 sm:$0xff]  }
  0x6d   : > { %8087 = vmatpush1.bf16.msra.mxu0 %v10620_v61  ;;  %7240 = vmatprep.subr.bf16.mxu1 %v10625_v62  ;;  %v10692_v61 = vld [vmem:[%s15533_s1 + $0x1250] ss:$8 sps:$4 sm:$0xff]   ;;  %v10697_v62 = vld [vmem:[%s15533_s1 + $0x264] ss:$8 sps:$4 sm:$0xff]  }
  0x6e   : > { %8088 = vmatprep.subr.bf16.mxu0 %v10628_v63  ;;  %v10700_v63 = vld [vmem:[%s15533_s1 + $0x1264] ss:$8 sps:$4 sm:$0xff]  }
  0x70   : > { %7241 = vmatpush1.bf16.msra.mxu1 %v10623_v0  ;;  %v10695_v0 = vld [vmem:[%s15533_s1 + $0x260] ss:$8 sps:$4 sm:$0xff]  }
  0x71   : > { %8089 = vmatpush1.bf16.msra.mxu0 %v10626_v1  ;;  %7242 = vmatprep.subr.bf16.mxu1 %v10631_v2  ;;  %v10698_v1 = vld [vmem:[%s15533_s1 + $0x1260] ss:$8 sps:$4 sm:$0xff]   ;;  %v10703_v2 = vld [vmem:[%s15533_s1 + $0x274] ss:$8 sps:$4 sm:$0xff]  }
  0x72   : > { %8090 = vmatprep.subr.bf16.mxu0 %v10634_v3  ;;  %v10706_v3 = vld [vmem:[%s15533_s1 + $0x1274] ss:$8 sps:$4 sm:$0xff]  }
  0x74   : > { %7243 = vmatpush1.bf16.msra.mxu1 %v10629_v4  ;;  %v10701_v4 = vld [vmem:[%s15533_s1 + $0x270] ss:$8 sps:$4 sm:$0xff]  }
  0x75   : > { %8091 = vmatpush1.bf16.msra.mxu0 %v10632_v5  ;;  %7244 = vmatprep.subr.bf16.mxu1 %v10637_v6  ;;  %v10704_v5 = vld [vmem:[%s15533_s1 + $0x1270] ss:$8 sps:$4 sm:$0xff]   ;;  %v10709_v6 = vld [vmem:[%s15533_s1 + $0x284] ss:$8 sps:$4 sm:$0xff]  }
  0x76   : > { %8092 = vmatprep.subr.bf16.mxu0 %v10640_v7  ;;  %v10712_v7 = vld [vmem:[%s15533_s1 + $0x1284] ss:$8 sps:$4 sm:$0xff]  }
  0x78   : > { %7245 = vmatpush1.bf16.msra.mxu1 %v10635_v8  ;;  %v10707_v8 = vld [vmem:[%s15533_s1 + $0x280] ss:$8 sps:$4 sm:$0xff]  }
  0x79   : > { %8093 = vmatpush1.bf16.msra.mxu0 %v10638_v9  ;;  %7246 = vmatprep.subr.bf16.mxu1 %v10643_v10  ;;  %v10710_v9 = vld [vmem:[%s15533_s1 + $0x1280] ss:$8 sps:$4 sm:$0xff]   ;;  %v10715_v10 = vld [vmem:[%s15533_s1 + $0x294] ss:$8 sps:$4 sm:$0xff]  }
  0x7a   : > { %8094 = vmatprep.subr.bf16.mxu0 %v10646_v11  ;;  %v10718_v11 = vld [vmem:[%s15533_s1 + $0x1294] ss:$8 sps:$4 sm:$0xff]  }
  0x7c   : > { %7247 = vmatpush1.bf16.msra.mxu1 %v10641_v12  ;;  %v10713_v12 = vld [vmem:[%s15533_s1 + $0x290] ss:$8 sps:$4 sm:$0xff]  }
  0x7d   : > { %8095 = vmatpush1.bf16.msra.mxu0 %v10644_v13  ;;  %7248 = vmatprep.subr.bf16.mxu1 %v10649_v14  ;;  %v10716_v13 = vld [vmem:[%s15533_s1 + $0x1290] ss:$8 sps:$4 sm:$0xff]   ;;  %v10721_v14 = vld [vmem:[%s15533_s1 + $0x2a4] ss:$8 sps:$4 sm:$0xff]  }
  0x7e   : > { %8096 = vmatprep.subr.bf16.mxu0 %v10652_v15  ;;  %v10724_v15 = vld [vmem:[%s15533_s1 + $0x12a4] ss:$8 sps:$4 sm:$0xff]  }
  0x80   : > { %7249 = vmatpush1.bf16.msra.mxu1 %v10647_v16  ;;  %v10719_v16 = vld [vmem:[%s15533_s1 + $0x2a0] ss:$8 sps:$4 sm:$0xff]  }
  0x81   : > { %8097 = vmatpush1.bf16.msra.mxu0 %v10650_v17  ;;  %7250 = vmatprep.subr.bf16.mxu1 %v10655_v18  ;;  %v10722_v17 = vld [vmem:[%s15533_s1 + $0x12a0] ss:$8 sps:$4 sm:$0xff]   ;;  %v10727_v18 = vld [vmem:[%s15533_s1 + $0x2b4] ss:$8 sps:$4 sm:$0xff]  }
  0x82   : > { %8098 = vmatprep.subr.bf16.mxu0 %v10658_v19  ;;  %v10730_v19 = vld [vmem:[%s15533_s1 + $0x12b4] ss:$8 sps:$4 sm:$0xff]  }
  0x84   : > { %7251 = vmatpush1.bf16.msra.mxu1 %v10653_v20  ;;  %v10725_v20 = vld [vmem:[%s15533_s1 + $0x2b0] ss:$8 sps:$4 sm:$0xff]  }
  0x85   : > { %8099 = vmatpush1.bf16.msra.mxu0 %v10656_v21  ;;  %7273 = vmatprep.subr.bf16.mxu1 %v10661_v22  ;;  %v10728_v21 = vld [vmem:[%s15533_s1 + $0x12b0] ss:$8 sps:$4 sm:$0xff]   ;;  %v10733_v22 = vld [vmem:[%s15533_s1 + $0x2c4] ss:$8 sps:$4 sm:$0xff]  }
  0x86   : > { %8121 = vmatprep.subr.bf16.mxu0 %v10664_v23  ;;  %v10736_v23 = vld [vmem:[%s15533_s1 + $0x12c4] ss:$8 sps:$4 sm:$0xff]  }
  0x87   : > { %7253 = vmatmul.mubr.bf16.vlgmr.msra.gmra.mrb[0].mxu1 %v9025_v27  ;;  %v10742_v27 = vld [vmem:[%s15533_s1 + $0x12d4] ss:$8 sps:$4 sm:$0xff]  }
  0x88   : > { %8101 = vmatmul.mubr.bf16.vlgmr.msra.gmra.mrb[0].mxu0 %v9057_v28  ;;  %7274 = vmatpush1.bf16.msra.mxu1 %v10659_v24  ;;  %v10731_v24 = vld [vmem:[%s15533_s1 + $0x2c0] ss:$8 sps:$4 sm:$0xff]   ;;  %v10737_v28 = vld [vmem:[%s15533_s1 + $0x2d0] ss:$8 sps:$4 sm:$0xff]  }
  0x89   : > { %8122 = vmatpush1.bf16.msra.mxu0 %v10662_v25  ;;  %7275 = vmatprep.subr.bf16.mxu1 %v10667_v30  ;;  %v10734_v25 = vld [vmem:[%s15533_s1 + $0x12c0] ss:$8 sps:$4 sm:$0xff]   ;;  %v10745_v30 = vld [vmem:[%s15533_s1 + $0x2e4] ss:$8 sps:$4 sm:$0xff]  }
  0x8a   : > { %8123 = vmatprep.subr.bf16.mxu0 %v10670_v31  ;;  %7262 = vmatprep.mubr.bf16.mxu1 %v9090_v34  ;;  %v10748_v31 = vld [vmem:[%s15533_s1 + $0x12e4] ss:$8 sps:$4 sm:$0xff]   ;;  %v10751_v34 = vld [vmem:[%s15533_s1 + $0x2f4] ss:$8 sps:$4 sm:$0xff]  }
  0x8b   : > { %8110 = vmatprep.mubr.bf16.mxu0 %v9122_v35  ;;  %v10754_v35 = vld [vmem:[%s15533_s1 + $0x12f4] ss:$8 sps:$4 sm:$0xff]  }
  0x8c   : > { %7276 = vmatpush1.bf16.msra.mxu1 %v10665_v36  ;;  %v10749_v36 = vld [vmem:[%s15533_s1 + $0x2f0] ss:$8 sps:$4 sm:$0xff]  }
  0x8d   : > { %8124 = vmatpush1.bf16.msra.mxu0 %v10668_v37  ;;  %7277 = vmatprep.subr.bf16.mxu1 %v10673_v38  ;;  %v10752_v37 = vld [vmem:[%s15533_s1 + $0x12f0] ss:$8 sps:$4 sm:$0xff]   ;;  %v10757_v38 = vld [vmem:[%s15533_s1 + $0x304] ss:$8 sps:$4 sm:$0xff]  }
  0x8e   : > { %8125 = vmatprep.subr.bf16.mxu0 %v10676_v39  ;;  %v10760_v39 = vld [vmem:[%s15533_s1 + $0x1304] ss:$8 sps:$4 sm:$0xff]  }
  0x8f   : > { %7263 = vmatmul.mubr.bf16.gmra.mrb[4].mxu1 %v9089_v43  ;;  %v309_v43 = vld [vmem:[%s12206_s12 + $0x210] sm:$0xff] }
  0x90   : > { %8111 = vmatmul.mubr.bf16.gmra.mrb[4].mxu0 %v9121_v44  ;;  %7278 = vmatpush1.bf16.msra.mxu1 %v10671_v40  ;;  %v10755_v40 = vld [vmem:[%s15533_s1 + $0x300] ss:$8 sps:$4 sm:$0xff]   ;;  %v341_v44 = vld [vmem:[%s12206_s12 + $0x310] sm:$0xff] }
  0x91   : > { %8126 = vmatpush1.bf16.msra.mxu0 %v10674_v41  ;;  %7279 = vmatprep.subr.bf16.mxu1 %v10679_v48  ;;  %v10758_v41 = vld [vmem:[%s15533_s1 + $0x1300] ss:$8 sps:$4 sm:$0xff]   ;;  %v9027_v48 = vcombine.low %v12529_v42, %v12532_v45  ;;  %v10761_v45 = vld [vmem:[%s15533_s1 + $0x310] ss:$8 sps:$4 sm:$0xff]  }
  0x92   : > { %8127 = vmatprep.subr.bf16.mxu0 %v10682_v49  ;;  %7305 = vmatprep.mubr.bf16.mxu1 %v9028_v50  ;;  %v9059_v49 = vcombine.low %v12535_v46, %v12538_v47  ;;  %v325_v50 = vld [vmem:[%s12206_s12 + $0x290] sm:$0xff]  ;;  %v10769_v47 = vld [vmem:[%s15533_s1 + $0x324] ss:$8 sps:$4 sm:$0xff]  }
  0x93   : > { %8153 = vmatprep.mubr.bf16.mxu0 %v9060_v51  ;;  %v357_v51 = vld [vmem:[%s12206_s12 + $0x390] sm:$0xff] }
  0x94   : > { %7280 = vmatpush1.bf16.msra.mxu1 %v10677_v52  ;;  %v10763_v52 = vld [vmem:[%s15533_s1 + $0x314] ss:$8 sps:$4 sm:$0xff]   ;;  %v9124_v42 = vcombine.high %v325_v50, %v357_v51  ;;  %v10764_v46 = vld [vmem:[%s15533_s1 + $0x1310] ss:$8 sps:$4 sm:$0xff]  }
  0x95   : > { %8128 = vmatpush1.bf16.msra.mxu0 %v10680_v53  ;;  %7281 = vmatprep.subr.bf16.mxu1 %v10685_v54  ;;  %v10766_v53 = vld [vmem:[%s15533_s1 + $0x1314] ss:$8 sps:$4 sm:$0xff]   ;;  %v9092_v54 = vcombine.high %v309_v43, %v341_v44 }
  0x96   : > { %8129 = vmatprep.subr.bf16.mxu0 %v10688_v55  ;;  %v10772_v55 = vld [vmem:[%s15533_s1 + $0x1324] ss:$8 sps:$4 sm:$0xff]  }
  0x98   : > { %7282 = vmatpush1.bf16.msra.mxu1 %v10683_v56  ;;  %v10767_v56 = vld [vmem:[%s15533_s1 + $0x320] ss:$8 sps:$4 sm:$0xff]  }
  0x99   : > { %8130 = vmatpush1.bf16.msra.mxu0 %v10686_v57  ;;  %7283 = vmatprep.subr.bf16.mxu1 %v10691_v58  ;;  %v10770_v57 = vld [vmem:[%s15533_s1 + $0x1320] ss:$8 sps:$4 sm:$0xff]   ;;  %v12745_v58 = vld [vmem:[%s12206_s12 + $0x18] sm:$0xff] }
  0x9a   : > { %8131 = vmatprep.subr.bf16.mxu0 %v10694_v59  ;;  %v12748_v59 = vld [vmem:[%s12206_s12 + $0x118] sm:$0xff] }
  0x9c   : > { %7284 = vmatpush1.bf16.msra.mxu1 %v10689_v60  ;;  %v9091_v60 = vcombine.low %v309_v43, %v341_v44  ;;  %v10835_v43 = vld [vmem:[%s15533_s1 + $0x3d4] ss:$8 sps:$4 sm:$0xff]  }
  0x9d   : > { %8132 = vmatpush1.bf16.msra.mxu0 %v10692_v61  ;;  %7285 = vmatprep.subr.bf16.mxu1 %v10697_v62  ;;  %v9123_v61 = vcombine.low %v325_v50, %v357_v51  ;;  %v12751_v62 = vld [vmem:[%s12206_s12 + $0x98] sm:$0xff]  ;;  %v10841_v50 = vld [vmem:[%s15533_s1 + $0x3e4] ss:$8 sps:$4 sm:$0xff]  }
  0x9e   : > { %8133 = vmatprep.subr.bf16.mxu0 %v10700_v63  ;;  %v12754_v63 = vld [vmem:[%s12206_s12 + $0x198] sm:$0xff]  ;;  %v10844_v51 = vld [vmem:[%s15533_s1 + $0x13e4] ss:$8 sps:$4 sm:$0xff]  }
  0x9f   : > { %v10838_v44 = vld [vmem:[%s15533_s1 + $0x13d4] ss:$8 sps:$4 sm:$0xff]  }
  0xa0   : > { %7286 = vmatpush1.bf16.msra.mxu1 %v10695_v0  ;;  %v10775_v0 = vld [vmem:[%s15533_s1 + $0x334] ss:$8 sps:$4 sm:$0xff]  }
  0xa1   : > { %8134 = vmatpush1.bf16.msra.mxu0 %v10698_v1  ;;  %7287 = vmatprep.subr.bf16.mxu1 %v10703_v2  ;;  %v10778_v1 = vld [vmem:[%s15533_s1 + $0x1334] ss:$8 sps:$4 sm:$0xff]   ;;  %v9030_v2 = vcombine.high %v12745_v58, %v12748_v59 }
  0xa2   : > { %8135 = vmatprep.subr.bf16.mxu0 %v10706_v3  ;;  %v9062_v3 = vcombine.high %v12751_v62, %v12754_v63 }
  0xa4   : > { %7288 = vmatpush1.bf16.msra.mxu1 %v10701_v4  ;;  %v10773_v4 = vld [vmem:[%s15533_s1 + $0x330] ss:$8 sps:$4 sm:$0xff]  }
  0xa5   : > { %8136 = vmatpush1.bf16.msra.mxu0 %v10704_v5  ;;  %7289 = vmatprep.subr.bf16.mxu1 %v10709_v6  ;;  %v10776_v5 = vld [vmem:[%s15533_s1 + $0x1330] ss:$8 sps:$4 sm:$0xff]   ;;  %v10781_v6 = vld [vmem:[%s15533_s1 + $0x344] ss:$8 sps:$4 sm:$0xff]  }
  0xa6   : > { %8137 = vmatprep.subr.bf16.mxu0 %v10712_v7  ;;  %v10784_v7 = vld [vmem:[%s15533_s1 + $0x1344] ss:$8 sps:$4 sm:$0xff]  }
  0xa8   : > { %7290 = vmatpush1.bf16.msra.mxu1 %v10707_v8  ;;  %v10779_v8 = vld [vmem:[%s15533_s1 + $0x340] ss:$8 sps:$4 sm:$0xff]  }
  0xa9   : > { %8138 = vmatpush1.bf16.msra.mxu0 %v10710_v9  ;;  %7291 = vmatprep.subr.bf16.mxu1 %v10715_v10  ;;  %v10782_v9 = vld [vmem:[%s15533_s1 + $0x1340] ss:$8 sps:$4 sm:$0xff]   ;;  %v10787_v10 = vld [vmem:[%s15533_s1 + $0x354] ss:$8 sps:$4 sm:$0xff]  }
  0xaa   : > { %8139 = vmatprep.subr.bf16.mxu0 %v10718_v11  ;;  %v10790_v11 = vld [vmem:[%s15533_s1 + $0x1354] ss:$8 sps:$4 sm:$0xff]  }
  0xac   : > { %7292 = vmatpush1.bf16.msra.mxu1 %v10713_v12  ;;  %v10785_v12 = vld [vmem:[%s15533_s1 + $0x350] ss:$8 sps:$4 sm:$0xff]  }
  0xad   : > { %8140 = vmatpush1.bf16.msra.mxu0 %v10716_v13  ;;  %7293 = vmatprep.subr.bf16.mxu1 %v10721_v14  ;;  %v10788_v13 = vld [vmem:[%s15533_s1 + $0x1350] ss:$8 sps:$4 sm:$0xff]   ;;  %v10793_v14 = vld [vmem:[%s15533_s1 + $0x364] ss:$8 sps:$4 sm:$0xff]  }
  0xae   : > { %8141 = vmatprep.subr.bf16.mxu0 %v10724_v15  ;;  %v10796_v15 = vld [vmem:[%s15533_s1 + $0x1364] ss:$8 sps:$4 sm:$0xff]  }
  0xb0   : > { %7294 = vmatpush1.bf16.msra.mxu1 %v10719_v16  ;;  %v10791_v16 = vld [vmem:[%s15533_s1 + $0x360] ss:$8 sps:$4 sm:$0xff]  }
  0xb1   : > { %8142 = vmatpush1.bf16.msra.mxu0 %v10722_v17  ;;  %7295 = vmatprep.subr.bf16.mxu1 %v10727_v18  ;;  %v10794_v17 = vld [vmem:[%s15533_s1 + $0x1360] ss:$8 sps:$4 sm:$0xff]   ;;  %v10799_v18 = vld [vmem:[%s15533_s1 + $0x374] ss:$8 sps:$4 sm:$0xff]  }
  0xb2   : > { %8143 = vmatprep.subr.bf16.mxu0 %v10730_v19  ;;  %v10802_v19 = vld [vmem:[%s15533_s1 + $0x1374] ss:$8 sps:$4 sm:$0xff]  }
  0xb4   : > { %7296 = vmatpush1.bf16.msra.mxu1 %v10725_v20  ;;  %v10797_v20 = vld [vmem:[%s15533_s1 + $0x370] ss:$8 sps:$4 sm:$0xff]  }
  0xb5   : > { %8144 = vmatpush1.bf16.msra.mxu0 %v10728_v21  ;;  %7297 = vmatprep.subr.bf16.mxu1 %v10733_v22  ;;  %v10800_v21 = vld [vmem:[%s15533_s1 + $0x1370] ss:$8 sps:$4 sm:$0xff]   ;;  %v10805_v22 = vld [vmem:[%s15533_s1 + $0x384] ss:$8 sps:$4 sm:$0xff]  }
  0xb6   : > { %8145 = vmatprep.subr.bf16.mxu0 %v10736_v23  ;;  %v10808_v23 = vld [vmem:[%s15533_s1 + $0x1384] ss:$8 sps:$4 sm:$0xff]  }
  0xb8   : > { %7298 = vmatpush1.bf16.msra.mxu1 %v10731_v24  ;;  %v10803_v24 = vld [vmem:[%s15533_s1 + $0x380] ss:$8 sps:$4 sm:$0xff]  }
  0xb9   : > { %8146 = vmatpush1.bf16.msra.mxu0 %v10734_v25  ;;  %7299 = vmatprep.subr.bf16.mxu1 %v10739_v26  ;;  %v10806_v25 = vld [vmem:[%s15533_s1 + $0x1380] ss:$8 sps:$4 sm:$0xff]   ;;  %v10811_v26 = vld [vmem:[%s15533_s1 + $0x394] ss:$8 sps:$4 sm:$0xff]  }
  0xba   : > { %8147 = vmatprep.subr.bf16.mxu0 %v10742_v27  ;;  %v10814_v27 = vld [vmem:[%s15533_s1 + $0x1394] ss:$8 sps:$4 sm:$0xff]  }
  0xbc   : > { %7300 = vmatpush1.bf16.msra.mxu1 %v10737_v28  ;;  %v10809_v28 = vld [vmem:[%s15533_s1 + $0x390] ss:$8 sps:$4 sm:$0xff]  }
  0xbd   : > { %8148 = vmatpush1.bf16.msra.mxu0 %v10740_v29  ;;  %7301 = vmatprep.subr.bf16.mxu1 %v10745_v30  ;;  %v10812_v29 = vld [vmem:[%s15533_s1 + $0x1390] ss:$8 sps:$4 sm:$0xff]   ;;  %v10817_v30 = vld [vmem:[%s15533_s1 + $0x3a4] ss:$8 sps:$4 sm:$0xff]  }
  0xbe   : > { %8149 = vmatprep.subr.bf16.mxu0 %v10748_v31  ;;  %v10820_v31 = vld [vmem:[%s15533_s1 + $0x13a4] ss:$8 sps:$4 sm:$0xff]  }
  0xc0   : > { %7302 = vmatpush1.bf16.msra.mxu1 %v10743_v32  ;;  %v10815_v32 = vld [vmem:[%s15533_s1 + $0x3a0] ss:$8 sps:$4 sm:$0xff]  }
  0xc1   : > { %8150 = vmatpush1.bf16.msra.mxu0 %v10746_v33  ;;  %7303 = vmatprep.subr.bf16.mxu1 %v10751_v34  ;;  %v10818_v33 = vld [vmem:[%s15533_s1 + $0x13a0] ss:$8 sps:$4 sm:$0xff]   ;;  %v10823_v34 = vld [vmem:[%s15533_s1 + $0x3b4] ss:$8 sps:$4 sm:$0xff]  }
  0xc2   : > { %8151 = vmatprep.subr.bf16.mxu0 %v10754_v35  ;;  %v10826_v35 = vld [vmem:[%s15533_s1 + $0x13b4] ss:$8 sps:$4 sm:$0xff]  }
  0xc4   : > { %7304 = vmatpush1.bf16.msra.mxu1 %v10749_v36  ;;  %v10821_v36 = vld [vmem:[%s15533_s1 + $0x3b0] ss:$8 sps:$4 sm:$0xff]  }
  0xc5   : > { %8152 = vmatpush1.bf16.msra.mxu0 %v10752_v37  ;;  %7326 = vmatprep.subr.bf16.mxu1 %v10757_v38  ;;  %v10824_v37 = vld [vmem:[%s15533_s1 + $0x13b0] ss:$8 sps:$4 sm:$0xff]   ;;  %v10829_v38 = vld [vmem:[%s15533_s1 + $0x3c4] ss:$8 sps:$4 sm:$0xff]  }
  0xc6   : > { %8174 = vmatprep.subr.bf16.mxu0 %v10760_v39  ;;  %v10832_v39 = vld [vmem:[%s15533_s1 + $0x13c4] ss:$8 sps:$4 sm:$0xff]  }
  0xc7   : > { %7306 = vmatmul.mubr.bf16.vlgmr.msra.gmra.mrb[0].mxu1 %v9027_v48  ;;  %v10833_v48 = vld [vmem:[%s15533_s1 + $0x3d0] ss:$8 sps:$4 sm:$0xff]  }
  0xc8   : > { %8154 = vmatmul.mubr.bf16.vlgmr.msra.gmra.mrb[0].mxu0 %v9059_v49  ;;  %7327 = vmatpush1.bf16.msra.mxu1 %v10755_v40  ;;  %v10827_v40 = vld [vmem:[%s15533_s1 + $0x3c0] ss:$8 sps:$4 sm:$0xff]   ;;  %v10836_v49 = vld [vmem:[%s15533_s1 + $0x13d0] ss:$8 sps:$4 sm:$0xff]  }
  0xc9   : > { %8175 = vmatpush1.bf16.msra.mxu0 %v10758_v41  ;;  %7328 = vmatprep.subr.bf16.mxu1 %v10763_v52  ;;  %v10830_v41 = vld [vmem:[%s15533_s1 + $0x13c0] ss:$8 sps:$4 sm:$0xff]  }
  0xca   : > { %8176 = vmatprep.subr.bf16.mxu0 %v10766_v53  ;;  %7315 = vmatprep.mubr.bf16.mxu1 %v9092_v54  ;;  %v10839_v52 = vld [vmem:[%s15533_s1 + $0x3e0] ss:$8 sps:$4 sm:$0xff]   ;;  %v10847_v54 = vld [vmem:[%s15533_s1 + $0x3f4] ss:$8 sps:$4 sm:$0xff]  }
  0xcb   : > { %8163 = vmatprep.mubr.bf16.mxu0 %v9124_v42  ;;  %v10842_v53 = vld [vmem:[%s15533_s1 + $0x13e0] ss:$8 sps:$4 sm:$0xff]   ;;  %v10850_v42 = vld [vmem:[%s15533_s1 + $0x13f4] ss:$8 sps:$4 sm:$0xff]  }
  0xcc   : > { %7329 = vmatpush1.bf16.msra.mxu1 %v10761_v45  ;;  %v10845_v45 = vld [vmem:[%s15533_s1 + $0x3f0] ss:$8 sps:$4 sm:$0xff]  }
  0xcd   : > { %8177 = vmatpush1.bf16.msra.mxu0 %v10764_v46  ;;  %7330 = vmatprep.subr.bf16.mxu1 %v10769_v47  ;;  %v10848_v46 = vld [vmem:[%s15533_s1 + $0x13f0] ss:$8 sps:$4 sm:$0xff]   ;;  %v10853_v47 = vld [vmem:[%s15533_s1 + $0x404] ss:$8 sps:$4 sm:$0xff]  }
  0xce   : > { %8178 = vmatprep.subr.bf16.mxu0 %v10772_v55  ;;  %v10856_v55 = vld [vmem:[%s15533_s1 + $0x1404] ss:$8 sps:$4 sm:$0xff]  }
  0xcf   : > { %7316 = vmatmul.mubr.bf16.gmra.mrb[4].mxu1 %v9091_v60  ;;  %v310_v60 = vld [vmem:[%s12206_s12 + $0x218] sm:$0xff] }
  0xd0   : > { %8164 = vmatmul.mubr.bf16.gmra.mrb[4].mxu0 %v9123_v61  ;;  %7331 = vmatpush1.bf16.msra.mxu1 %v10767_v56  ;;  %v10851_v56 = vld [vmem:[%s15533_s1 + $0x400] ss:$8 sps:$4 sm:$0xff]   ;;  %v342_v61 = vld [vmem:[%s12206_s12 + $0x318] sm:$0xff] }
  0xd1   : > { %8179 = vmatpush1.bf16.msra.mxu0 %v10770_v57  ;;  %7332 = vmatprep.subr.bf16.mxu1 %v10775_v0  ;;  %v10854_v57 = vld [vmem:[%s15533_s1 + $0x1400] ss:$8 sps:$4 sm:$0xff]   ;;  %v9029_v0 = vcombine.low %v12745_v58, %v12748_v59  ;;  %v9094_v58 = vcombine.high %v310_v60, %v342_v61 }
  0xd2   : > { %8180 = vmatprep.subr.bf16.mxu0 %v10778_v1  ;;  %7358 = vmatprep.mubr.bf16.mxu1 %v9030_v2  ;;  %v9061_v1 = vcombine.low %v12751_v62, %v12754_v63  ;;  %v326_v2 = vld [vmem:[%s12206_s12 + $0x298] sm:$0xff] }
  0xd3   : > { %8206 = vmatprep.mubr.bf16.mxu0 %v9062_v3  ;;  %v358_v3 = vld [vmem:[%s12206_s12 + $0x398] sm:$0xff] }
  0xd4   : > { %7333 = vmatpush1.bf16.msra.mxu1 %v10773_v4  ;;  %v10859_v4 = vld [vmem:[%s15533_s1 + $0x414] ss:$8 sps:$4 sm:$0xff]   ;;  %v9126_v59 = vcombine.high %v326_v2, %v358_v3  ;;  %v10857_v62 = vld [vmem:[%s15533_s1 + $0x410] ss:$8 sps:$4 sm:$0xff]  }
  0xd5   : > { %8181 = vmatpush1.bf16.msra.mxu0 %v10776_v5  ;;  %7334 = vmatprep.subr.bf16.mxu1 %v10781_v6  ;;  %v10862_v5 = vld [vmem:[%s15533_s1 + $0x1414] ss:$8 sps:$4 sm:$0xff]   ;;  %v10860_v63 = vld [vmem:[%s15533_s1 + $0x1410] ss:$8 sps:$4 sm:$0xff]   ;;  %v10865_v6 = vld [vmem:[%s15533_s1 + $0x424] ss:$8 sps:$4 sm:$0xff]  }
  0xd6   : > { %8182 = vmatprep.subr.bf16.mxu0 %v10784_v7  ;;  %v10868_v7 = vld [vmem:[%s15533_s1 + $0x1424] ss:$8 sps:$4 sm:$0xff]  }
  0xd8   : > { %7335 = vmatpush1.bf16.msra.mxu1 %v10779_v8  ;;  %v12955_v8 = vld [vmem:[%s12206_s12 + $0x20] sm:$0xff] }
  0xd9   : > { %8183 = vmatpush1.bf16.msra.mxu0 %v10782_v9  ;;  %7336 = vmatprep.subr.bf16.mxu1 %v10787_v10  ;;  %v12958_v9 = vld [vmem:[%s12206_s12 + $0x120] sm:$0xff] }
  0xda   : > { %8184 = vmatprep.subr.bf16.mxu0 %v10790_v11  ;;  %v12961_v10 = vld [vmem:[%s12206_s12 + $0xa0] sm:$0xff]  ;;  %v9093_v11 = vcombine.low %v310_v60, %v342_v61  ;;  %v10931_v60 = vld [vmem:[%s15533_s1 + $0x4d4] ss:$8 sps:$4 sm:$0xff]  }
  0xdb   : > { %v10934_v61 = vld [vmem:[%s15533_s1 + $0x14d4] ss:$8 sps:$4 sm:$0xff]  }
  0xdc   : > { %7337 = vmatpush1.bf16.msra.mxu1 %v10785_v12  ;;  %v9125_v12 = vcombine.low %v326_v2, %v358_v3  ;;  %v10937_v2 = vld [vmem:[%s15533_s1 + $0x4e4] ss:$8 sps:$4 sm:$0xff]  }
  0xdd   : > { %8185 = vmatpush1.bf16.msra.mxu0 %v10788_v13  ;;  %7338 = vmatprep.subr.bf16.mxu1 %v10793_v14  ;;  %v12964_v13 = vld [vmem:[%s12206_s12 + $0x1a0] sm:$0xff] }
  0xde   : > { %8186 = vmatprep.subr.bf16.mxu0 %v10796_v15  ;;  %v10863_v14 = vld [vmem:[%s15533_s1 + $0x420] ss:$8 sps:$4 sm:$0xff]   ;;  %v10940_v3 = vld [vmem:[%s15533_s1 + $0x14e4] ss:$8 sps:$4 sm:$0xff]  }
  0xdf   : > { %v10866_v15 = vld [vmem:[%s15533_s1 + $0x1420] ss:$8 sps:$4 sm:$0xff]  }
  0xe0   : > { %7339 = vmatpush1.bf16.msra.mxu1 %v10791_v16  ;;  %v10871_v16 = vld [vmem:[%s15533_s1 + $0x434] ss:$8 sps:$4 sm:$0xff]  }
  0xe1   : > { %8187 = vmatpush1.bf16.msra.mxu0 %v10794_v17  ;;  %7340 = vmatprep.subr.bf16.mxu1 %v10799_v18  ;;  %v10874_v17 = vld [vmem:[%s15533_s1 + $0x1434] ss:$8 sps:$4 sm:$0xff]   ;;  %v9032_v18 = vcombine.high %v12955_v8, %v12958_v9 }
  0xe2   : > { %8188 = vmatprep.subr.bf16.mxu0 %v10802_v19  ;;  %v9064_v19 = vcombine.high %v12961_v10, %v12964_v13 }
  0xe4   : > { %7341 = vmatpush1.bf16.msra.mxu1 %v10797_v20  ;;  %v10869_v20 = vld [vmem:[%s15533_s1 + $0x430] ss:$8 sps:$4 sm:$0xff]  }
  0xe5   : > { %8189 = vmatpush1.bf16.msra.mxu0 %v10800_v21  ;;  %7342 = vmatprep.subr.bf16.mxu1 %v10805_v22  ;;  %v10872_v21 = vld [vmem:[%s15533_s1 + $0x1430] ss:$8 sps:$4 sm:$0xff]   ;;  %v10877_v22 = vld [vmem:[%s15533_s1 + $0x444] ss:$8 sps:$4 sm:$0xff]  }
  0xe6   : > { %8190 = vmatprep.subr.bf16.mxu0 %v10808_v23  ;;  %v10880_v23 = vld [vmem:[%s15533_s1 + $0x1444] ss:$8 sps:$4 sm:$0xff]  }
  0xe8   : > { %7343 = vmatpush1.bf16.msra.mxu1 %v10803_v24  ;;  %v10875_v24 = vld [vmem:[%s15533_s1 + $0x440] ss:$8 sps:$4 sm:$0xff]  }
  0xe9   : > { %8191 = vmatpush1.bf16.msra.mxu0 %v10806_v25  ;;  %7344 = vmatprep.subr.bf16.mxu1 %v10811_v26  ;;  %v10878_v25 = vld [vmem:[%s15533_s1 + $0x1440] ss:$8 sps:$4 sm:$0xff]   ;;  %v10883_v26 = vld [vmem:[%s15533_s1 + $0x454] ss:$8 sps:$4 sm:$0xff]  }
  0xea   : > { %8192 = vmatprep.subr.bf16.mxu0 %v10814_v27  ;;  %v10886_v27 = vld [vmem:[%s15533_s1 + $0x1454] ss:$8 sps:$4 sm:$0xff]  }
  0xec   : > { %7345 = vmatpush1.bf16.msra.mxu1 %v10809_v28  ;;  %v10881_v28 = vld [vmem:[%s15533_s1 + $0x450] ss:$8 sps:$4 sm:$0xff]  }
  0xed   : > { %8193 = vmatpush1.bf16.msra.mxu0 %v10812_v29  ;;  %7346 = vmatprep.subr.bf16.mxu1 %v10817_v30  ;;  %v10884_v29 = vld [vmem:[%s15533_s1 + $0x1450] ss:$8 sps:$4 sm:$0xff]   ;;  %v10889_v30 = vld [vmem:[%s15533_s1 + $0x464] ss:$8 sps:$4 sm:$0xff]  }
  0xee   : > { %8194 = vmatprep.subr.bf16.mxu0 %v10820_v31  ;;  %v10892_v31 = vld [vmem:[%s15533_s1 + $0x1464] ss:$8 sps:$4 sm:$0xff]  }
  0xf0   : > { %7347 = vmatpush1.bf16.msra.mxu1 %v10815_v32  ;;  %v10887_v32 = vld [vmem:[%s15533_s1 + $0x460] ss:$8 sps:$4 sm:$0xff]  }
  0xf1   : > { %8195 = vmatpush1.bf16.msra.mxu0 %v10818_v33  ;;  %7348 = vmatprep.subr.bf16.mxu1 %v10823_v34  ;;  %v10890_v33 = vld [vmem:[%s15533_s1 + $0x1460] ss:$8 sps:$4 sm:$0xff]   ;;  %v10895_v34 = vld [vmem:[%s15533_s1 + $0x474] ss:$8 sps:$4 sm:$0xff]  }
  0xf2   : > { %8196 = vmatprep.subr.bf16.mxu0 %v10826_v35  ;;  %v10898_v35 = vld [vmem:[%s15533_s1 + $0x1474] ss:$8 sps:$4 sm:$0xff]  }
  0xf4   : > { %7349 = vmatpush1.bf16.msra.mxu1 %v10821_v36  ;;  %v10893_v36 = vld [vmem:[%s15533_s1 + $0x470] ss:$8 sps:$4 sm:$0xff]  }
  0xf5   : > { %8197 = vmatpush1.bf16.msra.mxu0 %v10824_v37  ;;  %7350 = vmatprep.subr.bf16.mxu1 %v10829_v38  ;;  %v10896_v37 = vld [vmem:[%s15533_s1 + $0x1470] ss:$8 sps:$4 sm:$0xff]   ;;  %v10901_v38 = vld [vmem:[%s15533_s1 + $0x484] ss:$8 sps:$4 sm:$0xff]  }
  0xf6   : > { %8198 = vmatprep.subr.bf16.mxu0 %v10832_v39  ;;  %v10904_v39 = vld [vmem:[%s15533_s1 + $0x1484] ss:$8 sps:$4 sm:$0xff]  }
  0xf8   : > { %7351 = vmatpush1.bf16.msra.mxu1 %v10827_v40  ;;  %v10899_v40 = vld [vmem:[%s15533_s1 + $0x480] ss:$8 sps:$4 sm:$0xff]  }
  0xf9   : > { %8199 = vmatpush1.bf16.msra.mxu0 %v10830_v41  ;;  %7352 = vmatprep.subr.bf16.mxu1 %v10835_v43  ;;  %v10902_v41 = vld [vmem:[%s15533_s1 + $0x1480] ss:$8 sps:$4 sm:$0xff]   ;;  %v10907_v43 = vld [vmem:[%s15533_s1 + $0x494] ss:$8 sps:$4 sm:$0xff]  }
  0xfa   : > { %8200 = vmatprep.subr.bf16.mxu0 %v10838_v44  ;;  %v10910_v44 = vld [vmem:[%s15533_s1 + $0x1494] ss:$8 sps:$4 sm:$0xff]  }
  0xfc   : > { %7353 = vmatpush1.bf16.msra.mxu1 %v10833_v48  ;;  %v10905_v48 = vld [vmem:[%s15533_s1 + $0x490] ss:$8 sps:$4 sm:$0xff]  }
  0xfd   : > { %8201 = vmatpush1.bf16.msra.mxu0 %v10836_v49  ;;  %7354 = vmatprep.subr.bf16.mxu1 %v10841_v50  ;;  %v10908_v49 = vld [vmem:[%s15533_s1 + $0x1490] ss:$8 sps:$4 sm:$0xff]   ;;  %v10913_v50 = vld [vmem:[%s15533_s1 + $0x4a4] ss:$8 sps:$4 sm:$0xff]  }
  0xfe   : > { %8202 = vmatprep.subr.bf16.mxu0 %v10844_v51  ;;  %v10916_v51 = vld [vmem:[%s15533_s1 + $0x14a4] ss:$8 sps:$4 sm:$0xff]  }
 0x100   : > { %7355 = vmatpush1.bf16.msra.mxu1 %v10839_v52  ;;  %v10911_v52 = vld [vmem:[%s15533_s1 + $0x4a0] ss:$8 sps:$4 sm:$0xff]  }
 0x101   : > { %8203 = vmatpush1.bf16.msra.mxu0 %v10842_v53  ;;  %7356 = vmatprep.subr.bf16.mxu1 %v10847_v54  ;;  %v10914_v53 = vld [vmem:[%s15533_s1 + $0x14a0] ss:$8 sps:$4 sm:$0xff]   ;;  %v10919_v54 = vld [vmem:[%s15533_s1 + $0x4b4] ss:$8 sps:$4 sm:$0xff]  }
 0x102   : > { %8204 = vmatprep.subr.bf16.mxu0 %v10850_v42  ;;  %v10922_v42 = vld [vmem:[%s15533_s1 + $0x14b4] ss:$8 sps:$4 sm:$0xff]  }
 0x104   : > { %7357 = vmatpush1.bf16.msra.mxu1 %v10845_v45  ;;  %v10917_v45 = vld [vmem:[%s15533_s1 + $0x4b0] ss:$8 sps:$4 sm:$0xff]  }
 0x105   : > { %8205 = vmatpush1.bf16.msra.mxu0 %v10848_v46  ;;  %7379 = vmatprep.subr.bf16.mxu1 %v10853_v47  ;;  %v10920_v46 = vld [vmem:[%s15533_s1 + $0x14b0] ss:$8 sps:$4 sm:$0xff]   ;;  %v10925_v47 = vld [vmem:[%s15533_s1 + $0x4c4] ss:$8 sps:$4 sm:$0xff]  }
 0x106   : > { %8227 = vmatprep.subr.bf16.mxu0 %v10856_v55  ;;  %v10928_v55 = vld [vmem:[%s15533_s1 + $0x14c4] ss:$8 sps:$4 sm:$0xff]  }
 0x107   : > { %7359 = vmatmul.mubr.bf16.vlgmr.msra.gmra.mrb[0].mxu1 %v9029_v0  ;;  %v10929_v0 = vld [vmem:[%s15533_s1 + $0x4d0] ss:$8 sps:$4 sm:$0xff]  }
 0x108   : > { %8207 = vmatmul.mubr.bf16.vlgmr.msra.gmra.mrb[0].mxu0 %v9061_v1  ;;  %7380 = vmatpush1.bf16.msra.mxu1 %v10851_v56  ;;  %v10923_v56 = vld [vmem:[%s15533_s1 + $0x4c0] ss:$8 sps:$4 sm:$0xff]   ;;  %v10932_v1 = vld [vmem:[%s15533_s1 + $0x14d0] ss:$8 sps:$4 sm:$0xff]  }
 0x109   : > { %8228 = vmatpush1.bf16.msra.mxu0 %v10854_v57  ;;  %7381 = vmatprep.subr.bf16.mxu1 %v10859_v4  ;;  %v10926_v57 = vld [vmem:[%s15533_s1 + $0x14c0] ss:$8 sps:$4 sm:$0xff]  }
 0x10a   : > { %8229 = vmatprep.subr.bf16.mxu0 %v10862_v5  ;;  %7368 = vmatprep.mubr.bf16.mxu1 %v9094_v58  ;;  %v10935_v4 = vld [vmem:[%s15533_s1 + $0x4e0] ss:$8 sps:$4 sm:$0xff]   ;;  %v10943_v58 = vld [vmem:[%s15533_s1 + $0x4f4] ss:$8 sps:$4 sm:$0xff]  }
 0x10b   : > { %8216 = vmatprep.mubr.bf16.mxu0 %v9126_v59  ;;  %v10938_v5 = vld [vmem:[%s15533_s1 + $0x14e0] ss:$8 sps:$4 sm:$0xff]   ;;  %v10946_v59 = vld [vmem:[%s15533_s1 + $0x14f4] ss:$8 sps:$4 sm:$0xff]  }
 0x10c   : > { %7382 = vmatpush1.bf16.msra.mxu1 %v10857_v62  ;;  %v10941_v62 = vld [vmem:[%s15533_s1 + $0x4f0] ss:$8 sps:$4 sm:$0xff]  }
 0x10d   : > { %8230 = vmatpush1.bf16.msra.mxu0 %v10860_v63  ;;  %7383 = vmatprep.subr.bf16.mxu1 %v10865_v6  ;;  %v10944_v63 = vld [vmem:[%s15533_s1 + $0x14f0] ss:$8 sps:$4 sm:$0xff]   ;;  %v10949_v6 = vld [vmem:[%s15533_s1 + $0x504] ss:$8 sps:$4 sm:$0xff]  }
 0x10e   : > { %8231 = vmatprep.subr.bf16.mxu0 %v10868_v7  ;;  %v10952_v7 = vld [vmem:[%s15533_s1 + $0x1504] ss:$8 sps:$4 sm:$0xff]  }
 0x10f   : > { %7369 = vmatmul.mubr.bf16.gmra.mrb[4].mxu1 %v9093_v11  ;;  %v311_v11 = vld [vmem:[%s12206_s12 + $0x220] sm:$0xff] }
 0x110   : > { %8217 = vmatmul.mubr.bf16.gmra.mrb[4].mxu0 %v9125_v12  ;;  %7384 = vmatpush1.bf16.msra.mxu1 %v10863_v14  ;;  %v343_v12 = vld [vmem:[%s12206_s12 + $0x320] sm:$0xff] }
 0x111   : > { %8232 = vmatpush1.bf16.msra.mxu0 %v10866_v15  ;;  %7385 = vmatprep.subr.bf16.mxu1 %v10871_v16  ;;  %v327_v14 = vld [vmem:[%s12206_s12 + $0x2a0] sm:$0xff]  ;;  %v9031_v16 = vcombine.low %v12955_v8, %v12958_v9  ;;  %v10955_v8 = vld [vmem:[%s15533_s1 + $0x514] ss:$8 sps:$4 sm:$0xff]  }
 0x112   : > { %8233 = vmatprep.subr.bf16.mxu0 %v10874_v17  ;;  %7411 = vmatprep.mubr.bf16.mxu1 %v9032_v18  ;;  %v359_v15 = vld [vmem:[%s12206_s12 + $0x3a0] sm:$0xff]  ;;  %v9063_v17 = vcombine.low %v12961_v10, %v12964_v13  ;;  %v10958_v9 = vld [vmem:[%s15533_s1 + $0x1514] ss:$8 sps:$4 sm:$0xff]   ;;  %v10953_v10 = vld [vmem:[%s15533_s1 + $0x510] ss:$8 sps:$4 sm:$0xff]  }
 0x113   : > { %8259 = vmatprep.mubr.bf16.mxu0 %v9064_v19  ;;  %v10947_v18 = vld [vmem:[%s15533_s1 + $0x500] ss:$8 sps:$4 sm:$0xff]   ;;  %v10956_v13 = vld [vmem:[%s15533_s1 + $0x1510] ss:$8 sps:$4 sm:$0xff]  }
 0x114   : > { %7386 = vmatpush1.bf16.msra.mxu1 %v10869_v20  ;;  %v10950_v19 = vld [vmem:[%s15533_s1 + $0x1500] ss:$8 sps:$4 sm:$0xff]   ;;  %v9096_v20 = vcombine.high %v311_v11, %v343_v12 }
 0x115   : > { %8234 = vmatpush1.bf16.msra.mxu0 %v10872_v21  ;;  %7387 = vmatprep.subr.bf16.mxu1 %v10877_v22  ;;  %v9128_v21 = vcombine.high %v327_v14, %v359_v15  ;;  %v10961_v22 = vld [vmem:[%s15533_s1 + $0x524] ss:$8 sps:$4 sm:$0xff]  }
 0x116   : > { %8235 = vmatprep.subr.bf16.mxu0 %v10880_v23  ;;  %v10964_v23 = vld [vmem:[%s15533_s1 + $0x1524] ss:$8 sps:$4 sm:$0xff]  }
 0x118   : > { %7388 = vmatpush1.bf16.msra.mxu1 %v10875_v24  ;;  %v13171_v24 = vld [vmem:[%s12206_s12 + $0x28] sm:$0xff] }
 0x119   : > { %8236 = vmatpush1.bf16.msra.mxu0 %v10878_v25  ;;  %7389 = vmatprep.subr.bf16.mxu1 %v10883_v26  ;;  %v13174_v25 = vld [vmem:[%s12206_s12 + $0x128] sm:$0xff] }
 0x11a   : > { %8237 = vmatprep.subr.bf16.mxu0 %v10886_v27  ;;  %v13177_v26 = vld [vmem:[%s12206_s12 + $0xa8] sm:$0xff] }
 0x11b   : > { %v13180_v27 = vld [vmem:[%s12206_s12 + $0x1a8] sm:$0xff] }
 0x11c   : > { %7390 = vmatpush1.bf16.msra.mxu1 %v10881_v28  ;;  %v9095_v28 = vcombine.low %v311_v11, %v343_v12  ;;  %v11019_v11 = vld [vmem:[%s15533_s1 + $0x5c0] ss:$8 sps:$4 sm:$0xff]  }
 0x11d   : > { %8238 = vmatpush1.bf16.msra.mxu0 %v10884_v29  ;;  %7391 = vmatprep.subr.bf16.mxu1 %v10889_v30  ;;  %v9127_v29 = vcombine.low %v327_v14, %v359_v15  ;;  %v10959_v30 = vld [vmem:[%s15533_s1 + $0x520] ss:$8 sps:$4 sm:$0xff]   ;;  %v11027_v14 = vld [vmem:[%s15533_s1 + $0x5d4] ss:$8 sps:$4 sm:$0xff]  }
 0x11e   : > { %8239 = vmatprep.subr.bf16.mxu0 %v10892_v31  ;;  %v10962_v31 = vld [vmem:[%s15533_s1 + $0x1520] ss:$8 sps:$4 sm:$0xff]   ;;  %v11030_v15 = vld [vmem:[%s15533_s1 + $0x15d4] ss:$8 sps:$4 sm:$0xff]  }
 0x11f   : > { %v11022_v12 = vld [vmem:[%s15533_s1 + $0x15c0] ss:$8 sps:$4 sm:$0xff]  }
 0x120   : > { %7392 = vmatpush1.bf16.msra.mxu1 %v10887_v32  ;;  %v10967_v32 = vld [vmem:[%s15533_s1 + $0x534] ss:$8 sps:$4 sm:$0xff]  }
 0x121   : > { %8240 = vmatpush1.bf16.msra.mxu0 %v10890_v33  ;;  %7393 = vmatprep.subr.bf16.mxu1 %v10895_v34  ;;  %v10970_v33 = vld [vmem:[%s15533_s1 + $0x1534] ss:$8 sps:$4 sm:$0xff]   ;;  %v9034_v34 = vcombine.high %v13171_v24, %v13174_v25 }
 0x122   : > { %8241 = vmatprep.subr.bf16.mxu0 %v10898_v35  ;;  %v9066_v35 = vcombine.high %v13177_v26, %v13180_v27 }
 0x124   : > { %7394 = vmatpush1.bf16.msra.mxu1 %v10893_v36  ;;  %v10965_v36 = vld [vmem:[%s15533_s1 + $0x530] ss:$8 sps:$4 sm:$0xff]  }
 0x125   : > { %8242 = vmatpush1.bf16.msra.mxu0 %v10896_v37  ;;  %7395 = vmatprep.subr.bf16.mxu1 %v10901_v38  ;;  %v10968_v37 = vld [vmem:[%s15533_s1 + $0x1530] ss:$8 sps:$4 sm:$0xff]   ;;  %v10973_v38 = vld [vmem:[%s15533_s1 + $0x544] ss:$8 sps:$4 sm:$0xff]  }
 0x126   : > { %8243 = vmatprep.subr.bf16.mxu0 %v10904_v39  ;;  %v10976_v39 = vld [vmem:[%s15533_s1 + $0x1544] ss:$8 sps:$4 sm:$0xff]  }
 0x128   : > { %7396 = vmatpush1.bf16.msra.mxu1 %v10899_v40  ;;  %v10971_v40 = vld [vmem:[%s15533_s1 + $0x540] ss:$8 sps:$4 sm:$0xff]  }
 0x129   : > { %8244 = vmatpush1.bf16.msra.mxu0 %v10902_v41  ;;  %7397 = vmatprep.subr.bf16.mxu1 %v10907_v43  ;;  %v10974_v41 = vld [vmem:[%s15533_s1 + $0x1540] ss:$8 sps:$4 sm:$0xff]   ;;  %v10979_v43 = vld [vmem:[%s15533_s1 + $0x554] ss:$8 sps:$4 sm:$0xff]  }
 0x12a   : > { %8245 = vmatprep.subr.bf16.mxu0 %v10910_v44  ;;  %v10982_v44 = vld [vmem:[%s15533_s1 + $0x1554] ss:$8 sps:$4 sm:$0xff]  }
 0x12c   : > { %7398 = vmatpush1.bf16.msra.mxu1 %v10905_v48  ;;  %v10977_v48 = vld [vmem:[%s15533_s1 + $0x550] ss:$8 sps:$4 sm:$0xff]  }
 0x12d   : > { %8246 = vmatpush1.bf16.msra.mxu0 %v10908_v49  ;;  %7399 = vmatprep.subr.bf16.mxu1 %v10913_v50  ;;  %v10980_v49 = vld [vmem:[%s15533_s1 + $0x1550] ss:$8 sps:$4 sm:$0xff]   ;;  %v10985_v50 = vld [vmem:[%s15533_s1 + $0x564] ss:$8 sps:$4 sm:$0xff]  }
 0x12e   : > { %8247 = vmatprep.subr.bf16.mxu0 %v10916_v51  ;;  %v10988_v51 = vld [vmem:[%s15533_s1 + $0x1564] ss:$8 sps:$4 sm:$0xff]  }
 0x130   : > { %7400 = vmatpush1.bf16.msra.mxu1 %v10911_v52  ;;  %v10983_v52 = vld [vmem:[%s15533_s1 + $0x560] ss:$8 sps:$4 sm:$0xff]  }
 0x131   : > { %8248 = vmatpush1.bf16.msra.mxu0 %v10914_v53  ;;  %7401 = vmatprep.subr.bf16.mxu1 %v10919_v54  ;;  %v10986_v53 = vld [vmem:[%s15533_s1 + $0x1560] ss:$8 sps:$4 sm:$0xff]   ;;  %v10991_v54 = vld [vmem:[%s15533_s1 + $0x574] ss:$8 sps:$4 sm:$0xff]  }
 0x132   : > { %8249 = vmatprep.subr.bf16.mxu0 %v10922_v42  ;;  %v10994_v42 = vld [vmem:[%s15533_s1 + $0x1574] ss:$8 sps:$4 sm:$0xff]  }
 0x134   : > { %7402 = vmatpush1.bf16.msra.mxu1 %v10917_v45  ;;  %v10989_v45 = vld [vmem:[%s15533_s1 + $0x570] ss:$8 sps:$4 sm:$0xff]  }
 0x135   : > { %8250 = vmatpush1.bf16.msra.mxu0 %v10920_v46  ;;  %7403 = vmatprep.subr.bf16.mxu1 %v10925_v47  ;;  %v10992_v46 = vld [vmem:[%s15533_s1 + $0x1570] ss:$8 sps:$4 sm:$0xff]   ;;  %v10997_v47 = vld [vmem:[%s15533_s1 + $0x584] ss:$8 sps:$4 sm:$0xff]  }
 0x136   : > { %8251 = vmatprep.subr.bf16.mxu0 %v10928_v55  ;;  %v11000_v55 = vld [vmem:[%s15533_s1 + $0x1584] ss:$8 sps:$4 sm:$0xff]  }
 0x138   : > { %7404 = vmatpush1.bf16.msra.mxu1 %v10923_v56  ;;  %v10995_v56 = vld [vmem:[%s15533_s1 + $0x580] ss:$8 sps:$4 sm:$0xff]  }
 0x139   : > { %8252 = vmatpush1.bf16.msra.mxu0 %v10926_v57  ;;  %7405 = vmatprep.subr.bf16.mxu1 %v10931_v60  ;;  %v10998_v57 = vld [vmem:[%s15533_s1 + $0x1580] ss:$8 sps:$4 sm:$0xff]   ;;  %v11003_v60 = vld [vmem:[%s15533_s1 + $0x594] ss:$8 sps:$4 sm:$0xff]  }
 0x13a   : > { %8253 = vmatprep.subr.bf16.mxu0 %v10934_v61  ;;  %v11006_v61 = vld [vmem:[%s15533_s1 + $0x1594] ss:$8 sps:$4 sm:$0xff]  }
 0x13c   : > { %7406 = vmatpush1.bf16.msra.mxu1 %v10929_v0  ;;  %v11001_v0 = vld [vmem:[%s15533_s1 + $0x590] ss:$8 sps:$4 sm:$0xff]  }
 0x13d   : > { %8254 = vmatpush1.bf16.msra.mxu0 %v10932_v1  ;;  %7407 = vmatprep.subr.bf16.mxu1 %v10937_v2  ;;  %v11004_v1 = vld [vmem:[%s15533_s1 + $0x1590] ss:$8 sps:$4 sm:$0xff]   ;;  %v11009_v2 = vld [vmem:[%s15533_s1 + $0x5a4] ss:$8 sps:$4 sm:$0xff]  }
 0x13e   : > { %8255 = vmatprep.subr.bf16.mxu0 %v10940_v3  ;;  %v11012_v3 = vld [vmem:[%s15533_s1 + $0x15a4] ss:$8 sps:$4 sm:$0xff]  }
 0x140   : > { %7408 = vmatpush1.bf16.msra.mxu1 %v10935_v4  ;;  %v11007_v4 = vld [vmem:[%s15533_s1 + $0x5a0] ss:$8 sps:$4 sm:$0xff]  }
 0x141   : > { %8256 = vmatpush1.bf16.msra.mxu0 %v10938_v5  ;;  %7409 = vmatprep.subr.bf16.mxu1 %v10943_v58  ;;  %v11010_v5 = vld [vmem:[%s15533_s1 + $0x15a0] ss:$8 sps:$4 sm:$0xff]   ;;  %v11015_v58 = vld [vmem:[%s15533_s1 + $0x5b4] ss:$8 sps:$4 sm:$0xff]  }
 0x142   : > { %8257 = vmatprep.subr.bf16.mxu0 %v10946_v59  ;;  %v11018_v59 = vld [vmem:[%s15533_s1 + $0x15b4] ss:$8 sps:$4 sm:$0xff]  }
 0x144   : > { %7410 = vmatpush1.bf16.msra.mxu1 %v10941_v62  ;;  %v11013_v62 = vld [vmem:[%s15533_s1 + $0x5b0] ss:$8 sps:$4 sm:$0xff]  }
 0x145   : > { %8258 = vmatpush1.bf16.msra.mxu0 %v10944_v63  ;;  %7432 = vmatprep.subr.bf16.mxu1 %v10949_v6  ;;  %v11016_v63 = vld [vmem:[%s15533_s1 + $0x15b0] ss:$8 sps:$4 sm:$0xff]   ;;  %v11021_v6 = vld [vmem:[%s15533_s1 + $0x5c4] ss:$8 sps:$4 sm:$0xff]  }
 0x146   : > { %8280 = vmatprep.subr.bf16.mxu0 %v10952_v7  ;;  %v11024_v7 = vld [vmem:[%s15533_s1 + $0x15c4] ss:$8 sps:$4 sm:$0xff]  }
 0x147   : > { %7412 = vmatmul.mubr.bf16.vlgmr.msra.gmra.mrb[0].mxu1 %v9031_v16  ;;  %v11025_v16 = vld [vmem:[%s15533_s1 + $0x5d0] ss:$8 sps:$4 sm:$0xff]  }
 0x148   : > { %8260 = vmatmul.mubr.bf16.vlgmr.msra.gmra.mrb[0].mxu0 %v9063_v17  ;;  %7433 = vmatpush1.bf16.msra.mxu1 %v10947_v18  ;;  %v11028_v17 = vld [vmem:[%s15533_s1 + $0x15d0] ss:$8 sps:$4 sm:$0xff]   ;;  %v11033_v18 = vld [vmem:[%s15533_s1 + $0x5e4] ss:$8 sps:$4 sm:$0xff]  }
 0x149   : > { %8281 = vmatpush1.bf16.msra.mxu0 %v10950_v19  ;;  %7434 = vmatprep.subr.bf16.mxu1 %v10955_v8  ;;  %v11036_v19 = vld [vmem:[%s15533_s1 + $0x15e4] ss:$8 sps:$4 sm:$0xff]   ;;  %v11031_v8 = vld [vmem:[%s15533_s1 + $0x5e0] ss:$8 sps:$4 sm:$0xff]  }
 0x14a   : > { %8282 = vmatprep.subr.bf16.mxu0 %v10958_v9  ;;  %7421 = vmatprep.mubr.bf16.mxu1 %v9096_v20  ;;  %v11034_v9 = vld [vmem:[%s15533_s1 + $0x15e0] ss:$8 sps:$4 sm:$0xff]   ;;  %v11037_v20 = vld [vmem:[%s15533_s1 + $0x5f0] ss:$8 sps:$4 sm:$0xff]  }
 0x14b   : > { %8269 = vmatprep.mubr.bf16.mxu0 %v9128_v21  ;;  %v11040_v21 = vld [vmem:[%s15533_s1 + $0x15f0] ss:$8 sps:$4 sm:$0xff]  }
 0x14c   : > { %7435 = vmatpush1.bf16.msra.mxu1 %v10953_v10  ;;  %v11039_v10 = vld [vmem:[%s15533_s1 + $0x5f4] ss:$8 sps:$4 sm:$0xff]  }
 0x14d   : > { %8283 = vmatpush1.bf16.msra.mxu0 %v10956_v13  ;;  %7436 = vmatprep.subr.bf16.mxu1 %v10961_v22  ;;  %v11042_v13 = vld [vmem:[%s15533_s1 + $0x15f4] ss:$8 sps:$4 sm:$0xff]   ;;  %v11045_v22 = vld [vmem:[%s15533_s1 + $0x604] ss:$8 sps:$4 sm:$0xff]  }
 0x14e   : > { %8284 = vmatprep.subr.bf16.mxu0 %v10964_v23  ;;  %v11048_v23 = vld [vmem:[%s15533_s1 + $0x1604] ss:$8 sps:$4 sm:$0xff]  }
 0x14f   : > { %7422 = vmatmul.mubr.bf16.gmra.mrb[4].mxu1 %v9095_v28  ;;  %v312_v28 = vld [vmem:[%s12206_s12 + $0x228] sm:$0xff] }
 0x150   : > { %8270 = vmatmul.mubr.bf16.gmra.mrb[4].mxu0 %v9127_v29  ;;  %7437 = vmatpush1.bf16.msra.mxu1 %v10959_v30  ;;  %v344_v29 = vld [vmem:[%s12206_s12 + $0x328] sm:$0xff] }
 0x151   : > { %8285 = vmatpush1.bf16.msra.mxu0 %v10962_v31  ;;  %7438 = vmatprep.subr.bf16.mxu1 %v10967_v32  ;;  %v328_v30 = vld [vmem:[%s12206_s12 + $0x2a8] sm:$0xff]  ;;  %v9033_v32 = vcombine.low %v13171_v24, %v13174_v25  ;;  %v11051_v24 = vld [vmem:[%s15533_s1 + $0x614] ss:$8 sps:$4 sm:$0xff]  }
 0x152   : > { %8286 = vmatprep.subr.bf16.mxu0 %v10970_v33  ;;  %7464 = vmatprep.mubr.bf16.mxu1 %v9034_v34  ;;  %v360_v31 = vld [vmem:[%s12206_s12 + $0x3a8] sm:$0xff]  ;;  %v9065_v33 = vcombine.low %v13177_v26, %v13180_v27  ;;  %v11054_v25 = vld [vmem:[%s15533_s1 + $0x1614] ss:$8 sps:$4 sm:$0xff]   ;;  %v11049_v26 = vld [vmem:[%s15533_s1 + $0x610] ss:$8 sps:$4 sm:$0xff]  }
 0x153   : > { %8312 = vmatprep.mubr.bf16.mxu0 %v9066_v35  ;;  %v11043_v34 = vld [vmem:[%s15533_s1 + $0x600] ss:$8 sps:$4 sm:$0xff]   ;;  %v11052_v27 = vld [vmem:[%s15533_s1 + $0x1610] ss:$8 sps:$4 sm:$0xff]  }
 0x154   : > { %7439 = vmatpush1.bf16.msra.mxu1 %v10965_v36  ;;  %v11046_v35 = vld [vmem:[%s15533_s1 + $0x1600] ss:$8 sps:$4 sm:$0xff]   ;;  %v9098_v36 = vcombine.high %v312_v28, %v344_v29 }
 0x155   : > { %8287 = vmatpush1.bf16.msra.mxu0 %v10968_v37  ;;  %7440 = vmatprep.subr.bf16.mxu1 %v10973_v38  ;;  %v9130_v37 = vcombine.high %v328_v30, %v360_v31  ;;  %v11057_v38 = vld [vmem:[%s15533_s1 + $0x624] ss:$8 sps:$4 sm:$0xff]  }
 0x156   : > { %8288 = vmatprep.subr.bf16.mxu0 %v10976_v39  ;;  %v11060_v39 = vld [vmem:[%s15533_s1 + $0x1624] ss:$8 sps:$4 sm:$0xff]  }
 0x158   : > { %7441 = vmatpush1.bf16.msra.mxu1 %v10971_v40  ;;  %v13387_v40 = vld [vmem:[%s12206_s12 + $0x30] sm:$0xff] }
 0x159   : > { %8289 = vmatpush1.bf16.msra.mxu0 %v10974_v41  ;;  %7442 = vmatprep.subr.bf16.mxu1 %v10979_v43  ;;  %v13390_v41 = vld [vmem:[%s12206_s12 + $0x130] sm:$0xff] }
 0x15a   : > { %8290 = vmatprep.subr.bf16.mxu0 %v10982_v44  ;;  %v13393_v43 = vld [vmem:[%s12206_s12 + $0xb0] sm:$0xff] }
 0x15b   : > { %v13396_v44 = vld [vmem:[%s12206_s12 + $0x1b0] sm:$0xff] }
 0x15c   : > { %7443 = vmatpush1.bf16.msra.mxu1 %v10977_v48  ;;  %v9097_v48 = vcombine.low %v312_v28, %v344_v29  ;;  %v11115_v28 = vld [vmem:[%s15533_s1 + $0x6c0] ss:$8 sps:$4 sm:$0xff]  }
 0x15d   : > { %8291 = vmatpush1.bf16.msra.mxu0 %v10980_v49  ;;  %7444 = vmatprep.subr.bf16.mxu1 %v10985_v50  ;;  %v9129_v49 = vcombine.low %v328_v30, %v360_v31  ;;  %v11055_v50 = vld [vmem:[%s15533_s1 + $0x620] ss:$8 sps:$4 sm:$0xff]   ;;  %v11123_v30 = vld [vmem:[%s15533_s1 + $0x6d4] ss:$8 sps:$4 sm:$0xff]  }
 0x15e   : > { %8292 = vmatprep.subr.bf16.mxu0 %v10988_v51  ;;  %v11058_v51 = vld [vmem:[%s15533_s1 + $0x1620] ss:$8 sps:$4 sm:$0xff]   ;;  %v11126_v31 = vld [vmem:[%s15533_s1 + $0x16d4] ss:$8 sps:$4 sm:$0xff]  }
 0x15f   : > { %v11118_v29 = vld [vmem:[%s15533_s1 + $0x16c0] ss:$8 sps:$4 sm:$0xff]  }
 0x160   : > { %7445 = vmatpush1.bf16.msra.mxu1 %v10983_v52  ;;  %v11063_v52 = vld [vmem:[%s15533_s1 + $0x634] ss:$8 sps:$4 sm:$0xff]  }
 0x161   : > { %8293 = vmatpush1.bf16.msra.mxu0 %v10986_v53  ;;  %7446 = vmatprep.subr.bf16.mxu1 %v10991_v54  ;;  %v11066_v53 = vld [vmem:[%s15533_s1 + $0x1634] ss:$8 sps:$4 sm:$0xff]   ;;  %v9036_v54 = vcombine.high %v13387_v40, %v13390_v41 }
 0x162   : > { %8294 = vmatprep.subr.bf16.mxu0 %v10994_v42  ;;  %v9068_v42 = vcombine.high %v13393_v43, %v13396_v44 }
 0x164   : > { %7447 = vmatpush1.bf16.msra.mxu1 %v10989_v45  ;;  %v11061_v45 = vld [vmem:[%s15533_s1 + $0x630] ss:$8 sps:$4 sm:$0xff]  }
 0x165   : > { %8295 = vmatpush1.bf16.msra.mxu0 %v10992_v46  ;;  %7448 = vmatprep.subr.bf16.mxu1 %v10997_v47  ;;  %v11064_v46 = vld [vmem:[%s15533_s1 + $0x1630] ss:$8 sps:$4 sm:$0xff]   ;;  %v11069_v47 = vld [vmem:[%s15533_s1 + $0x644] ss:$8 sps:$4 sm:$0xff]  }
 0x166   : > { %8296 = vmatprep.subr.bf16.mxu0 %v11000_v55  ;;  %v11072_v55 = vld [vmem:[%s15533_s1 + $0x1644] ss:$8 sps:$4 sm:$0xff]  }
 0x168   : > { %7449 = vmatpush1.bf16.msra.mxu1 %v10995_v56  ;;  %v11067_v56 = vld [vmem:[%s15533_s1 + $0x640] ss:$8 sps:$4 sm:$0xff]  }
 0x169   : > { %8297 = vmatpush1.bf16.msra.mxu0 %v10998_v57  ;;  %7450 = vmatprep.subr.bf16.mxu1 %v11003_v60  ;;  %v11070_v57 = vld [vmem:[%s15533_s1 + $0x1640] ss:$8 sps:$4 sm:$0xff]   ;;  %v11075_v60 = vld [vmem:[%s15533_s1 + $0x654] ss:$8 sps:$4 sm:$0xff]  }
 0x16a   : > { %8298 = vmatprep.subr.bf16.mxu0 %v11006_v61  ;;  %v11078_v61 = vld [vmem:[%s15533_s1 + $0x1654] ss:$8 sps:$4 sm:$0xff]  }
 0x16c   : > { %7451 = vmatpush1.bf16.msra.mxu1 %v11001_v0  ;;  %v11073_v0 = vld [vmem:[%s15533_s1 + $0x650] ss:$8 sps:$4 sm:$0xff]  }
 0x16d   : > { %8299 = vmatpush1.bf16.msra.mxu0 %v11004_v1  ;;  %7452 = vmatprep.subr.bf16.mxu1 %v11009_v2  ;;  %v11076_v1 = vld [vmem:[%s15533_s1 + $0x1650] ss:$8 sps:$4 sm:$0xff]   ;;  %v11081_v2 = vld [vmem:[%s15533_s1 + $0x664] ss:$8 sps:$4 sm:$0xff]  }
 0x16e   : > { %8300 = vmatprep.subr.bf16.mxu0 %v11012_v3  ;;  %v11084_v3 = vld [vmem:[%s15533_s1 + $0x1664] ss:$8 sps:$4 sm:$0xff]  }
 0x170   : > { %7453 = vmatpush1.bf16.msra.mxu1 %v11007_v4  ;;  %v11079_v4 = vld [vmem:[%s15533_s1 + $0x660] ss:$8 sps:$4 sm:$0xff]  }
 0x171   : > { %8301 = vmatpush1.bf16.msra.mxu0 %v11010_v5  ;;  %7454 = vmatprep.subr.bf16.mxu1 %v11015_v58  ;;  %v11082_v5 = vld [vmem:[%s15533_s1 + $0x1660] ss:$8 sps:$4 sm:$0xff]   ;;  %v11087_v58 = vld [vmem:[%s15533_s1 + $0x674] ss:$8 sps:$4 sm:$0xff]  }
 0x172   : > { %8302 = vmatprep.subr.bf16.mxu0 %v11018_v59  ;;  %v11090_v59 = vld [vmem:[%s15533_s1 + $0x1674] ss:$8 sps:$4 sm:$0xff]  }
 0x174   : > { %7455 = vmatpush1.bf16.msra.mxu1 %v11013_v62  ;;  %v11085_v62 = vld [vmem:[%s15533_s1 + $0x670] ss:$8 sps:$4 sm:$0xff]  }
 0x175   : > { %8303 = vmatpush1.bf16.msra.mxu0 %v11016_v63  ;;  %7456 = vmatprep.subr.bf16.mxu1 %v11021_v6  ;;  %v11088_v63 = vld [vmem:[%s15533_s1 + $0x1670] ss:$8 sps:$4 sm:$0xff]   ;;  %v11093_v6 = vld [vmem:[%s15533_s1 + $0x684] ss:$8 sps:$4 sm:$0xff]  }
 0x176   : > { %8304 = vmatprep.subr.bf16.mxu0 %v11024_v7  ;;  %v11096_v7 = vld [vmem:[%s15533_s1 + $0x1684] ss:$8 sps:$4 sm:$0xff]  }
 0x178   : > { %7457 = vmatpush1.bf16.msra.mxu1 %v11019_v11  ;;  %v11091_v11 = vld [vmem:[%s15533_s1 + $0x680] ss:$8 sps:$4 sm:$0xff]  }
 0x179   : > { %8305 = vmatpush1.bf16.msra.mxu0 %v11022_v12  ;;  %7458 = vmatprep.subr.bf16.mxu1 %v11027_v14  ;;  %v11094_v12 = vld [vmem:[%s15533_s1 + $0x1680] ss:$8 sps:$4 sm:$0xff]   ;;  %v11099_v14 = vld [vmem:[%s15533_s1 + $0x694] ss:$8 sps:$4 sm:$0xff]  }
 0x17a   : > { %8306 = vmatprep.subr.bf16.mxu0 %v11030_v15  ;;  %v11102_v15 = vld [vmem:[%s15533_s1 + $0x1694] ss:$8 sps:$4 sm:$0xff]  }
 0x17c   : > { %7459 = vmatpush1.bf16.msra.mxu1 %v11025_v16  ;;  %v11097_v16 = vld [vmem:[%s15533_s1 + $0x690] ss:$8 sps:$4 sm:$0xff]  }
 0x17d   : > { %8307 = vmatpush1.bf16.msra.mxu0 %v11028_v17  ;;  %7460 = vmatprep.subr.bf16.mxu1 %v11033_v18  ;;  %v11100_v17 = vld [vmem:[%s15533_s1 + $0x1690] ss:$8 sps:$4 sm:$0xff]   ;;  %v11105_v18 = vld [vmem:[%s15533_s1 + $0x6a4] ss:$8 sps:$4 sm:$0xff]  }
 0x17e   : > { %8308 = vmatprep.subr.bf16.mxu0 %v11036_v19  ;;  %v11108_v19 = vld [vmem:[%s15533_s1 + $0x16a4] ss:$8 sps:$4 sm:$0xff]  }
 0x180   : > { %7461 = vmatpush1.bf16.msra.mxu1 %v11031_v8  ;;  %v11103_v8 = vld [vmem:[%s15533_s1 + $0x6a0] ss:$8 sps:$4 sm:$0xff]  }
 0x181   : > { %8309 = vmatpush1.bf16.msra.mxu0 %v11034_v9  ;;  %7462 = vmatprep.subr.bf16.mxu1 %v11039_v10  ;;  %v11106_v9 = vld [vmem:[%s15533_s1 + $0x16a0] ss:$8 sps:$4 sm:$0xff]   ;;  %v11111_v10 = vld [vmem:[%s15533_s1 + $0x6b4] ss:$8 sps:$4 sm:$0xff]  }
 0x182   : > { %8310 = vmatprep.subr.bf16.mxu0 %v11042_v13  ;;  %v11114_v13 = vld [vmem:[%s15533_s1 + $0x16b4] ss:$8 sps:$4 sm:$0xff]  }
 0x184   : > { %7463 = vmatpush1.bf16.msra.mxu1 %v11037_v20  ;;  %v11109_v20 = vld [vmem:[%s15533_s1 + $0x6b0] ss:$8 sps:$4 sm:$0xff]  }
 0x185   : > { %8311 = vmatpush1.bf16.msra.mxu0 %v11040_v21  ;;  %7485 = vmatprep.subr.bf16.mxu1 %v11045_v22  ;;  %v11112_v21 = vld [vmem:[%s15533_s1 + $0x16b0] ss:$8 sps:$4 sm:$0xff]   ;;  %v11117_v22 = vld [vmem:[%s15533_s1 + $0x6c4] ss:$8 sps:$4 sm:$0xff]  }
 0x186   : > { %8333 = vmatprep.subr.bf16.mxu0 %v11048_v23  ;;  %v11120_v23 = vld [vmem:[%s15533_s1 + $0x16c4] ss:$8 sps:$4 sm:$0xff]  }
 0x187   : > { %7465 = vmatmul.mubr.bf16.vlgmr.msra.gmra.mrb[0].mxu1 %v9033_v32  ;;  %v11121_v32 = vld [vmem:[%s15533_s1 + $0x6d0] ss:$8 sps:$4 sm:$0xff]  }
 0x188   : > { %8313 = vmatmul.mubr.bf16.vlgmr.msra.gmra.mrb[0].mxu0 %v9065_v33  ;;  %7486 = vmatpush1.bf16.msra.mxu1 %v11043_v34  ;;  %v11124_v33 = vld [vmem:[%s15533_s1 + $0x16d0] ss:$8 sps:$4 sm:$0xff]   ;;  %v11129_v34 = vld [vmem:[%s15533_s1 + $0x6e4] ss:$8 sps:$4 sm:$0xff]  }
 0x189   : > { %8334 = vmatpush1.bf16.msra.mxu0 %v11046_v35  ;;  %7487 = vmatprep.subr.bf16.mxu1 %v11051_v24  ;;  %v11132_v35 = vld [vmem:[%s15533_s1 + $0x16e4] ss:$8 sps:$4 sm:$0xff]   ;;  %v11127_v24 = vld [vmem:[%s15533_s1 + $0x6e0] ss:$8 sps:$4 sm:$0xff]  }
 0x18a   : > { %8335 = vmatprep.subr.bf16.mxu0 %v11054_v25  ;;  %7474 = vmatprep.mubr.bf16.mxu1 %v9098_v36  ;;  %v11130_v25 = vld [vmem:[%s15533_s1 + $0x16e0] ss:$8 sps:$4 sm:$0xff]   ;;  %v11133_v36 = vld [vmem:[%s15533_s1 + $0x6f0] ss:$8 sps:$4 sm:$0xff]  }
 0x18b   : > { %8322 = vmatprep.mubr.bf16.mxu0 %v9130_v37  ;;  %v11136_v37 = vld [vmem:[%s15533_s1 + $0x16f0] ss:$8 sps:$4 sm:$0xff]  }
 0x18c   : > { %7488 = vmatpush1.bf16.msra.mxu1 %v11049_v26  ;;  %v11135_v26 = vld [vmem:[%s15533_s1 + $0x6f4] ss:$8 sps:$4 sm:$0xff]  }
 0x18d   : > { %8336 = vmatpush1.bf16.msra.mxu0 %v11052_v27  ;;  %7489 = vmatprep.subr.bf16.mxu1 %v11057_v38  ;;  %v11138_v27 = vld [vmem:[%s15533_s1 + $0x16f4] ss:$8 sps:$4 sm:$0xff]   ;;  %v11141_v38 = vld [vmem:[%s15533_s1 + $0x704] ss:$8 sps:$4 sm:$0xff]  }
 0x18e   : > { %8337 = vmatprep.subr.bf16.mxu0 %v11060_v39  ;;  %v11144_v39 = vld [vmem:[%s15533_s1 + $0x1704] ss:$8 sps:$4 sm:$0xff]  }
 0x18f   : > { %7475 = vmatmul.mubr.bf16.gmra.mrb[4].mxu1 %v9097_v48  ;;  %v313_v48 = vld [vmem:[%s12206_s12 + $0x230] sm:$0xff] }
 0x190   : > { %8323 = vmatmul.mubr.bf16.gmra.mrb[4].mxu0 %v9129_v49  ;;  %7490 = vmatpush1.bf16.msra.mxu1 %v11055_v50  ;;  %v345_v49 = vld [vmem:[%s12206_s12 + $0x330] sm:$0xff] }
 0x191   : > { %8338 = vmatpush1.bf16.msra.mxu0 %v11058_v51  ;;  %7491 = vmatprep.subr.bf16.mxu1 %v11063_v52  ;;  %v329_v50 = vld [vmem:[%s12206_s12 + $0x2b0] sm:$0xff]  ;;  %v9035_v52 = vcombine.low %v13387_v40, %v13390_v41 }
 0x192   : > { %8339 = vmatprep.subr.bf16.mxu0 %v11066_v53  ;;  %7517 = vmatprep.mubr.bf16.mxu1 %v9036_v54  ;;  %v361_v51 = vld [vmem:[%s12206_s12 + $0x3b0] sm:$0xff]  ;;  %v9067_v53 = vcombine.low %v13393_v43, %v13396_v44  ;;  %v11139_v54 = vld [vmem:[%s15533_s1 + $0x700] ss:$8 sps:$4 sm:$0xff]  }
 0x193   : > { %8365 = vmatprep.mubr.bf16.mxu0 %v9068_v42  ;;  %v11142_v42 = vld [vmem:[%s15533_s1 + $0x1700] ss:$8 sps:$4 sm:$0xff]   ;;  %v11147_v40 = vld [vmem:[%s15533_s1 + $0x714] ss:$8 sps:$4 sm:$0xff]   ;;  %v11145_v43 = vld [vmem:[%s15533_s1 + $0x710] ss:$8 sps:$4 sm:$0xff]  }
 0x194   : > { %7492 = vmatpush1.bf16.msra.mxu1 %v11061_v45  ;;  %v11150_v41 = vld [vmem:[%s15533_s1 + $0x1714] ss:$8 sps:$4 sm:$0xff]   ;;  %v11148_v44 = vld [vmem:[%s15533_s1 + $0x1710] ss:$8 sps:$4 sm:$0xff]   ;;  %v9100_v45 = vcombine.high %v313_v48, %v345_v49 }
 0x195   : > { %8340 = vmatpush1.bf16.msra.mxu0 %v11064_v46  ;;  %7493 = vmatprep.subr.bf16.mxu1 %v11069_v47  ;;  %v9132_v46 = vcombine.high %v329_v50, %v361_v51  ;;  %v11153_v47 = vld [vmem:[%s15533_s1 + $0x724] ss:$8 sps:$4 sm:$0xff]  }
 0x196   : > { %8341 = vmatprep.subr.bf16.mxu0 %v11072_v55  ;;  %v11156_v55 = vld [vmem:[%s15533_s1 + $0x1724] ss:$8 sps:$4 sm:$0xff]  }
 0x198   : > { %7494 = vmatpush1.bf16.msra.mxu1 %v11067_v56  ;;  %v13603_v56 = vld [vmem:[%s12206_s12 + $0x38] sm:$0xff] }
 0x199   : > { %8342 = vmatpush1.bf16.msra.mxu0 %v11070_v57  ;;  %7495 = vmatprep.subr.bf16.mxu1 %v11075_v60  ;;  %v13606_v57 = vld [vmem:[%s12206_s12 + $0x138] sm:$0xff] }
 0x19a   : > { %8343 = vmatprep.subr.bf16.mxu0 %v11078_v61  ;;  %v13609_v60 = vld [vmem:[%s12206_s12 + $0xb8] sm:$0xff] }
 0x19b   : > { %v13612_v61 = vld [vmem:[%s12206_s12 + $0x1b8] sm:$0xff] }
 0x19c   : > { %7496 = vmatpush1.bf16.msra.mxu1 %v11073_v0  ;;  %v9099_v0 = vcombine.low %v313_v48, %v345_v49  ;;  %v11211_v48 = vld [vmem:[%s15533_s1 + $0x7c0] ss:$8 sps:$4 sm:$0xff]  }
 0x19d   : > { %8344 = vmatpush1.bf16.msra.mxu0 %v11076_v1  ;;  %7497 = vmatprep.subr.bf16.mxu1 %v11081_v2  ;;  %v9131_v1 = vcombine.low %v329_v50, %v361_v51  ;;  %v11151_v2 = vld [vmem:[%s15533_s1 + $0x720] ss:$8 sps:$4 sm:$0xff]   ;;  %v11219_v50 = vld [vmem:[%s15533_s1 + $0x7d4] ss:$8 sps:$4 sm:$0xff]  }
 0x19e   : > { %8345 = vmatprep.subr.bf16.mxu0 %v11084_v3  ;;  %v11154_v3 = vld [vmem:[%s15533_s1 + $0x1720] ss:$8 sps:$4 sm:$0xff]   ;;  %v11222_v51 = vld [vmem:[%s15533_s1 + $0x17d4] ss:$8 sps:$4 sm:$0xff]  }
 0x19f   : > { %v11214_v49 = vld [vmem:[%s15533_s1 + $0x17c0] ss:$8 sps:$4 sm:$0xff]  }
 0x1a0   : > { %7498 = vmatpush1.bf16.msra.mxu1 %v11079_v4  ;;  %v11159_v4 = vld [vmem:[%s15533_s1 + $0x734] ss:$8 sps:$4 sm:$0xff]  }
 0x1a1   : > { %8346 = vmatpush1.bf16.msra.mxu0 %v11082_v5  ;;  %7499 = vmatprep.subr.bf16.mxu1 %v11087_v58  ;;  %v11162_v5 = vld [vmem:[%s15533_s1 + $0x1734] ss:$8 sps:$4 sm:$0xff]   ;;  %v9038_v58 = vcombine.high %v13603_v56, %v13606_v57 }
 0x1a2   : > { %8347 = vmatprep.subr.bf16.mxu0 %v11090_v59  ;;  %v9070_v59 = vcombine.high %v13609_v60, %v13612_v61 }
 0x1a4   : > { %7500 = vmatpush1.bf16.msra.mxu1 %v11085_v62  ;;  %v11157_v62 = vld [vmem:[%s15533_s1 + $0x730] ss:$8 sps:$4 sm:$0xff]  }
 0x1a5   : > { %8348 = vmatpush1.bf16.msra.mxu0 %v11088_v63  ;;  %7501 = vmatprep.subr.bf16.mxu1 %v11093_v6  ;;  %v11160_v63 = vld [vmem:[%s15533_s1 + $0x1730] ss:$8 sps:$4 sm:$0xff]   ;;  %v11165_v6 = vld [vmem:[%s15533_s1 + $0x744] ss:$8 sps:$4 sm:$0xff]  }
 0x1a6   : > { %8349 = vmatprep.subr.bf16.mxu0 %v11096_v7  ;;  %v11168_v7 = vld [vmem:[%s15533_s1 + $0x1744] ss:$8 sps:$4 sm:$0xff]  }
 0x1a8   : > { %7502 = vmatpush1.bf16.msra.mxu1 %v11091_v11  ;;  %v11163_v11 = vld [vmem:[%s15533_s1 + $0x740] ss:$8 sps:$4 sm:$0xff]  }
 0x1a9   : > { %8350 = vmatpush1.bf16.msra.mxu0 %v11094_v12  ;;  %7503 = vmatprep.subr.bf16.mxu1 %v11099_v14  ;;  %v11166_v12 = vld [vmem:[%s15533_s1 + $0x1740] ss:$8 sps:$4 sm:$0xff]   ;;  %v11171_v14 = vld [vmem:[%s15533_s1 + $0x754] ss:$8 sps:$4 sm:$0xff]  }
 0x1aa   : > { %8351 = vmatprep.subr.bf16.mxu0 %v11102_v15  ;;  %v11174_v15 = vld [vmem:[%s15533_s1 + $0x1754] ss:$8 sps:$4 sm:$0xff]  }
 0x1ac   : > { %7504 = vmatpush1.bf16.msra.mxu1 %v11097_v16  ;;  %v11169_v16 = vld [vmem:[%s15533_s1 + $0x750] ss:$8 sps:$4 sm:$0xff]  }
 0x1ad   : > { %8352 = vmatpush1.bf16.msra.mxu0 %v11100_v17  ;;  %7505 = vmatprep.subr.bf16.mxu1 %v11105_v18  ;;  %v11172_v17 = vld [vmem:[%s15533_s1 + $0x1750] ss:$8 sps:$4 sm:$0xff]   ;;  %v11177_v18 = vld [vmem:[%s15533_s1 + $0x764] ss:$8 sps:$4 sm:$0xff]  }
 0x1ae   : > { %8353 = vmatprep.subr.bf16.mxu0 %v11108_v19  ;;  %v11180_v19 = vld [vmem:[%s15533_s1 + $0x1764] ss:$8 sps:$4 sm:$0xff]  }
 0x1b0   : > { %7506 = vmatpush1.bf16.msra.mxu1 %v11103_v8  ;;  %v11175_v8 = vld [vmem:[%s15533_s1 + $0x760] ss:$8 sps:$4 sm:$0xff]  }
 0x1b1   : > { %8354 = vmatpush1.bf16.msra.mxu0 %v11106_v9  ;;  %7507 = vmatprep.subr.bf16.mxu1 %v11111_v10  ;;  %v11178_v9 = vld [vmem:[%s15533_s1 + $0x1760] ss:$8 sps:$4 sm:$0xff]   ;;  %v11183_v10 = vld [vmem:[%s15533_s1 + $0x774] ss:$8 sps:$4 sm:$0xff]  }
 0x1b2   : > { %8355 = vmatprep.subr.bf16.mxu0 %v11114_v13  ;;  %v11186_v13 = vld [vmem:[%s15533_s1 + $0x1774] ss:$8 sps:$4 sm:$0xff]  }
 0x1b4   : > { %7508 = vmatpush1.bf16.msra.mxu1 %v11109_v20  ;;  %v11181_v20 = vld [vmem:[%s15533_s1 + $0x770] ss:$8 sps:$4 sm:$0xff]  }
 0x1b5   : > { %8356 = vmatpush1.bf16.msra.mxu0 %v11112_v21  ;;  %7509 = vmatprep.subr.bf16.mxu1 %v11117_v22  ;;  %v11184_v21 = vld [vmem:[%s15533_s1 + $0x1770] ss:$8 sps:$4 sm:$0xff]   ;;  %v11189_v22 = vld [vmem:[%s15533_s1 + $0x784] ss:$8 sps:$4 sm:$0xff]  }
 0x1b6   : > { %8357 = vmatprep.subr.bf16.mxu0 %v11120_v23  ;;  %v11192_v23 = vld [vmem:[%s15533_s1 + $0x1784] ss:$8 sps:$4 sm:$0xff]  }
 0x1b8   : > { %7510 = vmatpush1.bf16.msra.mxu1 %v11115_v28  ;;  %v11187_v28 = vld [vmem:[%s15533_s1 + $0x780] ss:$8 sps:$4 sm:$0xff]  }
 0x1b9   : > { %8358 = vmatpush1.bf16.msra.mxu0 %v11118_v29  ;;  %7511 = vmatprep.subr.bf16.mxu1 %v11123_v30  ;;  %v11190_v29 = vld [vmem:[%s15533_s1 + $0x1780] ss:$8 sps:$4 sm:$0xff]   ;;  %v11195_v30 = vld [vmem:[%s15533_s1 + $0x794] ss:$8 sps:$4 sm:$0xff]  }
 0x1ba   : > { %8359 = vmatprep.subr.bf16.mxu0 %v11126_v31  ;;  %v11198_v31 = vld [vmem:[%s15533_s1 + $0x1794] ss:$8 sps:$4 sm:$0xff]  }
 0x1bc   : > { %7512 = vmatpush1.bf16.msra.mxu1 %v11121_v32  ;;  %v11193_v32 = vld [vmem:[%s15533_s1 + $0x790] ss:$8 sps:$4 sm:$0xff]  }
 0x1bd   : > { %8360 = vmatpush1.bf16.msra.mxu0 %v11124_v33  ;;  %7513 = vmatprep.subr.bf16.mxu1 %v11129_v34  ;;  %v11196_v33 = vld [vmem:[%s15533_s1 + $0x1790] ss:$8 sps:$4 sm:$0xff]   ;;  %v11201_v34 = vld [vmem:[%s15533_s1 + $0x7a4] ss:$8 sps:$4 sm:$0xff]  }
 0x1be   : > { %8361 = vmatprep.subr.bf16.mxu0 %v11132_v35  ;;  %v11204_v35 = vld [vmem:[%s15533_s1 + $0x17a4] ss:$8 sps:$4 sm:$0xff]  }
 0x1c0   : > { %7514 = vmatpush1.bf16.msra.mxu1 %v11127_v24  ;;  %v11199_v24 = vld [vmem:[%s15533_s1 + $0x7a0] ss:$8 sps:$4 sm:$0xff]  }
 0x1c1   : > { %8362 = vmatpush1.bf16.msra.mxu0 %v11130_v25  ;;  %7515 = vmatprep.subr.bf16.mxu1 %v11135_v26  ;;  %v11202_v25 = vld [vmem:[%s15533_s1 + $0x17a0] ss:$8 sps:$4 sm:$0xff]   ;;  %v11207_v26 = vld [vmem:[%s15533_s1 + $0x7b4] ss:$8 sps:$4 sm:$0xff]  }
 0x1c2   : > { %8363 = vmatprep.subr.bf16.mxu0 %v11138_v27  ;;  %v11210_v27 = vld [vmem:[%s15533_s1 + $0x17b4] ss:$8 sps:$4 sm:$0xff]  }
 0x1c4   : > { %7516 = vmatpush1.bf16.msra.mxu1 %v11133_v36  ;;  %v11205_v36 = vld [vmem:[%s15533_s1 + $0x7b0] ss:$8 sps:$4 sm:$0xff]  }
 0x1c5   : > { %8364 = vmatpush1.bf16.msra.mxu0 %v11136_v37  ;;  %7538 = vmatprep.subr.bf16.mxu1 %v11141_v38  ;;  %v11208_v37 = vld [vmem:[%s15533_s1 + $0x17b0] ss:$8 sps:$4 sm:$0xff]   ;;  %v11213_v38 = vld [vmem:[%s15533_s1 + $0x7c4] ss:$8 sps:$4 sm:$0xff]  }
 0x1c6   : > { %8386 = vmatprep.subr.bf16.mxu0 %v11144_v39  ;;  %v11216_v39 = vld [vmem:[%s15533_s1 + $0x17c4] ss:$8 sps:$4 sm:$0xff]  }
 0x1c7   : > { %7518 = vmatmul.mubr.bf16.vlgmr.msra.gmra.mrb[0].mxu1 %v9035_v52  ;;  %v11217_v52 = vld [vmem:[%s15533_s1 + $0x7d0] ss:$8 sps:$4 sm:$0xff]  }
 0x1c8   : > { %8366 = vmatmul.mubr.bf16.vlgmr.msra.gmra.mrb[0].mxu0 %v9067_v53  ;;  %7539 = vmatpush1.bf16.msra.mxu1 %v11139_v54  ;;  %v11220_v53 = vld [vmem:[%s15533_s1 + $0x17d0] ss:$8 sps:$4 sm:$0xff]   ;;  %v11225_v54 = vld [vmem:[%s15533_s1 + $0x7e4] ss:$8 sps:$4 sm:$0xff]  }
 0x1c9   : > { %8387 = vmatpush1.bf16.msra.mxu0 %v11142_v42  ;;  %7540 = vmatprep.subr.bf16.mxu1 %v11147_v40  ;;  %v11228_v42 = vld [vmem:[%s15533_s1 + $0x17e4] ss:$8 sps:$4 sm:$0xff]   ;;  %v11223_v40 = vld [vmem:[%s15533_s1 + $0x7e0] ss:$8 sps:$4 sm:$0xff]  }
 0x1ca   : > { %8388 = vmatprep.subr.bf16.mxu0 %v11150_v41  ;;  %7527 = vmatprep.mubr.bf16.mxu1 %v9100_v45  ;;  %v11226_v41 = vld [vmem:[%s15533_s1 + $0x17e0] ss:$8 sps:$4 sm:$0xff]   ;;  %v11229_v45 = vld [vmem:[%s15533_s1 + $0x7f0] ss:$8 sps:$4 sm:$0xff]  }
 0x1cb   : > { %8375 = vmatprep.mubr.bf16.mxu0 %v9132_v46  ;;  %v11232_v46 = vld [vmem:[%s15533_s1 + $0x17f0] ss:$8 sps:$4 sm:$0xff]  }
 0x1cc   : > { %7541 = vmatpush1.bf16.msra.mxu1 %v11145_v43  ;;  %v11231_v43 = vld [vmem:[%s15533_s1 + $0x7f4] ss:$8 sps:$4 sm:$0xff]  }
 0x1cd   : > { %8389 = vmatpush1.bf16.msra.mxu0 %v11148_v44  ;;  %7542 = vmatprep.subr.bf16.mxu1 %v11153_v47  ;;  %v11234_v44 = vld [vmem:[%s15533_s1 + $0x17f4] ss:$8 sps:$4 sm:$0xff]   ;;  %v11237_v47 = vld [vmem:[%s15533_s1 + $0x804] ss:$8 sps:$4 sm:$0xff]  }
 0x1ce   : > { %8390 = vmatprep.subr.bf16.mxu0 %v11156_v55  ;;  %v11240_v55 = vld [vmem:[%s15533_s1 + $0x1804] ss:$8 sps:$4 sm:$0xff]  }
 0x1cf   : > { %7528 = vmatmul.mubr.bf16.gmra.mrb[4].mxu1 %v9099_v0  ;;  %v314_v0 = vld [vmem:[%s12206_s12 + $0x238] sm:$0xff] }
 0x1d0   : > { %8376 = vmatmul.mubr.bf16.gmra.mrb[4].mxu0 %v9131_v1  ;;  %7543 = vmatpush1.bf16.msra.mxu1 %v11151_v2  ;;  %v346_v1 = vld [vmem:[%s12206_s12 + $0x338] sm:$0xff] }
 0x1d1   : > { %8391 = vmatpush1.bf16.msra.mxu0 %v11154_v3  ;;  %7544 = vmatprep.subr.bf16.mxu1 %v11159_v4  ;;  %v330_v2 = vld [vmem:[%s12206_s12 + $0x2b8] sm:$0xff]  ;;  %v9037_v4 = vcombine.low %v13603_v56, %v13606_v57 }
 0x1d2   : > { %8392 = vmatprep.subr.bf16.mxu0 %v11162_v5  ;;  %7570 = vmatprep.mubr.bf16.mxu1 %v9038_v58  ;;  %v362_v3 = vld [vmem:[%s12206_s12 + $0x3b8] sm:$0xff]  ;;  %v9069_v5 = vcombine.low %v13609_v60, %v13612_v61  ;;  %v11235_v58 = vld [vmem:[%s15533_s1 + $0x800] ss:$8 sps:$4 sm:$0xff]  }
 0x1d3   : > { %8418 = vmatprep.mubr.bf16.mxu0 %v9070_v59  ;;  %v11238_v59 = vld [vmem:[%s15533_s1 + $0x1800] ss:$8 sps:$4 sm:$0xff]   ;;  %v11243_v56 = vld [vmem:[%s15533_s1 + $0x814] ss:$8 sps:$4 sm:$0xff]   ;;  %v11241_v60 = vld [vmem:[%s15533_s1 + $0x810] ss:$8 sps:$4 sm:$0xff]  }
 0x1d4   : > { %7545 = vmatpush1.bf16.msra.mxu1 %v11157_v62  ;;  %v11246_v57 = vld [vmem:[%s15533_s1 + $0x1814] ss:$8 sps:$4 sm:$0xff]   ;;  %v11244_v61 = vld [vmem:[%s15533_s1 + $0x1810] ss:$8 sps:$4 sm:$0xff]   ;;  %v9102_v62 = vcombine.high %v314_v0, %v346_v1 }
 0x1d5   : > { %8393 = vmatpush1.bf16.msra.mxu0 %v11160_v63  ;;  %7546 = vmatprep.subr.bf16.mxu1 %v11165_v6  ;;  %v9134_v63 = vcombine.high %v330_v2, %v362_v3  ;;  %v11249_v6 = vld [vmem:[%s15533_s1 + $0x824] ss:$8 sps:$4 sm:$0xff]  }
 0x1d6   : > { %8394 = vmatprep.subr.bf16.mxu0 %v11168_v7  ;;  %v11252_v7 = vld [vmem:[%s15533_s1 + $0x1824] ss:$8 sps:$4 sm:$0xff]  }
 0x1d8   : > { %7547 = vmatpush1.bf16.msra.mxu1 %v11163_v11  ;;  %v13819_v11 = vld [vmem:[%s12206_s12 + $0x40] sm:$0xff] }
 0x1d9   : > { %8395 = vmatpush1.bf16.msra.mxu0 %v11166_v12  ;;  %7548 = vmatprep.subr.bf16.mxu1 %v11171_v14  ;;  %v13822_v12 = vld [vmem:[%s12206_s12 + $0x140] sm:$0xff] }
 0x1da   : > { %8396 = vmatprep.subr.bf16.mxu0 %v11174_v15  ;;  %v13825_v14 = vld [vmem:[%s12206_s12 + $0xc0] sm:$0xff] }
 0x1db   : > { %v13828_v15 = vld [vmem:[%s12206_s12 + $0x1c0] sm:$0xff] }
 0x1dc   : > { %7549 = vmatpush1.bf16.msra.mxu1 %v11169_v16  ;;  %v9101_v16 = vcombine.low %v314_v0, %v346_v1  ;;  %v11307_v0 = vld [vmem:[%s15533_s1 + $0x8c0] ss:$8 sps:$4 sm:$0xff]  }
 0x1dd   : > { %8397 = vmatpush1.bf16.msra.mxu0 %v11172_v17  ;;  %7550 = vmatprep.subr.bf16.mxu1 %v11177_v18  ;;  %v9133_v17 = vcombine.low %v330_v2, %v362_v3  ;;  %v11247_v18 = vld [vmem:[%s15533_s1 + $0x820] ss:$8 sps:$4 sm:$0xff]   ;;  %v11315_v2 = vld [vmem:[%s15533_s1 + $0x8d4] ss:$8 sps:$4 sm:$0xff]  }
 0x1de   : > { %8398 = vmatprep.subr.bf16.mxu0 %v11180_v19  ;;  %v11250_v19 = vld [vmem:[%s15533_s1 + $0x1820] ss:$8 sps:$4 sm:$0xff]   ;;  %v11318_v3 = vld [vmem:[%s15533_s1 + $0x18d4] ss:$8 sps:$4 sm:$0xff]  }
 0x1df   : > { %v11310_v1 = vld [vmem:[%s15533_s1 + $0x18c0] ss:$8 sps:$4 sm:$0xff]  }
 0x1e0   : > { %7551 = vmatpush1.bf16.msra.mxu1 %v11175_v8  ;;  %v11255_v8 = vld [vmem:[%s15533_s1 + $0x834] ss:$8 sps:$4 sm:$0xff]  }
 0x1e1   : > { %8399 = vmatpush1.bf16.msra.mxu0 %v11178_v9  ;;  %7552 = vmatprep.subr.bf16.mxu1 %v11183_v10  ;;  %v11258_v9 = vld [vmem:[%s15533_s1 + $0x1834] ss:$8 sps:$4 sm:$0xff]   ;;  %v9040_v10 = vcombine.high %v13819_v11, %v13822_v12 }
 0x1e2   : > { %8400 = vmatprep.subr.bf16.mxu0 %v11186_v13  ;;  %v9072_v13 = vcombine.high %v13825_v14, %v13828_v15 }
 0x1e4   : > { %7553 = vmatpush1.bf16.msra.mxu1 %v11181_v20  ;;  %v11253_v20 = vld [vmem:[%s15533_s1 + $0x830] ss:$8 sps:$4 sm:$0xff]  }
 0x1e5   : > { %8401 = vmatpush1.bf16.msra.mxu0 %v11184_v21  ;;  %7554 = vmatprep.subr.bf16.mxu1 %v11189_v22  ;;  %v11256_v21 = vld [vmem:[%s15533_s1 + $0x1830] ss:$8 sps:$4 sm:$0xff]   ;;  %v11261_v22 = vld [vmem:[%s15533_s1 + $0x844] ss:$8 sps:$4 sm:$0xff]  }
 0x1e6   : > { %8402 = vmatprep.subr.bf16.mxu0 %v11192_v23  ;;  %v11264_v23 = vld [vmem:[%s15533_s1 + $0x1844] ss:$8 sps:$4 sm:$0xff]  }
 0x1e8   : > { %7555 = vmatpush1.bf16.msra.mxu1 %v11187_v28  ;;  %v11259_v28 = vld [vmem:[%s15533_s1 + $0x840] ss:$8 sps:$4 sm:$0xff]  }
 0x1e9   : > { %8403 = vmatpush1.bf16.msra.mxu0 %v11190_v29  ;;  %7556 = vmatprep.subr.bf16.mxu1 %v11195_v30  ;;  %v11262_v29 = vld [vmem:[%s15533_s1 + $0x1840] ss:$8 sps:$4 sm:$0xff]   ;;  %v11267_v30 = vld [vmem:[%s15533_s1 + $0x854] ss:$8 sps:$4 sm:$0xff]  }
 0x1ea   : > { %8404 = vmatprep.subr.bf16.mxu0 %v11198_v31  ;;  %v11270_v31 = vld [vmem:[%s15533_s1 + $0x1854] ss:$8 sps:$4 sm:$0xff]  }
 0x1ec   : > { %7557 = vmatpush1.bf16.msra.mxu1 %v11193_v32  ;;  %v11265_v32 = vld [vmem:[%s15533_s1 + $0x850] ss:$8 sps:$4 sm:$0xff]  }
 0x1ed   : > { %8405 = vmatpush1.bf16.msra.mxu0 %v11196_v33  ;;  %7558 = vmatprep.subr.bf16.mxu1 %v11201_v34  ;;  %v11268_v33 = vld [vmem:[%s15533_s1 + $0x1850] ss:$8 sps:$4 sm:$0xff]   ;;  %v11273_v34 = vld [vmem:[%s15533_s1 + $0x864] ss:$8 sps:$4 sm:$0xff]  }
 0x1ee   : > { %8406 = vmatprep.subr.bf16.mxu0 %v11204_v35  ;;  %v11276_v35 = vld [vmem:[%s15533_s1 + $0x1864] ss:$8 sps:$4 sm:$0xff]  }
 0x1f0   : > { %7559 = vmatpush1.bf16.msra.mxu1 %v11199_v24  ;;  %v11271_v24 = vld [vmem:[%s15533_s1 + $0x860] ss:$8 sps:$4 sm:$0xff]  }
 0x1f1   : > { %8407 = vmatpush1.bf16.msra.mxu0 %v11202_v25  ;;  %7560 = vmatprep.subr.bf16.mxu1 %v11207_v26  ;;  %v11274_v25 = vld [vmem:[%s15533_s1 + $0x1860] ss:$8 sps:$4 sm:$0xff]   ;;  %v11279_v26 = vld [vmem:[%s15533_s1 + $0x874] ss:$8 sps:$4 sm:$0xff]  }
 0x1f2   : > { %8408 = vmatprep.subr.bf16.mxu0 %v11210_v27  ;;  %v11282_v27 = vld [vmem:[%s15533_s1 + $0x1874] ss:$8 sps:$4 sm:$0xff]  }
 0x1f4   : > { %7561 = vmatpush1.bf16.msra.mxu1 %v11205_v36  ;;  %v11277_v36 = vld [vmem:[%s15533_s1 + $0x870] ss:$8 sps:$4 sm:$0xff]  }
 0x1f5   : > { %8409 = vmatpush1.bf16.msra.mxu0 %v11208_v37  ;;  %7562 = vmatprep.subr.bf16.mxu1 %v11213_v38  ;;  %v11280_v37 = vld [vmem:[%s15533_s1 + $0x1870] ss:$8 sps:$4 sm:$0xff]   ;;  %v11285_v38 = vld [vmem:[%s15533_s1 + $0x884] ss:$8 sps:$4 sm:$0xff]  }
 0x1f6   : > { %8410 = vmatprep.subr.bf16.mxu0 %v11216_v39  ;;  %v11288_v39 = vld [vmem:[%s15533_s1 + $0x1884] ss:$8 sps:$4 sm:$0xff]  }
 0x1f8   : > { %7563 = vmatpush1.bf16.msra.mxu1 %v11211_v48  ;;  %v11283_v48 = vld [vmem:[%s15533_s1 + $0x880] ss:$8 sps:$4 sm:$0xff]  }
 0x1f9   : > { %8411 = vmatpush1.bf16.msra.mxu0 %v11214_v49  ;;  %7564 = vmatprep.subr.bf16.mxu1 %v11219_v50  ;;  %v11286_v49 = vld [vmem:[%s15533_s1 + $0x1880] ss:$8 sps:$4 sm:$0xff]   ;;  %v11291_v50 = vld [vmem:[%s15533_s1 + $0x894] ss:$8 sps:$4 sm:$0xff]  }
 0x1fa   : > { %8412 = vmatprep.subr.bf16.mxu0 %v11222_v51  ;;  %v11294_v51 = vld [vmem:[%s15533_s1 + $0x1894] ss:$8 sps:$4 sm:$0xff]  }
 0x1fc   : > { %7565 = vmatpush1.bf16.msra.mxu1 %v11217_v52  ;;  %v11289_v52 = vld [vmem:[%s15533_s1 + $0x890] ss:$8 sps:$4 sm:$0xff]  }
 0x1fd   : > { %8413 = vmatpush1.bf16.msra.mxu0 %v11220_v53  ;;  %7566 = vmatprep.subr.bf16.mxu1 %v11225_v54  ;;  %v11292_v53 = vld [vmem:[%s15533_s1 + $0x1890] ss:$8 sps:$4 sm:$0xff]   ;;  %v11297_v54 = vld [vmem:[%s15533_s1 + $0x8a4] ss:$8 sps:$4 sm:$0xff]  }
 0x1fe   : > { %8414 = vmatprep.subr.bf16.mxu0 %v11228_v42  ;;  %v11300_v42 = vld [vmem:[%s15533_s1 + $0x18a4] ss:$8 sps:$4 sm:$0xff]  }
 0x200   : > { %7567 = vmatpush1.bf16.msra.mxu1 %v11223_v40  ;;  %v11295_v40 = vld [vmem:[%s15533_s1 + $0x8a0] ss:$8 sps:$4 sm:$0xff]  }
 0x201   : > { %8415 = vmatpush1.bf16.msra.mxu0 %v11226_v41  ;;  %7568 = vmatprep.subr.bf16.mxu1 %v11231_v43  ;;  %v11298_v41 = vld [vmem:[%s15533_s1 + $0x18a0] ss:$8 sps:$4 sm:$0xff]   ;;  %v11303_v43 = vld [vmem:[%s15533_s1 + $0x8b4] ss:$8 sps:$4 sm:$0xff]  }
 0x202   : > { %8416 = vmatprep.subr.bf16.mxu0 %v11234_v44  ;;  %v11306_v44 = vld [vmem:[%s15533_s1 + $0x18b4] ss:$8 sps:$4 sm:$0xff]  }
 0x204   : > { %7569 = vmatpush1.bf16.msra.mxu1 %v11229_v45  ;;  %v11301_v45 = vld [vmem:[%s15533_s1 + $0x8b0] ss:$8 sps:$4 sm:$0xff]  }
 0x205   : > { %8417 = vmatpush1.bf16.msra.mxu0 %v11232_v46  ;;  %7591 = vmatprep.subr.bf16.mxu1 %v11237_v47  ;;  %v11304_v46 = vld [vmem:[%s15533_s1 + $0x18b0] ss:$8 sps:$4 sm:$0xff]   ;;  %v11309_v47 = vld [vmem:[%s15533_s1 + $0x8c4] ss:$8 sps:$4 sm:$0xff]  }
 0x206   : > { %8439 = vmatprep.subr.bf16.mxu0 %v11240_v55  ;;  %v11312_v55 = vld [vmem:[%s15533_s1 + $0x18c4] ss:$8 sps:$4 sm:$0xff]  }
 0x207   : > { %7571 = vmatmul.mubr.bf16.vlgmr.msra.gmra.mrb[0].mxu1 %v9037_v4  ;;  %v11313_v4 = vld [vmem:[%s15533_s1 + $0x8d0] ss:$8 sps:$4 sm:$0xff]  }
 0x208   : > { %8419 = vmatmul.mubr.bf16.vlgmr.msra.gmra.mrb[0].mxu0 %v9069_v5  ;;  %7592 = vmatpush1.bf16.msra.mxu1 %v11235_v58  ;;  %v11316_v5 = vld [vmem:[%s15533_s1 + $0x18d0] ss:$8 sps:$4 sm:$0xff]   ;;  %v11321_v58 = vld [vmem:[%s15533_s1 + $0x8e4] ss:$8 sps:$4 sm:$0xff]  }
 0x209   : > { %8440 = vmatpush1.bf16.msra.mxu0 %v11238_v59  ;;  %7593 = vmatprep.subr.bf16.mxu1 %v11243_v56  ;;  %v11324_v59 = vld [vmem:[%s15533_s1 + $0x18e4] ss:$8 sps:$4 sm:$0xff]   ;;  %v11319_v56 = vld [vmem:[%s15533_s1 + $0x8e0] ss:$8 sps:$4 sm:$0xff]  }
 0x20a   : > { %8441 = vmatprep.subr.bf16.mxu0 %v11246_v57  ;;  %7580 = vmatprep.mubr.bf16.mxu1 %v9102_v62  ;;  %v11322_v57 = vld [vmem:[%s15533_s1 + $0x18e0] ss:$8 sps:$4 sm:$0xff]   ;;  %v11325_v62 = vld [vmem:[%s15533_s1 + $0x8f0] ss:$8 sps:$4 sm:$0xff]  }
 0x20b   : > { %8428 = vmatprep.mubr.bf16.mxu0 %v9134_v63  ;;  %v11328_v63 = vld [vmem:[%s15533_s1 + $0x18f0] ss:$8 sps:$4 sm:$0xff]  }
 0x20c   : > { %7594 = vmatpush1.bf16.msra.mxu1 %v11241_v60  ;;  %v11327_v60 = vld [vmem:[%s15533_s1 + $0x8f4] ss:$8 sps:$4 sm:$0xff]  }
 0x20d   : > { %8442 = vmatpush1.bf16.msra.mxu0 %v11244_v61  ;;  %7595 = vmatprep.subr.bf16.mxu1 %v11249_v6  ;;  %v11330_v61 = vld [vmem:[%s15533_s1 + $0x18f4] ss:$8 sps:$4 sm:$0xff]   ;;  %v11333_v6 = vld [vmem:[%s15533_s1 + $0x904] ss:$8 sps:$4 sm:$0xff]  }
 0x20e   : > { %8443 = vmatprep.subr.bf16.mxu0 %v11252_v7  ;;  %v11336_v7 = vld [vmem:[%s15533_s1 + $0x1904] ss:$8 sps:$4 sm:$0xff]  }
 0x20f   : > { %7581 = vmatmul.mubr.bf16.gmra.mrb[4].mxu1 %v9101_v16  ;;  %v315_v16 = vld [vmem:[%s12206_s12 + $0x240] sm:$0xff] }
 0x210   : > { %8429 = vmatmul.mubr.bf16.gmra.mrb[4].mxu0 %v9133_v17  ;;  %7596 = vmatpush1.bf16.msra.mxu1 %v11247_v18  ;;  %v347_v17 = vld [vmem:[%s12206_s12 + $0x340] sm:$0xff] }
 0x211   : > { %8444 = vmatpush1.bf16.msra.mxu0 %v11250_v19  ;;  %7597 = vmatprep.subr.bf16.mxu1 %v11255_v8  ;;  %v331_v18 = vld [vmem:[%s12206_s12 + $0x2c0] sm:$0xff]  ;;  %v9039_v8 = vcombine.low %v13819_v11, %v13822_v12  ;;  %v11339_v11 = vld [vmem:[%s15533_s1 + $0x914] ss:$8 sps:$4 sm:$0xff]  }
 0x212   : > { %8445 = vmatprep.subr.bf16.mxu0 %v11258_v9  ;;  %7623 = vmatprep.mubr.bf16.mxu1 %v9040_v10  ;;  %v363_v19 = vld [vmem:[%s12206_s12 + $0x3c0] sm:$0xff]  ;;  %v9071_v9 = vcombine.low %v13825_v14, %v13828_v15  ;;  %v11342_v12 = vld [vmem:[%s15533_s1 + $0x1914] ss:$8 sps:$4 sm:$0xff]   ;;  %v11337_v14 = vld [vmem:[%s15533_s1 + $0x910] ss:$8 sps:$4 sm:$0xff]  }
 0x213   : > { %8471 = vmatprep.mubr.bf16.mxu0 %v9072_v13  ;;  %v11331_v10 = vld [vmem:[%s15533_s1 + $0x900] ss:$8 sps:$4 sm:$0xff]   ;;  %v11340_v15 = vld [vmem:[%s15533_s1 + $0x1910] ss:$8 sps:$4 sm:$0xff]  }
 0x214   : > { %7598 = vmatpush1.bf16.msra.mxu1 %v11253_v20  ;;  %v11334_v13 = vld [vmem:[%s15533_s1 + $0x1900] ss:$8 sps:$4 sm:$0xff]   ;;  %v9104_v20 = vcombine.high %v315_v16, %v347_v17 }
 0x215   : > { %8446 = vmatpush1.bf16.msra.mxu0 %v11256_v21  ;;  %7599 = vmatprep.subr.bf16.mxu1 %v11261_v22  ;;  %v9136_v21 = vcombine.high %v331_v18, %v363_v19  ;;  %v11345_v22 = vld [vmem:[%s15533_s1 + $0x924] ss:$8 sps:$4 sm:$0xff]  }
 0x216   : > { %8447 = vmatprep.subr.bf16.mxu0 %v11264_v23  ;;  %v11348_v23 = vld [vmem:[%s15533_s1 + $0x1924] ss:$8 sps:$4 sm:$0xff]  }
 0x218   : > { %7600 = vmatpush1.bf16.msra.mxu1 %v11259_v28  ;;  %v14035_v28 = vld [vmem:[%s12206_s12 + $0x48] sm:$0xff] }
 0x219   : > { %8448 = vmatpush1.bf16.msra.mxu0 %v11262_v29  ;;  %7601 = vmatprep.subr.bf16.mxu1 %v11267_v30  ;;  %v14038_v29 = vld [vmem:[%s12206_s12 + $0x148] sm:$0xff] }
 0x21a   : > { %8449 = vmatprep.subr.bf16.mxu0 %v11270_v31  ;;  %v14041_v30 = vld [vmem:[%s12206_s12 + $0xc8] sm:$0xff] }
 0x21b   : > { %v14044_v31 = vld [vmem:[%s12206_s12 + $0x1c8] sm:$0xff] }
 0x21c   : > { %7602 = vmatpush1.bf16.msra.mxu1 %v11265_v32  ;;  %v9103_v32 = vcombine.low %v315_v16, %v347_v17  ;;  %v11403_v16 = vld [vmem:[%s15533_s1 + $0x9c0] ss:$8 sps:$4 sm:$0xff]  }
 0x21d   : > { %8450 = vmatpush1.bf16.msra.mxu0 %v11268_v33  ;;  %7603 = vmatprep.subr.bf16.mxu1 %v11273_v34  ;;  %v9135_v33 = vcombine.low %v331_v18, %v363_v19  ;;  %v11343_v34 = vld [vmem:[%s15533_s1 + $0x920] ss:$8 sps:$4 sm:$0xff]   ;;  %v11411_v18 = vld [vmem:[%s15533_s1 + $0x9d4] ss:$8 sps:$4 sm:$0xff]  }
 0x21e   : > { %8451 = vmatprep.subr.bf16.mxu0 %v11276_v35  ;;  %v11346_v35 = vld [vmem:[%s15533_s1 + $0x1920] ss:$8 sps:$4 sm:$0xff]   ;;  %v11414_v19 = vld [vmem:[%s15533_s1 + $0x19d4] ss:$8 sps:$4 sm:$0xff]  }
 0x21f   : > { %v11406_v17 = vld [vmem:[%s15533_s1 + $0x19c0] ss:$8 sps:$4 sm:$0xff]  }
 0x220   : > { %7604 = vmatpush1.bf16.msra.mxu1 %v11271_v24  ;;  %v11351_v24 = vld [vmem:[%s15533_s1 + $0x934] ss:$8 sps:$4 sm:$0xff]  }
 0x221   : > { %8452 = vmatpush1.bf16.msra.mxu0 %v11274_v25  ;;  %7605 = vmatprep.subr.bf16.mxu1 %v11279_v26  ;;  %v11354_v25 = vld [vmem:[%s15533_s1 + $0x1934] ss:$8 sps:$4 sm:$0xff]   ;;  %v9042_v26 = vcombine.high %v14035_v28, %v14038_v29 }
 0x222   : > { %8453 = vmatprep.subr.bf16.mxu0 %v11282_v27  ;;  %v9074_v27 = vcombine.high %v14041_v30, %v14044_v31 }
 0x224   : > { %7606 = vmatpush1.bf16.msra.mxu1 %v11277_v36  ;;  %v11349_v36 = vld [vmem:[%s15533_s1 + $0x930] ss:$8 sps:$4 sm:$0xff]  }
 0x225   : > { %8454 = vmatpush1.bf16.msra.mxu0 %v11280_v37  ;;  %7607 = vmatprep.subr.bf16.mxu1 %v11285_v38  ;;  %v11352_v37 = vld [vmem:[%s15533_s1 + $0x1930] ss:$8 sps:$4 sm:$0xff]   ;;  %v11357_v38 = vld [vmem:[%s15533_s1 + $0x944] ss:$8 sps:$4 sm:$0xff]  }
 0x226   : > { %8455 = vmatprep.subr.bf16.mxu0 %v11288_v39  ;;  %v11360_v39 = vld [vmem:[%s15533_s1 + $0x1944] ss:$8 sps:$4 sm:$0xff]  }
 0x228   : > { %7608 = vmatpush1.bf16.msra.mxu1 %v11283_v48  ;;  %v11355_v48 = vld [vmem:[%s15533_s1 + $0x940] ss:$8 sps:$4 sm:$0xff]  }
 0x229   : > { %8456 = vmatpush1.bf16.msra.mxu0 %v11286_v49  ;;  %7609 = vmatprep.subr.bf16.mxu1 %v11291_v50  ;;  %v11358_v49 = vld [vmem:[%s15533_s1 + $0x1940] ss:$8 sps:$4 sm:$0xff]   ;;  %v11363_v50 = vld [vmem:[%s15533_s1 + $0x954] ss:$8 sps:$4 sm:$0xff]  }
 0x22a   : > { %8457 = vmatprep.subr.bf16.mxu0 %v11294_v51  ;;  %v11366_v51 = vld [vmem:[%s15533_s1 + $0x1954] ss:$8 sps:$4 sm:$0xff]  }
 0x22c   : > { %7610 = vmatpush1.bf16.msra.mxu1 %v11289_v52  ;;  %v11361_v52 = vld [vmem:[%s15533_s1 + $0x950] ss:$8 sps:$4 sm:$0xff]  }
 0x22d   : > { %8458 = vmatpush1.bf16.msra.mxu0 %v11292_v53  ;;  %7611 = vmatprep.subr.bf16.mxu1 %v11297_v54  ;;  %v11364_v53 = vld [vmem:[%s15533_s1 + $0x1950] ss:$8 sps:$4 sm:$0xff]   ;;  %v11369_v54 = vld [vmem:[%s15533_s1 + $0x964] ss:$8 sps:$4 sm:$0xff]  }
 0x22e   : > { %8459 = vmatprep.subr.bf16.mxu0 %v11300_v42  ;;  %v11372_v42 = vld [vmem:[%s15533_s1 + $0x1964] ss:$8 sps:$4 sm:$0xff]  }
 0x230   : > { %7612 = vmatpush1.bf16.msra.mxu1 %v11295_v40  ;;  %v11367_v40 = vld [vmem:[%s15533_s1 + $0x960] ss:$8 sps:$4 sm:$0xff]  }
 0x231   : > { %8460 = vmatpush1.bf16.msra.mxu0 %v11298_v41  ;;  %7613 = vmatprep.subr.bf16.mxu1 %v11303_v43  ;;  %v11370_v41 = vld [vmem:[%s15533_s1 + $0x1960] ss:$8 sps:$4 sm:$0xff]   ;;  %v11375_v43 = vld [vmem:[%s15533_s1 + $0x974] ss:$8 sps:$4 sm:$0xff]  }
 0x232   : > { %8461 = vmatprep.subr.bf16.mxu0 %v11306_v44  ;;  %v11378_v44 = vld [vmem:[%s15533_s1 + $0x1974] ss:$8 sps:$4 sm:$0xff]  }
 0x234   : > { %7614 = vmatpush1.bf16.msra.mxu1 %v11301_v45  ;;  %v11373_v45 = vld [vmem:[%s15533_s1 + $0x970] ss:$8 sps:$4 sm:$0xff]  }
 0x235   : > { %8462 = vmatpush1.bf16.msra.mxu0 %v11304_v46  ;;  %7615 = vmatprep.subr.bf16.mxu1 %v11309_v47  ;;  %v11376_v46 = vld [vmem:[%s15533_s1 + $0x1970] ss:$8 sps:$4 sm:$0xff]   ;;  %v11381_v47 = vld [vmem:[%s15533_s1 + $0x984] ss:$8 sps:$4 sm:$0xff]  }
 0x236   : > { %8463 = vmatprep.subr.bf16.mxu0 %v11312_v55  ;;  %v11384_v55 = vld [vmem:[%s15533_s1 + $0x1984] ss:$8 sps:$4 sm:$0xff]  }
 0x238   : > { %7616 = vmatpush1.bf16.msra.mxu1 %v11307_v0  ;;  %v11379_v0 = vld [vmem:[%s15533_s1 + $0x980] ss:$8 sps:$4 sm:$0xff]  }
 0x239   : > { %8464 = vmatpush1.bf16.msra.mxu0 %v11310_v1  ;;  %7617 = vmatprep.subr.bf16.mxu1 %v11315_v2  ;;  %v11382_v1 = vld [vmem:[%s15533_s1 + $0x1980] ss:$8 sps:$4 sm:$0xff]   ;;  %v11387_v2 = vld [vmem:[%s15533_s1 + $0x994] ss:$8 sps:$4 sm:$0xff]  }
 0x23a   : > { %8465 = vmatprep.subr.bf16.mxu0 %v11318_v3  ;;  %v11390_v3 = vld [vmem:[%s15533_s1 + $0x1994] ss:$8 sps:$4 sm:$0xff]  }
 0x23c   : > { %7618 = vmatpush1.bf16.msra.mxu1 %v11313_v4  ;;  %v11385_v4 = vld [vmem:[%s15533_s1 + $0x990] ss:$8 sps:$4 sm:$0xff]  }
 0x23d   : > { %8466 = vmatpush1.bf16.msra.mxu0 %v11316_v5  ;;  %7619 = vmatprep.subr.bf16.mxu1 %v11321_v58  ;;  %v11388_v5 = vld [vmem:[%s15533_s1 + $0x1990] ss:$8 sps:$4 sm:$0xff]   ;;  %v11393_v58 = vld [vmem:[%s15533_s1 + $0x9a4] ss:$8 sps:$4 sm:$0xff]  }
 0x23e   : > { %8467 = vmatprep.subr.bf16.mxu0 %v11324_v59  ;;  %v11396_v59 = vld [vmem:[%s15533_s1 + $0x19a4] ss:$8 sps:$4 sm:$0xff]  }
 0x240   : > { %7620 = vmatpush1.bf16.msra.mxu1 %v11319_v56  ;;  %v11391_v56 = vld [vmem:[%s15533_s1 + $0x9a0] ss:$8 sps:$4 sm:$0xff]  }
 0x241   : > { %8468 = vmatpush1.bf16.msra.mxu0 %v11322_v57  ;;  %7621 = vmatprep.subr.bf16.mxu1 %v11327_v60  ;;  %v11394_v57 = vld [vmem:[%s15533_s1 + $0x19a0] ss:$8 sps:$4 sm:$0xff]   ;;  %v11399_v60 = vld [vmem:[%s15533_s1 + $0x9b4] ss:$8 sps:$4 sm:$0xff]  }
 0x242   : > { %8469 = vmatprep.subr.bf16.mxu0 %v11330_v61  ;;  %v11402_v61 = vld [vmem:[%s15533_s1 + $0x19b4] ss:$8 sps:$4 sm:$0xff]  }
 0x244   : > { %7622 = vmatpush1.bf16.msra.mxu1 %v11325_v62  ;;  %v11397_v62 = vld [vmem:[%s15533_s1 + $0x9b0] ss:$8 sps:$4 sm:$0xff]  }
 0x245   : > { %8470 = vmatpush1.bf16.msra.mxu0 %v11328_v63  ;;  %7644 = vmatprep.subr.bf16.mxu1 %v11333_v6  ;;  %v11400_v63 = vld [vmem:[%s15533_s1 + $0x19b0] ss:$8 sps:$4 sm:$0xff]   ;;  %v11405_v6 = vld [vmem:[%s15533_s1 + $0x9c4] ss:$8 sps:$4 sm:$0xff]  }
 0x246   : > { %8492 = vmatprep.subr.bf16.mxu0 %v11336_v7  ;;  %v11408_v7 = vld [vmem:[%s15533_s1 + $0x19c4] ss:$8 sps:$4 sm:$0xff]  }
 0x247   : > { %7624 = vmatmul.mubr.bf16.vlgmr.msra.gmra.mrb[0].mxu1 %v9039_v8  ;;  %v11409_v8 = vld [vmem:[%s15533_s1 + $0x9d0] ss:$8 sps:$4 sm:$0xff]  }
 0x248   : > { %8472 = vmatmul.mubr.bf16.vlgmr.msra.gmra.mrb[0].mxu0 %v9071_v9  ;;  %7645 = vmatpush1.bf16.msra.mxu1 %v11331_v10  ;;  %v11412_v9 = vld [vmem:[%s15533_s1 + $0x19d0] ss:$8 sps:$4 sm:$0xff]   ;;  %v11417_v10 = vld [vmem:[%s15533_s1 + $0x9e4] ss:$8 sps:$4 sm:$0xff]  }
 0x249   : > { %8493 = vmatpush1.bf16.msra.mxu0 %v11334_v13  ;;  %7646 = vmatprep.subr.bf16.mxu1 %v11339_v11  ;;  %v11420_v13 = vld [vmem:[%s15533_s1 + $0x19e4] ss:$8 sps:$4 sm:$0xff]   ;;  %v11415_v11 = vld [vmem:[%s15533_s1 + $0x9e0] ss:$8 sps:$4 sm:$0xff]  }
 0x24a   : > { %8494 = vmatprep.subr.bf16.mxu0 %v11342_v12  ;;  %7633 = vmatprep.mubr.bf16.mxu1 %v9104_v20  ;;  %v11418_v12 = vld [vmem:[%s15533_s1 + $0x19e0] ss:$8 sps:$4 sm:$0xff]   ;;  %v11421_v20 = vld [vmem:[%s15533_s1 + $0x9f0] ss:$8 sps:$4 sm:$0xff]  }
 0x24b   : > { %8481 = vmatprep.mubr.bf16.mxu0 %v9136_v21  ;;  %v11424_v21 = vld [vmem:[%s15533_s1 + $0x19f0] ss:$8 sps:$4 sm:$0xff]  }
 0x24c   : > { %7647 = vmatpush1.bf16.msra.mxu1 %v11337_v14  ;;  %v11423_v14 = vld [vmem:[%s15533_s1 + $0x9f4] ss:$8 sps:$4 sm:$0xff]  }
 0x24d   : > { %8495 = vmatpush1.bf16.msra.mxu0 %v11340_v15  ;;  %7648 = vmatprep.subr.bf16.mxu1 %v11345_v22  ;;  %v11426_v15 = vld [vmem:[%s15533_s1 + $0x19f4] ss:$8 sps:$4 sm:$0xff]   ;;  %v11429_v22 = vld [vmem:[%s15533_s1 + $0xa04] ss:$8 sps:$4 sm:$0xff]  }
 0x24e   : > { %8496 = vmatprep.subr.bf16.mxu0 %v11348_v23  ;;  %v11432_v23 = vld [vmem:[%s15533_s1 + $0x1a04] ss:$8 sps:$4 sm:$0xff]  }
 0x24f   : > { %7634 = vmatmul.mubr.bf16.gmra.mrb[4].mxu1 %v9103_v32  ;;  %v316_v32 = vld [vmem:[%s12206_s12 + $0x248] sm:$0xff] }
 0x250   : > { %8482 = vmatmul.mubr.bf16.gmra.mrb[4].mxu0 %v9135_v33  ;;  %7649 = vmatpush1.bf16.msra.mxu1 %v11343_v34  ;;  %v9041_v33 = vcombine.low %v14035_v28, %v14038_v29  ;;  %v9073_v34 = vcombine.low %v14041_v30, %v14044_v31  ;;  %v11435_v28 = vld [vmem:[%s15533_s1 + $0xa14] ss:$8 sps:$4 sm:$0xff]  }
 0x251   : > { %8497 = vmatpush1.bf16.msra.mxu0 %v11346_v35  ;;  %7650 = vmatprep.subr.bf16.mxu1 %v11351_v24  ;;  %v348_v35 = vld [vmem:[%s12206_s12 + $0x348] sm:$0xff]  ;;  %v11438_v29 = vld [vmem:[%s15533_s1 + $0x1a14] ss:$8 sps:$4 sm:$0xff]  }
 0x252   : > { %8498 = vmatprep.subr.bf16.mxu0 %v11354_v25  ;;  %7676 = vmatprep.mubr.bf16.mxu1 %v9042_v26  ;;  %v332_v24 = vld [vmem:[%s12206_s12 + $0x2c8] sm:$0xff]  ;;  %v9106_v30 = vcombine.high %v316_v32, %v348_v35 }
 0x253   : > { %8524 = vmatprep.mubr.bf16.mxu0 %v9074_v27  ;;  %v364_v25 = vld [vmem:[%s12206_s12 + $0x3c8] sm:$0xff] }
 0x254   : > { %7651 = vmatpush1.bf16.msra.mxu1 %v11349_v36  ;;  %v11427_v26 = vld [vmem:[%s15533_s1 + $0xa00] ss:$8 sps:$4 sm:$0xff]   ;;  %v9138_v31 = vcombine.high %v332_v24, %v364_v25  ;;  %v11433_v36 = vld [vmem:[%s15533_s1 + $0xa10] ss:$8 sps:$4 sm:$0xff]  }
 0x255   : > { %8499 = vmatpush1.bf16.msra.mxu0 %v11352_v37  ;;  %7652 = vmatprep.subr.bf16.mxu1 %v11357_v38  ;;  %v11430_v27 = vld [vmem:[%s15533_s1 + $0x1a00] ss:$8 sps:$4 sm:$0xff]   ;;  %v11436_v37 = vld [vmem:[%s15533_s1 + $0x1a10] ss:$8 sps:$4 sm:$0xff]   ;;  %v11441_v38 = vld [vmem:[%s15533_s1 + $0xa24] ss:$8 sps:$4 sm:$0xff]  }
 0x256   : > { %8500 = vmatprep.subr.bf16.mxu0 %v11360_v39  ;;  %v11444_v39 = vld [vmem:[%s15533_s1 + $0x1a24] ss:$8 sps:$4 sm:$0xff]  }
 0x258   : > { %7653 = vmatpush1.bf16.msra.mxu1 %v11355_v48  ;;  %v14251_v48 = vld [vmem:[%s12206_s12 + $0x50] sm:$0xff] }
 0x259   : > { %8501 = vmatpush1.bf16.msra.mxu0 %v11358_v49  ;;  %7654 = vmatprep.subr.bf16.mxu1 %v11363_v50  ;;  %v9105_v49 = vcombine.low %v316_v32, %v348_v35  ;;  %v9137_v50 = vcombine.low %v332_v24, %v364_v25  ;;  %v11499_v32 = vld [vmem:[%s15533_s1 + $0xac0] ss:$8 sps:$4 sm:$0xff]   ;;  %v11510_v35 = vld [vmem:[%s15533_s1 + $0x1ad4] ss:$8 sps:$4 sm:$0xff]   ;;  %v11505_v24 = vld [vmem:[%s15533_s1 + $0xad0] ss:$8 sps:$4 sm:$0xff]  }
 0x25a   : > { %8502 = vmatprep.subr.bf16.mxu0 %v11366_v51  ;;  %v14254_v51 = vld [vmem:[%s12206_s12 + $0x150] sm:$0xff] }
 0x25b   : > { %v11508_v25 = vld [vmem:[%s15533_s1 + $0x1ad0] ss:$8 sps:$4 sm:$0xff]  }
 0x25c   : > { %7655 = vmatpush1.bf16.msra.mxu1 %v11361_v52  ;;  %v14257_v52 = vld [vmem:[%s12206_s12 + $0xd0] sm:$0xff] }
 0x25d   : > { %8503 = vmatpush1.bf16.msra.mxu0 %v11364_v53  ;;  %7656 = vmatprep.subr.bf16.mxu1 %v11369_v54  ;;  %v14260_v53 = vld [vmem:[%s12206_s12 + $0x1d0] sm:$0xff]  ;;  %v11439_v54 = vld [vmem:[%s15533_s1 + $0xa20] ss:$8 sps:$4 sm:$0xff]  }
 0x25e   : > { %8504 = vmatprep.subr.bf16.mxu0 %v11372_v42  ;;  %v11442_v42 = vld [vmem:[%s15533_s1 + $0x1a20] ss:$8 sps:$4 sm:$0xff]  }
 0x260   : > { %7657 = vmatpush1.bf16.msra.mxu1 %v11367_v40  ;;  %v11447_v40 = vld [vmem:[%s15533_s1 + $0xa34] ss:$8 sps:$4 sm:$0xff]  }
 0x261   : > { %8505 = vmatpush1.bf16.msra.mxu0 %v11370_v41  ;;  %7658 = vmatprep.subr.bf16.mxu1 %v11375_v43  ;;  %v11450_v41 = vld [vmem:[%s15533_s1 + $0x1a34] ss:$8 sps:$4 sm:$0xff]   ;;  %v9044_v43 = vcombine.high %v14251_v48, %v14254_v51 }
 0x262   : > { %8506 = vmatprep.subr.bf16.mxu0 %v11378_v44  ;;  %v9076_v44 = vcombine.high %v14257_v52, %v14260_v53 }
 0x264   : > { %7659 = vmatpush1.bf16.msra.mxu1 %v11373_v45  ;;  %v11445_v45 = vld [vmem:[%s15533_s1 + $0xa30] ss:$8 sps:$4 sm:$0xff]  }
 0x265   : > { %8507 = vmatpush1.bf16.msra.mxu0 %v11376_v46  ;;  %7660 = vmatprep.subr.bf16.mxu1 %v11381_v47  ;;  %v11448_v46 = vld [vmem:[%s15533_s1 + $0x1a30] ss:$8 sps:$4 sm:$0xff]   ;;  %v11453_v47 = vld [vmem:[%s15533_s1 + $0xa44] ss:$8 sps:$4 sm:$0xff]  }
 0x266   : > { %8508 = vmatprep.subr.bf16.mxu0 %v11384_v55  ;;  %v11456_v55 = vld [vmem:[%s15533_s1 + $0x1a44] ss:$8 sps:$4 sm:$0xff]  }
 0x268   : > { %7661 = vmatpush1.bf16.msra.mxu1 %v11379_v0  ;;  %v11451_v0 = vld [vmem:[%s15533_s1 + $0xa40] ss:$8 sps:$4 sm:$0xff]  }
 0x269   : > { %8509 = vmatpush1.bf16.msra.mxu0 %v11382_v1  ;;  %7662 = vmatprep.subr.bf16.mxu1 %v11387_v2  ;;  %v11454_v1 = vld [vmem:[%s15533_s1 + $0x1a40] ss:$8 sps:$4 sm:$0xff]   ;;  %v11459_v2 = vld [vmem:[%s15533_s1 + $0xa54] ss:$8 sps:$4 sm:$0xff]  }
 0x26a   : > { %8510 = vmatprep.subr.bf16.mxu0 %v11390_v3  ;;  %v11462_v3 = vld [vmem:[%s15533_s1 + $0x1a54] ss:$8 sps:$4 sm:$0xff]  }
 0x26c   : > { %7663 = vmatpush1.bf16.msra.mxu1 %v11385_v4  ;;  %v11457_v4 = vld [vmem:[%s15533_s1 + $0xa50] ss:$8 sps:$4 sm:$0xff]  }
 0x26d   : > { %8511 = vmatpush1.bf16.msra.mxu0 %v11388_v5  ;;  %7664 = vmatprep.subr.bf16.mxu1 %v11393_v58  ;;  %v11460_v5 = vld [vmem:[%s15533_s1 + $0x1a50] ss:$8 sps:$4 sm:$0xff]   ;;  %v11465_v58 = vld [vmem:[%s15533_s1 + $0xa64] ss:$8 sps:$4 sm:$0xff]  }
 0x26e   : > { %8512 = vmatprep.subr.bf16.mxu0 %v11396_v59  ;;  %v11468_v59 = vld [vmem:[%s15533_s1 + $0x1a64] ss:$8 sps:$4 sm:$0xff]  }
 0x270   : > { %7665 = vmatpush1.bf16.msra.mxu1 %v11391_v56  ;;  %v11463_v56 = vld [vmem:[%s15533_s1 + $0xa60] ss:$8 sps:$4 sm:$0xff]  }
 0x271   : > { %8513 = vmatpush1.bf16.msra.mxu0 %v11394_v57  ;;  %7666 = vmatprep.subr.bf16.mxu1 %v11399_v60  ;;  %v11466_v57 = vld [vmem:[%s15533_s1 + $0x1a60] ss:$8 sps:$4 sm:$0xff]   ;;  %v11471_v60 = vld [vmem:[%s15533_s1 + $0xa74] ss:$8 sps:$4 sm:$0xff]  }
 0x272   : > { %8514 = vmatprep.subr.bf16.mxu0 %v11402_v61  ;;  %v11474_v61 = vld [vmem:[%s15533_s1 + $0x1a74] ss:$8 sps:$4 sm:$0xff]  }
 0x274   : > { %7667 = vmatpush1.bf16.msra.mxu1 %v11397_v62  ;;  %v11469_v62 = vld [vmem:[%s15533_s1 + $0xa70] ss:$8 sps:$4 sm:$0xff]  }
 0x275   : > { %8515 = vmatpush1.bf16.msra.mxu0 %v11400_v63  ;;  %7668 = vmatprep.subr.bf16.mxu1 %v11405_v6  ;;  %v11472_v63 = vld [vmem:[%s15533_s1 + $0x1a70] ss:$8 sps:$4 sm:$0xff]   ;;  %v11477_v6 = vld [vmem:[%s15533_s1 + $0xa84] ss:$8 sps:$4 sm:$0xff]  }
 0x276   : > { %8516 = vmatprep.subr.bf16.mxu0 %v11408_v7  ;;  %v11480_v7 = vld [vmem:[%s15533_s1 + $0x1a84] ss:$8 sps:$4 sm:$0xff]  }
 0x278   : > { %7669 = vmatpush1.bf16.msra.mxu1 %v11403_v16  ;;  %v11475_v16 = vld [vmem:[%s15533_s1 + $0xa80] ss:$8 sps:$4 sm:$0xff]  }
 0x279   : > { %8517 = vmatpush1.bf16.msra.mxu0 %v11406_v17  ;;  %7670 = vmatprep.subr.bf16.mxu1 %v11411_v18  ;;  %v11478_v17 = vld [vmem:[%s15533_s1 + $0x1a80] ss:$8 sps:$4 sm:$0xff]   ;;  %v11483_v18 = vld [vmem:[%s15533_s1 + $0xa94] ss:$8 sps:$4 sm:$0xff]  }
 0x27a   : > { %8518 = vmatprep.subr.bf16.mxu0 %v11414_v19  ;;  %v11486_v19 = vld [vmem:[%s15533_s1 + $0x1a94] ss:$8 sps:$4 sm:$0xff]  }
 0x27c   : > { %7671 = vmatpush1.bf16.msra.mxu1 %v11409_v8  ;;  %v11481_v8 = vld [vmem:[%s15533_s1 + $0xa90] ss:$8 sps:$4 sm:$0xff]  }
 0x27d   : > { %8519 = vmatpush1.bf16.msra.mxu0 %v11412_v9  ;;  %7672 = vmatprep.subr.bf16.mxu1 %v11417_v10  ;;  %v11484_v9 = vld [vmem:[%s15533_s1 + $0x1a90] ss:$8 sps:$4 sm:$0xff]   ;;  %v11489_v10 = vld [vmem:[%s15533_s1 + $0xaa4] ss:$8 sps:$4 sm:$0xff]  }
 0x27e   : > { %8520 = vmatprep.subr.bf16.mxu0 %v11420_v13  ;;  %v11492_v13 = vld [vmem:[%s15533_s1 + $0x1aa4] ss:$8 sps:$4 sm:$0xff]  }
 0x280   : > { %7673 = vmatpush1.bf16.msra.mxu1 %v11415_v11  ;;  %v11487_v11 = vld [vmem:[%s15533_s1 + $0xaa0] ss:$8 sps:$4 sm:$0xff]  }
 0x281   : > { %8521 = vmatpush1.bf16.msra.mxu0 %v11418_v12  ;;  %7674 = vmatprep.subr.bf16.mxu1 %v11423_v14  ;;  %v11490_v12 = vld [vmem:[%s15533_s1 + $0x1aa0] ss:$8 sps:$4 sm:$0xff]   ;;  %v11495_v14 = vld [vmem:[%s15533_s1 + $0xab4] ss:$8 sps:$4 sm:$0xff]  }
 0x282   : > { %8522 = vmatprep.subr.bf16.mxu0 %v11426_v15  ;;  %v11498_v15 = vld [vmem:[%s15533_s1 + $0x1ab4] ss:$8 sps:$4 sm:$0xff]  }
 0x284   : > { %7675 = vmatpush1.bf16.msra.mxu1 %v11421_v20  ;;  %v11493_v20 = vld [vmem:[%s15533_s1 + $0xab0] ss:$8 sps:$4 sm:$0xff]  }
 0x285   : > { %8523 = vmatpush1.bf16.msra.mxu0 %v11424_v21  ;;  %7697 = vmatprep.subr.bf16.mxu1 %v11429_v22  ;;  %v11496_v21 = vld [vmem:[%s15533_s1 + $0x1ab0] ss:$8 sps:$4 sm:$0xff]   ;;  %v11501_v22 = vld [vmem:[%s15533_s1 + $0xac4] ss:$8 sps:$4 sm:$0xff]  }
 0x286   : > { %8545 = vmatprep.subr.bf16.mxu0 %v11432_v23  ;;  %v11504_v23 = vld [vmem:[%s15533_s1 + $0x1ac4] ss:$8 sps:$4 sm:$0xff]  }
 0x287   : > { %7677 = vmatmul.mubr.bf16.vlgmr.msra.gmra.mrb[0].mxu1 %v9041_v33  ;;  %v11502_v33 = vld [vmem:[%s15533_s1 + $0x1ac0] ss:$8 sps:$4 sm:$0xff]  }
 0x288   : > { %8525 = vmatmul.mubr.bf16.vlgmr.msra.gmra.mrb[0].mxu0 %v9073_v34  ;;  %7698 = vmatpush1.bf16.msra.mxu1 %v11427_v26  ;;  %v11507_v34 = vld [vmem:[%s15533_s1 + $0xad4] ss:$8 sps:$4 sm:$0xff]   ;;  %v11513_v26 = vld [vmem:[%s15533_s1 + $0xae4] ss:$8 sps:$4 sm:$0xff]  }
 0x289   : > { %8546 = vmatpush1.bf16.msra.mxu0 %v11430_v27  ;;  %7699 = vmatprep.subr.bf16.mxu1 %v11435_v28  ;;  %v11516_v27 = vld [vmem:[%s15533_s1 + $0x1ae4] ss:$8 sps:$4 sm:$0xff]   ;;  %v11511_v28 = vld [vmem:[%s15533_s1 + $0xae0] ss:$8 sps:$4 sm:$0xff]  }
 0x28a   : > { %8547 = vmatprep.subr.bf16.mxu0 %v11438_v29  ;;  %7686 = vmatprep.mubr.bf16.mxu1 %v9106_v30  ;;  %v11514_v29 = vld [vmem:[%s15533_s1 + $0x1ae0] ss:$8 sps:$4 sm:$0xff]   ;;  %v11519_v30 = vld [vmem:[%s15533_s1 + $0xaf4] ss:$8 sps:$4 sm:$0xff]  }
 0x28b   : > { %8534 = vmatprep.mubr.bf16.mxu0 %v9138_v31  ;;  %v11522_v31 = vld [vmem:[%s15533_s1 + $0x1af4] ss:$8 sps:$4 sm:$0xff]  }
 0x28c   : > { %7700 = vmatpush1.bf16.msra.mxu1 %v11433_v36  ;;  %v11517_v36 = vld [vmem:[%s15533_s1 + $0xaf0] ss:$8 sps:$4 sm:$0xff]  }
 0x28d   : > { %8548 = vmatpush1.bf16.msra.mxu0 %v11436_v37  ;;  %7701 = vmatprep.subr.bf16.mxu1 %v11441_v38  ;;  %v11520_v37 = vld [vmem:[%s15533_s1 + $0x1af0] ss:$8 sps:$4 sm:$0xff]   ;;  %v11525_v38 = vld [vmem:[%s15533_s1 + $0xb04] ss:$8 sps:$4 sm:$0xff]  }
 0x28e   : > { %8549 = vmatprep.subr.bf16.mxu0 %v11444_v39  ;;  %v11528_v39 = vld [vmem:[%s15533_s1 + $0x1b04] ss:$8 sps:$4 sm:$0xff]  }
 0x28f   : > { %7687 = vmatmul.mubr.bf16.gmra.mrb[4].mxu1 %v9105_v49  ;;  %v317_v49 = vld [vmem:[%s12206_s12 + $0x250] sm:$0xff] }
 0x290   : > { %8535 = vmatmul.mubr.bf16.gmra.mrb[4].mxu0 %v9137_v50  ;;  %7702 = vmatpush1.bf16.msra.mxu1 %v11439_v54  ;;  %v9043_v50 = vcombine.low %v14251_v48, %v14254_v51  ;;  %v9075_v54 = vcombine.low %v14257_v52, %v14260_v53  ;;  %v11531_v48 = vld [vmem:[%s15533_s1 + $0xb14] ss:$8 sps:$4 sm:$0xff]  }
 0x291   : > { %8550 = vmatpush1.bf16.msra.mxu0 %v11442_v42  ;;  %7703 = vmatprep.subr.bf16.mxu1 %v11447_v40  ;;  %v349_v42 = vld [vmem:[%s12206_s12 + $0x350] sm:$0xff] }
 0x292   : > { %8551 = vmatprep.subr.bf16.mxu0 %v11450_v41  ;;  %7729 = vmatprep.mubr.bf16.mxu1 %v9044_v43  ;;  %v333_v40 = vld [vmem:[%s12206_s12 + $0x2d0] sm:$0xff]  ;;  %v11523_v43 = vld [vmem:[%s15533_s1 + $0xb00] ss:$8 sps:$4 sm:$0xff]   ;;  %v9108_v52 = vcombine.high %v317_v49, %v349_v42 }
 0x293   : > { %8577 = vmatprep.mubr.bf16.mxu0 %v9076_v44  ;;  %v365_v41 = vld [vmem:[%s12206_s12 + $0x3d0] sm:$0xff]  ;;  %v11526_v44 = vld [vmem:[%s15533_s1 + $0x1b00] ss:$8 sps:$4 sm:$0xff]  }
 0x294   : > { %7704 = vmatpush1.bf16.msra.mxu1 %v11445_v45  ;;  %v11534_v51 = vld [vmem:[%s15533_s1 + $0x1b14] ss:$8 sps:$4 sm:$0xff]   ;;  %v9140_v53 = vcombine.high %v333_v40, %v365_v41  ;;  %v11529_v45 = vld [vmem:[%s15533_s1 + $0xb10] ss:$8 sps:$4 sm:$0xff]  }
 0x295   : > { %8552 = vmatpush1.bf16.msra.mxu0 %v11448_v46  ;;  %7705 = vmatprep.subr.bf16.mxu1 %v11453_v47  ;;  %v11532_v46 = vld [vmem:[%s15533_s1 + $0x1b10] ss:$8 sps:$4 sm:$0xff]   ;;  %v11537_v47 = vld [vmem:[%s15533_s1 + $0xb24] ss:$8 sps:$4 sm:$0xff]  }
 0x296   : > { %8553 = vmatprep.subr.bf16.mxu0 %v11456_v55  ;;  %v11540_v55 = vld [vmem:[%s15533_s1 + $0x1b24] ss:$8 sps:$4 sm:$0xff]  }
 0x298   : > { %7706 = vmatpush1.bf16.msra.mxu1 %v11451_v0  ;;  %v14467_v0 = vld [vmem:[%s12206_s12 + $0x58] sm:$0xff] }
 0x299   : > { %8554 = vmatpush1.bf16.msra.mxu0 %v11454_v1  ;;  %7707 = vmatprep.subr.bf16.mxu1 %v11459_v2  ;;  %v9107_v1 = vcombine.low %v317_v49, %v349_v42  ;;  %v9139_v2 = vcombine.low %v333_v40, %v365_v41  ;;  %v11595_v49 = vld [vmem:[%s15533_s1 + $0xbc0] ss:$8 sps:$4 sm:$0xff]   ;;  %v11606_v42 = vld [vmem:[%s15533_s1 + $0x1bd4] ss:$8 sps:$4 sm:$0xff]   ;;  %v11601_v40 = vld [vmem:[%s15533_s1 + $0xbd0] ss:$8 sps:$4 sm:$0xff]  }
 0x29a   : > { %8555 = vmatprep.subr.bf16.mxu0 %v11462_v3  ;;  %v14470_v3 = vld [vmem:[%s12206_s12 + $0x158] sm:$0xff] }
 0x29b   : > { %v11604_v41 = vld [vmem:[%s15533_s1 + $0x1bd0] ss:$8 sps:$4 sm:$0xff]  }
 0x29c   : > { %7708 = vmatpush1.bf16.msra.mxu1 %v11457_v4  ;;  %v14473_v4 = vld [vmem:[%s12206_s12 + $0xd8] sm:$0xff] }
 0x29d   : > { %8556 = vmatpush1.bf16.msra.mxu0 %v11460_v5  ;;  %7709 = vmatprep.subr.bf16.mxu1 %v11465_v58  ;;  %v14476_v5 = vld [vmem:[%s12206_s12 + $0x1d8] sm:$0xff]  ;;  %v11535_v58 = vld [vmem:[%s15533_s1 + $0xb20] ss:$8 sps:$4 sm:$0xff]  }
 0x29e   : > { %8557 = vmatprep.subr.bf16.mxu0 %v11468_v59  ;;  %v11538_v59 = vld [vmem:[%s15533_s1 + $0x1b20] ss:$8 sps:$4 sm:$0xff]  }
 0x2a0   : > { %7710 = vmatpush1.bf16.msra.mxu1 %v11463_v56  ;;  %v11543_v56 = vld [vmem:[%s15533_s1 + $0xb34] ss:$8 sps:$4 sm:$0xff]  }
 0x2a1   : > { %8558 = vmatpush1.bf16.msra.mxu0 %v11466_v57  ;;  %7711 = vmatprep.subr.bf16.mxu1 %v11471_v60  ;;  %v11546_v57 = vld [vmem:[%s15533_s1 + $0x1b34] ss:$8 sps:$4 sm:$0xff]   ;;  %v9046_v60 = vcombine.high %v14467_v0, %v14470_v3 }
 0x2a2   : > { %8559 = vmatprep.subr.bf16.mxu0 %v11474_v61  ;;  %v9078_v61 = vcombine.high %v14473_v4, %v14476_v5 }
 0x2a4   : > { %7712 = vmatpush1.bf16.msra.mxu1 %v11469_v62  ;;  %v11541_v62 = vld [vmem:[%s15533_s1 + $0xb30] ss:$8 sps:$4 sm:$0xff]  }
 0x2a5   : > { %8560 = vmatpush1.bf16.msra.mxu0 %v11472_v63  ;;  %7713 = vmatprep.subr.bf16.mxu1 %v11477_v6  ;;  %v11544_v63 = vld [vmem:[%s15533_s1 + $0x1b30] ss:$8 sps:$4 sm:$0xff]   ;;  %v11549_v6 = vld [vmem:[%s15533_s1 + $0xb44] ss:$8 sps:$4 sm:$0xff]  }
 0x2a6   : > { %8561 = vmatprep.subr.bf16.mxu0 %v11480_v7  ;;  %v11552_v7 = vld [vmem:[%s15533_s1 + $0x1b44] ss:$8 sps:$4 sm:$0xff]  }
 0x2a8   : > { %7714 = vmatpush1.bf16.msra.mxu1 %v11475_v16  ;;  %v11547_v16 = vld [vmem:[%s15533_s1 + $0xb40] ss:$8 sps:$4 sm:$0xff]  }
 0x2a9   : > { %8562 = vmatpush1.bf16.msra.mxu0 %v11478_v17  ;;  %7715 = vmatprep.subr.bf16.mxu1 %v11483_v18  ;;  %v11550_v17 = vld [vmem:[%s15533_s1 + $0x1b40] ss:$8 sps:$4 sm:$0xff]   ;;  %v11555_v18 = vld [vmem:[%s15533_s1 + $0xb54] ss:$8 sps:$4 sm:$0xff]  }
 0x2aa   : > { %8563 = vmatprep.subr.bf16.mxu0 %v11486_v19  ;;  %v11558_v19 = vld [vmem:[%s15533_s1 + $0x1b54] ss:$8 sps:$4 sm:$0xff]  }
 0x2ac   : > { %7716 = vmatpush1.bf16.msra.mxu1 %v11481_v8  ;;  %v11553_v8 = vld [vmem:[%s15533_s1 + $0xb50] ss:$8 sps:$4 sm:$0xff]  }
 0x2ad   : > { %8564 = vmatpush1.bf16.msra.mxu0 %v11484_v9  ;;  %7717 = vmatprep.subr.bf16.mxu1 %v11489_v10  ;;  %v11556_v9 = vld [vmem:[%s15533_s1 + $0x1b50] ss:$8 sps:$4 sm:$0xff]   ;;  %v11561_v10 = vld [vmem:[%s15533_s1 + $0xb64] ss:$8 sps:$4 sm:$0xff]  }
 0x2ae   : > { %8565 = vmatprep.subr.bf16.mxu0 %v11492_v13  ;;  %v11564_v13 = vld [vmem:[%s15533_s1 + $0x1b64] ss:$8 sps:$4 sm:$0xff]  }
 0x2b0   : > { %7718 = vmatpush1.bf16.msra.mxu1 %v11487_v11  ;;  %v11559_v11 = vld [vmem:[%s15533_s1 + $0xb60] ss:$8 sps:$4 sm:$0xff]  }
 0x2b1   : > { %8566 = vmatpush1.bf16.msra.mxu0 %v11490_v12  ;;  %7719 = vmatprep.subr.bf16.mxu1 %v11495_v14  ;;  %v11562_v12 = vld [vmem:[%s15533_s1 + $0x1b60] ss:$8 sps:$4 sm:$0xff]   ;;  %v11567_v14 = vld [vmem:[%s15533_s1 + $0xb74] ss:$8 sps:$4 sm:$0xff]  }
 0x2b2   : > { %8567 = vmatprep.subr.bf16.mxu0 %v11498_v15  ;;  %v11570_v15 = vld [vmem:[%s15533_s1 + $0x1b74] ss:$8 sps:$4 sm:$0xff]  }
 0x2b4   : > { %7720 = vmatpush1.bf16.msra.mxu1 %v11493_v20  ;;  %v11565_v20 = vld [vmem:[%s15533_s1 + $0xb70] ss:$8 sps:$4 sm:$0xff]  }
 0x2b5   : > { %8568 = vmatpush1.bf16.msra.mxu0 %v11496_v21  ;;  %7721 = vmatprep.subr.bf16.mxu1 %v11501_v22  ;;  %v11568_v21 = vld [vmem:[%s15533_s1 + $0x1b70] ss:$8 sps:$4 sm:$0xff]   ;;  %v11573_v22 = vld [vmem:[%s15533_s1 + $0xb84] ss:$8 sps:$4 sm:$0xff]  }
 0x2b6   : > { %8569 = vmatprep.subr.bf16.mxu0 %v11504_v23  ;;  %v11576_v23 = vld [vmem:[%s15533_s1 + $0x1b84] ss:$8 sps:$4 sm:$0xff]  }
 0x2b8   : > { %7722 = vmatpush1.bf16.msra.mxu1 %v11499_v32  ;;  %v11571_v32 = vld [vmem:[%s15533_s1 + $0xb80] ss:$8 sps:$4 sm:$0xff]  }
 0x2b9   : > { %8570 = vmatpush1.bf16.msra.mxu0 %v11502_v33  ;;  %7723 = vmatprep.subr.bf16.mxu1 %v11507_v34  ;;  %v11574_v33 = vld [vmem:[%s15533_s1 + $0x1b80] ss:$8 sps:$4 sm:$0xff]   ;;  %v11579_v34 = vld [vmem:[%s15533_s1 + $0xb94] ss:$8 sps:$4 sm:$0xff]  }
 0x2ba   : > { %8571 = vmatprep.subr.bf16.mxu0 %v11510_v35  ;;  %v11582_v35 = vld [vmem:[%s15533_s1 + $0x1b94] ss:$8 sps:$4 sm:$0xff]  }
 0x2bc   : > { %7724 = vmatpush1.bf16.msra.mxu1 %v11505_v24  ;;  %v11577_v24 = vld [vmem:[%s15533_s1 + $0xb90] ss:$8 sps:$4 sm:$0xff]  }
 0x2bd   : > { %8572 = vmatpush1.bf16.msra.mxu0 %v11508_v25  ;;  %7725 = vmatprep.subr.bf16.mxu1 %v11513_v26  ;;  %v11580_v25 = vld [vmem:[%s15533_s1 + $0x1b90] ss:$8 sps:$4 sm:$0xff]   ;;  %v11585_v26 = vld [vmem:[%s15533_s1 + $0xba4] ss:$8 sps:$4 sm:$0xff]  }
 0x2be   : > { %8573 = vmatprep.subr.bf16.mxu0 %v11516_v27  ;;  %v11588_v27 = vld [vmem:[%s15533_s1 + $0x1ba4] ss:$8 sps:$4 sm:$0xff]  }
 0x2c0   : > { %7726 = vmatpush1.bf16.msra.mxu1 %v11511_v28  ;;  %v11583_v28 = vld [vmem:[%s15533_s1 + $0xba0] ss:$8 sps:$4 sm:$0xff]  }
 0x2c1   : > { %8574 = vmatpush1.bf16.msra.mxu0 %v11514_v29  ;;  %7727 = vmatprep.subr.bf16.mxu1 %v11519_v30  ;;  %v11586_v29 = vld [vmem:[%s15533_s1 + $0x1ba0] ss:$8 sps:$4 sm:$0xff]   ;;  %v11591_v30 = vld [vmem:[%s15533_s1 + $0xbb4] ss:$8 sps:$4 sm:$0xff]  }
 0x2c2   : > { %8575 = vmatprep.subr.bf16.mxu0 %v11522_v31  ;;  %v11594_v31 = vld [vmem:[%s15533_s1 + $0x1bb4] ss:$8 sps:$4 sm:$0xff]  }
 0x2c4   : > { %7728 = vmatpush1.bf16.msra.mxu1 %v11517_v36  ;;  %v11589_v36 = vld [vmem:[%s15533_s1 + $0xbb0] ss:$8 sps:$4 sm:$0xff]  }
 0x2c5   : > { %8576 = vmatpush1.bf16.msra.mxu0 %v11520_v37  ;;  %7750 = vmatprep.subr.bf16.mxu1 %v11525_v38  ;;  %v11592_v37 = vld [vmem:[%s15533_s1 + $0x1bb0] ss:$8 sps:$4 sm:$0xff]   ;;  %v11597_v38 = vld [vmem:[%s15533_s1 + $0xbc4] ss:$8 sps:$4 sm:$0xff]  }
 0x2c6   : > { %8598 = vmatprep.subr.bf16.mxu0 %v11528_v39  ;;  %v11600_v39 = vld [vmem:[%s15533_s1 + $0x1bc4] ss:$8 sps:$4 sm:$0xff]  }
 0x2c7   : > { %7730 = vmatmul.mubr.bf16.vlgmr.msra.gmra.mrb[0].mxu1 %v9043_v50  ;;  %v11598_v50 = vld [vmem:[%s15533_s1 + $0x1bc0] ss:$8 sps:$4 sm:$0xff]  }
 0x2c8   : > { %8578 = vmatmul.mubr.bf16.vlgmr.msra.gmra.mrb[0].mxu0 %v9075_v54  ;;  %7751 = vmatpush1.bf16.msra.mxu1 %v11523_v43  ;;  %v11603_v54 = vld [vmem:[%s15533_s1 + $0xbd4] ss:$8 sps:$4 sm:$0xff]   ;;  %v11609_v43 = vld [vmem:[%s15533_s1 + $0xbe4] ss:$8 sps:$4 sm:$0xff]  }
 0x2c9   : > { %8599 = vmatpush1.bf16.msra.mxu0 %v11526_v44  ;;  %7752 = vmatprep.subr.bf16.mxu1 %v11531_v48  ;;  %v11612_v44 = vld [vmem:[%s15533_s1 + $0x1be4] ss:$8 sps:$4 sm:$0xff]   ;;  %v11607_v48 = vld [vmem:[%s15533_s1 + $0xbe0] ss:$8 sps:$4 sm:$0xff]  }
 0x2ca   : > { %8600 = vmatprep.subr.bf16.mxu0 %v11534_v51  ;;  %7739 = vmatprep.mubr.bf16.mxu1 %v9108_v52  ;;  %v11610_v51 = vld [vmem:[%s15533_s1 + $0x1be0] ss:$8 sps:$4 sm:$0xff]   ;;  %v11615_v52 = vld [vmem:[%s15533_s1 + $0xbf4] ss:$8 sps:$4 sm:$0xff]  }
 0x2cb   : > { %8587 = vmatprep.mubr.bf16.mxu0 %v9140_v53  ;;  %v11618_v53 = vld [vmem:[%s15533_s1 + $0x1bf4] ss:$8 sps:$4 sm:$0xff]  }
 0x2cc   : > { %7753 = vmatpush1.bf16.msra.mxu1 %v11529_v45  ;;  %v11613_v45 = vld [vmem:[%s15533_s1 + $0xbf0] ss:$8 sps:$4 sm:$0xff]  }
 0x2cd   : > { %8601 = vmatpush1.bf16.msra.mxu0 %v11532_v46  ;;  %7754 = vmatprep.subr.bf16.mxu1 %v11537_v47  ;;  %v11616_v46 = vld [vmem:[%s15533_s1 + $0x1bf0] ss:$8 sps:$4 sm:$0xff]   ;;  %v11621_v47 = vld [vmem:[%s15533_s1 + $0xc04] ss:$8 sps:$4 sm:$0xff]  }
 0x2ce   : > { %8602 = vmatprep.subr.bf16.mxu0 %v11540_v55  ;;  %v11624_v55 = vld [vmem:[%s15533_s1 + $0x1c04] ss:$8 sps:$4 sm:$0xff]  }
 0x2cf   : > { %7740 = vmatmul.mubr.bf16.gmra.mrb[4].mxu1 %v9107_v1  ;;  %v318_v1 = vld [vmem:[%s12206_s12 + $0x258] sm:$0xff] }
 0x2d0   : > { %8588 = vmatmul.mubr.bf16.gmra.mrb[4].mxu0 %v9139_v2  ;;  %7755 = vmatpush1.bf16.msra.mxu1 %v11535_v58  ;;  %v9045_v2 = vcombine.low %v14467_v0, %v14470_v3  ;;  %v9077_v58 = vcombine.low %v14473_v4, %v14476_v5  ;;  %v11627_v0 = vld [vmem:[%s15533_s1 + $0xc14] ss:$8 sps:$4 sm:$0xff]  }
 0x2d1   : > { %8603 = vmatpush1.bf16.msra.mxu0 %v11538_v59  ;;  %7756 = vmatprep.subr.bf16.mxu1 %v11543_v56  ;;  %v350_v59 = vld [vmem:[%s12206_s12 + $0x358] sm:$0xff] }
 0x2d2   : > { %8604 = vmatprep.subr.bf16.mxu0 %v11546_v57  ;;  %7782 = vmatprep.mubr.bf16.mxu1 %v9046_v60  ;;  %v334_v56 = vld [vmem:[%s12206_s12 + $0x2d8] sm:$0xff]  ;;  %v11619_v60 = vld [vmem:[%s15533_s1 + $0xc00] ss:$8 sps:$4 sm:$0xff]   ;;  %v9110_v4 = vcombine.high %v318_v1, %v350_v59 }
 0x2d3   : > { %8630 = vmatprep.mubr.bf16.mxu0 %v9078_v61  ;;  %v366_v57 = vld [vmem:[%s12206_s12 + $0x3d8] sm:$0xff]  ;;  %v11622_v61 = vld [vmem:[%s15533_s1 + $0x1c00] ss:$8 sps:$4 sm:$0xff]  }
 0x2d4   : > { %7757 = vmatpush1.bf16.msra.mxu1 %v11541_v62  ;;  %v11630_v3 = vld [vmem:[%s15533_s1 + $0x1c14] ss:$8 sps:$4 sm:$0xff]   ;;  %v9142_v5 = vcombine.high %v334_v56, %v366_v57  ;;  %v11625_v62 = vld [vmem:[%s15533_s1 + $0xc10] ss:$8 sps:$4 sm:$0xff]  }
 0x2d5   : > { %8605 = vmatpush1.bf16.msra.mxu0 %v11544_v63  ;;  %7758 = vmatprep.subr.bf16.mxu1 %v11549_v6  ;;  %v11628_v63 = vld [vmem:[%s15533_s1 + $0x1c10] ss:$8 sps:$4 sm:$0xff]   ;;  %v11633_v6 = vld [vmem:[%s15533_s1 + $0xc24] ss:$8 sps:$4 sm:$0xff]  }
 0x2d6   : > { %8606 = vmatprep.subr.bf16.mxu0 %v11552_v7  ;;  %v11636_v7 = vld [vmem:[%s15533_s1 + $0x1c24] ss:$8 sps:$4 sm:$0xff]  }
 0x2d8   : > { %7759 = vmatpush1.bf16.msra.mxu1 %v11547_v16  ;;  %v14683_v16 = vld [vmem:[%s12206_s12 + $0x60] sm:$0xff] }
 0x2d9   : > { %8607 = vmatpush1.bf16.msra.mxu0 %v11550_v17  ;;  %7760 = vmatprep.subr.bf16.mxu1 %v11555_v18  ;;  %v9109_v17 = vcombine.low %v318_v1, %v350_v59  ;;  %v9141_v18 = vcombine.low %v334_v56, %v366_v57  ;;  %v11691_v1 = vld [vmem:[%s15533_s1 + $0xcc0] ss:$8 sps:$4 sm:$0xff]   ;;  %v11702_v59 = vld [vmem:[%s15533_s1 + $0x1cd4] ss:$8 sps:$4 sm:$0xff]   ;;  %v11697_v56 = vld [vmem:[%s15533_s1 + $0xcd0] ss:$8 sps:$4 sm:$0xff]  }
 0x2da   : > { %8608 = vmatprep.subr.bf16.mxu0 %v11558_v19  ;;  %v14686_v19 = vld [vmem:[%s12206_s12 + $0x160] sm:$0xff]  ;;  %v11700_v57 = vld [vmem:[%s15533_s1 + $0x1cd0] ss:$8 sps:$4 sm:$0xff]  }
 0x2dc   : > { %7761 = vmatpush1.bf16.msra.mxu1 %v11553_v8  ;;  %v14689_v8 = vld [vmem:[%s12206_s12 + $0xe0] sm:$0xff] }
 0x2dd   : > { %8609 = vmatpush1.bf16.msra.mxu0 %v11556_v9  ;;  %7762 = vmatprep.subr.bf16.mxu1 %v11561_v10  ;;  %v14692_v9 = vld [vmem:[%s12206_s12 + $0x1e0] sm:$0xff] }
 0x2de   : > { %8610 = vmatprep.subr.bf16.mxu0 %v11564_v13  ;;  %v11631_v10 = vld [vmem:[%s15533_s1 + $0xc20] ss:$8 sps:$4 sm:$0xff]  }
 0x2df   : > { %v11634_v13 = vld [vmem:[%s15533_s1 + $0x1c20] ss:$8 sps:$4 sm:$0xff]  }
 0x2e0   : > { %7763 = vmatpush1.bf16.msra.mxu1 %v11559_v11  ;;  %v11639_v11 = vld [vmem:[%s15533_s1 + $0xc34] ss:$8 sps:$4 sm:$0xff]  }
 0x2e1   : > { %8611 = vmatpush1.bf16.msra.mxu0 %v11562_v12  ;;  %7764 = vmatprep.subr.bf16.mxu1 %v11567_v14  ;;  %v11642_v12 = vld [vmem:[%s15533_s1 + $0x1c34] ss:$8 sps:$4 sm:$0xff]   ;;  %v9048_v14 = vcombine.high %v14683_v16, %v14686_v19 }
 0x2e2   : > { %8612 = vmatprep.subr.bf16.mxu0 %v11570_v15  ;;  %v9080_v15 = vcombine.high %v14689_v8, %v14692_v9 }
 0x2e4   : > { %7765 = vmatpush1.bf16.msra.mxu1 %v11565_v20  ;;  %v11637_v20 = vld [vmem:[%s15533_s1 + $0xc30] ss:$8 sps:$4 sm:$0xff]  }
 0x2e5   : > { %8613 = vmatpush1.bf16.msra.mxu0 %v11568_v21  ;;  %7766 = vmatprep.subr.bf16.mxu1 %v11573_v22  ;;  %v11640_v21 = vld [vmem:[%s15533_s1 + $0x1c30] ss:$8 sps:$4 sm:$0xff]   ;;  %v11645_v22 = vld [vmem:[%s15533_s1 + $0xc44] ss:$8 sps:$4 sm:$0xff]  }
 0x2e6   : > { %8614 = vmatprep.subr.bf16.mxu0 %v11576_v23  ;;  %v11648_v23 = vld [vmem:[%s15533_s1 + $0x1c44] ss:$8 sps:$4 sm:$0xff]  }
 0x2e8   : > { %7767 = vmatpush1.bf16.msra.mxu1 %v11571_v32  ;;  %v11643_v32 = vld [vmem:[%s15533_s1 + $0xc40] ss:$8 sps:$4 sm:$0xff]  }
 0x2e9   : > { %8615 = vmatpush1.bf16.msra.mxu0 %v11574_v33  ;;  %7768 = vmatprep.subr.bf16.mxu1 %v11579_v34  ;;  %v11646_v33 = vld [vmem:[%s15533_s1 + $0x1c40] ss:$8 sps:$4 sm:$0xff]   ;;  %v11651_v34 = vld [vmem:[%s15533_s1 + $0xc54] ss:$8 sps:$4 sm:$0xff]  }
 0x2ea   : > { %8616 = vmatprep.subr.bf16.mxu0 %v11582_v35  ;;  %v11654_v35 = vld [vmem:[%s15533_s1 + $0x1c54] ss:$8 sps:$4 sm:$0xff]  }
 0x2ec   : > { %7769 = vmatpush1.bf16.msra.mxu1 %v11577_v24  ;;  %v11649_v24 = vld [vmem:[%s15533_s1 + $0xc50] ss:$8 sps:$4 sm:$0xff]  }
 0x2ed   : > { %8617 = vmatpush1.bf16.msra.mxu0 %v11580_v25  ;;  %7770 = vmatprep.subr.bf16.mxu1 %v11585_v26  ;;  %v11652_v25 = vld [vmem:[%s15533_s1 + $0x1c50] ss:$8 sps:$4 sm:$0xff]   ;;  %v11657_v26 = vld [vmem:[%s15533_s1 + $0xc64] ss:$8 sps:$4 sm:$0xff]  }
 0x2ee   : > { %8618 = vmatprep.subr.bf16.mxu0 %v11588_v27  ;;  %v11660_v27 = vld [vmem:[%s15533_s1 + $0x1c64] ss:$8 sps:$4 sm:$0xff]  }
 0x2f0   : > { %7771 = vmatpush1.bf16.msra.mxu1 %v11583_v28  ;;  %v11655_v28 = vld [vmem:[%s15533_s1 + $0xc60] ss:$8 sps:$4 sm:$0xff]  }
 0x2f1   : > { %8619 = vmatpush1.bf16.msra.mxu0 %v11586_v29  ;;  %7772 = vmatprep.subr.bf16.mxu1 %v11591_v30  ;;  %v11658_v29 = vld [vmem:[%s15533_s1 + $0x1c60] ss:$8 sps:$4 sm:$0xff]   ;;  %v11663_v30 = vld [vmem:[%s15533_s1 + $0xc74] ss:$8 sps:$4 sm:$0xff]  }
 0x2f2   : > { %8620 = vmatprep.subr.bf16.mxu0 %v11594_v31  ;;  %v11666_v31 = vld [vmem:[%s15533_s1 + $0x1c74] ss:$8 sps:$4 sm:$0xff]  }
 0x2f4   : > { %7773 = vmatpush1.bf16.msra.mxu1 %v11589_v36  ;;  %v11661_v36 = vld [vmem:[%s15533_s1 + $0xc70] ss:$8 sps:$4 sm:$0xff]  }
 0x2f5   : > { %8621 = vmatpush1.bf16.msra.mxu0 %v11592_v37  ;;  %7774 = vmatprep.subr.bf16.mxu1 %v11597_v38  ;;  %v11664_v37 = vld [vmem:[%s15533_s1 + $0x1c70] ss:$8 sps:$4 sm:$0xff]   ;;  %v11669_v38 = vld [vmem:[%s15533_s1 + $0xc84] ss:$8 sps:$4 sm:$0xff]  }
 0x2f6   : > { %8622 = vmatprep.subr.bf16.mxu0 %v11600_v39  ;;  %v11672_v39 = vld [vmem:[%s15533_s1 + $0x1c84] ss:$8 sps:$4 sm:$0xff]  }
 0x2f8   : > { %7775 = vmatpush1.bf16.msra.mxu1 %v11595_v49  ;;  %v11667_v49 = vld [vmem:[%s15533_s1 + $0xc80] ss:$8 sps:$4 sm:$0xff]  }
 0x2f9   : > { %8623 = vmatpush1.bf16.msra.mxu0 %v11598_v50  ;;  %7776 = vmatprep.subr.bf16.mxu1 %v11603_v54  ;;  %v11670_v50 = vld [vmem:[%s15533_s1 + $0x1c80] ss:$8 sps:$4 sm:$0xff]   ;;  %v11675_v54 = vld [vmem:[%s15533_s1 + $0xc94] ss:$8 sps:$4 sm:$0xff]  }
 0x2fa   : > { %8624 = vmatprep.subr.bf16.mxu0 %v11606_v42  ;;  %v11678_v42 = vld [vmem:[%s15533_s1 + $0x1c94] ss:$8 sps:$4 sm:$0xff]  }
 0x2fc   : > { %7777 = vmatpush1.bf16.msra.mxu1 %v11601_v40  ;;  %v11673_v40 = vld [vmem:[%s15533_s1 + $0xc90] ss:$8 sps:$4 sm:$0xff]  }
 0x2fd   : > { %8625 = vmatpush1.bf16.msra.mxu0 %v11604_v41  ;;  %7778 = vmatprep.subr.bf16.mxu1 %v11609_v43  ;;  %v11676_v41 = vld [vmem:[%s15533_s1 + $0x1c90] ss:$8 sps:$4 sm:$0xff]   ;;  %v11681_v43 = vld [vmem:[%s15533_s1 + $0xca4] ss:$8 sps:$4 sm:$0xff]  }
 0x2fe   : > { %8626 = vmatprep.subr.bf16.mxu0 %v11612_v44  ;;  %v11684_v44 = vld [vmem:[%s15533_s1 + $0x1ca4] ss:$8 sps:$4 sm:$0xff]  }
 0x300   : > { %7779 = vmatpush1.bf16.msra.mxu1 %v11607_v48  ;;  %v11679_v48 = vld [vmem:[%s15533_s1 + $0xca0] ss:$8 sps:$4 sm:$0xff]  }
 0x301   : > { %8627 = vmatpush1.bf16.msra.mxu0 %v11610_v51  ;;  %7780 = vmatprep.subr.bf16.mxu1 %v11615_v52  ;;  %v11682_v51 = vld [vmem:[%s15533_s1 + $0x1ca0] ss:$8 sps:$4 sm:$0xff]   ;;  %v11687_v52 = vld [vmem:[%s15533_s1 + $0xcb4] ss:$8 sps:$4 sm:$0xff]  }
 0x302   : > { %8628 = vmatprep.subr.bf16.mxu0 %v11618_v53  ;;  %v11690_v53 = vld [vmem:[%s15533_s1 + $0x1cb4] ss:$8 sps:$4 sm:$0xff]  }
 0x304   : > { %7781 = vmatpush1.bf16.msra.mxu1 %v11613_v45  ;;  %v11685_v45 = vld [vmem:[%s15533_s1 + $0xcb0] ss:$8 sps:$4 sm:$0xff]  }
 0x305   : > { %8629 = vmatpush1.bf16.msra.mxu0 %v11616_v46  ;;  %7803 = vmatprep.subr.bf16.mxu1 %v11621_v47  ;;  %v11688_v46 = vld [vmem:[%s15533_s1 + $0x1cb0] ss:$8 sps:$4 sm:$0xff]   ;;  %v11693_v47 = vld [vmem:[%s15533_s1 + $0xcc4] ss:$8 sps:$4 sm:$0xff]  }
 0x306   : > { %8651 = vmatprep.subr.bf16.mxu0 %v11624_v55  ;;  %v11696_v55 = vld [vmem:[%s15533_s1 + $0x1cc4] ss:$8 sps:$4 sm:$0xff]  }
 0x307   : > { %7783 = vmatmul.mubr.bf16.vlgmr.msra.gmra.mrb[0].mxu1 %v9045_v2  ;;  %v11694_v2 = vld [vmem:[%s15533_s1 + $0x1cc0] ss:$8 sps:$4 sm:$0xff]  }
 0x308   : > { %8631 = vmatmul.mubr.bf16.vlgmr.msra.gmra.mrb[0].mxu0 %v9077_v58  ;;  %7804 = vmatpush1.bf16.msra.mxu1 %v11619_v60  ;;  %v11699_v58 = vld [vmem:[%s15533_s1 + $0xcd4] ss:$8 sps:$4 sm:$0xff]   ;;  %v11705_v60 = vld [vmem:[%s15533_s1 + $0xce4] ss:$8 sps:$4 sm:$0xff]  }
 0x309   : > { %8652 = vmatpush1.bf16.msra.mxu0 %v11622_v61  ;;  %7805 = vmatprep.subr.bf16.mxu1 %v11627_v0  ;;  %v11708_v61 = vld [vmem:[%s15533_s1 + $0x1ce4] ss:$8 sps:$4 sm:$0xff]   ;;  %v11703_v0 = vld [vmem:[%s15533_s1 + $0xce0] ss:$8 sps:$4 sm:$0xff]  }
 0x30a   : > { %8653 = vmatprep.subr.bf16.mxu0 %v11630_v3  ;;  %7792 = vmatprep.mubr.bf16.mxu1 %v9110_v4  ;;  %v11706_v3 = vld [vmem:[%s15533_s1 + $0x1ce0] ss:$8 sps:$4 sm:$0xff]   ;;  %v11711_v4 = vld [vmem:[%s15533_s1 + $0xcf4] ss:$8 sps:$4 sm:$0xff]  }
 0x30b   : > { %8640 = vmatprep.mubr.bf16.mxu0 %v9142_v5  ;;  %v11714_v5 = vld [vmem:[%s15533_s1 + $0x1cf4] ss:$8 sps:$4 sm:$0xff]  }
 0x30c   : > { %7806 = vmatpush1.bf16.msra.mxu1 %v11625_v62  ;;  %v11709_v62 = vld [vmem:[%s15533_s1 + $0xcf0] ss:$8 sps:$4 sm:$0xff]  }
 0x30d   : > { %8654 = vmatpush1.bf16.msra.mxu0 %v11628_v63  ;;  %7807 = vmatprep.subr.bf16.mxu1 %v11633_v6  ;;  %v11712_v63 = vld [vmem:[%s15533_s1 + $0x1cf0] ss:$8 sps:$4 sm:$0xff]   ;;  %v11717_v6 = vld [vmem:[%s15533_s1 + $0xd04] ss:$8 sps:$4 sm:$0xff]  }
 0x30e   : > { %8655 = vmatprep.subr.bf16.mxu0 %v11636_v7  ;;  %v11720_v7 = vld [vmem:[%s15533_s1 + $0x1d04] ss:$8 sps:$4 sm:$0xff]  }
 0x30f   : > { %7793 = vmatmul.mubr.bf16.gmra.mrb[4].mxu1 %v9109_v17  ;;  %v319_v17 = vld [vmem:[%s12206_s12 + $0x260] sm:$0xff] }
 0x310   : > { %8641 = vmatmul.mubr.bf16.gmra.mrb[4].mxu0 %v9141_v18  ;;  %7808 = vmatpush1.bf16.msra.mxu1 %v11631_v10  ;;  %v9047_v18 = vcombine.low %v14683_v16, %v14686_v19  ;;  %v9079_v10 = vcombine.low %v14689_v8, %v14692_v9  ;;  %v11723_v16 = vld [vmem:[%s15533_s1 + $0xd14] ss:$8 sps:$4 sm:$0xff]  }
 0x311   : > { %8656 = vmatpush1.bf16.msra.mxu0 %v11634_v13  ;;  %7809 = vmatprep.subr.bf16.mxu1 %v11639_v11  ;;  %v351_v13 = vld [vmem:[%s12206_s12 + $0x360] sm:$0xff]  ;;  %v11726_v19 = vld [vmem:[%s15533_s1 + $0x1d14] ss:$8 sps:$4 sm:$0xff]  }
 0x312   : > { %8657 = vmatprep.subr.bf16.mxu0 %v11642_v12  ;;  %7835 = vmatprep.mubr.bf16.mxu1 %v9048_v14  ;;  %v335_v11 = vld [vmem:[%s12206_s12 + $0x2e0] sm:$0xff]  ;;  %v9112_v8 = vcombine.high %v319_v17, %v351_v13 }
 0x313   : > { %8683 = vmatprep.mubr.bf16.mxu0 %v9080_v15  ;;  %v367_v12 = vld [vmem:[%s12206_s12 + $0x3e0] sm:$0xff] }
 0x314   : > { %7810 = vmatpush1.bf16.msra.mxu1 %v11637_v20  ;;  %v11715_v14 = vld [vmem:[%s15533_s1 + $0xd00] ss:$8 sps:$4 sm:$0xff]   ;;  %v9144_v9 = vcombine.high %v335_v11, %v367_v12  ;;  %v11721_v20 = vld [vmem:[%s15533_s1 + $0xd10] ss:$8 sps:$4 sm:$0xff]  }
 0x315   : > { %8658 = vmatpush1.bf16.msra.mxu0 %v11640_v21  ;;  %7811 = vmatprep.subr.bf16.mxu1 %v11645_v22  ;;  %v11718_v15 = vld [vmem:[%s15533_s1 + $0x1d00] ss:$8 sps:$4 sm:$0xff]   ;;  %v11724_v21 = vld [vmem:[%s15533_s1 + $0x1d10] ss:$8 sps:$4 sm:$0xff]   ;;  %v11729_v22 = vld [vmem:[%s15533_s1 + $0xd24] ss:$8 sps:$4 sm:$0xff]  }
 0x316   : > { %8659 = vmatprep.subr.bf16.mxu0 %v11648_v23  ;;  %v11732_v23 = vld [vmem:[%s15533_s1 + $0x1d24] ss:$8 sps:$4 sm:$0xff]  }
 0x318   : > { %7812 = vmatpush1.bf16.msra.mxu1 %v11643_v32  ;;  %v14899_v32 = vld [vmem:[%s12206_s12 + $0x68] sm:$0xff] }
 0x319   : > { %8660 = vmatpush1.bf16.msra.mxu0 %v11646_v33  ;;  %7813 = vmatprep.subr.bf16.mxu1 %v11651_v34  ;;  %v9111_v33 = vcombine.low %v319_v17, %v351_v13  ;;  %v9143_v34 = vcombine.low %v335_v11, %v367_v12  ;;  %v11787_v17 = vld [vmem:[%s15533_s1 + $0xdc0] ss:$8 sps:$4 sm:$0xff]   ;;  %v11798_v13 = vld [vmem:[%s15533_s1 + $0x1dd4] ss:$8 sps:$4 sm:$0xff]   ;;  %v11793_v11 = vld [vmem:[%s15533_s1 + $0xdd0] ss:$8 sps:$4 sm:$0xff]  }
 0x31a   : > { %8661 = vmatprep.subr.bf16.mxu0 %v11654_v35  ;;  %v14902_v35 = vld [vmem:[%s12206_s12 + $0x168] sm:$0xff]  ;;  %v11796_v12 = vld [vmem:[%s15533_s1 + $0x1dd0] ss:$8 sps:$4 sm:$0xff]  }
 0x31c   : > { %7814 = vmatpush1.bf16.msra.mxu1 %v11649_v24  ;;  %v14905_v24 = vld [vmem:[%s12206_s12 + $0xe8] sm:$0xff] }
 0x31d   : > { %8662 = vmatpush1.bf16.msra.mxu0 %v11652_v25  ;;  %7815 = vmatprep.subr.bf16.mxu1 %v11657_v26  ;;  %v14908_v25 = vld [vmem:[%s12206_s12 + $0x1e8] sm:$0xff] }
 0x31e   : > { %8663 = vmatprep.subr.bf16.mxu0 %v11660_v27  ;;  %v11727_v26 = vld [vmem:[%s15533_s1 + $0xd20] ss:$8 sps:$4 sm:$0xff]  }
 0x31f   : > { %v11730_v27 = vld [vmem:[%s15533_s1 + $0x1d20] ss:$8 sps:$4 sm:$0xff]  }
 0x320   : > { %7816 = vmatpush1.bf16.msra.mxu1 %v11655_v28  ;;  %v11735_v28 = vld [vmem:[%s15533_s1 + $0xd34] ss:$8 sps:$4 sm:$0xff]  }
 0x321   : > { %8664 = vmatpush1.bf16.msra.mxu0 %v11658_v29  ;;  %7817 = vmatprep.subr.bf16.mxu1 %v11663_v30  ;;  %v11738_v29 = vld [vmem:[%s15533_s1 + $0x1d34] ss:$8 sps:$4 sm:$0xff]   ;;  %v9050_v30 = vcombine.high %v14899_v32, %v14902_v35 }
 0x322   : > { %8665 = vmatprep.subr.bf16.mxu0 %v11666_v31  ;;  %v9082_v31 = vcombine.high %v14905_v24, %v14908_v25 }
 0x324   : > { %7818 = vmatpush1.bf16.msra.mxu1 %v11661_v36  ;;  %v11733_v36 = vld [vmem:[%s15533_s1 + $0xd30] ss:$8 sps:$4 sm:$0xff]  }
 0x325   : > { %8666 = vmatpush1.bf16.msra.mxu0 %v11664_v37  ;;  %7819 = vmatprep.subr.bf16.mxu1 %v11669_v38  ;;  %v11736_v37 = vld [vmem:[%s15533_s1 + $0x1d30] ss:$8 sps:$4 sm:$0xff]   ;;  %v11741_v38 = vld [vmem:[%s15533_s1 + $0xd44] ss:$8 sps:$4 sm:$0xff]  }
 0x326   : > { %8667 = vmatprep.subr.bf16.mxu0 %v11672_v39  ;;  %v11744_v39 = vld [vmem:[%s15533_s1 + $0x1d44] ss:$8 sps:$4 sm:$0xff]  }
 0x328   : > { %7820 = vmatpush1.bf16.msra.mxu1 %v11667_v49  ;;  %v11739_v49 = vld [vmem:[%s15533_s1 + $0xd40] ss:$8 sps:$4 sm:$0xff]  }
 0x329   : > { %8668 = vmatpush1.bf16.msra.mxu0 %v11670_v50  ;;  %7821 = vmatprep.subr.bf16.mxu1 %v11675_v54  ;;  %v11742_v50 = vld [vmem:[%s15533_s1 + $0x1d40] ss:$8 sps:$4 sm:$0xff]   ;;  %v11747_v54 = vld [vmem:[%s15533_s1 + $0xd54] ss:$8 sps:$4 sm:$0xff]  }
 0x32a   : > { %8669 = vmatprep.subr.bf16.mxu0 %v11678_v42  ;;  %v11750_v42 = vld [vmem:[%s15533_s1 + $0x1d54] ss:$8 sps:$4 sm:$0xff]  }
 0x32c   : > { %7822 = vmatpush1.bf16.msra.mxu1 %v11673_v40  ;;  %v11745_v40 = vld [vmem:[%s15533_s1 + $0xd50] ss:$8 sps:$4 sm:$0xff]  }
 0x32d   : > { %8670 = vmatpush1.bf16.msra.mxu0 %v11676_v41  ;;  %7823 = vmatprep.subr.bf16.mxu1 %v11681_v43  ;;  %v11748_v41 = vld [vmem:[%s15533_s1 + $0x1d50] ss:$8 sps:$4 sm:$0xff]   ;;  %v11753_v43 = vld [vmem:[%s15533_s1 + $0xd64] ss:$8 sps:$4 sm:$0xff]  }
 0x32e   : > { %8671 = vmatprep.subr.bf16.mxu0 %v11684_v44  ;;  %v11756_v44 = vld [vmem:[%s15533_s1 + $0x1d64] ss:$8 sps:$4 sm:$0xff]  }
 0x330   : > { %7824 = vmatpush1.bf16.msra.mxu1 %v11679_v48  ;;  %v11751_v48 = vld [vmem:[%s15533_s1 + $0xd60] ss:$8 sps:$4 sm:$0xff]  }
 0x331   : > { %8672 = vmatpush1.bf16.msra.mxu0 %v11682_v51  ;;  %7825 = vmatprep.subr.bf16.mxu1 %v11687_v52  ;;  %v11754_v51 = vld [vmem:[%s15533_s1 + $0x1d60] ss:$8 sps:$4 sm:$0xff]   ;;  %v11759_v52 = vld [vmem:[%s15533_s1 + $0xd74] ss:$8 sps:$4 sm:$0xff]  }
 0x332   : > { %8673 = vmatprep.subr.bf16.mxu0 %v11690_v53  ;;  %v11762_v53 = vld [vmem:[%s15533_s1 + $0x1d74] ss:$8 sps:$4 sm:$0xff]  }
 0x334   : > { %7826 = vmatpush1.bf16.msra.mxu1 %v11685_v45  ;;  %v11757_v45 = vld [vmem:[%s15533_s1 + $0xd70] ss:$8 sps:$4 sm:$0xff]  }
 0x335   : > { %8674 = vmatpush1.bf16.msra.mxu0 %v11688_v46  ;;  %7827 = vmatprep.subr.bf16.mxu1 %v11693_v47  ;;  %v11760_v46 = vld [vmem:[%s15533_s1 + $0x1d70] ss:$8 sps:$4 sm:$0xff]   ;;  %v11765_v47 = vld [vmem:[%s15533_s1 + $0xd84] ss:$8 sps:$4 sm:$0xff]  }
 0x336   : > { %8675 = vmatprep.subr.bf16.mxu0 %v11696_v55  ;;  %v11768_v55 = vld [vmem:[%s15533_s1 + $0x1d84] ss:$8 sps:$4 sm:$0xff]  }
 0x338   : > { %7828 = vmatpush1.bf16.msra.mxu1 %v11691_v1  ;;  %v11763_v1 = vld [vmem:[%s15533_s1 + $0xd80] ss:$8 sps:$4 sm:$0xff]  }
 0x339   : > { %8676 = vmatpush1.bf16.msra.mxu0 %v11694_v2  ;;  %7829 = vmatprep.subr.bf16.mxu1 %v11699_v58  ;;  %v11766_v2 = vld [vmem:[%s15533_s1 + $0x1d80] ss:$8 sps:$4 sm:$0xff]   ;;  %v11771_v58 = vld [vmem:[%s15533_s1 + $0xd94] ss:$8 sps:$4 sm:$0xff]  }
 0x33a   : > { %8677 = vmatprep.subr.bf16.mxu0 %v11702_v59  ;;  %v11774_v59 = vld [vmem:[%s15533_s1 + $0x1d94] ss:$8 sps:$4 sm:$0xff]  }
 0x33c   : > { %7830 = vmatpush1.bf16.msra.mxu1 %v11697_v56  ;;  %v11769_v56 = vld [vmem:[%s15533_s1 + $0xd90] ss:$8 sps:$4 sm:$0xff]  }
 0x33d   : > { %8678 = vmatpush1.bf16.msra.mxu0 %v11700_v57  ;;  %7831 = vmatprep.subr.bf16.mxu1 %v11705_v60  ;;  %v11772_v57 = vld [vmem:[%s15533_s1 + $0x1d90] ss:$8 sps:$4 sm:$0xff]   ;;  %v11777_v60 = vld [vmem:[%s15533_s1 + $0xda4] ss:$8 sps:$4 sm:$0xff]  }
 0x33e   : > { %8679 = vmatprep.subr.bf16.mxu0 %v11708_v61  ;;  %v11780_v61 = vld [vmem:[%s15533_s1 + $0x1da4] ss:$8 sps:$4 sm:$0xff]  }
 0x340   : > { %7832 = vmatpush1.bf16.msra.mxu1 %v11703_v0  ;;  %v11775_v0 = vld [vmem:[%s15533_s1 + $0xda0] ss:$8 sps:$4 sm:$0xff]  }
 0x341   : > { %8680 = vmatpush1.bf16.msra.mxu0 %v11706_v3  ;;  %7833 = vmatprep.subr.bf16.mxu1 %v11711_v4  ;;  %v11778_v3 = vld [vmem:[%s15533_s1 + $0x1da0] ss:$8 sps:$4 sm:$0xff]   ;;  %v11783_v4 = vld [vmem:[%s15533_s1 + $0xdb4] ss:$8 sps:$4 sm:$0xff]  }
 0x342   : > { %8681 = vmatprep.subr.bf16.mxu0 %v11714_v5  ;;  %v11786_v5 = vld [vmem:[%s15533_s1 + $0x1db4] ss:$8 sps:$4 sm:$0xff]  }
 0x344   : > { %7834 = vmatpush1.bf16.msra.mxu1 %v11709_v62  ;;  %v11781_v62 = vld [vmem:[%s15533_s1 + $0xdb0] ss:$8 sps:$4 sm:$0xff]  }
 0x345   : > { %8682 = vmatpush1.bf16.msra.mxu0 %v11712_v63  ;;  %7856 = vmatprep.subr.bf16.mxu1 %v11717_v6  ;;  %v11784_v63 = vld [vmem:[%s15533_s1 + $0x1db0] ss:$8 sps:$4 sm:$0xff]   ;;  %v11789_v6 = vld [vmem:[%s15533_s1 + $0xdc4] ss:$8 sps:$4 sm:$0xff]  }
 0x346   : > { %8704 = vmatprep.subr.bf16.mxu0 %v11720_v7  ;;  %v11792_v7 = vld [vmem:[%s15533_s1 + $0x1dc4] ss:$8 sps:$4 sm:$0xff]  }
 0x347   : > { %7836 = vmatmul.mubr.bf16.vlgmr.msra.gmra.mrb[0].mxu1 %v9047_v18  ;;  %v11790_v18 = vld [vmem:[%s15533_s1 + $0x1dc0] ss:$8 sps:$4 sm:$0xff]  }
 0x348   : > { %8684 = vmatmul.mubr.bf16.vlgmr.msra.gmra.mrb[0].mxu0 %v9079_v10  ;;  %7857 = vmatpush1.bf16.msra.mxu1 %v11715_v14  ;;  %v11795_v10 = vld [vmem:[%s15533_s1 + $0xdd4] ss:$8 sps:$4 sm:$0xff]   ;;  %v11801_v14 = vld [vmem:[%s15533_s1 + $0xde4] ss:$8 sps:$4 sm:$0xff]  }
 0x349   : > { %8705 = vmatpush1.bf16.msra.mxu0 %v11718_v15  ;;  %7858 = vmatprep.subr.bf16.mxu1 %v11723_v16  ;;  %v11804_v15 = vld [vmem:[%s15533_s1 + $0x1de4] ss:$8 sps:$4 sm:$0xff]   ;;  %v11799_v16 = vld [vmem:[%s15533_s1 + $0xde0] ss:$8 sps:$4 sm:$0xff]  }
 0x34a   : > { %8706 = vmatprep.subr.bf16.mxu0 %v11726_v19  ;;  %7845 = vmatprep.mubr.bf16.mxu1 %v9112_v8  ;;  %v11802_v19 = vld [vmem:[%s15533_s1 + $0x1de0] ss:$8 sps:$4 sm:$0xff]   ;;  %v11807_v8 = vld [vmem:[%s15533_s1 + $0xdf4] ss:$8 sps:$4 sm:$0xff]  }
 0x34b   : > { %8693 = vmatprep.mubr.bf16.mxu0 %v9144_v9  ;;  %v11810_v9 = vld [vmem:[%s15533_s1 + $0x1df4] ss:$8 sps:$4 sm:$0xff]  }
 0x34c   : > { %7859 = vmatpush1.bf16.msra.mxu1 %v11721_v20  ;;  %v11805_v20 = vld [vmem:[%s15533_s1 + $0xdf0] ss:$8 sps:$4 sm:$0xff]  }
 0x34d   : > { %8707 = vmatpush1.bf16.msra.mxu0 %v11724_v21  ;;  %7860 = vmatprep.subr.bf16.mxu1 %v11729_v22  ;;  %v11808_v21 = vld [vmem:[%s15533_s1 + $0x1df0] ss:$8 sps:$4 sm:$0xff]   ;;  %v11813_v22 = vld [vmem:[%s15533_s1 + $0xe04] ss:$8 sps:$4 sm:$0xff]  }
 0x34e   : > { %8708 = vmatprep.subr.bf16.mxu0 %v11732_v23  ;;  %v11816_v23 = vld [vmem:[%s15533_s1 + $0x1e04] ss:$8 sps:$4 sm:$0xff]  }
 0x34f   : > { %7846 = vmatmul.mubr.bf16.gmra.mrb[4].mxu1 %v9111_v33  ;;  %v320_v33 = vld [vmem:[%s12206_s12 + $0x268] sm:$0xff] }
 0x350   : > { %8694 = vmatmul.mubr.bf16.gmra.mrb[4].mxu0 %v9143_v34  ;;  %7861 = vmatpush1.bf16.msra.mxu1 %v11727_v26  ;;  %v9049_v34 = vcombine.low %v14899_v32, %v14902_v35  ;;  %v9081_v26 = vcombine.low %v14905_v24, %v14908_v25  ;;  %v11819_v32 = vld [vmem:[%s15533_s1 + $0xe14] ss:$8 sps:$4 sm:$0xff]  }
 0x351   : > { %8709 = vmatpush1.bf16.msra.mxu0 %v11730_v27  ;;  %7862 = vmatprep.subr.bf16.mxu1 %v11735_v28  ;;  %v352_v27 = vld [vmem:[%s12206_s12 + $0x368] sm:$0xff]  ;;  %v11822_v35 = vld [vmem:[%s15533_s1 + $0x1e14] ss:$8 sps:$4 sm:$0xff]  }
 0x352   : > { %8710 = vmatprep.subr.bf16.mxu0 %v11738_v29  ;;  %7888 = vmatprep.mubr.bf16.mxu1 %v9050_v30  ;;  %v336_v28 = vld [vmem:[%s12206_s12 + $0x2e8] sm:$0xff]  ;;  %v9114_v24 = vcombine.high %v320_v33, %v352_v27 }
 0x353   : > { %8736 = vmatprep.mubr.bf16.mxu0 %v9082_v31  ;;  %v368_v29 = vld [vmem:[%s12206_s12 + $0x3e8] sm:$0xff] }
 0x354   : > { %7863 = vmatpush1.bf16.msra.mxu1 %v11733_v36  ;;  %v11811_v30 = vld [vmem:[%s15533_s1 + $0xe00] ss:$8 sps:$4 sm:$0xff]   ;;  %v9146_v25 = vcombine.high %v336_v28, %v368_v29  ;;  %v11817_v36 = vld [vmem:[%s15533_s1 + $0xe10] ss:$8 sps:$4 sm:$0xff]  }
 0x355   : > { %8711 = vmatpush1.bf16.msra.mxu0 %v11736_v37  ;;  %7864 = vmatprep.subr.bf16.mxu1 %v11741_v38  ;;  %v11814_v31 = vld [vmem:[%s15533_s1 + $0x1e00] ss:$8 sps:$4 sm:$0xff]   ;;  %v11820_v37 = vld [vmem:[%s15533_s1 + $0x1e10] ss:$8 sps:$4 sm:$0xff]   ;;  %v11825_v38 = vld [vmem:[%s15533_s1 + $0xe24] ss:$8 sps:$4 sm:$0xff]  }
 0x356   : > { %8712 = vmatprep.subr.bf16.mxu0 %v11744_v39  ;;  %v11828_v39 = vld [vmem:[%s15533_s1 + $0x1e24] ss:$8 sps:$4 sm:$0xff]  }
 0x358   : > { %7865 = vmatpush1.bf16.msra.mxu1 %v11739_v49  ;;  %v15115_v49 = vld [vmem:[%s12206_s12 + $0x70] sm:$0xff] }
 0x359   : > { %8713 = vmatpush1.bf16.msra.mxu0 %v11742_v50  ;;  %7866 = vmatprep.subr.bf16.mxu1 %v11747_v54  ;;  %v9113_v50 = vcombine.low %v320_v33, %v352_v27  ;;  %v9145_v54 = vcombine.low %v336_v28, %v368_v29  ;;  %v11883_v33 = vld [vmem:[%s15533_s1 + $0xec0] ss:$8 sps:$4 sm:$0xff]   ;;  %v11894_v27 = vld [vmem:[%s15533_s1 + $0x1ed4] ss:$8 sps:$4 sm:$0xff]   ;;  %v11889_v28 = vld [vmem:[%s15533_s1 + $0xed0] ss:$8 sps:$4 sm:$0xff]  }
 0x35a   : > { %8714 = vmatprep.subr.bf16.mxu0 %v11750_v42  ;;  %v15118_v42 = vld [vmem:[%s12206_s12 + $0x170] sm:$0xff] }
 0x35b   : > { %v11892_v29 = vld [vmem:[%s15533_s1 + $0x1ed0] ss:$8 sps:$4 sm:$0xff]  }
 0x35c   : > { %7867 = vmatpush1.bf16.msra.mxu1 %v11745_v40  ;;  %v15121_v40 = vld [vmem:[%s12206_s12 + $0xf0] sm:$0xff] }
 0x35d   : > { %8715 = vmatpush1.bf16.msra.mxu0 %v11748_v41  ;;  %7868 = vmatprep.subr.bf16.mxu1 %v11753_v43  ;;  %v15124_v41 = vld [vmem:[%s12206_s12 + $0x1f0] sm:$0xff]  ;;  %v11823_v43 = vld [vmem:[%s15533_s1 + $0xe20] ss:$8 sps:$4 sm:$0xff]  }
 0x35e   : > { %8716 = vmatprep.subr.bf16.mxu0 %v11756_v44  ;;  %v11826_v44 = vld [vmem:[%s15533_s1 + $0x1e20] ss:$8 sps:$4 sm:$0xff]  }
 0x360   : > { %7869 = vmatpush1.bf16.msra.mxu1 %v11751_v48  ;;  %v11831_v48 = vld [vmem:[%s15533_s1 + $0xe34] ss:$8 sps:$4 sm:$0xff]  }
 0x361   : > { %8717 = vmatpush1.bf16.msra.mxu0 %v11754_v51  ;;  %7870 = vmatprep.subr.bf16.mxu1 %v11759_v52  ;;  %v11834_v51 = vld [vmem:[%s15533_s1 + $0x1e34] ss:$8 sps:$4 sm:$0xff]   ;;  %v9052_v52 = vcombine.high %v15115_v49, %v15118_v42 }
 0x362   : > { %8718 = vmatprep.subr.bf16.mxu0 %v11762_v53  ;;  %v9084_v53 = vcombine.high %v15121_v40, %v15124_v41 }
 0x364   : > { %7871 = vmatpush1.bf16.msra.mxu1 %v11757_v45  ;;  %v11829_v45 = vld [vmem:[%s15533_s1 + $0xe30] ss:$8 sps:$4 sm:$0xff]  }
 0x365   : > { %8719 = vmatpush1.bf16.msra.mxu0 %v11760_v46  ;;  %7872 = vmatprep.subr.bf16.mxu1 %v11765_v47  ;;  %v11832_v46 = vld [vmem:[%s15533_s1 + $0x1e30] ss:$8 sps:$4 sm:$0xff]   ;;  %v11837_v47 = vld [vmem:[%s15533_s1 + $0xe44] ss:$8 sps:$4 sm:$0xff]  }
 0x366   : > { %8720 = vmatprep.subr.bf16.mxu0 %v11768_v55  ;;  %v11840_v55 = vld [vmem:[%s15533_s1 + $0x1e44] ss:$8 sps:$4 sm:$0xff]  }
 0x368   : > { %7873 = vmatpush1.bf16.msra.mxu1 %v11763_v1  ;;  %v11835_v1 = vld [vmem:[%s15533_s1 + $0xe40] ss:$8 sps:$4 sm:$0xff]  }
 0x369   : > { %8721 = vmatpush1.bf16.msra.mxu0 %v11766_v2  ;;  %7874 = vmatprep.subr.bf16.mxu1 %v11771_v58  ;;  %v11838_v2 = vld [vmem:[%s15533_s1 + $0x1e40] ss:$8 sps:$4 sm:$0xff]   ;;  %v11843_v58 = vld [vmem:[%s15533_s1 + $0xe54] ss:$8 sps:$4 sm:$0xff]  }
 0x36a   : > { %8722 = vmatprep.subr.bf16.mxu0 %v11774_v59  ;;  %v11846_v59 = vld [vmem:[%s15533_s1 + $0x1e54] ss:$8 sps:$4 sm:$0xff]  }
 0x36c   : > { %7875 = vmatpush1.bf16.msra.mxu1 %v11769_v56  ;;  %v11841_v56 = vld [vmem:[%s15533_s1 + $0xe50] ss:$8 sps:$4 sm:$0xff]  }
 0x36d   : > { %8723 = vmatpush1.bf16.msra.mxu0 %v11772_v57  ;;  %7876 = vmatprep.subr.bf16.mxu1 %v11777_v60  ;;  %v11844_v57 = vld [vmem:[%s15533_s1 + $0x1e50] ss:$8 sps:$4 sm:$0xff]   ;;  %v11849_v60 = vld [vmem:[%s15533_s1 + $0xe64] ss:$8 sps:$4 sm:$0xff]  }
 0x36e   : > { %8724 = vmatprep.subr.bf16.mxu0 %v11780_v61  ;;  %v11852_v61 = vld [vmem:[%s15533_s1 + $0x1e64] ss:$8 sps:$4 sm:$0xff]  }
 0x370   : > { %7877 = vmatpush1.bf16.msra.mxu1 %v11775_v0  ;;  %v11847_v0 = vld [vmem:[%s15533_s1 + $0xe60] ss:$8 sps:$4 sm:$0xff]  }
 0x371   : > { %8725 = vmatpush1.bf16.msra.mxu0 %v11778_v3  ;;  %7878 = vmatprep.subr.bf16.mxu1 %v11783_v4  ;;  %v11850_v3 = vld [vmem:[%s15533_s1 + $0x1e60] ss:$8 sps:$4 sm:$0xff]   ;;  %v11855_v4 = vld [vmem:[%s15533_s1 + $0xe74] ss:$8 sps:$4 sm:$0xff]  }
 0x372   : > { %8726 = vmatprep.subr.bf16.mxu0 %v11786_v5  ;;  %v11858_v5 = vld [vmem:[%s15533_s1 + $0x1e74] ss:$8 sps:$4 sm:$0xff]  }
 0x374   : > { %7879 = vmatpush1.bf16.msra.mxu1 %v11781_v62  ;;  %v11853_v62 = vld [vmem:[%s15533_s1 + $0xe70] ss:$8 sps:$4 sm:$0xff]  }
 0x375   : > { %8727 = vmatpush1.bf16.msra.mxu0 %v11784_v63  ;;  %7880 = vmatprep.subr.bf16.mxu1 %v11789_v6  ;;  %v11856_v63 = vld [vmem:[%s15533_s1 + $0x1e70] ss:$8 sps:$4 sm:$0xff]   ;;  %v11861_v6 = vld [vmem:[%s15533_s1 + $0xe84] ss:$8 sps:$4 sm:$0xff]  }
 0x376   : > { %8728 = vmatprep.subr.bf16.mxu0 %v11792_v7  ;;  %v11864_v7 = vld [vmem:[%s15533_s1 + $0x1e84] ss:$8 sps:$4 sm:$0xff]  }
 0x378   : > { %7881 = vmatpush1.bf16.msra.mxu1 %v11787_v17  ;;  %v11859_v17 = vld [vmem:[%s15533_s1 + $0xe80] ss:$8 sps:$4 sm:$0xff]  }
 0x379   : > { %8729 = vmatpush1.bf16.msra.mxu0 %v11790_v18  ;;  %7882 = vmatprep.subr.bf16.mxu1 %v11795_v10  ;;  %v11862_v18 = vld [vmem:[%s15533_s1 + $0x1e80] ss:$8 sps:$4 sm:$0xff]   ;;  %v11867_v10 = vld [vmem:[%s15533_s1 + $0xe94] ss:$8 sps:$4 sm:$0xff]  }
 0x37a   : > { %8730 = vmatprep.subr.bf16.mxu0 %v11798_v13  ;;  %v11870_v13 = vld [vmem:[%s15533_s1 + $0x1e94] ss:$8 sps:$4 sm:$0xff]  }
 0x37c   : > { %7883 = vmatpush1.bf16.msra.mxu1 %v11793_v11  ;;  %v11865_v11 = vld [vmem:[%s15533_s1 + $0xe90] ss:$8 sps:$4 sm:$0xff]  }
 0x37d   : > { %8731 = vmatpush1.bf16.msra.mxu0 %v11796_v12  ;;  %7884 = vmatprep.subr.bf16.mxu1 %v11801_v14  ;;  %v11868_v12 = vld [vmem:[%s15533_s1 + $0x1e90] ss:$8 sps:$4 sm:$0xff]   ;;  %v11873_v14 = vld [vmem:[%s15533_s1 + $0xea4] ss:$8 sps:$4 sm:$0xff]  }
 0x37e   : > { %8732 = vmatprep.subr.bf16.mxu0 %v11804_v15  ;;  %v11876_v15 = vld [vmem:[%s15533_s1 + $0x1ea4] ss:$8 sps:$4 sm:$0xff]  }
 0x380   : > { %7885 = vmatpush1.bf16.msra.mxu1 %v11799_v16  ;;  %v11871_v16 = vld [vmem:[%s15533_s1 + $0xea0] ss:$8 sps:$4 sm:$0xff]  }
 0x381   : > { %8733 = vmatpush1.bf16.msra.mxu0 %v11802_v19  ;;  %7886 = vmatprep.subr.bf16.mxu1 %v11807_v8  ;;  %v11874_v19 = vld [vmem:[%s15533_s1 + $0x1ea0] ss:$8 sps:$4 sm:$0xff]   ;;  %v11879_v8 = vld [vmem:[%s15533_s1 + $0xeb4] ss:$8 sps:$4 sm:$0xff]  }
 0x382   : > { %8734 = vmatprep.subr.bf16.mxu0 %v11810_v9  ;;  %v11882_v9 = vld [vmem:[%s15533_s1 + $0x1eb4] ss:$8 sps:$4 sm:$0xff]  }
 0x384   : > { %7887 = vmatpush1.bf16.msra.mxu1 %v11805_v20  ;;  %v11877_v20 = vld [vmem:[%s15533_s1 + $0xeb0] ss:$8 sps:$4 sm:$0xff]  }
 0x385   : > { %8735 = vmatpush1.bf16.msra.mxu0 %v11808_v21  ;;  %7909 = vmatprep.subr.bf16.mxu1 %v11813_v22  ;;  %v11880_v21 = vld [vmem:[%s15533_s1 + $0x1eb0] ss:$8 sps:$4 sm:$0xff]   ;;  %v11885_v22 = vld [vmem:[%s15533_s1 + $0xec4] ss:$8 sps:$4 sm:$0xff]  }
 0x386   : > { %8757 = vmatprep.subr.bf16.mxu0 %v11816_v23  ;;  %v11888_v23 = vld [vmem:[%s15533_s1 + $0x1ec4] ss:$8 sps:$4 sm:$0xff]  }
 0x387   : > { %7889 = vmatmul.mubr.bf16.vlgmr.msra.gmra.mrb[0].mxu1 %v9049_v34  ;;  %v11886_v34 = vld [vmem:[%s15533_s1 + $0x1ec0] ss:$8 sps:$4 sm:$0xff]  }
 0x388   : > { %8737 = vmatmul.mubr.bf16.vlgmr.msra.gmra.mrb[0].mxu0 %v9081_v26  ;;  %7910 = vmatpush1.bf16.msra.mxu1 %v11811_v30  ;;  %v11891_v26 = vld [vmem:[%s15533_s1 + $0xed4] ss:$8 sps:$4 sm:$0xff]   ;;  %v11897_v30 = vld [vmem:[%s15533_s1 + $0xee4] ss:$8 sps:$4 sm:$0xff]  }
 0x389   : > { %8758 = vmatpush1.bf16.msra.mxu0 %v11814_v31  ;;  %7911 = vmatprep.subr.bf16.mxu1 %v11819_v32  ;;  %v11900_v31 = vld [vmem:[%s15533_s1 + $0x1ee4] ss:$8 sps:$4 sm:$0xff]   ;;  %v11895_v32 = vld [vmem:[%s15533_s1 + $0xee0] ss:$8 sps:$4 sm:$0xff]  }
 0x38a   : > { %8759 = vmatprep.subr.bf16.mxu0 %v11822_v35  ;;  %7898 = vmatprep.mubr.bf16.mxu1 %v9114_v24  ;;  %v11898_v35 = vld [vmem:[%s15533_s1 + $0x1ee0] ss:$8 sps:$4 sm:$0xff]   ;;  %v11903_v24 = vld [vmem:[%s15533_s1 + $0xef4] ss:$8 sps:$4 sm:$0xff]  }
 0x38b   : > { %8746 = vmatprep.mubr.bf16.mxu0 %v9146_v25  ;;  %v11906_v25 = vld [vmem:[%s15533_s1 + $0x1ef4] ss:$8 sps:$4 sm:$0xff]  }
 0x38c   : > { %7912 = vmatpush1.bf16.msra.mxu1 %v11817_v36  ;;  %v11901_v36 = vld [vmem:[%s15533_s1 + $0xef0] ss:$8 sps:$4 sm:$0xff]  }
 0x38d   : > { %8760 = vmatpush1.bf16.msra.mxu0 %v11820_v37  ;;  %7913 = vmatprep.subr.bf16.mxu1 %v11825_v38  ;;  %v11904_v37 = vld [vmem:[%s15533_s1 + $0x1ef0] ss:$8 sps:$4 sm:$0xff]   ;;  %v11909_v38 = vld [vmem:[%s15533_s1 + $0xf04] ss:$8 sps:$4 sm:$0xff]  }
 0x38e   : > { %8761 = vmatprep.subr.bf16.mxu0 %v11828_v39  ;;  %v11912_v39 = vld [vmem:[%s15533_s1 + $0x1f04] ss:$8 sps:$4 sm:$0xff]  }
 0x38f   : > { %7899 = vmatmul.mubr.bf16.gmra.mrb[4].mxu1 %v9113_v50  ;;  %v321_v50 = vld [vmem:[%s12206_s12 + $0x270] sm:$0xff] }
 0x390   : > { %8747 = vmatmul.mubr.bf16.gmra.mrb[4].mxu0 %v9145_v54  ;;  %7914 = vmatpush1.bf16.msra.mxu1 %v11823_v43  ;;  %v9051_v54 = vcombine.low %v15115_v49, %v15118_v42  ;;  %v9083_v43 = vcombine.low %v15121_v40, %v15124_v41  ;;  %v11915_v49 = vld [vmem:[%s15533_s1 + $0xf14] ss:$8 sps:$4 sm:$0xff]  }
 0x391   : > { %8762 = vmatpush1.bf16.msra.mxu0 %v11826_v44  ;;  %7915 = vmatprep.subr.bf16.mxu1 %v11831_v48  ;;  %v353_v44 = vld [vmem:[%s12206_s12 + $0x370] sm:$0xff] }
 0x392   : > { %8763 = vmatprep.subr.bf16.mxu0 %v11834_v51  ;;  %7941 = vmatprep.mubr.bf16.mxu1 %v9052_v52  ;;  %v337_v48 = vld [vmem:[%s12206_s12 + $0x2f0] sm:$0xff]  ;;  %v11907_v52 = vld [vmem:[%s15533_s1 + $0xf00] ss:$8 sps:$4 sm:$0xff]   ;;  %v9116_v40 = vcombine.high %v321_v50, %v353_v44 }
 0x393   : > { %8789 = vmatprep.mubr.bf16.mxu0 %v9084_v53  ;;  %v369_v51 = vld [vmem:[%s12206_s12 + $0x3f0] sm:$0xff]  ;;  %v11910_v53 = vld [vmem:[%s15533_s1 + $0x1f00] ss:$8 sps:$4 sm:$0xff]  }
 0x394   : > { %7916 = vmatpush1.bf16.msra.mxu1 %v11829_v45  ;;  %v11918_v42 = vld [vmem:[%s15533_s1 + $0x1f14] ss:$8 sps:$4 sm:$0xff]   ;;  %v9148_v41 = vcombine.high %v337_v48, %v369_v51  ;;  %v11913_v45 = vld [vmem:[%s15533_s1 + $0xf10] ss:$8 sps:$4 sm:$0xff]  }
 0x395   : > { %8764 = vmatpush1.bf16.msra.mxu0 %v11832_v46  ;;  %7917 = vmatprep.subr.bf16.mxu1 %v11837_v47  ;;  %v11916_v46 = vld [vmem:[%s15533_s1 + $0x1f10] ss:$8 sps:$4 sm:$0xff]   ;;  %v11921_v47 = vld [vmem:[%s15533_s1 + $0xf24] ss:$8 sps:$4 sm:$0xff]  }
 0x396   : > { %8765 = vmatprep.subr.bf16.mxu0 %v11840_v55  ;;  %v11924_v55 = vld [vmem:[%s15533_s1 + $0x1f24] ss:$8 sps:$4 sm:$0xff]  }
 0x398   : > { %7918 = vmatpush1.bf16.msra.mxu1 %v11835_v1  ;;  %v15331_v1 = vld [vmem:[%s12206_s12 + $0x78] sm:$0xff] }
 0x399   : > { %8766 = vmatpush1.bf16.msra.mxu0 %v11838_v2  ;;  %7919 = vmatprep.subr.bf16.mxu1 %v11843_v58  ;;  %v9115_v2 = vcombine.low %v321_v50, %v353_v44  ;;  %v9147_v58 = vcombine.low %v337_v48, %v369_v51  ;;  %v11979_v50 = vld [vmem:[%s15533_s1 + $0xfc0] ss:$8 sps:$4 sm:$0xff]   ;;  %v11990_v44 = vld [vmem:[%s15533_s1 + $0x1fd4] ss:$8 sps:$4 sm:$0xff]   ;;  %v11985_v48 = vld [vmem:[%s15533_s1 + $0xfd0] ss:$8 sps:$4 sm:$0xff]  }
 0x39a   : > { %8767 = vmatprep.subr.bf16.mxu0 %v11846_v59  ;;  %v15334_v59 = vld [vmem:[%s12206_s12 + $0x178] sm:$0xff] }
 0x39b   : > { %v11988_v51 = vld [vmem:[%s15533_s1 + $0x1fd0] ss:$8 sps:$4 sm:$0xff]  }
 0x39c   : > { %7920 = vmatpush1.bf16.msra.mxu1 %v11841_v56  ;;  %v15337_v56 = vld [vmem:[%s12206_s12 + $0xf8] sm:$0xff] }
 0x39d   : > { %8768 = vmatpush1.bf16.msra.mxu0 %v11844_v57  ;;  %7921 = vmatprep.subr.bf16.mxu1 %v11849_v60  ;;  %v15340_v57 = vld [vmem:[%s12206_s12 + $0x1f8] sm:$0xff]  ;;  %v11919_v60 = vld [vmem:[%s15533_s1 + $0xf20] ss:$8 sps:$4 sm:$0xff]  }
 0x39e   : > { %8769 = vmatprep.subr.bf16.mxu0 %v11852_v61  ;;  %v11922_v61 = vld [vmem:[%s15533_s1 + $0x1f20] ss:$8 sps:$4 sm:$0xff]  }
 0x3a0   : > { %7922 = vmatpush1.bf16.msra.mxu1 %v11847_v0  ;;  %v11927_v0 = vld [vmem:[%s15533_s1 + $0xf34] ss:$8 sps:$4 sm:$0xff]  }
 0x3a1   : > { %8770 = vmatpush1.bf16.msra.mxu0 %v11850_v3  ;;  %7923 = vmatprep.subr.bf16.mxu1 %v11855_v4  ;;  %v11930_v3 = vld [vmem:[%s15533_s1 + $0x1f34] ss:$8 sps:$4 sm:$0xff]   ;;  %v9054_v4 = vcombine.high %v15331_v1, %v15334_v59 }
 0x3a2   : > { %8771 = vmatprep.subr.bf16.mxu0 %v11858_v5  ;;  %v9086_v5 = vcombine.high %v15337_v56, %v15340_v57 }
 0x3a4   : > { %7924 = vmatpush1.bf16.msra.mxu1 %v11853_v62  ;;  %v11925_v62 = vld [vmem:[%s15533_s1 + $0xf30] ss:$8 sps:$4 sm:$0xff]  }
 0x3a5   : > { %8772 = vmatpush1.bf16.msra.mxu0 %v11856_v63  ;;  %7925 = vmatprep.subr.bf16.mxu1 %v11861_v6  ;;  %v11928_v63 = vld [vmem:[%s15533_s1 + $0x1f30] ss:$8 sps:$4 sm:$0xff]   ;;  %v11933_v6 = vld [vmem:[%s15533_s1 + $0xf44] ss:$8 sps:$4 sm:$0xff]  }
 0x3a6   : > { %8773 = vmatprep.subr.bf16.mxu0 %v11864_v7  ;;  %v11936_v7 = vld [vmem:[%s15533_s1 + $0x1f44] ss:$8 sps:$4 sm:$0xff]  }
 0x3a8   : > { %7926 = vmatpush1.bf16.msra.mxu1 %v11859_v17  ;;  %v11931_v17 = vld [vmem:[%s15533_s1 + $0xf40] ss:$8 sps:$4 sm:$0xff]  }
 0x3a9   : > { %8774 = vmatpush1.bf16.msra.mxu0 %v11862_v18  ;;  %7927 = vmatprep.subr.bf16.mxu1 %v11867_v10  ;;  %v11934_v18 = vld [vmem:[%s15533_s1 + $0x1f40] ss:$8 sps:$4 sm:$0xff]   ;;  %v11939_v10 = vld [vmem:[%s15533_s1 + $0xf54] ss:$8 sps:$4 sm:$0xff]  }
 0x3aa   : > { %8775 = vmatprep.subr.bf16.mxu0 %v11870_v13  ;;  %v11942_v13 = vld [vmem:[%s15533_s1 + $0x1f54] ss:$8 sps:$4 sm:$0xff]  }
 0x3ac   : > { %7928 = vmatpush1.bf16.msra.mxu1 %v11865_v11  ;;  %v11937_v11 = vld [vmem:[%s15533_s1 + $0xf50] ss:$8 sps:$4 sm:$0xff]  }
 0x3ad   : > { %8776 = vmatpush1.bf16.msra.mxu0 %v11868_v12  ;;  %7929 = vmatprep.subr.bf16.mxu1 %v11873_v14  ;;  %v11940_v12 = vld [vmem:[%s15533_s1 + $0x1f50] ss:$8 sps:$4 sm:$0xff]   ;;  %v11945_v14 = vld [vmem:[%s15533_s1 + $0xf64] ss:$8 sps:$4 sm:$0xff]  }
 0x3ae   : > { %8777 = vmatprep.subr.bf16.mxu0 %v11876_v15  ;;  %v11948_v15 = vld [vmem:[%s15533_s1 + $0x1f64] ss:$8 sps:$4 sm:$0xff]  }
 0x3b0   : > { %7930 = vmatpush1.bf16.msra.mxu1 %v11871_v16  ;;  %v11943_v16 = vld [vmem:[%s15533_s1 + $0xf60] ss:$8 sps:$4 sm:$0xff]  }
 0x3b1   : > { %8778 = vmatpush1.bf16.msra.mxu0 %v11874_v19  ;;  %7931 = vmatprep.subr.bf16.mxu1 %v11879_v8  ;;  %v11946_v19 = vld [vmem:[%s15533_s1 + $0x1f60] ss:$8 sps:$4 sm:$0xff]   ;;  %v11951_v8 = vld [vmem:[%s15533_s1 + $0xf74] ss:$8 sps:$4 sm:$0xff]  }
 0x3b2   : > { %8779 = vmatprep.subr.bf16.mxu0 %v11882_v9  ;;  %v11954_v9 = vld [vmem:[%s15533_s1 + $0x1f74] ss:$8 sps:$4 sm:$0xff]  }
 0x3b4   : > { %7932 = vmatpush1.bf16.msra.mxu1 %v11877_v20  ;;  %v11949_v20 = vld [vmem:[%s15533_s1 + $0xf70] ss:$8 sps:$4 sm:$0xff]  }
 0x3b5   : > { %8780 = vmatpush1.bf16.msra.mxu0 %v11880_v21  ;;  %7933 = vmatprep.subr.bf16.mxu1 %v11885_v22  ;;  %v11952_v21 = vld [vmem:[%s15533_s1 + $0x1f70] ss:$8 sps:$4 sm:$0xff]   ;;  %v11957_v22 = vld [vmem:[%s15533_s1 + $0xf84] ss:$8 sps:$4 sm:$0xff]  }
 0x3b6   : > { %8781 = vmatprep.subr.bf16.mxu0 %v11888_v23  ;;  %v11960_v23 = vld [vmem:[%s15533_s1 + $0x1f84] ss:$8 sps:$4 sm:$0xff]  }
 0x3b8   : > { %7934 = vmatpush1.bf16.msra.mxu1 %v11883_v33  ;;  %v11955_v33 = vld [vmem:[%s15533_s1 + $0xf80] ss:$8 sps:$4 sm:$0xff]  }
 0x3b9   : > { %8782 = vmatpush1.bf16.msra.mxu0 %v11886_v34  ;;  %7935 = vmatprep.subr.bf16.mxu1 %v11891_v26  ;;  %v11958_v34 = vld [vmem:[%s15533_s1 + $0x1f80] ss:$8 sps:$4 sm:$0xff]   ;;  %v11963_v26 = vld [vmem:[%s15533_s1 + $0xf94] ss:$8 sps:$4 sm:$0xff]  }
 0x3ba   : > { %8783 = vmatprep.subr.bf16.mxu0 %v11894_v27  ;;  %v11966_v27 = vld [vmem:[%s15533_s1 + $0x1f94] ss:$8 sps:$4 sm:$0xff]  }
 0x3bc   : > { %7936 = vmatpush1.bf16.msra.mxu1 %v11889_v28  ;;  %v11961_v28 = vld [vmem:[%s15533_s1 + $0xf90] ss:$8 sps:$4 sm:$0xff]  }
 0x3bd   : > { %8784 = vmatpush1.bf16.msra.mxu0 %v11892_v29  ;;  %7937 = vmatprep.subr.bf16.mxu1 %v11897_v30  ;;  %v11964_v29 = vld [vmem:[%s15533_s1 + $0x1f90] ss:$8 sps:$4 sm:$0xff]   ;;  %v11969_v30 = vld [vmem:[%s15533_s1 + $0xfa4] ss:$8 sps:$4 sm:$0xff]  }
 0x3be   : > { %8785 = vmatprep.subr.bf16.mxu0 %v11900_v31  ;;  %v11972_v31 = vld [vmem:[%s15533_s1 + $0x1fa4] ss:$8 sps:$4 sm:$0xff]  }
 0x3c0   : > { %7938 = vmatpush1.bf16.msra.mxu1 %v11895_v32  ;;  %v11967_v32 = vld [vmem:[%s15533_s1 + $0xfa0] ss:$8 sps:$4 sm:$0xff]  }
 0x3c1   : > { %8786 = vmatpush1.bf16.msra.mxu0 %v11898_v35  ;;  %7939 = vmatprep.subr.bf16.mxu1 %v11903_v24  ;;  %v11970_v35 = vld [vmem:[%s15533_s1 + $0x1fa0] ss:$8 sps:$4 sm:$0xff]   ;;  %v11975_v24 = vld [vmem:[%s15533_s1 + $0xfb4] ss:$8 sps:$4 sm:$0xff]  }
 0x3c2   : > { %8787 = vmatprep.subr.bf16.mxu0 %v11906_v25  ;;  %v11978_v25 = vld [vmem:[%s15533_s1 + $0x1fb4] ss:$8 sps:$4 sm:$0xff]  }
 0x3c4   : > { %7940 = vmatpush1.bf16.msra.mxu1 %v11901_v36  ;;  %v11973_v36 = vld [vmem:[%s15533_s1 + $0xfb0] ss:$8 sps:$4 sm:$0xff]  }
 0x3c5   : > { %8788 = vmatpush1.bf16.msra.mxu0 %v11904_v37  ;;  %7962 = vmatprep.subr.bf16.mxu1 %v11909_v38  ;;  %v11976_v37 = vld [vmem:[%s15533_s1 + $0x1fb0] ss:$8 sps:$4 sm:$0xff]   ;;  %v11981_v38 = vld [vmem:[%s15533_s1 + $0xfc4] ss:$8 sps:$4 sm:$0xff]  }
 0x3c6   : > { %8810 = vmatprep.subr.bf16.mxu0 %v11912_v39  ;;  %v11984_v39 = vld [vmem:[%s15533_s1 + $0x1fc4] ss:$8 sps:$4 sm:$0xff]  }
 0x3c7   : > { %7942 = vmatmul.mubr.bf16.vlgmr.msra.gmra.mrb[0].mxu1 %v9051_v54  ;;  %v11982_v54 = vld [vmem:[%s15533_s1 + $0x1fc0] ss:$8 sps:$4 sm:$0xff]  }
 0x3c8   : > { %8790 = vmatmul.mubr.bf16.vlgmr.msra.gmra.mrb[0].mxu0 %v9083_v43  ;;  %7963 = vmatpush1.bf16.msra.mxu1 %v11907_v52  ;;  %v11987_v43 = vld [vmem:[%s15533_s1 + $0xfd4] ss:$8 sps:$4 sm:$0xff]   ;;  %v11993_v52 = vld [vmem:[%s15533_s1 + $0xfe4] ss:$8 sps:$4 sm:$0xff]  }
 0x3c9   : > { %8811 = vmatpush1.bf16.msra.mxu0 %v11910_v53  ;;  %7964 = vmatprep.subr.bf16.mxu1 %v11915_v49  ;;  %v11996_v53 = vld [vmem:[%s15533_s1 + $0x1fe4] ss:$8 sps:$4 sm:$0xff]   ;;  %v11991_v49 = vld [vmem:[%s15533_s1 + $0xfe0] ss:$8 sps:$4 sm:$0xff]  }
 0x3ca   : > { %8812 = vmatprep.subr.bf16.mxu0 %v11918_v42  ;;  %7951 = vmatprep.mubr.bf16.mxu1 %v9116_v40  ;;  %v11994_v42 = vld [vmem:[%s15533_s1 + $0x1fe0] ss:$8 sps:$4 sm:$0xff]   ;;  %v11999_v40 = vld [vmem:[%s15533_s1 + $0xff4] ss:$8 sps:$4 sm:$0xff]  }
 0x3cb   : > { %8799 = vmatprep.mubr.bf16.mxu0 %v9148_v41  ;;  %v12002_v41 = vld [vmem:[%s15533_s1 + $0x1ff4] ss:$8 sps:$4 sm:$0xff]  }
 0x3cc   : > { %7965 = vmatpush1.bf16.msra.mxu1 %v11913_v45  ;;  %v11997_v45 = vld [vmem:[%s15533_s1 + $0xff0] ss:$8 sps:$4 sm:$0xff]  }
 0x3cd   : > { %8813 = vmatpush1.bf16.msra.mxu0 %v11916_v46  ;;  %7966 = vmatprep.subr.bf16.mxu1 %v11921_v47  ;;  %v12000_v46 = vld [vmem:[%s15533_s1 + $0x1ff0] ss:$8 sps:$4 sm:$0xff]  }
 0x3ce   : > { %8814 = vmatprep.subr.bf16.mxu0 %v11924_v55  ;;  %v322_v47 = vld [vmem:[%s12206_s12 + $0x278] sm:$0xff] }
 0x3cf   : > { %7952 = vmatmul.mubr.bf16.gmra.mrb[4].mxu1 %v9115_v2  ;;  %v354_v55 = vld [vmem:[%s12206_s12 + $0x378] sm:$0xff] }
 0x3d0   : > { %8800 = vmatmul.mubr.bf16.gmra.mrb[4].mxu0 %v9147_v58  ;;  %7967 = vmatpush1.bf16.msra.mxu1 %v11919_v60  ;;  %v338_v2 = vld [vmem:[%s12206_s12 + $0x2f8] sm:$0xff]  ;;  %v9053_v60 = vcombine.low %v15331_v1, %v15334_v59  ;;  %v1395_v1 = vld [vmem:[%s15534_s2] sm:$0x3] }
 0x3d1   : > { %8815 = vmatpush1.bf16.msra.mxu0 %v11922_v61  ;;  %7968 = vmatprep.subr.bf16.mxu1 %v11927_v0  ;;  %v370_v58 = vld [vmem:[%s12206_s12 + $0x3f8] sm:$0xff]  ;;  %v9085_v61 = vcombine.low %v15337_v56, %v15340_v57  ;;  %v9118_v0 = vcombine.high %v322_v47, %v354_v55 }
 0x3d2   : > { %8816 = vmatprep.subr.bf16.mxu0 %v11930_v3  ;;  %7994 = vmatprep.mubr.bf16.mxu1 %v9054_v4  ;;  %v9150_v3 = vcombine.high %v338_v2, %v370_v58  ;;  %v9117_v4 = vcombine.low %v322_v47, %v354_v55 }
 0x3d3   : > { %8842 = vmatprep.mubr.bf16.mxu0 %v9086_v5  ;;  %v9149_v5 = vcombine.low %v338_v2, %v370_v58 }
 0x3d4   : > { %7969 = vmatpush1.bf16.msra.mxu1 %v11925_v62  ;;  %v1397_v62 = vlaneseq }
 0x3d5   : > { %8817 = vmatpush1.bf16.msra.mxu0 %v11928_v63  ;;  %7970 = vmatprep.subr.bf16.mxu1 %v11933_v6 }
 0x3d6   : > { %8818 = vmatprep.subr.bf16.mxu0 %v11936_v7  ;;  %v1398_v63 = vshrl.u32 %v1397_v62, 7 }
 0x3d8   : > { %7971 = vmatpush1.bf16.msra.mxu1 %v11931_v17  ;;  %v1399_v6 = vsub.s32 0, %v1398_v63  ;;  %v1403_v59 = vsub.s32 1, %v1398_v63 }
 0x3d9   : > { %8819 = vmatpush1.bf16.msra.mxu0 %v11934_v18  ;;  %7972 = vmatprep.subr.bf16.mxu1 %v11939_v10 }
 0x3da   : > { %8820 = vmatprep.subr.bf16.mxu0 %v11942_v13  ;;  %v1400_v56 = vrot.slane %v1395_v1, %v1399_v6  ;;  %v1404_v57 = vrot.slane %v1395_v1, %v1403_v59 }
 0x3dc   : > { %7973 = vmatpush1.bf16.msra.mxu1 %v11937_v11 }
 0x3dd   : > { %8821 = vmatpush1.bf16.msra.mxu0 %v11940_v12  ;;  %7974 = vmatprep.subr.bf16.mxu1 %v11945_v14 }
 0x3de   : > { %8822 = vmatprep.subr.bf16.mxu0 %v11948_v15 }
 0x3e0   : > { %7975 = vmatpush1.bf16.msra.mxu1 %v11943_v16 }
 0x3e1   : > { %8823 = vmatpush1.bf16.msra.mxu0 %v11946_v19  ;;  %7976 = vmatprep.subr.bf16.mxu1 %v11951_v8 }
 0x3e2   : > { %8824 = vmatprep.subr.bf16.mxu0 %v11954_v9 }
 0x3e4   : > { %7977 = vmatpush1.bf16.msra.mxu1 %v11949_v20 }
 0x3e5   : > { %8825 = vmatpush1.bf16.msra.mxu0 %v11952_v21  ;;  %7978 = vmatprep.subr.bf16.mxu1 %v11957_v22 }
 0x3e6   : > { %8826 = vmatprep.subr.bf16.mxu0 %v11960_v23 }
 0x3e8   : > { %7979 = vmatpush1.bf16.msra.mxu1 %v11955_v33 }
 0x3e9   : > { %8827 = vmatpush1.bf16.msra.mxu0 %v11958_v34  ;;  %7980 = vmatprep.subr.bf16.mxu1 %v11963_v26 }
 0x3ea   : > { %8828 = vmatprep.subr.bf16.mxu0 %v11966_v27 }
 0x3ec   : > { %7981 = vmatpush1.bf16.msra.mxu1 %v11961_v28 }
 0x3ed   : > { %8829 = vmatpush1.bf16.msra.mxu0 %v11964_v29  ;;  %7982 = vmatprep.subr.bf16.mxu1 %v11969_v30 }
 0x3ee   : > { %8830 = vmatprep.subr.bf16.mxu0 %v11972_v31 }
 0x3f0   : > { %7983 = vmatpush1.bf16.msra.mxu1 %v11967_v32 }
 0x3f1   : > { %8831 = vmatpush1.bf16.msra.mxu0 %v11970_v35  ;;  %7984 = vmatprep.subr.bf16.mxu1 %v11975_v24 }
 0x3f2   : > { %8832 = vmatprep.subr.bf16.mxu0 %v11978_v25 }
 0x3f4   : > { %7985 = vmatpush1.bf16.msra.mxu1 %v11973_v36 }
 0x3f5   : > { %8833 = vmatpush1.bf16.msra.mxu0 %v11976_v37  ;;  %7986 = vmatprep.subr.bf16.mxu1 %v11981_v38 }
 0x3f6   : > { %8834 = vmatprep.subr.bf16.mxu0 %v11984_v39 }
 0x3f8   : > { %7987 = vmatpush1.bf16.msra.mxu1 %v11979_v50 }
 0x3f9   : > { %8835 = vmatpush1.bf16.msra.mxu0 %v11982_v54  ;;  %7988 = vmatprep.subr.bf16.mxu1 %v11987_v43 }
 0x3fa   : > { %8836 = vmatprep.subr.bf16.mxu0 %v11990_v44 }
 0x3fc   : > { %7989 = vmatpush1.bf16.msra.mxu1 %v11985_v48 }
 0x3fd   : > { %8837 = vmatpush1.bf16.msra.mxu0 %v11988_v51  ;;  %7990 = vmatprep.subr.bf16.mxu1 %v11993_v52 }
 0x3fe   : > { %8838 = vmatprep.subr.bf16.mxu0 %v11996_v53 }
 0x400   : > { %7991 = vmatpush1.bf16.msra.mxu1 %v11991_v49 }
 0x401   : > { %8839 = vmatpush1.bf16.msra.mxu0 %v11994_v42  ;;  %7992 = vmatprep.subr.bf16.mxu1 %v11999_v40 }
 0x402   : > { %8840 = vmatprep.subr.bf16.mxu0 %v12002_v41 }
 0x404   : > { %7993 = vmatpush1.bf16.msra.mxu1 %v11997_v45 }
 0x405   : > { %8841 = vmatpush1.bf16.msra.mxu0 %v12000_v46 }
 0x407   : > { %7995 = vmatmul.mubr.bf16.vlgmr.msra.gmra.mrb[0].mxu1 %v9053_v60 }
 0x408   : > { %8843 = vmatmul.mubr.bf16.vlgmr.msra.gmra.mrb[0].mxu0 %v9085_v61  ;;  %8004 = vmatprep.mubr.bf16.mxu1 %v9118_v0 }
 0x409   : > { %8852 = vmatprep.mubr.bf16.mxu0 %v9150_v3 }
 0x40f   : > { %8005 = vmatmul.mubr.bf16.gmra.mrb[4].mxu1 %v9117_v4 }
 0x410   : > { %8853 = vmatmul.mubr.bf16.gmra.mrb[4].mxu0 %v9149_v5 }
 0x4da   : > { %v7996_v7 = vpop.f32.mrb[0].mxu1 }
 0x4db   : > { %v8844_v17 = vpop.f32.mrb[0].mxu0  ;;  %v10187_v18 = vadd.f32 %v7996_v7, %v1400_v56  ;;  %v7998_v10 = vpop.f32.mrb[1].mxu1 }
 0x4dc   : > { %v8846_v13 = vpop.f32.mrb[1].mxu0  ;;  %v10189_v11 = vadd.f32 %v7998_v10, %v1404_v57  ;;  %v8000_v12 = vpop.f32.mrb[2].mxu1 }
 0x4dd   : > { %v8848_v14 = vpop.f32.mrb[2].mxu0  ;;  %v10188_v15 = vadd.f32 %v10187_v18, %v8844_v17  ;;  %v10191_v16 = vadd.f32 %v8000_v12, %v1400_v56  ;;  %v8002_v19 = vpop.f32.mrb[3].mxu1 }
 0x4de   : > { %v8850_v8 = vpop.f32.mrb[3].mxu0  ;;  %v10190_v9 = vadd.f32 %v10189_v11, %v8846_v13  ;;  %v10193_v20 = vadd.f32 %v8002_v19, %v1404_v57 }
 0x4df   : > { %v8863_v21 = vmax.f32 %v10188_v15, 0.0  ;;  %v10192_v22 = vadd.f32 %v10191_v16, %v8848_v14 }
 0x4e0   : > { %v8864_v23 = vmax.f32 %v10190_v9, 0.0  ;;  %v10194_v33 = vadd.f32 %v10193_v20, %v8850_v8 }
 0x4e1   : > { %v8865_v34 = vmax.f32 %v10192_v22, 0.0 }
 0x4e2   : > { %v10183_v26 = vpack.c.bf16 %v8864_v23, %v8863_v21  ;;  %v8866_v27 = vmax.f32 %v10194_v33, 0.0  ;;  %v8006_v28 = vpop.f32.mrb[4].mxu1 }
 0x4e3   : > { %v8854_v29 = vpop.f32.mrb[4].mxu0  ;;  %v10195_v30 = vadd.f32 %v8006_v28, %v1400_v56  ;;  %v8008_v31 = vpop.f32.mrb[5].mxu1 }
 0x4e4   : > { %v8856_v32 = vpop.f32.mrb[5].mxu0  ;;  %8895 = vst [vmem:[%s240_s22] sm:$0xff] %v10183_v26  ;;  %v10184_v35 = vpack.c.bf16 %v8866_v27, %v8865_v34  ;;  %v10197_v24 = vadd.f32 %v8008_v31, %v1404_v57  ;;  %v8010_v25 = vpop.f32.mrb[6].mxu1 }
 0x4e5   : > { %v8858_v36 = vpop.f32.mrb[6].mxu0  ;;  %v10196_v37 = vadd.f32 %v10195_v30, %v8854_v29  ;;  %v10199_v38 = vadd.f32 %v8010_v25, %v1400_v56  ;;  %v8012_v39 = vpop.f32.mrb[7].mxu1 }
 0x4e6   : > { %v8860_v50 = vpop.f32.mrb[7].mxu0  ;;  %8896 = vst [vmem:[%s240_s22 + $0x8] sm:$0xff] %v10184_v35  ;;  %v10198_v54 = vadd.f32 %v10197_v24, %v8856_v32  ;;  %v10201_v43 = vadd.f32 %v8012_v39, %v1404_v57 }
 0x4e7   : > { %v8867_v44 = vmax.f32 %v10196_v37, 0.0  ;;  %v10200_v48 = vadd.f32 %v10199_v38, %v8858_v36 }
 0x4e8   : > { %v8868_v51 = vmax.f32 %v10198_v54, 0.0  ;;  %v10202_v52 = vadd.f32 %v10201_v43, %v8860_v50 }
 0x4e9   : > { %v8869_v53 = vmax.f32 %v10200_v48, 0.0 }
 0x4ea   : > { %v10185_v49 = vpack.c.bf16 %v8868_v51, %v8867_v44  ;;  %v8870_v42 = vmax.f32 %v10202_v52, 0.0 }
 0x4ec   : > { %8897 = vst [vmem:[%s240_s22 + $0x10] sm:$0xff] %v10185_v49  ;;  %v10186_v40 = vpack.c.bf16 %v8870_v42, %v8869_v53 }
 0x4ee   : > { %8898 = vst [vmem:[%s240_s22 + $0x18] sm:$0xff] %v10186_v40 }
 0x4ef PF: > { %s13_s14 = sadd.s32 1, %s12025_s14   ;;  %s15536_s12 = smov %s12021_s13 }
 0x4f0   : > { %p10_p5 = scmp.ge.s32.totalorder %s13_s14, 4   ;;  %s15537_s13 = smov %s15539_s15 }
 0x4f2   :  { %12 = sbr.rel (!%p10_p5) target bundleno = 2 (0x2), region = 68 }

// kernel: _lambda_.8
= control target key start
LH: loop header
LB: loop body
LE: loop exit
PB: predicated region body
PF: predicated region fallthrough
CT: control target
= control target key end

     0   :  { %s10435_s12 = smov 0   ;;  %s10437_s13 = smov 0   ;;  %s13180_s0 = inlined_call_operand.vmem [shape: bf16[64,6912], index: 0, kind: input, shape index: {}]   ;;  %s13181_s1 = inlined_call_operand.vmem [shape: bf16[6912,256], index: 1, kind: input, shape index: {}]   ;;  %s13182_s2 = inlined_call_operand.vmem [shape: f32[1,256], index: 2, kind: input, shape index: {}]   ;;  %s13183_s3 = inlined_call_operand.vmem [shape: bf16[64,256], index: 3, kind: output, shape index: {}]  }
   0x1   :  { %s10439_s14 = smov 0  }
   0x2 LB: > { %s25_s15 = sadd.s32 1, %s10409_s13  ;;  %p7671_p0 = scmp.ge.s32.totalorder %s10413_s14, 1  ;;  %s10413_s14 = sphi %s10439_s14, %s13_s14   ;;  %s10409_s13 = sphi %s10437_s13, %s13185_s13   ;;  %s10405_s12 = sphi %s10435_s12, %s13184_s12  }
   0x3   : > { %p27_p1 = scmp.ge.s32.totalorder %s25_s15, 2  ;;  %p174_p2 = scmp.lt.s32.totalorder %s10413_s14, 3 }
   0x5   : > { %s13187_s15 = smov (%p27_p1, %s25_s15), 0  ;;  %p175_p3 = pnand %p7671_p0, %p174_p2 }
   0x6   : > { %v8933_v0 = vld [vmem:[%s13181_s1 + $0x4] ss:$8 sps:$4 sm:$0xff] (!%p175_p3)   ;;  %v8937_v2 = vld [vmem:[%s13181_s1] ss:$8 sps:$4 sm:$0xff] (!%p175_p3)   ;;  %v8939_v4 = vld [vmem:[%s13181_s1 + $0x14] ss:$8 sps:$4 sm:$0xff] (!%p175_p3)  }
   0x7   : > { %178 = sbr.rel (%p175_p3) target bundleno = 1126 (0x466), region = 32  ;;  %v8935_v1 = vld [vmem:[%s13181_s1 + $0xd04] ss:$8 sps:$4 sm:$0xff] (!%p175_p3)   ;;  %6087 = vmatprep.subr.bf16.mxu1 (!%p175_p3), %v8933_v0  ;;  %v8938_v3 = vld [vmem:[%s13181_s1 + $0xd00] ss:$8 sps:$4 sm:$0xff] (!%p175_p3)   ;;  %s7672_s30 = sshll.u32 (!%p175_p3), %s10405_s12, 2 }
   0x8   : > { %6776 = vmatprep.subr.bf16.mxu0 (!%p175_p3), %v8935_v1  ;;  %6088 = vmatpush1.bf16.msra.mxu1 (!%p175_p3), %v8937_v2  ;;  %v8941_v5 = vld [vmem:[%s13181_s1 + $0xd14] ss:$8 sps:$4 sm:$0xff] (!%p175_p3)   ;;  %v8943_v6 = vld [vmem:[%s13181_s1 + $0x10] ss:$8 sps:$4 sm:$0xff] (!%p175_p3)   ;;  %v8945_v8 = vld [vmem:[%s13181_s1 + $0x24] ss:$8 sps:$4 sm:$0xff] (!%p175_p3)  }
   0x9   : > { %6777 = vmatpush1.bf16.msra.mxu0 (!%p175_p3), %v8938_v3  ;;  %6089 = vmatprep.subr.bf16.mxu1 (!%p175_p3), %v8939_v4  ;;  %v8944_v7 = vld [vmem:[%s13181_s1 + $0xd10] ss:$8 sps:$4 sm:$0xff] (!%p175_p3)   ;;  %v8947_v9 = vld [vmem:[%s13181_s1 + $0xd24] ss:$8 sps:$4 sm:$0xff] (!%p175_p3)   ;;  %v8949_v10 = vld [vmem:[%s13181_s1 + $0x20] ss:$8 sps:$4 sm:$0xff] (!%p175_p3)  }
   0xa   : > { %6778 = vmatprep.subr.bf16.mxu0 (!%p175_p3), %v8941_v5  ;;  %v8950_v11 = vld [vmem:[%s13181_s1 + $0xd20] ss:$8 sps:$4 sm:$0xff] (!%p175_p3)   ;;  %v8951_v12 = vld [vmem:[%s13181_s1 + $0x34] ss:$8 sps:$4 sm:$0xff] (!%p175_p3)   ;;  %v8955_v14 = vld [vmem:[%s13181_s1 + $0x30] ss:$8 sps:$4 sm:$0xff] (!%p175_p3)  }
   0xb   : > { %v8953_v13 = vld [vmem:[%s13181_s1 + $0xd34] ss:$8 sps:$4 sm:$0xff] (!%p175_p3)   ;;  %v8956_v15 = vld [vmem:[%s13181_s1 + $0xd30] ss:$8 sps:$4 sm:$0xff] (!%p175_p3)   ;;  %v8957_v16 = vld [vmem:[%s13181_s1 + $0x44] ss:$8 sps:$4 sm:$0xff] (!%p175_p3)  }
   0xc   : > { %6090 = vmatpush1.bf16.msra.mxu1 (!%p175_p3), %v8943_v6  ;;  %v8959_v17 = vld [vmem:[%s13181_s1 + $0xd44] ss:$8 sps:$4 sm:$0xff] (!%p175_p3)   ;;  %v8961_v18 = vld [vmem:[%s13181_s1 + $0x40] ss:$8 sps:$4 sm:$0xff] (!%p175_p3)   ;;  %v8963_v20 = vld [vmem:[%s13181_s1 + $0x54] ss:$8 sps:$4 sm:$0xff] (!%p175_p3)  }
   0xd   : > { %6779 = vmatpush1.bf16.msra.mxu0 (!%p175_p3), %v8944_v7  ;;  %6091 = vmatprep.subr.bf16.mxu1 (!%p175_p3), %v8945_v8  ;;  %v8962_v19 = vld [vmem:[%s13181_s1 + $0xd40] ss:$8 sps:$4 sm:$0xff] (!%p175_p3)   ;;  %v8965_v21 = vld [vmem:[%s13181_s1 + $0xd54] ss:$8 sps:$4 sm:$0xff] (!%p175_p3)   ;;  %v8967_v22 = vld [vmem:[%s13181_s1 + $0x50] ss:$8 sps:$4 sm:$0xff] (!%p175_p3)  }
   0xe   : > { %6780 = vmatprep.subr.bf16.mxu0 %v8947_v9  ;;  %v8968_v23 = vld [vmem:[%s13181_s1 + $0xd50] ss:$8 sps:$4 sm:$0xff]   ;;  %v8969_v24 = vld [vmem:[%s13181_s1 + $0x64] ss:$8 sps:$4 sm:$0xff]   ;;  %v8973_v26 = vld [vmem:[%s13181_s1 + $0x60] ss:$8 sps:$4 sm:$0xff]  }
   0xf   : > { %v8971_v25 = vld [vmem:[%s13181_s1 + $0xd64] ss:$8 sps:$4 sm:$0xff]   ;;  %v8974_v27 = vld [vmem:[%s13181_s1 + $0xd60] ss:$8 sps:$4 sm:$0xff]   ;;  %v8975_v28 = vld [vmem:[%s13181_s1 + $0x74] ss:$8 sps:$4 sm:$0xff]  }
  0x10   : > { %6092 = vmatpush1.bf16.msra.mxu1 %v8949_v10  ;;  %v8977_v29 = vld [vmem:[%s13181_s1 + $0xd74] ss:$8 sps:$4 sm:$0xff]   ;;  %v8979_v30 = vld [vmem:[%s13181_s1 + $0x70] ss:$8 sps:$4 sm:$0xff]   ;;  %v8981_v32 = vld [vmem:[%s13181_s1 + $0x84] ss:$8 sps:$4 sm:$0xff]  }
  0x11   : > { %6781 = vmatpush1.bf16.msra.mxu0 %v8950_v11  ;;  %6093 = vmatprep.subr.bf16.mxu1 %v8951_v12  ;;  %v8980_v31 = vld [vmem:[%s13181_s1 + $0xd70] ss:$8 sps:$4 sm:$0xff]   ;;  %p214_p4 = scmp.lt.s32.totalorder %s7672_s30, 7  ;;  %v8983_v33 = vld [vmem:[%s13181_s1 + $0xd84] ss:$8 sps:$4 sm:$0xff]  }
  0x12   : > { %6782 = vmatprep.subr.bf16.mxu0 %v8953_v13  ;;  %v8985_v34 = vld [vmem:[%s13181_s1 + $0x80] ss:$8 sps:$4 sm:$0xff]   ;;  %v8987_v36 = vld [vmem:[%s13181_s1 + $0x94] ss:$8 sps:$4 sm:$0xff]   ;;  %v8991_v38 = vld [vmem:[%s13181_s1 + $0x90] ss:$8 sps:$4 sm:$0xff]  }
  0x13   : > { %v8986_v35 = vld [vmem:[%s13181_s1 + $0xd80] ss:$8 sps:$4 sm:$0xff]   ;;  %s13189_s30 = smov (!%p214_p4, %s7672_s30), 7  ;;  %v8989_v37 = vld [vmem:[%s13181_s1 + $0xd94] ss:$8 sps:$4 sm:$0xff]  }
  0x14   : > { %6094 = vmatpush1.bf16.msra.mxu1 %v8955_v14  ;;  %v8992_v39 = vld [vmem:[%s13181_s1 + $0xd90] ss:$8 sps:$4 sm:$0xff]   ;;  %v8993_v40 = vld [vmem:[%s13181_s1 + $0xa4] ss:$8 sps:$4 sm:$0xff]   ;;  %s8908_s29 = smul.u32 216, %s13189_s30 }
  0x15   : > { %6783 = vmatpush1.bf16.msra.mxu0 %v8956_v15  ;;  %6095 = vmatprep.subr.bf16.mxu1 %v8957_v16  ;;  %v8995_v41 = vld [vmem:[%s13181_s1 + $0xda4] ss:$8 sps:$4 sm:$0xff]   ;;  %v8997_v42 = vld [vmem:[%s13181_s1 + $0xa0] ss:$8 sps:$4 sm:$0xff]   ;;  %v8999_v44 = vld [vmem:[%s13181_s1 + $0xb4] ss:$8 sps:$4 sm:$0xff]  }
  0x16   : > { %6784 = vmatprep.subr.bf16.mxu0 %v8959_v17  ;;  %v8998_v43 = vld [vmem:[%s13181_s1 + $0xda0] ss:$8 sps:$4 sm:$0xff]   ;;  %s10597_s17 = scalar_lea.vmem %s13180_s0, %s8908_s29  ;;  %v9001_v45 = vld [vmem:[%s13181_s1 + $0xdb4] ss:$8 sps:$4 sm:$0xff]   ;;  %v9003_v46 = vld [vmem:[%s13181_s1 + $0xb0] ss:$8 sps:$4 sm:$0xff]  }
  0x17   : > { %v9004_v47 = vld [vmem:[%s13181_s1 + $0xdb0] ss:$8 sps:$4 sm:$0xff]   ;;  %v9031_v48 = vld [vmem:[%s10597_s17 + $0x4] ss:$216 sps:$4 sm:$0xff]   ;;  %v9009_v52 = vld [vmem:[%s13181_s1 + $0xc0] ss:$8 sps:$4 sm:$0xff]  }
  0x18   : > { %6096 = vmatpush1.bf16.msra.mxu1 %v8961_v18  ;;  %v9005_v49 = vld [vmem:[%s13181_s1 + $0xc4] ss:$8 sps:$4 sm:$0xff]   ;;  %6119 = vmatprep.mubr.bf16.mxu1 %v9031_v48  ;;  %v9010_v53 = vld [vmem:[%s13181_s1 + $0xdc0] ss:$8 sps:$4 sm:$0xff]   ;;  %v9011_v54 = vld [vmem:[%s13181_s1 + $0xd4] ss:$8 sps:$4 sm:$0xff]  }
  0x19   : > { %6785 = vmatpush1.bf16.msra.mxu0 %v8962_v19  ;;  %6097 = vmatprep.subr.bf16.mxu1 %v8963_v20  ;;  %v9007_v50 = vld [vmem:[%s13181_s1 + $0xdc4] ss:$8 sps:$4 sm:$0xff]   ;;  %v9013_v55 = vld [vmem:[%s13181_s1 + $0xdd4] ss:$8 sps:$4 sm:$0xff]   ;;  %v9015_v56 = vld [vmem:[%s13181_s1 + $0xd0] ss:$8 sps:$4 sm:$0xff]  }
  0x1a   : > { %6786 = vmatprep.subr.bf16.mxu0 %v8965_v21  ;;  %v9037_v51 = vld [vmem:[%s10597_s17 + $0x6c] ss:$216 sps:$4 sm:$0xff]   ;;  %v9016_v57 = vld [vmem:[%s13181_s1 + $0xdd0] ss:$8 sps:$4 sm:$0xff]   ;;  %v9021_v60 = vld [vmem:[%s13181_s1 + $0xe0] ss:$8 sps:$4 sm:$0xff]  }
  0x1b   : > { %6808 = vmatprep.mubr.bf16.mxu0 %v9037_v51  ;;  %v9017_v58 = vld [vmem:[%s13181_s1 + $0xe4] ss:$8 sps:$4 sm:$0xff]   ;;  %v9022_v61 = vld [vmem:[%s13181_s1 + $0xde0] ss:$8 sps:$4 sm:$0xff]   ;;  %v9023_v62 = vld [vmem:[%s13181_s1 + $0xf4] ss:$8 sps:$4 sm:$0xff]  }
  0x1c   : > { %6098 = vmatpush1.bf16.msra.mxu1 %v8967_v22  ;;  %v9019_v59 = vld [vmem:[%s13181_s1 + $0xde4] ss:$8 sps:$4 sm:$0xff]   ;;  %v9025_v63 = vld [vmem:[%s13181_s1 + $0xdf4] ss:$8 sps:$4 sm:$0xff]   ;;  %v9027_v0 = vld [vmem:[%s13181_s1 + $0xf0] ss:$8 sps:$4 sm:$0xff]  }
  0x1d   : > { %6787 = vmatpush1.bf16.msra.mxu0 %v8968_v23  ;;  %6099 = vmatprep.subr.bf16.mxu1 %v8969_v24  ;;  %v9028_v1 = vld [vmem:[%s13181_s1 + $0xdf0] ss:$8 sps:$4 sm:$0xff]   ;;  %v9034_v2 = vld [vmem:[%s13181_s1 + $0x104] ss:$8 sps:$4 sm:$0xff]   ;;  %v9032_v5 = vld [vmem:[%s13181_s1 + $0x100] ss:$8 sps:$4 sm:$0xff]  }
  0x1e   : > { %6788 = vmatprep.subr.bf16.mxu0 %v8971_v25  ;;  %v9040_v3 = vld [vmem:[%s13181_s1 + $0xe04] ss:$8 sps:$4 sm:$0xff]   ;;  %v9029_v4 = vld [vmem:[%s10597_s17] ss:$216 sps:$4 sm:$0xff]   ;;  %v9043_v8 = vld [vmem:[%s13181_s1 + $0x114] ss:$8 sps:$4 sm:$0xff]  }
  0x1f   : > { %v9035_v6 = vld [vmem:[%s10597_s17 + $0x68] ss:$216 sps:$4 sm:$0xff]   ;;  %v9046_v9 = vld [vmem:[%s13181_s1 + $0xe14] ss:$8 sps:$4 sm:$0xff]   ;;  %v9041_v10 = vld [vmem:[%s13181_s1 + $0x110] ss:$8 sps:$4 sm:$0xff]  }
  0x20   : > { %6100 = vmatpush1.bf16.msra.mxu1 %v8973_v26  ;;  %v9038_v7 = vld [vmem:[%s13181_s1 + $0xe00] ss:$8 sps:$4 sm:$0xff]   ;;  %v9044_v11 = vld [vmem:[%s13181_s1 + $0xe10] ss:$8 sps:$4 sm:$0xff]   ;;  %v9049_v12 = vld [vmem:[%s13181_s1 + $0x124] ss:$8 sps:$4 sm:$0xff]  }
  0x21   : > { %6789 = vmatpush1.bf16.msra.mxu0 %v8974_v27  ;;  %6101 = vmatprep.subr.bf16.mxu1 %v8975_v28  ;;  %v9052_v13 = vld [vmem:[%s13181_s1 + $0xe24] ss:$8 sps:$4 sm:$0xff]   ;;  %v9047_v14 = vld [vmem:[%s13181_s1 + $0x120] ss:$8 sps:$4 sm:$0xff]   ;;  %v9055_v16 = vld [vmem:[%s13181_s1 + $0x134] ss:$8 sps:$4 sm:$0xff]  }
  0x22   : > { %6790 = vmatprep.subr.bf16.mxu0 %v8977_v29  ;;  %v9050_v15 = vld [vmem:[%s13181_s1 + $0xe20] ss:$8 sps:$4 sm:$0xff]   ;;  %v9058_v17 = vld [vmem:[%s13181_s1 + $0xe34] ss:$8 sps:$4 sm:$0xff]   ;;  %v9053_v18 = vld [vmem:[%s13181_s1 + $0x130] ss:$8 sps:$4 sm:$0xff]  }
  0x23   : > { %v9056_v19 = vld [vmem:[%s13181_s1 + $0xe30] ss:$8 sps:$4 sm:$0xff]   ;;  %v9061_v20 = vld [vmem:[%s13181_s1 + $0x144] ss:$8 sps:$4 sm:$0xff]   ;;  %v9059_v22 = vld [vmem:[%s13181_s1 + $0x140] ss:$8 sps:$4 sm:$0xff]  }
  0x24   : > { %6102 = vmatpush1.bf16.msra.mxu1 %v8979_v30  ;;  %v9064_v21 = vld [vmem:[%s13181_s1 + $0xe44] ss:$8 sps:$4 sm:$0xff]   ;;  %v9062_v23 = vld [vmem:[%s13181_s1 + $0xe40] ss:$8 sps:$4 sm:$0xff]   ;;  %v9067_v24 = vld [vmem:[%s13181_s1 + $0x154] ss:$8 sps:$4 sm:$0xff]  }
  0x25   : > { %6791 = vmatpush1.bf16.msra.mxu0 %v8980_v31  ;;  %6103 = vmatprep.subr.bf16.mxu1 %v8981_v32  ;;  %v9070_v25 = vld [vmem:[%s13181_s1 + $0xe54] ss:$8 sps:$4 sm:$0xff]   ;;  %v9065_v26 = vld [vmem:[%s13181_s1 + $0x150] ss:$8 sps:$4 sm:$0xff]   ;;  %v9073_v29 = vld [vmem:[%s13181_s1 + $0x164] ss:$8 sps:$4 sm:$0xff]  }
  0x26   : > { %6792 = vmatprep.subr.bf16.mxu0 %v8983_v33  ;;  %v9068_v27 = vld [vmem:[%s13181_s1 + $0xe50] ss:$8 sps:$4 sm:$0xff]   ;;  %v9119_v28 = vld [vmem:[%s10597_s17 + $0x1b4] ss:$216 sps:$4 sm:$0xff]   ;;  %v9071_v32 = vld [vmem:[%s13181_s1 + $0x160] ss:$8 sps:$4 sm:$0xff]  }
  0x27   : > { %v9076_v30 = vld [vmem:[%s13181_s1 + $0xe64] ss:$8 sps:$4 sm:$0xff]   ;;  %v9124_v31 = vld [vmem:[%s10597_s17 + $0x21c] ss:$216 sps:$4 sm:$0xff]   ;;  %v9074_v33 = vld [vmem:[%s13181_s1 + $0xe60] ss:$8 sps:$4 sm:$0xff]  }
  0x28   : > { %6104 = vmatpush1.bf16.msra.mxu1 %v8985_v34  ;;  %v9129_v34 = vld [vmem:[%s10597_s17 + $0x1b0] ss:$216 sps:$4 sm:$0xff]   ;;  %v9100_v51 = vld [vmem:[%s13181_s1 + $0xea4] ss:$8 sps:$4 sm:$0xff]  }
  0x29   : > { %6793 = vmatpush1.bf16.msra.mxu0 %v8986_v35  ;;  %6105 = vmatprep.subr.bf16.mxu1 %v8987_v36  ;;  %v9130_v35 = vld [vmem:[%s10597_s17 + $0x218] ss:$216 sps:$4 sm:$0xff]   ;;  %v9079_v36 = vld [vmem:[%s13181_s1 + $0x174] ss:$8 sps:$4 sm:$0xff]  }
  0x2a   : > { %6794 = vmatprep.subr.bf16.mxu0 %v8989_v37  ;;  %v9082_v37 = vld [vmem:[%s13181_s1 + $0xe74] ss:$8 sps:$4 sm:$0xff]   ;;  %v9089_v48 = vld [vmem:[%s13181_s1 + $0x190] ss:$8 sps:$4 sm:$0xff]  }
  0x2c   : > { %6106 = vmatpush1.bf16.msra.mxu1 %v8991_v38  ;;  %v9077_v38 = vld [vmem:[%s13181_s1 + $0x170] ss:$8 sps:$4 sm:$0xff]  }
  0x2d   : > { %6795 = vmatpush1.bf16.msra.mxu0 %v8992_v39  ;;  %6107 = vmatprep.subr.bf16.mxu1 %v8993_v40  ;;  %v9080_v39 = vld [vmem:[%s13181_s1 + $0xe70] ss:$8 sps:$4 sm:$0xff]   ;;  %v9139_v40 = vld [vmem:[%s10597_s17 + $0xc] ss:$216 sps:$4 sm:$0xff]  }
  0x2e   : > { %6796 = vmatprep.subr.bf16.mxu0 %v8995_v41  ;;  %v9085_v41 = vld [vmem:[%s13181_s1 + $0x184] ss:$8 sps:$4 sm:$0xff]  }
  0x30   : > { %6108 = vmatpush1.bf16.msra.mxu1 %v8997_v42  ;;  %v9088_v42 = vld [vmem:[%s13181_s1 + $0xe84] ss:$8 sps:$4 sm:$0xff]  }
  0x31   : > { %6797 = vmatpush1.bf16.msra.mxu0 %v8998_v43  ;;  %6109 = vmatprep.subr.bf16.mxu1 %v8999_v44  ;;  %v9145_v43 = vld [vmem:[%s10597_s17 + $0x74] ss:$216 sps:$4 sm:$0xff]   ;;  %v9083_v44 = vld [vmem:[%s13181_s1 + $0x180] ss:$8 sps:$4 sm:$0xff]  }
  0x32   : > { %6798 = vmatprep.subr.bf16.mxu0 %v9001_v45  ;;  %v9086_v45 = vld [vmem:[%s13181_s1 + $0xe80] ss:$8 sps:$4 sm:$0xff]  }
  0x34   : > { %6110 = vmatpush1.bf16.msra.mxu1 %v9003_v46  ;;  %v9091_v46 = vld [vmem:[%s13181_s1 + $0x194] ss:$8 sps:$4 sm:$0xff]  }
  0x35   : > { %6799 = vmatpush1.bf16.msra.mxu0 %v9004_v47  ;;  %6111 = vmatprep.subr.bf16.mxu1 %v9005_v49  ;;  %v9094_v47 = vld [vmem:[%s13181_s1 + $0xe94] ss:$8 sps:$4 sm:$0xff]   ;;  %v9092_v49 = vld [vmem:[%s13181_s1 + $0xe90] ss:$8 sps:$4 sm:$0xff]  }
  0x36   : > { %6800 = vmatprep.subr.bf16.mxu0 %v9007_v50  ;;  %v9097_v50 = vld [vmem:[%s13181_s1 + $0x1a4] ss:$8 sps:$4 sm:$0xff]  }
  0x38   : > { %6112 = vmatpush1.bf16.msra.mxu1 %v9009_v52  ;;  %v9095_v52 = vld [vmem:[%s13181_s1 + $0x1a0] ss:$8 sps:$4 sm:$0xff]  }
  0x39   : > { %6801 = vmatpush1.bf16.msra.mxu0 %v9010_v53  ;;  %6113 = vmatprep.subr.bf16.mxu1 %v9011_v54  ;;  %v9098_v53 = vld [vmem:[%s13181_s1 + $0xea0] ss:$8 sps:$4 sm:$0xff]   ;;  %v9103_v54 = vld [vmem:[%s13181_s1 + $0x1b4] ss:$8 sps:$4 sm:$0xff]  }
  0x3a   : > { %6802 = vmatprep.subr.bf16.mxu0 %v9013_v55  ;;  %v9106_v55 = vld [vmem:[%s13181_s1 + $0xeb4] ss:$8 sps:$4 sm:$0xff]  }
  0x3c   : > { %6114 = vmatpush1.bf16.msra.mxu1 %v9015_v56  ;;  %v9101_v56 = vld [vmem:[%s13181_s1 + $0x1b0] ss:$8 sps:$4 sm:$0xff]  }
  0x3d   : > { %6803 = vmatpush1.bf16.msra.mxu0 %v9016_v57  ;;  %6115 = vmatprep.subr.bf16.mxu1 %v9017_v58  ;;  %v9104_v57 = vld [vmem:[%s13181_s1 + $0xeb0] ss:$8 sps:$4 sm:$0xff]   ;;  %v9109_v58 = vld [vmem:[%s13181_s1 + $0x1c4] ss:$8 sps:$4 sm:$0xff]  }
  0x3e   : > { %6804 = vmatprep.subr.bf16.mxu0 %v9019_v59  ;;  %v9112_v59 = vld [vmem:[%s13181_s1 + $0xec4] ss:$8 sps:$4 sm:$0xff]  }
  0x40   : > { %6116 = vmatpush1.bf16.msra.mxu1 %v9021_v60  ;;  %v9107_v60 = vld [vmem:[%s13181_s1 + $0x1c0] ss:$8 sps:$4 sm:$0xff]  }
  0x41   : > { %6805 = vmatpush1.bf16.msra.mxu0 %v9022_v61  ;;  %6117 = vmatprep.subr.bf16.mxu1 %v9023_v62  ;;  %v9110_v61 = vld [vmem:[%s13181_s1 + $0xec0] ss:$8 sps:$4 sm:$0xff]   ;;  %v9115_v62 = vld [vmem:[%s13181_s1 + $0x1d4] ss:$8 sps:$4 sm:$0xff]  }
  0x42   : > { %6806 = vmatprep.subr.bf16.mxu0 %v9025_v63  ;;  %v9118_v63 = vld [vmem:[%s13181_s1 + $0xed4] ss:$8 sps:$4 sm:$0xff]  }
  0x44   : > { %6118 = vmatpush1.bf16.msra.mxu1 %v9027_v0  ;;  %v9113_v0 = vld [vmem:[%s13181_s1 + $0x1d0] ss:$8 sps:$4 sm:$0xff]  }
  0x45   : > { %6807 = vmatpush1.bf16.msra.mxu0 %v9028_v1  ;;  %6140 = vmatprep.subr.bf16.mxu1 %v9034_v2  ;;  %v9116_v1 = vld [vmem:[%s13181_s1 + $0xed0] ss:$8 sps:$4 sm:$0xff]   ;;  %v9123_v2 = vld [vmem:[%s13181_s1 + $0x1e4] ss:$8 sps:$4 sm:$0xff]  }
  0x46   : > { %6829 = vmatprep.subr.bf16.mxu0 %v9040_v3  ;;  %v9128_v3 = vld [vmem:[%s13181_s1 + $0xee4] ss:$8 sps:$4 sm:$0xff]  }
  0x47   : > { %6120 = vmatmul.mubr.bf16.vlgmr.msra.gmra.mrb[0].mxu1 %v9029_v4  ;;  %v9121_v4 = vld [vmem:[%s13181_s1 + $0x1e0] ss:$8 sps:$4 sm:$0xff]  }
  0x48   : > { %6809 = vmatmul.mubr.bf16.vlgmr.msra.gmra.mrb[0].mxu0 %v9035_v6  ;;  %6141 = vmatpush1.bf16.msra.mxu1 %v9032_v5  ;;  %v9126_v5 = vld [vmem:[%s13181_s1 + $0xee0] ss:$8 sps:$4 sm:$0xff]   ;;  %v9133_v6 = vld [vmem:[%s13181_s1 + $0x1f4] ss:$8 sps:$4 sm:$0xff]  }
  0x49   : > { %6830 = vmatpush1.bf16.msra.mxu0 %v9038_v7  ;;  %6142 = vmatprep.subr.bf16.mxu1 %v9043_v8  ;;  %v9136_v7 = vld [vmem:[%s13181_s1 + $0xef4] ss:$8 sps:$4 sm:$0xff]   ;;  %v9131_v8 = vld [vmem:[%s13181_s1 + $0x1f0] ss:$8 sps:$4 sm:$0xff]  }
  0x4a   : > { %6831 = vmatprep.subr.bf16.mxu0 %v9046_v9  ;;  %6129 = vmatprep.mubr.bf16.mxu1 %v9119_v28  ;;  %v9134_v9 = vld [vmem:[%s13181_s1 + $0xef0] ss:$8 sps:$4 sm:$0xff]   ;;  %v9163_v28 = vld [vmem:[%s13181_s1 + $0x234] ss:$8 sps:$4 sm:$0xff]  }
  0x4b   : > { %6818 = vmatprep.mubr.bf16.mxu0 %v9124_v31  ;;  %v9164_v31 = vld [vmem:[%s13181_s1 + $0xf30] ss:$8 sps:$4 sm:$0xff]  }
  0x4c   : > { %6143 = vmatpush1.bf16.msra.mxu1 %v9041_v10  ;;  %v9142_v10 = vld [vmem:[%s13181_s1 + $0x204] ss:$8 sps:$4 sm:$0xff]  }
  0x4d   : > { %6832 = vmatpush1.bf16.msra.mxu0 %v9044_v11  ;;  %6144 = vmatprep.subr.bf16.mxu1 %v9049_v12  ;;  %v9148_v11 = vld [vmem:[%s13181_s1 + $0xf04] ss:$8 sps:$4 sm:$0xff]   ;;  %v9137_v12 = vld [vmem:[%s10597_s17 + $0x8] ss:$216 sps:$4 sm:$0xff]  }
  0x4e   : > { %6833 = vmatprep.subr.bf16.mxu0 %v9052_v13  ;;  %v9140_v13 = vld [vmem:[%s13181_s1 + $0x200] ss:$8 sps:$4 sm:$0xff]  }
  0x4f   : > { %6130 = vmatmul.mubr.bf16.gmra.mrb[4].mxu1 %v9129_v34  ;;  %v9172_v34 = vld [vmem:[%s13181_s1 + $0xf44] ss:$8 sps:$4 sm:$0xff]  }
  0x50   : > { %6145 = vmatpush1.bf16.msra.mxu1 %v9047_v14  ;;  %6819 = vmatmul.mubr.bf16.gmra.mrb[4].mxu0 %v9130_v35  ;;  %v9143_v14 = vld [vmem:[%s10597_s17 + $0x70] ss:$216 sps:$4 sm:$0xff]   ;;  %v9253_v35 = vld [vmem:[%s10597_s17 + $0x7c] ss:$216 sps:$4 sm:$0xff]  }
  0x51   : > { %6834 = vmatpush1.bf16.msra.mxu0 %v9050_v15  ;;  %6146 = vmatprep.subr.bf16.mxu1 %v9055_v16  ;;  %v9146_v15 = vld [vmem:[%s13181_s1 + $0xf00] ss:$8 sps:$4 sm:$0xff]   ;;  %v9151_v16 = vld [vmem:[%s13181_s1 + $0x214] ss:$8 sps:$4 sm:$0xff]  }
  0x52   : > { %6835 = vmatprep.subr.bf16.mxu0 %v9058_v17  ;;  %6172 = vmatprep.mubr.bf16.mxu1 %v9139_v40  ;;  %v9154_v17 = vld [vmem:[%s13181_s1 + $0xf14] ss:$8 sps:$4 sm:$0xff]   ;;  %v9173_v40 = vld [vmem:[%s13181_s1 + $0x250] ss:$8 sps:$4 sm:$0xff]  }
  0x53   : > { %6861 = vmatprep.mubr.bf16.mxu0 %v9145_v43  ;;  %v9184_v43 = vld [vmem:[%s13181_s1 + $0xf64] ss:$8 sps:$4 sm:$0xff]  }
  0x54   : > { %6147 = vmatpush1.bf16.msra.mxu1 %v9053_v18  ;;  %v9149_v18 = vld [vmem:[%s13181_s1 + $0x210] ss:$8 sps:$4 sm:$0xff]  }
  0x55   : > { %6836 = vmatpush1.bf16.msra.mxu0 %v9056_v19  ;;  %6148 = vmatprep.subr.bf16.mxu1 %v9061_v20  ;;  %v9152_v19 = vld [vmem:[%s13181_s1 + $0xf10] ss:$8 sps:$4 sm:$0xff]   ;;  %v9227_v20 = vld [vmem:[%s10597_s17 + $0x1bc] ss:$216 sps:$4 sm:$0xff]  }
  0x56   : > { %6837 = vmatprep.subr.bf16.mxu0 %v9064_v21  ;;  %v9157_v21 = vld [vmem:[%s13181_s1 + $0x224] ss:$8 sps:$4 sm:$0xff]  }
  0x58   : > { %6149 = vmatpush1.bf16.msra.mxu1 %v9059_v22  ;;  %v9160_v22 = vld [vmem:[%s13181_s1 + $0xf24] ss:$8 sps:$4 sm:$0xff]  }
  0x59   : > { %6838 = vmatpush1.bf16.msra.mxu0 %v9062_v23  ;;  %6150 = vmatprep.subr.bf16.mxu1 %v9067_v24  ;;  %v9232_v23 = vld [vmem:[%s10597_s17 + $0x224] ss:$216 sps:$4 sm:$0xff]   ;;  %v9155_v24 = vld [vmem:[%s13181_s1 + $0x220] ss:$8 sps:$4 sm:$0xff]  }
  0x5a   : > { %6839 = vmatprep.subr.bf16.mxu0 %v9070_v25  ;;  %v9158_v25 = vld [vmem:[%s13181_s1 + $0xf20] ss:$8 sps:$4 sm:$0xff]  }
  0x5c   : > { %6151 = vmatpush1.bf16.msra.mxu1 %v9065_v26  ;;  %v9237_v26 = vld [vmem:[%s10597_s17 + $0x1b8] ss:$216 sps:$4 sm:$0xff]  }
  0x5d   : > { %6840 = vmatpush1.bf16.msra.mxu0 %v9068_v27  ;;  %6152 = vmatprep.subr.bf16.mxu1 %v9073_v29  ;;  %v9238_v27 = vld [vmem:[%s10597_s17 + $0x220] ss:$216 sps:$4 sm:$0xff]   ;;  %v9166_v29 = vld [vmem:[%s13181_s1 + $0xf34] ss:$8 sps:$4 sm:$0xff]  }
  0x5e   : > { %6841 = vmatprep.subr.bf16.mxu0 %v9076_v30  ;;  %v9161_v30 = vld [vmem:[%s13181_s1 + $0x230] ss:$8 sps:$4 sm:$0xff]  }
  0x60   : > { %6153 = vmatpush1.bf16.msra.mxu1 %v9071_v32  ;;  %v9247_v32 = vld [vmem:[%s10597_s17 + $0x14] ss:$216 sps:$4 sm:$0xff]  }
  0x61   : > { %6842 = vmatpush1.bf16.msra.mxu0 %v9074_v33  ;;  %6154 = vmatprep.subr.bf16.mxu1 %v9079_v36  ;;  %v9169_v33 = vld [vmem:[%s13181_s1 + $0x244] ss:$8 sps:$4 sm:$0xff]   ;;  %v9167_v36 = vld [vmem:[%s13181_s1 + $0x240] ss:$8 sps:$4 sm:$0xff]  }
  0x62   : > { %6843 = vmatprep.subr.bf16.mxu0 %v9082_v37  ;;  %v9170_v37 = vld [vmem:[%s13181_s1 + $0xf40] ss:$8 sps:$4 sm:$0xff]  }
  0x64   : > { %6155 = vmatpush1.bf16.msra.mxu1 %v9077_v38  ;;  %v9175_v38 = vld [vmem:[%s13181_s1 + $0x254] ss:$8 sps:$4 sm:$0xff]  }
  0x65   : > { %6844 = vmatpush1.bf16.msra.mxu0 %v9080_v39  ;;  %6156 = vmatprep.subr.bf16.mxu1 %v9085_v41  ;;  %v9178_v39 = vld [vmem:[%s13181_s1 + $0xf54] ss:$8 sps:$4 sm:$0xff]   ;;  %v9176_v41 = vld [vmem:[%s13181_s1 + $0xf50] ss:$8 sps:$4 sm:$0xff]  }
  0x66   : > { %6845 = vmatprep.subr.bf16.mxu0 %v9088_v42  ;;  %v9181_v42 = vld [vmem:[%s13181_s1 + $0x264] ss:$8 sps:$4 sm:$0xff]  }
  0x68   : > { %6157 = vmatpush1.bf16.msra.mxu1 %v9083_v44  ;;  %v9179_v44 = vld [vmem:[%s13181_s1 + $0x260] ss:$8 sps:$4 sm:$0xff]  }
  0x69   : > { %6846 = vmatpush1.bf16.msra.mxu0 %v9086_v45  ;;  %6158 = vmatprep.subr.bf16.mxu1 %v9091_v46  ;;  %v9182_v45 = vld [vmem:[%s13181_s1 + $0xf60] ss:$8 sps:$4 sm:$0xff]   ;;  %v9187_v46 = vld [vmem:[%s13181_s1 + $0x274] ss:$8 sps:$4 sm:$0xff]  }
  0x6a   : > { %6847 = vmatprep.subr.bf16.mxu0 %v9094_v47  ;;  %v9190_v47 = vld [vmem:[%s13181_s1 + $0xf74] ss:$8 sps:$4 sm:$0xff]  }
  0x6c   : > { %6159 = vmatpush1.bf16.msra.mxu1 %v9089_v48  ;;  %v9185_v48 = vld [vmem:[%s13181_s1 + $0x270] ss:$8 sps:$4 sm:$0xff]  }
  0x6d   : > { %6848 = vmatpush1.bf16.msra.mxu0 %v9092_v49  ;;  %6160 = vmatprep.subr.bf16.mxu1 %v9097_v50  ;;  %v9188_v49 = vld [vmem:[%s13181_s1 + $0xf70] ss:$8 sps:$4 sm:$0xff]   ;;  %v9193_v50 = vld [vmem:[%s13181_s1 + $0x284] ss:$8 sps:$4 sm:$0xff]  }
  0x6e   : > { %6849 = vmatprep.subr.bf16.mxu0 %v9100_v51  ;;  %v9196_v51 = vld [vmem:[%s13181_s1 + $0xf84] ss:$8 sps:$4 sm:$0xff]  }
  0x70   : > { %6161 = vmatpush1.bf16.msra.mxu1 %v9095_v52  ;;  %v9191_v52 = vld [vmem:[%s13181_s1 + $0x280] ss:$8 sps:$4 sm:$0xff]  }
  0x71   : > { %6850 = vmatpush1.bf16.msra.mxu0 %v9098_v53  ;;  %6162 = vmatprep.subr.bf16.mxu1 %v9103_v54  ;;  %v9194_v53 = vld [vmem:[%s13181_s1 + $0xf80] ss:$8 sps:$4 sm:$0xff]   ;;  %v9199_v54 = vld [vmem:[%s13181_s1 + $0x294] ss:$8 sps:$4 sm:$0xff]  }
  0x72   : > { %6851 = vmatprep.subr.bf16.mxu0 %v9106_v55  ;;  %v9202_v55 = vld [vmem:[%s13181_s1 + $0xf94] ss:$8 sps:$4 sm:$0xff]  }
  0x74   : > { %6163 = vmatpush1.bf16.msra.mxu1 %v9101_v56  ;;  %v9197_v56 = vld [vmem:[%s13181_s1 + $0x290] ss:$8 sps:$4 sm:$0xff]  }
  0x75   : > { %6852 = vmatpush1.bf16.msra.mxu0 %v9104_v57  ;;  %6164 = vmatprep.subr.bf16.mxu1 %v9109_v58  ;;  %v9200_v57 = vld [vmem:[%s13181_s1 + $0xf90] ss:$8 sps:$4 sm:$0xff]   ;;  %v9205_v58 = vld [vmem:[%s13181_s1 + $0x2a4] ss:$8 sps:$4 sm:$0xff]  }
  0x76   : > { %6853 = vmatprep.subr.bf16.mxu0 %v9112_v59  ;;  %v9208_v59 = vld [vmem:[%s13181_s1 + $0xfa4] ss:$8 sps:$4 sm:$0xff]  }
  0x78   : > { %6165 = vmatpush1.bf16.msra.mxu1 %v9107_v60  ;;  %v9203_v60 = vld [vmem:[%s13181_s1 + $0x2a0] ss:$8 sps:$4 sm:$0xff]  }
  0x79   : > { %6854 = vmatpush1.bf16.msra.mxu0 %v9110_v61  ;;  %6166 = vmatprep.subr.bf16.mxu1 %v9115_v62  ;;  %v9206_v61 = vld [vmem:[%s13181_s1 + $0xfa0] ss:$8 sps:$4 sm:$0xff]   ;;  %v9211_v62 = vld [vmem:[%s13181_s1 + $0x2b4] ss:$8 sps:$4 sm:$0xff]  }
  0x7a   : > { %6855 = vmatprep.subr.bf16.mxu0 %v9118_v63  ;;  %v9214_v63 = vld [vmem:[%s13181_s1 + $0xfb4] ss:$8 sps:$4 sm:$0xff]  }
  0x7c   : > { %6167 = vmatpush1.bf16.msra.mxu1 %v9113_v0  ;;  %v9209_v0 = vld [vmem:[%s13181_s1 + $0x2b0] ss:$8 sps:$4 sm:$0xff]  }
  0x7d   : > { %6856 = vmatpush1.bf16.msra.mxu0 %v9116_v1  ;;  %6168 = vmatprep.subr.bf16.mxu1 %v9123_v2  ;;  %v9212_v1 = vld [vmem:[%s13181_s1 + $0xfb0] ss:$8 sps:$4 sm:$0xff]   ;;  %v9217_v2 = vld [vmem:[%s13181_s1 + $0x2c4] ss:$8 sps:$4 sm:$0xff]  }
  0x7e   : > { %6857 = vmatprep.subr.bf16.mxu0 %v9128_v3  ;;  %v9220_v3 = vld [vmem:[%s13181_s1 + $0xfc4] ss:$8 sps:$4 sm:$0xff]  }
  0x80   : > { %6169 = vmatpush1.bf16.msra.mxu1 %v9121_v4  ;;  %v9215_v4 = vld [vmem:[%s13181_s1 + $0x2c0] ss:$8 sps:$4 sm:$0xff]  }
  0x81   : > { %6858 = vmatpush1.bf16.msra.mxu0 %v9126_v5  ;;  %6170 = vmatprep.subr.bf16.mxu1 %v9133_v6  ;;  %v9218_v5 = vld [vmem:[%s13181_s1 + $0xfc0] ss:$8 sps:$4 sm:$0xff]   ;;  %v9223_v6 = vld [vmem:[%s13181_s1 + $0x2d4] ss:$8 sps:$4 sm:$0xff]  }
  0x82   : > { %6859 = vmatprep.subr.bf16.mxu0 %v9136_v7  ;;  %v9226_v7 = vld [vmem:[%s13181_s1 + $0xfd4] ss:$8 sps:$4 sm:$0xff]  }
  0x84   : > { %6171 = vmatpush1.bf16.msra.mxu1 %v9131_v8  ;;  %v9221_v8 = vld [vmem:[%s13181_s1 + $0x2d0] ss:$8 sps:$4 sm:$0xff]  }
  0x85   : > { %6860 = vmatpush1.bf16.msra.mxu0 %v9134_v9  ;;  %6193 = vmatprep.subr.bf16.mxu1 %v9142_v10  ;;  %v9224_v9 = vld [vmem:[%s13181_s1 + $0xfd0] ss:$8 sps:$4 sm:$0xff]   ;;  %v9231_v10 = vld [vmem:[%s13181_s1 + $0x2e4] ss:$8 sps:$4 sm:$0xff]  }
  0x86   : > { %6882 = vmatprep.subr.bf16.mxu0 %v9148_v11  ;;  %v9236_v11 = vld [vmem:[%s13181_s1 + $0xfe4] ss:$8 sps:$4 sm:$0xff]  }
  0x87   : > { %6173 = vmatmul.mubr.bf16.vlgmr.msra.gmra.mrb[0].mxu1 %v9137_v12  ;;  %v9229_v12 = vld [vmem:[%s13181_s1 + $0x2e0] ss:$8 sps:$4 sm:$0xff]  }
  0x88   : > { %6862 = vmatmul.mubr.bf16.vlgmr.msra.gmra.mrb[0].mxu0 %v9143_v14  ;;  %6194 = vmatpush1.bf16.msra.mxu1 %v9140_v13  ;;  %v9234_v13 = vld [vmem:[%s13181_s1 + $0xfe0] ss:$8 sps:$4 sm:$0xff]   ;;  %v9241_v14 = vld [vmem:[%s13181_s1 + $0x2f4] ss:$8 sps:$4 sm:$0xff]  }
  0x89   : > { %6883 = vmatpush1.bf16.msra.mxu0 %v9146_v15  ;;  %6195 = vmatprep.subr.bf16.mxu1 %v9151_v16  ;;  %v9244_v15 = vld [vmem:[%s13181_s1 + $0xff4] ss:$8 sps:$4 sm:$0xff]   ;;  %v9239_v16 = vld [vmem:[%s13181_s1 + $0x2f0] ss:$8 sps:$4 sm:$0xff]  }
  0x8a   : > { %6884 = vmatprep.subr.bf16.mxu0 %v9154_v17  ;;  %6182 = vmatprep.mubr.bf16.mxu1 %v9227_v20  ;;  %v9242_v17 = vld [vmem:[%s13181_s1 + $0xff0] ss:$8 sps:$4 sm:$0xff]  }
  0x8b   : > { %6871 = vmatprep.mubr.bf16.mxu0 %v9232_v23  ;;  %v9245_v20 = vld [vmem:[%s10597_s17 + $0x10] ss:$216 sps:$4 sm:$0xff]  }
  0x8c   : > { %6196 = vmatpush1.bf16.msra.mxu1 %v9149_v18  ;;  %v9250_v18 = vld [vmem:[%s13181_s1 + $0x304] ss:$8 sps:$4 sm:$0xff]   ;;  %v9254_v23 = vld [vmem:[%s13181_s1 + $0x1000] ss:$8 sps:$4 sm:$0xff]  }
  0x8d   : > { %6885 = vmatpush1.bf16.msra.mxu0 %v9152_v19  ;;  %6197 = vmatprep.subr.bf16.mxu1 %v9157_v21  ;;  %v9256_v19 = vld [vmem:[%s13181_s1 + $0x1004] ss:$8 sps:$4 sm:$0xff]   ;;  %v9248_v21 = vld [vmem:[%s13181_s1 + $0x300] ss:$8 sps:$4 sm:$0xff]  }
  0x8e   : > { %6886 = vmatprep.subr.bf16.mxu0 %v9160_v22  ;;  %v9251_v22 = vld [vmem:[%s10597_s17 + $0x78] ss:$216 sps:$4 sm:$0xff]  }
  0x8f   : > { %6183 = vmatmul.mubr.bf16.gmra.mrb[4].mxu1 %v9237_v26  ;;  %v9335_v26 = vld [vmem:[%s10597_s17 + $0x1c4] ss:$216 sps:$4 sm:$0xff]  }
  0x90   : > { %6872 = vmatmul.mubr.bf16.gmra.mrb[4].mxu0 %v9238_v27  ;;  %6198 = vmatpush1.bf16.msra.mxu1 %v9155_v24  ;;  %v9259_v24 = vld [vmem:[%s13181_s1 + $0x314] ss:$8 sps:$4 sm:$0xff]   ;;  %v9340_v27 = vld [vmem:[%s10597_s17 + $0x22c] ss:$216 sps:$4 sm:$0xff]  }
  0x91   : > { %6887 = vmatpush1.bf16.msra.mxu0 %v9158_v25  ;;  %6199 = vmatprep.subr.bf16.mxu1 %v9163_v28  ;;  %v9262_v25 = vld [vmem:[%s13181_s1 + $0x1014] ss:$8 sps:$4 sm:$0xff]   ;;  %v9257_v28 = vld [vmem:[%s13181_s1 + $0x310] ss:$8 sps:$4 sm:$0xff]  }
  0x92   : > { %6888 = vmatprep.subr.bf16.mxu0 %v9166_v29  ;;  %6225 = vmatprep.mubr.bf16.mxu1 %v9247_v32  ;;  %v9260_v29 = vld [vmem:[%s13181_s1 + $0x1010] ss:$8 sps:$4 sm:$0xff]   ;;  %v9263_v32 = vld [vmem:[%s13181_s1 + $0x320] ss:$8 sps:$4 sm:$0xff]  }
  0x93   : > { %6914 = vmatprep.mubr.bf16.mxu0 %v9253_v35  ;;  %v9346_v35 = vld [vmem:[%s10597_s17 + $0x228] ss:$216 sps:$4 sm:$0xff]  }
  0x94   : > { %6200 = vmatpush1.bf16.msra.mxu1 %v9161_v30  ;;  %v9265_v30 = vld [vmem:[%s13181_s1 + $0x324] ss:$8 sps:$4 sm:$0xff]  }
  0x95   : > { %6889 = vmatpush1.bf16.msra.mxu0 %v9164_v31  ;;  %6201 = vmatprep.subr.bf16.mxu1 %v9169_v33  ;;  %v9268_v31 = vld [vmem:[%s13181_s1 + $0x1024] ss:$8 sps:$4 sm:$0xff]   ;;  %v9266_v33 = vld [vmem:[%s13181_s1 + $0x1020] ss:$8 sps:$4 sm:$0xff]  }
  0x96   : > { %6890 = vmatprep.subr.bf16.mxu0 %v9172_v34  ;;  %v9345_v34 = vld [vmem:[%s10597_s17 + $0x1c0] ss:$216 sps:$4 sm:$0xff]  }
  0x98   : > { %6202 = vmatpush1.bf16.msra.mxu1 %v9167_v36  ;;  %v9271_v36 = vld [vmem:[%s13181_s1 + $0x334] ss:$8 sps:$4 sm:$0xff]  }
  0x99   : > { %6891 = vmatpush1.bf16.msra.mxu0 %v9170_v37  ;;  %6203 = vmatprep.subr.bf16.mxu1 %v9175_v38  ;;  %v9274_v37 = vld [vmem:[%s13181_s1 + $0x1034] ss:$8 sps:$4 sm:$0xff]  }
  0x9a   : > { %6892 = vmatprep.subr.bf16.mxu0 %v9178_v39  ;;  %v9355_v38 = vld [vmem:[%s10597_s17 + $0x1c] ss:$216 sps:$4 sm:$0xff]  }
  0x9b   : > { %v9361_v39 = vld [vmem:[%s10597_s17 + $0x84] ss:$216 sps:$4 sm:$0xff]  }
  0x9c   : > { %6204 = vmatpush1.bf16.msra.mxu1 %v9173_v40  ;;  %v9269_v40 = vld [vmem:[%s13181_s1 + $0x330] ss:$8 sps:$4 sm:$0xff]  }
  0x9d   : > { %6893 = vmatpush1.bf16.msra.mxu0 %v9176_v41  ;;  %6205 = vmatprep.subr.bf16.mxu1 %v9181_v42  ;;  %v9272_v41 = vld [vmem:[%s13181_s1 + $0x1030] ss:$8 sps:$4 sm:$0xff]   ;;  %v9277_v42 = vld [vmem:[%s13181_s1 + $0x344] ss:$8 sps:$4 sm:$0xff]  }
  0x9e   : > { %6894 = vmatprep.subr.bf16.mxu0 %v9184_v43  ;;  %v9280_v43 = vld [vmem:[%s13181_s1 + $0x1044] ss:$8 sps:$4 sm:$0xff]  }
  0xa0   : > { %6206 = vmatpush1.bf16.msra.mxu1 %v9179_v44  ;;  %v9275_v44 = vld [vmem:[%s13181_s1 + $0x340] ss:$8 sps:$4 sm:$0xff]  }
  0xa1   : > { %6895 = vmatpush1.bf16.msra.mxu0 %v9182_v45  ;;  %6207 = vmatprep.subr.bf16.mxu1 %v9187_v46  ;;  %v9278_v45 = vld [vmem:[%s13181_s1 + $0x1040] ss:$8 sps:$4 sm:$0xff]   ;;  %v9283_v46 = vld [vmem:[%s13181_s1 + $0x354] ss:$8 sps:$4 sm:$0xff]  }
  0xa2   : > { %6896 = vmatprep.subr.bf16.mxu0 %v9190_v47  ;;  %v9286_v47 = vld [vmem:[%s13181_s1 + $0x1054] ss:$8 sps:$4 sm:$0xff]  }
  0xa4   : > { %6208 = vmatpush1.bf16.msra.mxu1 %v9185_v48  ;;  %v9281_v48 = vld [vmem:[%s13181_s1 + $0x350] ss:$8 sps:$4 sm:$0xff]  }
  0xa5   : > { %6897 = vmatpush1.bf16.msra.mxu0 %v9188_v49  ;;  %6209 = vmatprep.subr.bf16.mxu1 %v9193_v50  ;;  %v9284_v49 = vld [vmem:[%s13181_s1 + $0x1050] ss:$8 sps:$4 sm:$0xff]   ;;  %v9289_v50 = vld [vmem:[%s13181_s1 + $0x364] ss:$8 sps:$4 sm:$0xff]  }
  0xa6   : > { %6898 = vmatprep.subr.bf16.mxu0 %v9196_v51  ;;  %v9292_v51 = vld [vmem:[%s13181_s1 + $0x1064] ss:$8 sps:$4 sm:$0xff]  }
  0xa8   : > { %6210 = vmatpush1.bf16.msra.mxu1 %v9191_v52  ;;  %v9287_v52 = vld [vmem:[%s13181_s1 + $0x360] ss:$8 sps:$4 sm:$0xff]  }
  0xa9   : > { %6899 = vmatpush1.bf16.msra.mxu0 %v9194_v53  ;;  %6211 = vmatprep.subr.bf16.mxu1 %v9199_v54  ;;  %v9290_v53 = vld [vmem:[%s13181_s1 + $0x1060] ss:$8 sps:$4 sm:$0xff]   ;;  %v9295_v54 = vld [vmem:[%s13181_s1 + $0x374] ss:$8 sps:$4 sm:$0xff]  }
  0xaa   : > { %6900 = vmatprep.subr.bf16.mxu0 %v9202_v55  ;;  %v9298_v55 = vld [vmem:[%s13181_s1 + $0x1074] ss:$8 sps:$4 sm:$0xff]  }
  0xac   : > { %6212 = vmatpush1.bf16.msra.mxu1 %v9197_v56  ;;  %v9293_v56 = vld [vmem:[%s13181_s1 + $0x370] ss:$8 sps:$4 sm:$0xff]  }
  0xad   : > { %6901 = vmatpush1.bf16.msra.mxu0 %v9200_v57  ;;  %6213 = vmatprep.subr.bf16.mxu1 %v9205_v58  ;;  %v9296_v57 = vld [vmem:[%s13181_s1 + $0x1070] ss:$8 sps:$4 sm:$0xff]   ;;  %v9301_v58 = vld [vmem:[%s13181_s1 + $0x384] ss:$8 sps:$4 sm:$0xff]  }
  0xae   : > { %6902 = vmatprep.subr.bf16.mxu0 %v9208_v59  ;;  %v9304_v59 = vld [vmem:[%s13181_s1 + $0x1084] ss:$8 sps:$4 sm:$0xff]  }
  0xb0   : > { %6214 = vmatpush1.bf16.msra.mxu1 %v9203_v60  ;;  %v9299_v60 = vld [vmem:[%s13181_s1 + $0x380] ss:$8 sps:$4 sm:$0xff]  }
  0xb1   : > { %6903 = vmatpush1.bf16.msra.mxu0 %v9206_v61  ;;  %6215 = vmatprep.subr.bf16.mxu1 %v9211_v62  ;;  %v9302_v61 = vld [vmem:[%s13181_s1 + $0x1080] ss:$8 sps:$4 sm:$0xff]   ;;  %v9307_v62 = vld [vmem:[%s13181_s1 + $0x394] ss:$8 sps:$4 sm:$0xff]  }
  0xb2   : > { %6904 = vmatprep.subr.bf16.mxu0 %v9214_v63  ;;  %v9310_v63 = vld [vmem:[%s13181_s1 + $0x1094] ss:$8 sps:$4 sm:$0xff]  }
  0xb4   : > { %6216 = vmatpush1.bf16.msra.mxu1 %v9209_v0  ;;  %v9305_v0 = vld [vmem:[%s13181_s1 + $0x390] ss:$8 sps:$4 sm:$0xff]  }
  0xb5   : > { %6905 = vmatpush1.bf16.msra.mxu0 %v9212_v1  ;;  %6217 = vmatprep.subr.bf16.mxu1 %v9217_v2  ;;  %v9308_v1 = vld [vmem:[%s13181_s1 + $0x1090] ss:$8 sps:$4 sm:$0xff]   ;;  %v9313_v2 = vld [vmem:[%s13181_s1 + $0x3a4] ss:$8 sps:$4 sm:$0xff]  }
  0xb6   : > { %6906 = vmatprep.subr.bf16.mxu0 %v9220_v3  ;;  %v9316_v3 = vld [vmem:[%s13181_s1 + $0x10a4] ss:$8 sps:$4 sm:$0xff]  }
  0xb8   : > { %6218 = vmatpush1.bf16.msra.mxu1 %v9215_v4  ;;  %v9311_v4 = vld [vmem:[%s13181_s1 + $0x3a0] ss:$8 sps:$4 sm:$0xff]  }
  0xb9   : > { %6907 = vmatpush1.bf16.msra.mxu0 %v9218_v5  ;;  %6219 = vmatprep.subr.bf16.mxu1 %v9223_v6  ;;  %v9314_v5 = vld [vmem:[%s13181_s1 + $0x10a0] ss:$8 sps:$4 sm:$0xff]   ;;  %v9319_v6 = vld [vmem:[%s13181_s1 + $0x3b4] ss:$8 sps:$4 sm:$0xff]  }
  0xba   : > { %6908 = vmatprep.subr.bf16.mxu0 %v9226_v7  ;;  %v9322_v7 = vld [vmem:[%s13181_s1 + $0x10b4] ss:$8 sps:$4 sm:$0xff]  }
  0xbc   : > { %6220 = vmatpush1.bf16.msra.mxu1 %v9221_v8  ;;  %v9317_v8 = vld [vmem:[%s13181_s1 + $0x3b0] ss:$8 sps:$4 sm:$0xff]  }
  0xbd   : > { %6909 = vmatpush1.bf16.msra.mxu0 %v9224_v9  ;;  %6221 = vmatprep.subr.bf16.mxu1 %v9231_v10  ;;  %v9320_v9 = vld [vmem:[%s13181_s1 + $0x10b0] ss:$8 sps:$4 sm:$0xff]   ;;  %v9325_v10 = vld [vmem:[%s13181_s1 + $0x3c4] ss:$8 sps:$4 sm:$0xff]  }
  0xbe   : > { %6910 = vmatprep.subr.bf16.mxu0 %v9236_v11  ;;  %v9328_v11 = vld [vmem:[%s13181_s1 + $0x10c4] ss:$8 sps:$4 sm:$0xff]  }
  0xc0   : > { %6222 = vmatpush1.bf16.msra.mxu1 %v9229_v12  ;;  %v9323_v12 = vld [vmem:[%s13181_s1 + $0x3c0] ss:$8 sps:$4 sm:$0xff]  }
  0xc1   : > { %6911 = vmatpush1.bf16.msra.mxu0 %v9234_v13  ;;  %6223 = vmatprep.subr.bf16.mxu1 %v9241_v14  ;;  %v9326_v13 = vld [vmem:[%s13181_s1 + $0x10c0] ss:$8 sps:$4 sm:$0xff]   ;;  %v9331_v14 = vld [vmem:[%s13181_s1 + $0x3d4] ss:$8 sps:$4 sm:$0xff]  }
  0xc2   : > { %6912 = vmatprep.subr.bf16.mxu0 %v9244_v15  ;;  %v9334_v15 = vld [vmem:[%s13181_s1 + $0x10d4] ss:$8 sps:$4 sm:$0xff]  }
  0xc4   : > { %6224 = vmatpush1.bf16.msra.mxu1 %v9239_v16  ;;  %v9329_v16 = vld [vmem:[%s13181_s1 + $0x3d0] ss:$8 sps:$4 sm:$0xff]  }
  0xc5   : > { %6913 = vmatpush1.bf16.msra.mxu0 %v9242_v17  ;;  %6246 = vmatprep.subr.bf16.mxu1 %v9250_v18  ;;  %v9332_v17 = vld [vmem:[%s13181_s1 + $0x10d0] ss:$8 sps:$4 sm:$0xff]   ;;  %v9339_v18 = vld [vmem:[%s13181_s1 + $0x3e4] ss:$8 sps:$4 sm:$0xff]  }
  0xc6   : > { %6935 = vmatprep.subr.bf16.mxu0 %v9256_v19  ;;  %v9344_v19 = vld [vmem:[%s13181_s1 + $0x10e4] ss:$8 sps:$4 sm:$0xff]  }
  0xc7   : > { %6226 = vmatmul.mubr.bf16.vlgmr.msra.gmra.mrb[0].mxu1 %v9245_v20  ;;  %v9337_v20 = vld [vmem:[%s13181_s1 + $0x3e0] ss:$8 sps:$4 sm:$0xff]  }
  0xc8   : > { %6915 = vmatmul.mubr.bf16.vlgmr.msra.gmra.mrb[0].mxu0 %v9251_v22  ;;  %6247 = vmatpush1.bf16.msra.mxu1 %v9248_v21  ;;  %v9342_v21 = vld [vmem:[%s13181_s1 + $0x10e0] ss:$8 sps:$4 sm:$0xff]   ;;  %v9349_v22 = vld [vmem:[%s13181_s1 + $0x3f4] ss:$8 sps:$4 sm:$0xff]  }
  0xc9   : > { %6936 = vmatpush1.bf16.msra.mxu0 %v9254_v23  ;;  %6248 = vmatprep.subr.bf16.mxu1 %v9259_v24  ;;  %v9352_v23 = vld [vmem:[%s13181_s1 + $0x10f4] ss:$8 sps:$4 sm:$0xff]   ;;  %v9347_v24 = vld [vmem:[%s13181_s1 + $0x3f0] ss:$8 sps:$4 sm:$0xff]  }
  0xca   : > { %6937 = vmatprep.subr.bf16.mxu0 %v9262_v25  ;;  %6235 = vmatprep.mubr.bf16.mxu1 %v9335_v26  ;;  %v9350_v25 = vld [vmem:[%s13181_s1 + $0x10f0] ss:$8 sps:$4 sm:$0xff]   ;;  %v9358_v26 = vld [vmem:[%s13181_s1 + $0x404] ss:$8 sps:$4 sm:$0xff]  }
  0xcb   : > { %6924 = vmatprep.mubr.bf16.mxu0 %v9340_v27  ;;  %v9364_v27 = vld [vmem:[%s13181_s1 + $0x1104] ss:$8 sps:$4 sm:$0xff]  }
  0xcc   : > { %6249 = vmatpush1.bf16.msra.mxu1 %v9257_v28  ;;  %v9353_v28 = vld [vmem:[%s10597_s17 + $0x18] ss:$216 sps:$4 sm:$0xff]  }
  0xcd   : > { %6938 = vmatpush1.bf16.msra.mxu0 %v9260_v29  ;;  %6250 = vmatprep.subr.bf16.mxu1 %v9265_v30  ;;  %v9356_v29 = vld [vmem:[%s13181_s1 + $0x400] ss:$8 sps:$4 sm:$0xff]  }
  0xce   : > { %6939 = vmatprep.subr.bf16.mxu0 %v9268_v31  ;;  %v9359_v30 = vld [vmem:[%s10597_s17 + $0x80] ss:$216 sps:$4 sm:$0xff]  }
  0xcf   : > { %6236 = vmatmul.mubr.bf16.gmra.mrb[4].mxu1 %v9345_v34  ;;  %v9362_v31 = vld [vmem:[%s13181_s1 + $0x1100] ss:$8 sps:$4 sm:$0xff]   ;;  %v9443_v34 = vld [vmem:[%s10597_s17 + $0x1cc] ss:$216 sps:$4 sm:$0xff]  }
  0xd0   : > { %6925 = vmatmul.mubr.bf16.gmra.mrb[4].mxu0 %v9346_v35  ;;  %6251 = vmatpush1.bf16.msra.mxu1 %v9263_v32  ;;  %v9367_v32 = vld [vmem:[%s13181_s1 + $0x414] ss:$8 sps:$4 sm:$0xff]  }
  0xd1   : > { %6940 = vmatpush1.bf16.msra.mxu0 %v9266_v33  ;;  %6252 = vmatprep.subr.bf16.mxu1 %v9271_v36  ;;  %v9370_v33 = vld [vmem:[%s13181_s1 + $0x1114] ss:$8 sps:$4 sm:$0xff]   ;;  %v9365_v36 = vld [vmem:[%s13181_s1 + $0x410] ss:$8 sps:$4 sm:$0xff]  }
  0xd2   : > { %6941 = vmatprep.subr.bf16.mxu0 %v9274_v37  ;;  %6278 = vmatprep.mubr.bf16.mxu1 %v9355_v38  ;;  %v9448_v35 = vld [vmem:[%s10597_s17 + $0x234] ss:$216 sps:$4 sm:$0xff]   ;;  %v9368_v37 = vld [vmem:[%s13181_s1 + $0x1110] ss:$8 sps:$4 sm:$0xff]  }
  0xd3   : > { %6967 = vmatprep.mubr.bf16.mxu0 %v9361_v39  ;;  %v9373_v38 = vld [vmem:[%s13181_s1 + $0x424] ss:$8 sps:$4 sm:$0xff]  }
  0xd4   : > { %6253 = vmatpush1.bf16.msra.mxu1 %v9269_v40  ;;  %v9376_v39 = vld [vmem:[%s13181_s1 + $0x1124] ss:$8 sps:$4 sm:$0xff]   ;;  %v9371_v40 = vld [vmem:[%s13181_s1 + $0x420] ss:$8 sps:$4 sm:$0xff]  }
  0xd5   : > { %6942 = vmatpush1.bf16.msra.mxu0 %v9272_v41  ;;  %6254 = vmatprep.subr.bf16.mxu1 %v9277_v42  ;;  %v9374_v41 = vld [vmem:[%s13181_s1 + $0x1120] ss:$8 sps:$4 sm:$0xff]  }
  0xd6   : > { %6943 = vmatprep.subr.bf16.mxu0 %v9280_v43  ;;  %v9453_v42 = vld [vmem:[%s10597_s17 + $0x1c8] ss:$216 sps:$4 sm:$0xff]  }
  0xd7   : > { %v9454_v43 = vld [vmem:[%s10597_s17 + $0x230] ss:$216 sps:$4 sm:$0xff]  }
  0xd8   : > { %6255 = vmatpush1.bf16.msra.mxu1 %v9275_v44  ;;  %v9379_v44 = vld [vmem:[%s13181_s1 + $0x434] ss:$8 sps:$4 sm:$0xff]  }
  0xd9   : > { %6944 = vmatpush1.bf16.msra.mxu0 %v9278_v45  ;;  %6256 = vmatprep.subr.bf16.mxu1 %v9283_v46  ;;  %v9382_v45 = vld [vmem:[%s13181_s1 + $0x1134] ss:$8 sps:$4 sm:$0xff]  }
  0xda   : > { %6945 = vmatprep.subr.bf16.mxu0 %v9286_v47  ;;  %v9463_v46 = vld [vmem:[%s10597_s17 + $0x24] ss:$216 sps:$4 sm:$0xff]  }
  0xdb   : > { %v9469_v47 = vld [vmem:[%s10597_s17 + $0x8c] ss:$216 sps:$4 sm:$0xff]  }
  0xdc   : > { %6257 = vmatpush1.bf16.msra.mxu1 %v9281_v48  ;;  %v9377_v48 = vld [vmem:[%s13181_s1 + $0x430] ss:$8 sps:$4 sm:$0xff]  }
  0xdd   : > { %6946 = vmatpush1.bf16.msra.mxu0 %v9284_v49  ;;  %6258 = vmatprep.subr.bf16.mxu1 %v9289_v50  ;;  %v9380_v49 = vld [vmem:[%s13181_s1 + $0x1130] ss:$8 sps:$4 sm:$0xff]   ;;  %v9385_v50 = vld [vmem:[%s13181_s1 + $0x444] ss:$8 sps:$4 sm:$0xff]  }
  0xde   : > { %6947 = vmatprep.subr.bf16.mxu0 %v9292_v51  ;;  %v9388_v51 = vld [vmem:[%s13181_s1 + $0x1144] ss:$8 sps:$4 sm:$0xff]  }
  0xe0   : > { %6259 = vmatpush1.bf16.msra.mxu1 %v9287_v52  ;;  %v9383_v52 = vld [vmem:[%s13181_s1 + $0x440] ss:$8 sps:$4 sm:$0xff]  }
  0xe1   : > { %6948 = vmatpush1.bf16.msra.mxu0 %v9290_v53  ;;  %6260 = vmatprep.subr.bf16.mxu1 %v9295_v54  ;;  %v9386_v53 = vld [vmem:[%s13181_s1 + $0x1140] ss:$8 sps:$4 sm:$0xff]   ;;  %v9391_v54 = vld [vmem:[%s13181_s1 + $0x454] ss:$8 sps:$4 sm:$0xff]  }
  0xe2   : > { %6949 = vmatprep.subr.bf16.mxu0 %v9298_v55  ;;  %v9394_v55 = vld [vmem:[%s13181_s1 + $0x1154] ss:$8 sps:$4 sm:$0xff]  }
  0xe4   : > { %6261 = vmatpush1.bf16.msra.mxu1 %v9293_v56  ;;  %v9389_v56 = vld [vmem:[%s13181_s1 + $0x450] ss:$8 sps:$4 sm:$0xff]  }
  0xe5   : > { %6950 = vmatpush1.bf16.msra.mxu0 %v9296_v57  ;;  %6262 = vmatprep.subr.bf16.mxu1 %v9301_v58  ;;  %v9392_v57 = vld [vmem:[%s13181_s1 + $0x1150] ss:$8 sps:$4 sm:$0xff]   ;;  %v9397_v58 = vld [vmem:[%s13181_s1 + $0x464] ss:$8 sps:$4 sm:$0xff]  }
  0xe6   : > { %6951 = vmatprep.subr.bf16.mxu0 %v9304_v59  ;;  %v9400_v59 = vld [vmem:[%s13181_s1 + $0x1164] ss:$8 sps:$4 sm:$0xff]  }
  0xe8   : > { %6263 = vmatpush1.bf16.msra.mxu1 %v9299_v60  ;;  %v9395_v60 = vld [vmem:[%s13181_s1 + $0x460] ss:$8 sps:$4 sm:$0xff]  }
  0xe9   : > { %6952 = vmatpush1.bf16.msra.mxu0 %v9302_v61  ;;  %6264 = vmatprep.subr.bf16.mxu1 %v9307_v62  ;;  %v9398_v61 = vld [vmem:[%s13181_s1 + $0x1160] ss:$8 sps:$4 sm:$0xff]   ;;  %v9403_v62 = vld [vmem:[%s13181_s1 + $0x474] ss:$8 sps:$4 sm:$0xff]  }
  0xea   : > { %6953 = vmatprep.subr.bf16.mxu0 %v9310_v63  ;;  %v9406_v63 = vld [vmem:[%s13181_s1 + $0x1174] ss:$8 sps:$4 sm:$0xff]  }
  0xec   : > { %6265 = vmatpush1.bf16.msra.mxu1 %v9305_v0  ;;  %v9401_v0 = vld [vmem:[%s13181_s1 + $0x470] ss:$8 sps:$4 sm:$0xff]  }
  0xed   : > { %6954 = vmatpush1.bf16.msra.mxu0 %v9308_v1  ;;  %6266 = vmatprep.subr.bf16.mxu1 %v9313_v2  ;;  %v9404_v1 = vld [vmem:[%s13181_s1 + $0x1170] ss:$8 sps:$4 sm:$0xff]   ;;  %v9409_v2 = vld [vmem:[%s13181_s1 + $0x484] ss:$8 sps:$4 sm:$0xff]  }
  0xee   : > { %6955 = vmatprep.subr.bf16.mxu0 %v9316_v3  ;;  %v9412_v3 = vld [vmem:[%s13181_s1 + $0x1184] ss:$8 sps:$4 sm:$0xff]  }
  0xf0   : > { %6267 = vmatpush1.bf16.msra.mxu1 %v9311_v4  ;;  %v9407_v4 = vld [vmem:[%s13181_s1 + $0x480] ss:$8 sps:$4 sm:$0xff]  }
  0xf1   : > { %6956 = vmatpush1.bf16.msra.mxu0 %v9314_v5  ;;  %6268 = vmatprep.subr.bf16.mxu1 %v9319_v6  ;;  %v9410_v5 = vld [vmem:[%s13181_s1 + $0x1180] ss:$8 sps:$4 sm:$0xff]   ;;  %v9415_v6 = vld [vmem:[%s13181_s1 + $0x494] ss:$8 sps:$4 sm:$0xff]  }
  0xf2   : > { %6957 = vmatprep.subr.bf16.mxu0 %v9322_v7  ;;  %v9418_v7 = vld [vmem:[%s13181_s1 + $0x1194] ss:$8 sps:$4 sm:$0xff]  }
  0xf4   : > { %6269 = vmatpush1.bf16.msra.mxu1 %v9317_v8  ;;  %v9413_v8 = vld [vmem:[%s13181_s1 + $0x490] ss:$8 sps:$4 sm:$0xff]  }
  0xf5   : > { %6958 = vmatpush1.bf16.msra.mxu0 %v9320_v9  ;;  %6270 = vmatprep.subr.bf16.mxu1 %v9325_v10  ;;  %v9416_v9 = vld [vmem:[%s13181_s1 + $0x1190] ss:$8 sps:$4 sm:$0xff]   ;;  %v9421_v10 = vld [vmem:[%s13181_s1 + $0x4a4] ss:$8 sps:$4 sm:$0xff]  }
  0xf6   : > { %6959 = vmatprep.subr.bf16.mxu0 %v9328_v11  ;;  %v9424_v11 = vld [vmem:[%s13181_s1 + $0x11a4] ss:$8 sps:$4 sm:$0xff]  }
  0xf8   : > { %6271 = vmatpush1.bf16.msra.mxu1 %v9323_v12  ;;  %v9419_v12 = vld [vmem:[%s13181_s1 + $0x4a0] ss:$8 sps:$4 sm:$0xff]  }
  0xf9   : > { %6960 = vmatpush1.bf16.msra.mxu0 %v9326_v13  ;;  %6272 = vmatprep.subr.bf16.mxu1 %v9331_v14  ;;  %v9422_v13 = vld [vmem:[%s13181_s1 + $0x11a0] ss:$8 sps:$4 sm:$0xff]   ;;  %v9427_v14 = vld [vmem:[%s13181_s1 + $0x4b4] ss:$8 sps:$4 sm:$0xff]  }
  0xfa   : > { %6961 = vmatprep.subr.bf16.mxu0 %v9334_v15  ;;  %v9430_v15 = vld [vmem:[%s13181_s1 + $0x11b4] ss:$8 sps:$4 sm:$0xff]  }
  0xfc   : > { %6273 = vmatpush1.bf16.msra.mxu1 %v9329_v16  ;;  %v9425_v16 = vld [vmem:[%s13181_s1 + $0x4b0] ss:$8 sps:$4 sm:$0xff]  }
  0xfd   : > { %6962 = vmatpush1.bf16.msra.mxu0 %v9332_v17  ;;  %6274 = vmatprep.subr.bf16.mxu1 %v9339_v18  ;;  %v9428_v17 = vld [vmem:[%s13181_s1 + $0x11b0] ss:$8 sps:$4 sm:$0xff]   ;;  %v9433_v18 = vld [vmem:[%s13181_s1 + $0x4c4] ss:$8 sps:$4 sm:$0xff]  }
  0xfe   : > { %6963 = vmatprep.subr.bf16.mxu0 %v9344_v19  ;;  %v9436_v19 = vld [vmem:[%s13181_s1 + $0x11c4] ss:$8 sps:$4 sm:$0xff]  }
 0x100   : > { %6275 = vmatpush1.bf16.msra.mxu1 %v9337_v20  ;;  %v9431_v20 = vld [vmem:[%s13181_s1 + $0x4c0] ss:$8 sps:$4 sm:$0xff]  }
 0x101   : > { %6964 = vmatpush1.bf16.msra.mxu0 %v9342_v21  ;;  %6276 = vmatprep.subr.bf16.mxu1 %v9349_v22  ;;  %v9434_v21 = vld [vmem:[%s13181_s1 + $0x11c0] ss:$8 sps:$4 sm:$0xff]   ;;  %v9439_v22 = vld [vmem:[%s13181_s1 + $0x4d4] ss:$8 sps:$4 sm:$0xff]  }
 0x102   : > { %6965 = vmatprep.subr.bf16.mxu0 %v9352_v23  ;;  %v9442_v23 = vld [vmem:[%s13181_s1 + $0x11d4] ss:$8 sps:$4 sm:$0xff]  }
 0x104   : > { %6277 = vmatpush1.bf16.msra.mxu1 %v9347_v24  ;;  %v9437_v24 = vld [vmem:[%s13181_s1 + $0x4d0] ss:$8 sps:$4 sm:$0xff]  }
 0x105   : > { %6966 = vmatpush1.bf16.msra.mxu0 %v9350_v25  ;;  %6299 = vmatprep.subr.bf16.mxu1 %v9358_v26  ;;  %v9440_v25 = vld [vmem:[%s13181_s1 + $0x11d0] ss:$8 sps:$4 sm:$0xff]   ;;  %v9447_v26 = vld [vmem:[%s13181_s1 + $0x4e4] ss:$8 sps:$4 sm:$0xff]  }
 0x106   : > { %6988 = vmatprep.subr.bf16.mxu0 %v9364_v27  ;;  %v9452_v27 = vld [vmem:[%s13181_s1 + $0x11e4] ss:$8 sps:$4 sm:$0xff]  }
 0x107   : > { %6279 = vmatmul.mubr.bf16.vlgmr.msra.gmra.mrb[0].mxu1 %v9353_v28  ;;  %v9445_v28 = vld [vmem:[%s13181_s1 + $0x4e0] ss:$8 sps:$4 sm:$0xff]  }
 0x108   : > { %6968 = vmatmul.mubr.bf16.vlgmr.msra.gmra.mrb[0].mxu0 %v9359_v30  ;;  %6300 = vmatpush1.bf16.msra.mxu1 %v9356_v29  ;;  %v9450_v29 = vld [vmem:[%s13181_s1 + $0x11e0] ss:$8 sps:$4 sm:$0xff]   ;;  %v9457_v30 = vld [vmem:[%s13181_s1 + $0x4f4] ss:$8 sps:$4 sm:$0xff]  }
 0x109   : > { %6989 = vmatpush1.bf16.msra.mxu0 %v9362_v31  ;;  %6301 = vmatprep.subr.bf16.mxu1 %v9367_v32  ;;  %v9460_v31 = vld [vmem:[%s13181_s1 + $0x11f4] ss:$8 sps:$4 sm:$0xff]   ;;  %v9455_v32 = vld [vmem:[%s13181_s1 + $0x4f0] ss:$8 sps:$4 sm:$0xff]  }
 0x10a   : > { %6990 = vmatprep.subr.bf16.mxu0 %v9370_v33  ;;  %6288 = vmatprep.mubr.bf16.mxu1 %v9443_v34  ;;  %v9458_v33 = vld [vmem:[%s13181_s1 + $0x11f0] ss:$8 sps:$4 sm:$0xff]   ;;  %v9466_v34 = vld [vmem:[%s13181_s1 + $0x504] ss:$8 sps:$4 sm:$0xff]  }
 0x10b   : > { %6977 = vmatprep.mubr.bf16.mxu0 %v9448_v35  ;;  %v9472_v35 = vld [vmem:[%s13181_s1 + $0x1204] ss:$8 sps:$4 sm:$0xff]  }
 0x10c   : > { %6302 = vmatpush1.bf16.msra.mxu1 %v9365_v36  ;;  %v9461_v36 = vld [vmem:[%s10597_s17 + $0x20] ss:$216 sps:$4 sm:$0xff]  }
 0x10d   : > { %6991 = vmatpush1.bf16.msra.mxu0 %v9368_v37  ;;  %6303 = vmatprep.subr.bf16.mxu1 %v9373_v38  ;;  %v9464_v37 = vld [vmem:[%s13181_s1 + $0x500] ss:$8 sps:$4 sm:$0xff]  }
 0x10e   : > { %6992 = vmatprep.subr.bf16.mxu0 %v9376_v39  ;;  %v9467_v38 = vld [vmem:[%s10597_s17 + $0x88] ss:$216 sps:$4 sm:$0xff]  }
 0x10f   : > { %6289 = vmatmul.mubr.bf16.gmra.mrb[4].mxu1 %v9453_v42  ;;  %v9470_v39 = vld [vmem:[%s13181_s1 + $0x1200] ss:$8 sps:$4 sm:$0xff]   ;;  %v9551_v42 = vld [vmem:[%s10597_s17 + $0x1d4] ss:$216 sps:$4 sm:$0xff]  }
 0x110   : > { %6978 = vmatmul.mubr.bf16.gmra.mrb[4].mxu0 %v9454_v43  ;;  %6304 = vmatpush1.bf16.msra.mxu1 %v9371_v40  ;;  %v9475_v40 = vld [vmem:[%s13181_s1 + $0x514] ss:$8 sps:$4 sm:$0xff]  }
 0x111   : > { %6993 = vmatpush1.bf16.msra.mxu0 %v9374_v41  ;;  %6305 = vmatprep.subr.bf16.mxu1 %v9379_v44  ;;  %v9478_v41 = vld [vmem:[%s13181_s1 + $0x1214] ss:$8 sps:$4 sm:$0xff]   ;;  %v9473_v44 = vld [vmem:[%s13181_s1 + $0x510] ss:$8 sps:$4 sm:$0xff]  }
 0x112   : > { %6994 = vmatprep.subr.bf16.mxu0 %v9382_v45  ;;  %6331 = vmatprep.mubr.bf16.mxu1 %v9463_v46  ;;  %v9556_v43 = vld [vmem:[%s10597_s17 + $0x23c] ss:$216 sps:$4 sm:$0xff]   ;;  %v9476_v45 = vld [vmem:[%s13181_s1 + $0x1210] ss:$8 sps:$4 sm:$0xff]   ;;  %v9481_v46 = vld [vmem:[%s13181_s1 + $0x524] ss:$8 sps:$4 sm:$0xff]  }
 0x113   : > { %7020 = vmatprep.mubr.bf16.mxu0 %v9469_v47  ;;  %v9484_v47 = vld [vmem:[%s13181_s1 + $0x1224] ss:$8 sps:$4 sm:$0xff]  }
 0x114   : > { %6306 = vmatpush1.bf16.msra.mxu1 %v9377_v48  ;;  %v9479_v48 = vld [vmem:[%s13181_s1 + $0x520] ss:$8 sps:$4 sm:$0xff]  }
 0x115   : > { %6995 = vmatpush1.bf16.msra.mxu0 %v9380_v49  ;;  %6307 = vmatprep.subr.bf16.mxu1 %v9385_v50  ;;  %v9482_v49 = vld [vmem:[%s13181_s1 + $0x1220] ss:$8 sps:$4 sm:$0xff]  }
 0x116   : > { %6996 = vmatprep.subr.bf16.mxu0 %v9388_v51  ;;  %v9561_v50 = vld [vmem:[%s10597_s17 + $0x1d0] ss:$216 sps:$4 sm:$0xff]  }
 0x117   : > { %v9562_v51 = vld [vmem:[%s10597_s17 + $0x238] ss:$216 sps:$4 sm:$0xff]  }
 0x118   : > { %6308 = vmatpush1.bf16.msra.mxu1 %v9383_v52  ;;  %v9487_v52 = vld [vmem:[%s13181_s1 + $0x534] ss:$8 sps:$4 sm:$0xff]  }
 0x119   : > { %6997 = vmatpush1.bf16.msra.mxu0 %v9386_v53  ;;  %6309 = vmatprep.subr.bf16.mxu1 %v9391_v54  ;;  %v9490_v53 = vld [vmem:[%s13181_s1 + $0x1234] ss:$8 sps:$4 sm:$0xff]   ;;  %v9571_v54 = vld [vmem:[%s10597_s17 + $0x2c] ss:$216 sps:$4 sm:$0xff]  }
 0x11a   : > { %6998 = vmatprep.subr.bf16.mxu0 %v9394_v55  ;;  %v9577_v55 = vld [vmem:[%s10597_s17 + $0x94] ss:$216 sps:$4 sm:$0xff]  }
 0x11c   : > { %6310 = vmatpush1.bf16.msra.mxu1 %v9389_v56  ;;  %v9485_v56 = vld [vmem:[%s13181_s1 + $0x530] ss:$8 sps:$4 sm:$0xff]  }
 0x11d   : > { %6999 = vmatpush1.bf16.msra.mxu0 %v9392_v57  ;;  %6311 = vmatprep.subr.bf16.mxu1 %v9397_v58  ;;  %v9488_v57 = vld [vmem:[%s13181_s1 + $0x1230] ss:$8 sps:$4 sm:$0xff]   ;;  %v9493_v58 = vld [vmem:[%s13181_s1 + $0x544] ss:$8 sps:$4 sm:$0xff]  }
 0x11e   : > { %7000 = vmatprep.subr.bf16.mxu0 %v9400_v59  ;;  %v9496_v59 = vld [vmem:[%s13181_s1 + $0x1244] ss:$8 sps:$4 sm:$0xff]  }
 0x120   : > { %6312 = vmatpush1.bf16.msra.mxu1 %v9395_v60  ;;  %v9491_v60 = vld [vmem:[%s13181_s1 + $0x540] ss:$8 sps:$4 sm:$0xff]  }
 0x121   : > { %7001 = vmatpush1.bf16.msra.mxu0 %v9398_v61  ;;  %6313 = vmatprep.subr.bf16.mxu1 %v9403_v62  ;;  %v9494_v61 = vld [vmem:[%s13181_s1 + $0x1240] ss:$8 sps:$4 sm:$0xff]   ;;  %v9499_v62 = vld [vmem:[%s13181_s1 + $0x554] ss:$8 sps:$4 sm:$0xff]  }
 0x122   : > { %7002 = vmatprep.subr.bf16.mxu0 %v9406_v63  ;;  %v9502_v63 = vld [vmem:[%s13181_s1 + $0x1254] ss:$8 sps:$4 sm:$0xff]  }
 0x124   : > { %6314 = vmatpush1.bf16.msra.mxu1 %v9401_v0  ;;  %v9497_v0 = vld [vmem:[%s13181_s1 + $0x550] ss:$8 sps:$4 sm:$0xff]  }
 0x125   : > { %7003 = vmatpush1.bf16.msra.mxu0 %v9404_v1  ;;  %6315 = vmatprep.subr.bf16.mxu1 %v9409_v2  ;;  %v9500_v1 = vld [vmem:[%s13181_s1 + $0x1250] ss:$8 sps:$4 sm:$0xff]   ;;  %v9505_v2 = vld [vmem:[%s13181_s1 + $0x564] ss:$8 sps:$4 sm:$0xff]  }
 0x126   : > { %7004 = vmatprep.subr.bf16.mxu0 %v9412_v3  ;;  %v9508_v3 = vld [vmem:[%s13181_s1 + $0x1264] ss:$8 sps:$4 sm:$0xff]  }
 0x128   : > { %6316 = vmatpush1.bf16.msra.mxu1 %v9407_v4  ;;  %v9503_v4 = vld [vmem:[%s13181_s1 + $0x560] ss:$8 sps:$4 sm:$0xff]  }
 0x129   : > { %7005 = vmatpush1.bf16.msra.mxu0 %v9410_v5  ;;  %6317 = vmatprep.subr.bf16.mxu1 %v9415_v6  ;;  %v9506_v5 = vld [vmem:[%s13181_s1 + $0x1260] ss:$8 sps:$4 sm:$0xff]   ;;  %v9511_v6 = vld [vmem:[%s13181_s1 + $0x574] ss:$8 sps:$4 sm:$0xff]  }
 0x12a   : > { %7006 = vmatprep.subr.bf16.mxu0 %v9418_v7  ;;  %v9514_v7 = vld [vmem:[%s13181_s1 + $0x1274] ss:$8 sps:$4 sm:$0xff]  }
 0x12c   : > { %6318 = vmatpush1.bf16.msra.mxu1 %v9413_v8  ;;  %v9509_v8 = vld [vmem:[%s13181_s1 + $0x570] ss:$8 sps:$4 sm:$0xff]  }
 0x12d   : > { %7007 = vmatpush1.bf16.msra.mxu0 %v9416_v9  ;;  %6319 = vmatprep.subr.bf16.mxu1 %v9421_v10  ;;  %v9512_v9 = vld [vmem:[%s13181_s1 + $0x1270] ss:$8 sps:$4 sm:$0xff]   ;;  %v9517_v10 = vld [vmem:[%s13181_s1 + $0x584] ss:$8 sps:$4 sm:$0xff]  }
 0x12e   : > { %7008 = vmatprep.subr.bf16.mxu0 %v9424_v11  ;;  %v9520_v11 = vld [vmem:[%s13181_s1 + $0x1284] ss:$8 sps:$4 sm:$0xff]  }
 0x130   : > { %6320 = vmatpush1.bf16.msra.mxu1 %v9419_v12  ;;  %v9515_v12 = vld [vmem:[%s13181_s1 + $0x580] ss:$8 sps:$4 sm:$0xff]  }
 0x131   : > { %7009 = vmatpush1.bf16.msra.mxu0 %v9422_v13  ;;  %6321 = vmatprep.subr.bf16.mxu1 %v9427_v14  ;;  %v9518_v13 = vld [vmem:[%s13181_s1 + $0x1280] ss:$8 sps:$4 sm:$0xff]   ;;  %v9523_v14 = vld [vmem:[%s13181_s1 + $0x594] ss:$8 sps:$4 sm:$0xff]  }
 0x132   : > { %7010 = vmatprep.subr.bf16.mxu0 %v9430_v15  ;;  %v9526_v15 = vld [vmem:[%s13181_s1 + $0x1294] ss:$8 sps:$4 sm:$0xff]  }
 0x134   : > { %6322 = vmatpush1.bf16.msra.mxu1 %v9425_v16  ;;  %v9521_v16 = vld [vmem:[%s13181_s1 + $0x590] ss:$8 sps:$4 sm:$0xff]  }
 0x135   : > { %7011 = vmatpush1.bf16.msra.mxu0 %v9428_v17  ;;  %6323 = vmatprep.subr.bf16.mxu1 %v9433_v18  ;;  %v9524_v17 = vld [vmem:[%s13181_s1 + $0x1290] ss:$8 sps:$4 sm:$0xff]   ;;  %v9529_v18 = vld [vmem:[%s13181_s1 + $0x5a4] ss:$8 sps:$4 sm:$0xff]  }
 0x136   : > { %7012 = vmatprep.subr.bf16.mxu0 %v9436_v19  ;;  %v9532_v19 = vld [vmem:[%s13181_s1 + $0x12a4] ss:$8 sps:$4 sm:$0xff]  }
 0x138   : > { %6324 = vmatpush1.bf16.msra.mxu1 %v9431_v20  ;;  %v9527_v20 = vld [vmem:[%s13181_s1 + $0x5a0] ss:$8 sps:$4 sm:$0xff]  }
 0x139   : > { %7013 = vmatpush1.bf16.msra.mxu0 %v9434_v21  ;;  %6325 = vmatprep.subr.bf16.mxu1 %v9439_v22  ;;  %v9530_v21 = vld [vmem:[%s13181_s1 + $0x12a0] ss:$8 sps:$4 sm:$0xff]   ;;  %v9535_v22 = vld [vmem:[%s13181_s1 + $0x5b4] ss:$8 sps:$4 sm:$0xff]  }
 0x13a   : > { %7014 = vmatprep.subr.bf16.mxu0 %v9442_v23  ;;  %v9538_v23 = vld [vmem:[%s13181_s1 + $0x12b4] ss:$8 sps:$4 sm:$0xff]  }
 0x13c   : > { %6326 = vmatpush1.bf16.msra.mxu1 %v9437_v24  ;;  %v9533_v24 = vld [vmem:[%s13181_s1 + $0x5b0] ss:$8 sps:$4 sm:$0xff]  }
 0x13d   : > { %7015 = vmatpush1.bf16.msra.mxu0 %v9440_v25  ;;  %6327 = vmatprep.subr.bf16.mxu1 %v9447_v26  ;;  %v9536_v25 = vld [vmem:[%s13181_s1 + $0x12b0] ss:$8 sps:$4 sm:$0xff]   ;;  %v9541_v26 = vld [vmem:[%s13181_s1 + $0x5c4] ss:$8 sps:$4 sm:$0xff]  }
 0x13e   : > { %7016 = vmatprep.subr.bf16.mxu0 %v9452_v27  ;;  %v9544_v27 = vld [vmem:[%s13181_s1 + $0x12c4] ss:$8 sps:$4 sm:$0xff]  }
 0x140   : > { %6328 = vmatpush1.bf16.msra.mxu1 %v9445_v28  ;;  %v9539_v28 = vld [vmem:[%s13181_s1 + $0x5c0] ss:$8 sps:$4 sm:$0xff]  }
 0x141   : > { %7017 = vmatpush1.bf16.msra.mxu0 %v9450_v29  ;;  %6329 = vmatprep.subr.bf16.mxu1 %v9457_v30  ;;  %v9542_v29 = vld [vmem:[%s13181_s1 + $0x12c0] ss:$8 sps:$4 sm:$0xff]   ;;  %v9547_v30 = vld [vmem:[%s13181_s1 + $0x5d4] ss:$8 sps:$4 sm:$0xff]  }
 0x142   : > { %7018 = vmatprep.subr.bf16.mxu0 %v9460_v31  ;;  %v9550_v31 = vld [vmem:[%s13181_s1 + $0x12d4] ss:$8 sps:$4 sm:$0xff]  }
 0x144   : > { %6330 = vmatpush1.bf16.msra.mxu1 %v9455_v32  ;;  %v9545_v32 = vld [vmem:[%s13181_s1 + $0x5d0] ss:$8 sps:$4 sm:$0xff]  }
 0x145   : > { %7019 = vmatpush1.bf16.msra.mxu0 %v9458_v33  ;;  %6352 = vmatprep.subr.bf16.mxu1 %v9466_v34  ;;  %v9548_v33 = vld [vmem:[%s13181_s1 + $0x12d0] ss:$8 sps:$4 sm:$0xff]   ;;  %v9555_v34 = vld [vmem:[%s13181_s1 + $0x5e4] ss:$8 sps:$4 sm:$0xff]  }
 0x146   : > { %7041 = vmatprep.subr.bf16.mxu0 %v9472_v35  ;;  %v9560_v35 = vld [vmem:[%s13181_s1 + $0x12e4] ss:$8 sps:$4 sm:$0xff]  }
 0x147   : > { %6332 = vmatmul.mubr.bf16.vlgmr.msra.gmra.mrb[0].mxu1 %v9461_v36  ;;  %v9553_v36 = vld [vmem:[%s13181_s1 + $0x5e0] ss:$8 sps:$4 sm:$0xff]  }
 0x148   : > { %7021 = vmatmul.mubr.bf16.vlgmr.msra.gmra.mrb[0].mxu0 %v9467_v38  ;;  %6353 = vmatpush1.bf16.msra.mxu1 %v9464_v37  ;;  %v9558_v37 = vld [vmem:[%s13181_s1 + $0x12e0] ss:$8 sps:$4 sm:$0xff]   ;;  %v9565_v38 = vld [vmem:[%s13181_s1 + $0x5f4] ss:$8 sps:$4 sm:$0xff]  }
 0x149   : > { %7042 = vmatpush1.bf16.msra.mxu0 %v9470_v39  ;;  %6354 = vmatprep.subr.bf16.mxu1 %v9475_v40  ;;  %v9568_v39 = vld [vmem:[%s13181_s1 + $0x12f4] ss:$8 sps:$4 sm:$0xff]   ;;  %v9563_v40 = vld [vmem:[%s13181_s1 + $0x5f0] ss:$8 sps:$4 sm:$0xff]  }
 0x14a   : > { %7043 = vmatprep.subr.bf16.mxu0 %v9478_v41  ;;  %6341 = vmatprep.mubr.bf16.mxu1 %v9551_v42  ;;  %v9566_v41 = vld [vmem:[%s13181_s1 + $0x12f0] ss:$8 sps:$4 sm:$0xff]   ;;  %v9574_v42 = vld [vmem:[%s13181_s1 + $0x604] ss:$8 sps:$4 sm:$0xff]  }
 0x14b   : > { %7030 = vmatprep.mubr.bf16.mxu0 %v9556_v43  ;;  %v9569_v43 = vld [vmem:[%s10597_s17 + $0x28] ss:$216 sps:$4 sm:$0xff]  }
 0x14c   : > { %6355 = vmatpush1.bf16.msra.mxu1 %v9473_v44  ;;  %v9575_v44 = vld [vmem:[%s10597_s17 + $0x90] ss:$216 sps:$4 sm:$0xff]  }
 0x14d   : > { %7044 = vmatpush1.bf16.msra.mxu0 %v9476_v45  ;;  %6356 = vmatprep.subr.bf16.mxu1 %v9481_v46  ;;  %v9580_v45 = vld [vmem:[%s13181_s1 + $0x1304] ss:$8 sps:$4 sm:$0xff]   ;;  %v9572_v46 = vld [vmem:[%s13181_s1 + $0x600] ss:$8 sps:$4 sm:$0xff]  }
 0x14e   : > { %7045 = vmatprep.subr.bf16.mxu0 %v9484_v47  ;;  %v9578_v47 = vld [vmem:[%s13181_s1 + $0x1300] ss:$8 sps:$4 sm:$0xff]  }
 0x14f   : > { %6342 = vmatmul.mubr.bf16.gmra.mrb[4].mxu1 %v9561_v50  ;;  %v9581_v50 = vld [vmem:[%s13181_s1 + $0x610] ss:$8 sps:$4 sm:$0xff]  }
 0x150   : > { %7031 = vmatmul.mubr.bf16.gmra.mrb[4].mxu0 %v9562_v51  ;;  %6357 = vmatpush1.bf16.msra.mxu1 %v9479_v48  ;;  %v9583_v48 = vld [vmem:[%s13181_s1 + $0x614] ss:$8 sps:$4 sm:$0xff]   ;;  %v9584_v51 = vld [vmem:[%s13181_s1 + $0x1310] ss:$8 sps:$4 sm:$0xff]  }
 0x151   : > { %7046 = vmatpush1.bf16.msra.mxu0 %v9482_v49  ;;  %6358 = vmatprep.subr.bf16.mxu1 %v9487_v52  ;;  %v9586_v49 = vld [vmem:[%s13181_s1 + $0x1314] ss:$8 sps:$4 sm:$0xff]  }
 0x152   : > { %7047 = vmatprep.subr.bf16.mxu0 %v9490_v53  ;;  %6384 = vmatprep.mubr.bf16.mxu1 %v9571_v54  ;;  %v9659_v52 = vld [vmem:[%s10597_s17 + $0x1dc] ss:$216 sps:$4 sm:$0xff]   ;;  %v9589_v54 = vld [vmem:[%s13181_s1 + $0x624] ss:$8 sps:$4 sm:$0xff]  }
 0x153   : > { %7073 = vmatprep.mubr.bf16.mxu0 %v9577_v55  ;;  %v9664_v53 = vld [vmem:[%s10597_s17 + $0x244] ss:$216 sps:$4 sm:$0xff]  }
 0x154   : > { %6359 = vmatpush1.bf16.msra.mxu1 %v9485_v56  ;;  %v9592_v55 = vld [vmem:[%s13181_s1 + $0x1324] ss:$8 sps:$4 sm:$0xff]   ;;  %v9669_v56 = vld [vmem:[%s10597_s17 + $0x1d8] ss:$216 sps:$4 sm:$0xff]  }
 0x155   : > { %7048 = vmatpush1.bf16.msra.mxu0 %v9488_v57  ;;  %6360 = vmatprep.subr.bf16.mxu1 %v9493_v58  ;;  %v9670_v57 = vld [vmem:[%s10597_s17 + $0x240] ss:$216 sps:$4 sm:$0xff]  }
 0x156   : > { %7049 = vmatprep.subr.bf16.mxu0 %v9496_v59  ;;  %v9587_v58 = vld [vmem:[%s13181_s1 + $0x620] ss:$8 sps:$4 sm:$0xff]  }
 0x157   : > { %v9590_v59 = vld [vmem:[%s13181_s1 + $0x1320] ss:$8 sps:$4 sm:$0xff]  }
 0x158   : > { %6361 = vmatpush1.bf16.msra.mxu1 %v9491_v60  ;;  %v9595_v60 = vld [vmem:[%s13181_s1 + $0x634] ss:$8 sps:$4 sm:$0xff]  }
 0x159   : > { %7050 = vmatpush1.bf16.msra.mxu0 %v9494_v61  ;;  %6362 = vmatprep.subr.bf16.mxu1 %v9499_v62  ;;  %v9598_v61 = vld [vmem:[%s13181_s1 + $0x1334] ss:$8 sps:$4 sm:$0xff]  }
 0x15a   : > { %7051 = vmatprep.subr.bf16.mxu0 %v9502_v63  ;;  %v9679_v62 = vld [vmem:[%s10597_s17 + $0x34] ss:$216 sps:$4 sm:$0xff]  }
 0x15b   : > { %v9685_v63 = vld [vmem:[%s10597_s17 + $0x9c] ss:$216 sps:$4 sm:$0xff]  }
 0x15c   : > { %6363 = vmatpush1.bf16.msra.mxu1 %v9497_v0  ;;  %v9593_v0 = vld [vmem:[%s13181_s1 + $0x630] ss:$8 sps:$4 sm:$0xff]  }
 0x15d   : > { %7052 = vmatpush1.bf16.msra.mxu0 %v9500_v1  ;;  %6364 = vmatprep.subr.bf16.mxu1 %v9505_v2  ;;  %v9596_v1 = vld [vmem:[%s13181_s1 + $0x1330] ss:$8 sps:$4 sm:$0xff]   ;;  %v9601_v2 = vld [vmem:[%s13181_s1 + $0x644] ss:$8 sps:$4 sm:$0xff]  }
 0x15e   : > { %7053 = vmatprep.subr.bf16.mxu0 %v9508_v3  ;;  %v9604_v3 = vld [vmem:[%s13181_s1 + $0x1344] ss:$8 sps:$4 sm:$0xff]  }
 0x160   : > { %6365 = vmatpush1.bf16.msra.mxu1 %v9503_v4  ;;  %v9599_v4 = vld [vmem:[%s13181_s1 + $0x640] ss:$8 sps:$4 sm:$0xff]  }
 0x161   : > { %7054 = vmatpush1.bf16.msra.mxu0 %v9506_v5  ;;  %6366 = vmatprep.subr.bf16.mxu1 %v9511_v6  ;;  %v9602_v5 = vld [vmem:[%s13181_s1 + $0x1340] ss:$8 sps:$4 sm:$0xff]   ;;  %v9607_v6 = vld [vmem:[%s13181_s1 + $0x654] ss:$8 sps:$4 sm:$0xff]  }
 0x162   : > { %7055 = vmatprep.subr.bf16.mxu0 %v9514_v7  ;;  %v9610_v7 = vld [vmem:[%s13181_s1 + $0x1354] ss:$8 sps:$4 sm:$0xff]  }
 0x164   : > { %6367 = vmatpush1.bf16.msra.mxu1 %v9509_v8  ;;  %v9605_v8 = vld [vmem:[%s13181_s1 + $0x650] ss:$8 sps:$4 sm:$0xff]  }
 0x165   : > { %7056 = vmatpush1.bf16.msra.mxu0 %v9512_v9  ;;  %6368 = vmatprep.subr.bf16.mxu1 %v9517_v10  ;;  %v9608_v9 = vld [vmem:[%s13181_s1 + $0x1350] ss:$8 sps:$4 sm:$0xff]   ;;  %v9613_v10 = vld [vmem:[%s13181_s1 + $0x664] ss:$8 sps:$4 sm:$0xff]  }
 0x166   : > { %7057 = vmatprep.subr.bf16.mxu0 %v9520_v11  ;;  %v9616_v11 = vld [vmem:[%s13181_s1 + $0x1364] ss:$8 sps:$4 sm:$0xff]  }
 0x168   : > { %6369 = vmatpush1.bf16.msra.mxu1 %v9515_v12  ;;  %v9611_v12 = vld [vmem:[%s13181_s1 + $0x660] ss:$8 sps:$4 sm:$0xff]  }
 0x169   : > { %7058 = vmatpush1.bf16.msra.mxu0 %v9518_v13  ;;  %6370 = vmatprep.subr.bf16.mxu1 %v9523_v14  ;;  %v9614_v13 = vld [vmem:[%s13181_s1 + $0x1360] ss:$8 sps:$4 sm:$0xff]   ;;  %v9619_v14 = vld [vmem:[%s13181_s1 + $0x674] ss:$8 sps:$4 sm:$0xff]  }
 0x16a   : > { %7059 = vmatprep.subr.bf16.mxu0 %v9526_v15  ;;  %v9622_v15 = vld [vmem:[%s13181_s1 + $0x1374] ss:$8 sps:$4 sm:$0xff]  }
 0x16c   : > { %6371 = vmatpush1.bf16.msra.mxu1 %v9521_v16  ;;  %v9617_v16 = vld [vmem:[%s13181_s1 + $0x670] ss:$8 sps:$4 sm:$0xff]  }
 0x16d   : > { %7060 = vmatpush1.bf16.msra.mxu0 %v9524_v17  ;;  %6372 = vmatprep.subr.bf16.mxu1 %v9529_v18  ;;  %v9620_v17 = vld [vmem:[%s13181_s1 + $0x1370] ss:$8 sps:$4 sm:$0xff]   ;;  %v9625_v18 = vld [vmem:[%s13181_s1 + $0x684] ss:$8 sps:$4 sm:$0xff]  }
 0x16e   : > { %7061 = vmatprep.subr.bf16.mxu0 %v9532_v19  ;;  %v9628_v19 = vld [vmem:[%s13181_s1 + $0x1384] ss:$8 sps:$4 sm:$0xff]  }
 0x170   : > { %6373 = vmatpush1.bf16.msra.mxu1 %v9527_v20  ;;  %v9623_v20 = vld [vmem:[%s13181_s1 + $0x680] ss:$8 sps:$4 sm:$0xff]  }
 0x171   : > { %7062 = vmatpush1.bf16.msra.mxu0 %v9530_v21  ;;  %6374 = vmatprep.subr.bf16.mxu1 %v9535_v22  ;;  %v9626_v21 = vld [vmem:[%s13181_s1 + $0x1380] ss:$8 sps:$4 sm:$0xff]   ;;  %v9631_v22 = vld [vmem:[%s13181_s1 + $0x694] ss:$8 sps:$4 sm:$0xff]  }
 0x172   : > { %7063 = vmatprep.subr.bf16.mxu0 %v9538_v23  ;;  %v9634_v23 = vld [vmem:[%s13181_s1 + $0x1394] ss:$8 sps:$4 sm:$0xff]  }
 0x174   : > { %6375 = vmatpush1.bf16.msra.mxu1 %v9533_v24  ;;  %v9629_v24 = vld [vmem:[%s13181_s1 + $0x690] ss:$8 sps:$4 sm:$0xff]  }
 0x175   : > { %7064 = vmatpush1.bf16.msra.mxu0 %v9536_v25  ;;  %6376 = vmatprep.subr.bf16.mxu1 %v9541_v26  ;;  %v9632_v25 = vld [vmem:[%s13181_s1 + $0x1390] ss:$8 sps:$4 sm:$0xff]   ;;  %v9637_v26 = vld [vmem:[%s13181_s1 + $0x6a4] ss:$8 sps:$4 sm:$0xff]  }
 0x176   : > { %7065 = vmatprep.subr.bf16.mxu0 %v9544_v27  ;;  %v9640_v27 = vld [vmem:[%s13181_s1 + $0x13a4] ss:$8 sps:$4 sm:$0xff]  }
 0x178   : > { %6377 = vmatpush1.bf16.msra.mxu1 %v9539_v28  ;;  %v9635_v28 = vld [vmem:[%s13181_s1 + $0x6a0] ss:$8 sps:$4 sm:$0xff]  }
 0x179   : > { %7066 = vmatpush1.bf16.msra.mxu0 %v9542_v29  ;;  %6378 = vmatprep.subr.bf16.mxu1 %v9547_v30  ;;  %v9638_v29 = vld [vmem:[%s13181_s1 + $0x13a0] ss:$8 sps:$4 sm:$0xff]   ;;  %v9643_v30 = vld [vmem:[%s13181_s1 + $0x6b4] ss:$8 sps:$4 sm:$0xff]  }
 0x17a   : > { %7067 = vmatprep.subr.bf16.mxu0 %v9550_v31  ;;  %v9646_v31 = vld [vmem:[%s13181_s1 + $0x13b4] ss:$8 sps:$4 sm:$0xff]  }
 0x17c   : > { %6379 = vmatpush1.bf16.msra.mxu1 %v9545_v32  ;;  %v9641_v32 = vld [vmem:[%s13181_s1 + $0x6b0] ss:$8 sps:$4 sm:$0xff]  }
 0x17d   : > { %7068 = vmatpush1.bf16.msra.mxu0 %v9548_v33  ;;  %6380 = vmatprep.subr.bf16.mxu1 %v9555_v34  ;;  %v9644_v33 = vld [vmem:[%s13181_s1 + $0x13b0] ss:$8 sps:$4 sm:$0xff]   ;;  %v9649_v34 = vld [vmem:[%s13181_s1 + $0x6c4] ss:$8 sps:$4 sm:$0xff]  }
 0x17e   : > { %7069 = vmatprep.subr.bf16.mxu0 %v9560_v35  ;;  %v9652_v35 = vld [vmem:[%s13181_s1 + $0x13c4] ss:$8 sps:$4 sm:$0xff]  }
 0x180   : > { %6381 = vmatpush1.bf16.msra.mxu1 %v9553_v36  ;;  %v9647_v36 = vld [vmem:[%s13181_s1 + $0x6c0] ss:$8 sps:$4 sm:$0xff]  }
 0x181   : > { %7070 = vmatpush1.bf16.msra.mxu0 %v9558_v37  ;;  %6382 = vmatprep.subr.bf16.mxu1 %v9565_v38  ;;  %v9650_v37 = vld [vmem:[%s13181_s1 + $0x13c0] ss:$8 sps:$4 sm:$0xff]   ;;  %v9655_v38 = vld [vmem:[%s13181_s1 + $0x6d4] ss:$8 sps:$4 sm:$0xff]  }
 0x182   : > { %7071 = vmatprep.subr.bf16.mxu0 %v9568_v39  ;;  %v9658_v39 = vld [vmem:[%s13181_s1 + $0x13d4] ss:$8 sps:$4 sm:$0xff]  }
 0x184   : > { %6383 = vmatpush1.bf16.msra.mxu1 %v9563_v40  ;;  %v9653_v40 = vld [vmem:[%s13181_s1 + $0x6d0] ss:$8 sps:$4 sm:$0xff]  }
 0x185   : > { %7072 = vmatpush1.bf16.msra.mxu0 %v9566_v41  ;;  %6405 = vmatprep.subr.bf16.mxu1 %v9574_v42  ;;  %v9656_v41 = vld [vmem:[%s13181_s1 + $0x13d0] ss:$8 sps:$4 sm:$0xff]   ;;  %v9663_v42 = vld [vmem:[%s13181_s1 + $0x6e4] ss:$8 sps:$4 sm:$0xff]  }
 0x186   : > { %7094 = vmatprep.subr.bf16.mxu0 %v9580_v45  ;;  %v9666_v45 = vld [vmem:[%s13181_s1 + $0x13e0] ss:$8 sps:$4 sm:$0xff]  }
 0x187   : > { %6385 = vmatmul.mubr.bf16.vlgmr.msra.gmra.mrb[0].mxu1 %v9569_v43  ;;  %v9668_v43 = vld [vmem:[%s13181_s1 + $0x13e4] ss:$8 sps:$4 sm:$0xff]  }
 0x188   : > { %7074 = vmatmul.mubr.bf16.vlgmr.msra.gmra.mrb[0].mxu0 %v9575_v44  ;;  %6406 = vmatpush1.bf16.msra.mxu1 %v9572_v46  ;;  %v9661_v44 = vld [vmem:[%s13181_s1 + $0x6e0] ss:$8 sps:$4 sm:$0xff]   ;;  %v9673_v46 = vld [vmem:[%s13181_s1 + $0x6f4] ss:$8 sps:$4 sm:$0xff]  }
 0x189   : > { %7095 = vmatpush1.bf16.msra.mxu0 %v9578_v47  ;;  %6407 = vmatprep.subr.bf16.mxu1 %v9583_v48  ;;  %v9676_v47 = vld [vmem:[%s13181_s1 + $0x13f4] ss:$8 sps:$4 sm:$0xff]   ;;  %v9671_v48 = vld [vmem:[%s13181_s1 + $0x6f0] ss:$8 sps:$4 sm:$0xff]  }
 0x18a   : > { %7096 = vmatprep.subr.bf16.mxu0 %v9586_v49  ;;  %6394 = vmatprep.mubr.bf16.mxu1 %v9659_v52  ;;  %v9674_v49 = vld [vmem:[%s13181_s1 + $0x13f0] ss:$8 sps:$4 sm:$0xff]  }
 0x18b   : > { %7083 = vmatprep.mubr.bf16.mxu0 %v9664_v53  ;;  %v9683_v52 = vld [vmem:[%s10597_s17 + $0x98] ss:$216 sps:$4 sm:$0xff]   ;;  %v9688_v53 = vld [vmem:[%s13181_s1 + $0x1404] ss:$8 sps:$4 sm:$0xff]  }
 0x18c   : > { %6408 = vmatpush1.bf16.msra.mxu1 %v9581_v50  ;;  %v9682_v50 = vld [vmem:[%s13181_s1 + $0x704] ss:$8 sps:$4 sm:$0xff]  }
 0x18d   : > { %7097 = vmatpush1.bf16.msra.mxu0 %v9584_v51  ;;  %6409 = vmatprep.subr.bf16.mxu1 %v9589_v54  ;;  %v9677_v51 = vld [vmem:[%s10597_s17 + $0x30] ss:$216 sps:$4 sm:$0xff]  }
 0x18e   : > { %7098 = vmatprep.subr.bf16.mxu0 %v9592_v55  ;;  %v9680_v54 = vld [vmem:[%s13181_s1 + $0x700] ss:$8 sps:$4 sm:$0xff]  }
 0x18f   : > { %6395 = vmatmul.mubr.bf16.gmra.mrb[4].mxu1 %v9669_v56  ;;  %v9686_v55 = vld [vmem:[%s13181_s1 + $0x1400] ss:$8 sps:$4 sm:$0xff]   ;;  %v9691_v56 = vld [vmem:[%s13181_s1 + $0x714] ss:$8 sps:$4 sm:$0xff]  }
 0x190   : > { %7084 = vmatmul.mubr.bf16.gmra.mrb[4].mxu0 %v9670_v57  ;;  %6410 = vmatpush1.bf16.msra.mxu1 %v9587_v58  ;;  %v9694_v57 = vld [vmem:[%s13181_s1 + $0x1414] ss:$8 sps:$4 sm:$0xff]   ;;  %v9689_v58 = vld [vmem:[%s13181_s1 + $0x710] ss:$8 sps:$4 sm:$0xff]  }
 0x191   : > { %7099 = vmatpush1.bf16.msra.mxu0 %v9590_v59  ;;  %6411 = vmatprep.subr.bf16.mxu1 %v9595_v60  ;;  %v9692_v59 = vld [vmem:[%s13181_s1 + $0x1410] ss:$8 sps:$4 sm:$0xff]   ;;  %v9767_v60 = vld [vmem:[%s10597_s17 + $0x1e4] ss:$216 sps:$4 sm:$0xff]  }
 0x192   : > { %7100 = vmatprep.subr.bf16.mxu0 %v9598_v61  ;;  %6437 = vmatprep.mubr.bf16.mxu1 %v9679_v62  ;;  %v9772_v61 = vld [vmem:[%s10597_s17 + $0x24c] ss:$216 sps:$4 sm:$0xff]  }
 0x193   : > { %7126 = vmatprep.mubr.bf16.mxu0 %v9685_v63  ;;  %v9697_v62 = vld [vmem:[%s13181_s1 + $0x724] ss:$8 sps:$4 sm:$0xff]  }
 0x194   : > { %6412 = vmatpush1.bf16.msra.mxu1 %v9593_v0  ;;  %v9700_v63 = vld [vmem:[%s13181_s1 + $0x1424] ss:$8 sps:$4 sm:$0xff]   ;;  %v9777_v0 = vld [vmem:[%s10597_s17 + $0x1e0] ss:$216 sps:$4 sm:$0xff]  }
 0x195   : > { %7101 = vmatpush1.bf16.msra.mxu0 %v9596_v1  ;;  %6413 = vmatprep.subr.bf16.mxu1 %v9601_v2  ;;  %v9778_v1 = vld [vmem:[%s10597_s17 + $0x248] ss:$216 sps:$4 sm:$0xff]  }
 0x196   : > { %7102 = vmatprep.subr.bf16.mxu0 %v9604_v3  ;;  %v9695_v2 = vld [vmem:[%s13181_s1 + $0x720] ss:$8 sps:$4 sm:$0xff]  }
 0x197   : > { %v9698_v3 = vld [vmem:[%s13181_s1 + $0x1420] ss:$8 sps:$4 sm:$0xff]  }
 0x198   : > { %6414 = vmatpush1.bf16.msra.mxu1 %v9599_v4  ;;  %v9703_v4 = vld [vmem:[%s13181_s1 + $0x734] ss:$8 sps:$4 sm:$0xff]  }
 0x199   : > { %7103 = vmatpush1.bf16.msra.mxu0 %v9602_v5  ;;  %6415 = vmatprep.subr.bf16.mxu1 %v9607_v6  ;;  %v9706_v5 = vld [vmem:[%s13181_s1 + $0x1434] ss:$8 sps:$4 sm:$0xff]  }
 0x19a   : > { %7104 = vmatprep.subr.bf16.mxu0 %v9610_v7  ;;  %v9787_v6 = vld [vmem:[%s10597_s17 + $0x3c] ss:$216 sps:$4 sm:$0xff]  }
 0x19b   : > { %v9793_v7 = vld [vmem:[%s10597_s17 + $0xa4] ss:$216 sps:$4 sm:$0xff]  }
 0x19c   : > { %6416 = vmatpush1.bf16.msra.mxu1 %v9605_v8  ;;  %v9701_v8 = vld [vmem:[%s13181_s1 + $0x730] ss:$8 sps:$4 sm:$0xff]  }
 0x19d   : > { %7105 = vmatpush1.bf16.msra.mxu0 %v9608_v9  ;;  %6417 = vmatprep.subr.bf16.mxu1 %v9613_v10  ;;  %v9704_v9 = vld [vmem:[%s13181_s1 + $0x1430] ss:$8 sps:$4 sm:$0xff]   ;;  %v9709_v10 = vld [vmem:[%s13181_s1 + $0x744] ss:$8 sps:$4 sm:$0xff]  }
 0x19e   : > { %7106 = vmatprep.subr.bf16.mxu0 %v9616_v11  ;;  %v9712_v11 = vld [vmem:[%s13181_s1 + $0x1444] ss:$8 sps:$4 sm:$0xff]  }
 0x1a0   : > { %6418 = vmatpush1.bf16.msra.mxu1 %v9611_v12  ;;  %v9707_v12 = vld [vmem:[%s13181_s1 + $0x740] ss:$8 sps:$4 sm:$0xff]  }
 0x1a1   : > { %7107 = vmatpush1.bf16.msra.mxu0 %v9614_v13  ;;  %6419 = vmatprep.subr.bf16.mxu1 %v9619_v14  ;;  %v9710_v13 = vld [vmem:[%s13181_s1 + $0x1440] ss:$8 sps:$4 sm:$0xff]   ;;  %v9715_v14 = vld [vmem:[%s13181_s1 + $0x754] ss:$8 sps:$4 sm:$0xff]  }
 0x1a2   : > { %7108 = vmatprep.subr.bf16.mxu0 %v9622_v15  ;;  %v9718_v15 = vld [vmem:[%s13181_s1 + $0x1454] ss:$8 sps:$4 sm:$0xff]  }
 0x1a4   : > { %6420 = vmatpush1.bf16.msra.mxu1 %v9617_v16  ;;  %v9713_v16 = vld [vmem:[%s13181_s1 + $0x750] ss:$8 sps:$4 sm:$0xff]  }
 0x1a5   : > { %7109 = vmatpush1.bf16.msra.mxu0 %v9620_v17  ;;  %6421 = vmatprep.subr.bf16.mxu1 %v9625_v18  ;;  %v9716_v17 = vld [vmem:[%s13181_s1 + $0x1450] ss:$8 sps:$4 sm:$0xff]   ;;  %v9721_v18 = vld [vmem:[%s13181_s1 + $0x764] ss:$8 sps:$4 sm:$0xff]  }
 0x1a6   : > { %7110 = vmatprep.subr.bf16.mxu0 %v9628_v19  ;;  %v9724_v19 = vld [vmem:[%s13181_s1 + $0x1464] ss:$8 sps:$4 sm:$0xff]  }
 0x1a8   : > { %6422 = vmatpush1.bf16.msra.mxu1 %v9623_v20  ;;  %v9719_v20 = vld [vmem:[%s13181_s1 + $0x760] ss:$8 sps:$4 sm:$0xff]  }
 0x1a9   : > { %7111 = vmatpush1.bf16.msra.mxu0 %v9626_v21  ;;  %6423 = vmatprep.subr.bf16.mxu1 %v9631_v22  ;;  %v9722_v21 = vld [vmem:[%s13181_s1 + $0x1460] ss:$8 sps:$4 sm:$0xff]   ;;  %v9727_v22 = vld [vmem:[%s13181_s1 + $0x774] ss:$8 sps:$4 sm:$0xff]  }
 0x1aa   : > { %7112 = vmatprep.subr.bf16.mxu0 %v9634_v23  ;;  %v9730_v23 = vld [vmem:[%s13181_s1 + $0x1474] ss:$8 sps:$4 sm:$0xff]  }
 0x1ac   : > { %6424 = vmatpush1.bf16.msra.mxu1 %v9629_v24  ;;  %v9725_v24 = vld [vmem:[%s13181_s1 + $0x770] ss:$8 sps:$4 sm:$0xff]  }
 0x1ad   : > { %7113 = vmatpush1.bf16.msra.mxu0 %v9632_v25  ;;  %6425 = vmatprep.subr.bf16.mxu1 %v9637_v26  ;;  %v9728_v25 = vld [vmem:[%s13181_s1 + $0x1470] ss:$8 sps:$4 sm:$0xff]   ;;  %v9733_v26 = vld [vmem:[%s13181_s1 + $0x784] ss:$8 sps:$4 sm:$0xff]  }
 0x1ae   : > { %7114 = vmatprep.subr.bf16.mxu0 %v9640_v27  ;;  %v9736_v27 = vld [vmem:[%s13181_s1 + $0x1484] ss:$8 sps:$4 sm:$0xff]  }
 0x1b0   : > { %6426 = vmatpush1.bf16.msra.mxu1 %v9635_v28  ;;  %v9731_v28 = vld [vmem:[%s13181_s1 + $0x780] ss:$8 sps:$4 sm:$0xff]  }
 0x1b1   : > { %7115 = vmatpush1.bf16.msra.mxu0 %v9638_v29  ;;  %6427 = vmatprep.subr.bf16.mxu1 %v9643_v30  ;;  %v9734_v29 = vld [vmem:[%s13181_s1 + $0x1480] ss:$8 sps:$4 sm:$0xff]   ;;  %v9739_v30 = vld [vmem:[%s13181_s1 + $0x794] ss:$8 sps:$4 sm:$0xff]  }
 0x1b2   : > { %7116 = vmatprep.subr.bf16.mxu0 %v9646_v31  ;;  %v9742_v31 = vld [vmem:[%s13181_s1 + $0x1494] ss:$8 sps:$4 sm:$0xff]  }
 0x1b4   : > { %6428 = vmatpush1.bf16.msra.mxu1 %v9641_v32  ;;  %v9737_v32 = vld [vmem:[%s13181_s1 + $0x790] ss:$8 sps:$4 sm:$0xff]  }
 0x1b5   : > { %7117 = vmatpush1.bf16.msra.mxu0 %v9644_v33  ;;  %6429 = vmatprep.subr.bf16.mxu1 %v9649_v34  ;;  %v9740_v33 = vld [vmem:[%s13181_s1 + $0x1490] ss:$8 sps:$4 sm:$0xff]   ;;  %v9745_v34 = vld [vmem:[%s13181_s1 + $0x7a4] ss:$8 sps:$4 sm:$0xff]  }
 0x1b6   : > { %7118 = vmatprep.subr.bf16.mxu0 %v9652_v35  ;;  %v9748_v35 = vld [vmem:[%s13181_s1 + $0x14a4] ss:$8 sps:$4 sm:$0xff]  }
 0x1b8   : > { %6430 = vmatpush1.bf16.msra.mxu1 %v9647_v36  ;;  %v9743_v36 = vld [vmem:[%s13181_s1 + $0x7a0] ss:$8 sps:$4 sm:$0xff]  }
 0x1b9   : > { %7119 = vmatpush1.bf16.msra.mxu0 %v9650_v37  ;;  %6431 = vmatprep.subr.bf16.mxu1 %v9655_v38  ;;  %v9746_v37 = vld [vmem:[%s13181_s1 + $0x14a0] ss:$8 sps:$4 sm:$0xff]   ;;  %v9751_v38 = vld [vmem:[%s13181_s1 + $0x7b4] ss:$8 sps:$4 sm:$0xff]  }
 0x1ba   : > { %7120 = vmatprep.subr.bf16.mxu0 %v9658_v39  ;;  %v9754_v39 = vld [vmem:[%s13181_s1 + $0x14b4] ss:$8 sps:$4 sm:$0xff]  }
 0x1bc   : > { %6432 = vmatpush1.bf16.msra.mxu1 %v9653_v40  ;;  %v9749_v40 = vld [vmem:[%s13181_s1 + $0x7b0] ss:$8 sps:$4 sm:$0xff]  }
 0x1bd   : > { %7121 = vmatpush1.bf16.msra.mxu0 %v9656_v41  ;;  %6433 = vmatprep.subr.bf16.mxu1 %v9663_v42  ;;  %v9752_v41 = vld [vmem:[%s13181_s1 + $0x14b0] ss:$8 sps:$4 sm:$0xff]   ;;  %v9757_v42 = vld [vmem:[%s13181_s1 + $0x7c4] ss:$8 sps:$4 sm:$0xff]  }
 0x1be   : > { %7122 = vmatprep.subr.bf16.mxu0 %v9668_v43  ;;  %v9760_v43 = vld [vmem:[%s13181_s1 + $0x14c4] ss:$8 sps:$4 sm:$0xff]  }
 0x1c0   : > { %6434 = vmatpush1.bf16.msra.mxu1 %v9661_v44  ;;  %v9755_v44 = vld [vmem:[%s13181_s1 + $0x7c0] ss:$8 sps:$4 sm:$0xff]  }
 0x1c1   : > { %7123 = vmatpush1.bf16.msra.mxu0 %v9666_v45  ;;  %6435 = vmatprep.subr.bf16.mxu1 %v9673_v46  ;;  %v9758_v45 = vld [vmem:[%s13181_s1 + $0x14c0] ss:$8 sps:$4 sm:$0xff]   ;;  %v9763_v46 = vld [vmem:[%s13181_s1 + $0x7d4] ss:$8 sps:$4 sm:$0xff]  }
 0x1c2   : > { %7124 = vmatprep.subr.bf16.mxu0 %v9676_v47  ;;  %v9766_v47 = vld [vmem:[%s13181_s1 + $0x14d4] ss:$8 sps:$4 sm:$0xff]  }
 0x1c4   : > { %6436 = vmatpush1.bf16.msra.mxu1 %v9671_v48  ;;  %v9761_v48 = vld [vmem:[%s13181_s1 + $0x7d0] ss:$8 sps:$4 sm:$0xff]  }
 0x1c5   : > { %7125 = vmatpush1.bf16.msra.mxu0 %v9674_v49  ;;  %6458 = vmatprep.subr.bf16.mxu1 %v9682_v50  ;;  %v9764_v49 = vld [vmem:[%s13181_s1 + $0x14d0] ss:$8 sps:$4 sm:$0xff]   ;;  %v9771_v50 = vld [vmem:[%s13181_s1 + $0x7e4] ss:$8 sps:$4 sm:$0xff]  }
 0x1c6   : > { %7147 = vmatprep.subr.bf16.mxu0 %v9688_v53  ;;  %v9774_v53 = vld [vmem:[%s13181_s1 + $0x14e0] ss:$8 sps:$4 sm:$0xff]  }
 0x1c7   : > { %6438 = vmatmul.mubr.bf16.vlgmr.msra.gmra.mrb[0].mxu1 %v9677_v51  ;;  %v9776_v51 = vld [vmem:[%s13181_s1 + $0x14e4] ss:$8 sps:$4 sm:$0xff]  }
 0x1c8   : > { %7127 = vmatmul.mubr.bf16.vlgmr.msra.gmra.mrb[0].mxu0 %v9683_v52  ;;  %6459 = vmatpush1.bf16.msra.mxu1 %v9680_v54  ;;  %v9769_v52 = vld [vmem:[%s13181_s1 + $0x7e0] ss:$8 sps:$4 sm:$0xff]   ;;  %v9781_v54 = vld [vmem:[%s13181_s1 + $0x7f4] ss:$8 sps:$4 sm:$0xff]  }
 0x1c9   : > { %7148 = vmatpush1.bf16.msra.mxu0 %v9686_v55  ;;  %6460 = vmatprep.subr.bf16.mxu1 %v9691_v56  ;;  %v9784_v55 = vld [vmem:[%s13181_s1 + $0x14f4] ss:$8 sps:$4 sm:$0xff]   ;;  %v9779_v56 = vld [vmem:[%s13181_s1 + $0x7f0] ss:$8 sps:$4 sm:$0xff]  }
 0x1ca   : > { %7149 = vmatprep.subr.bf16.mxu0 %v9694_v57  ;;  %6447 = vmatprep.mubr.bf16.mxu1 %v9767_v60  ;;  %v9782_v57 = vld [vmem:[%s13181_s1 + $0x14f0] ss:$8 sps:$4 sm:$0xff]  }
 0x1cb   : > { %7136 = vmatprep.mubr.bf16.mxu0 %v9772_v61  ;;  %v9791_v60 = vld [vmem:[%s10597_s17 + $0xa0] ss:$216 sps:$4 sm:$0xff]   ;;  %v9796_v61 = vld [vmem:[%s13181_s1 + $0x1504] ss:$8 sps:$4 sm:$0xff]  }
 0x1cc   : > { %6461 = vmatpush1.bf16.msra.mxu1 %v9689_v58  ;;  %v9790_v58 = vld [vmem:[%s13181_s1 + $0x804] ss:$8 sps:$4 sm:$0xff]  }
 0x1cd   : > { %7150 = vmatpush1.bf16.msra.mxu0 %v9692_v59  ;;  %6462 = vmatprep.subr.bf16.mxu1 %v9697_v62  ;;  %v9785_v59 = vld [vmem:[%s10597_s17 + $0x38] ss:$216 sps:$4 sm:$0xff]   ;;  %v9788_v62 = vld [vmem:[%s13181_s1 + $0x800] ss:$8 sps:$4 sm:$0xff]  }
 0x1ce   : > { %7151 = vmatprep.subr.bf16.mxu0 %v9700_v63  ;;  %v9794_v63 = vld [vmem:[%s13181_s1 + $0x1500] ss:$8 sps:$4 sm:$0xff]  }
 0x1cf   : > { %6448 = vmatmul.mubr.bf16.gmra.mrb[4].mxu1 %v9777_v0  ;;  %v9799_v0 = vld [vmem:[%s13181_s1 + $0x814] ss:$8 sps:$4 sm:$0xff]  }
 0x1d0   : > { %7137 = vmatmul.mubr.bf16.gmra.mrb[4].mxu0 %v9778_v1  ;;  %6463 = vmatpush1.bf16.msra.mxu1 %v9695_v2  ;;  %v9802_v1 = vld [vmem:[%s13181_s1 + $0x1514] ss:$8 sps:$4 sm:$0xff]   ;;  %v9797_v2 = vld [vmem:[%s13181_s1 + $0x810] ss:$8 sps:$4 sm:$0xff]  }
 0x1d1   : > { %7152 = vmatpush1.bf16.msra.mxu0 %v9698_v3  ;;  %6464 = vmatprep.subr.bf16.mxu1 %v9703_v4  ;;  %v9800_v3 = vld [vmem:[%s13181_s1 + $0x1510] ss:$8 sps:$4 sm:$0xff]   ;;  %v9875_v4 = vld [vmem:[%s10597_s17 + $0x1ec] ss:$216 sps:$4 sm:$0xff]  }
 0x1d2   : > { %7153 = vmatprep.subr.bf16.mxu0 %v9706_v5  ;;  %6490 = vmatprep.mubr.bf16.mxu1 %v9787_v6  ;;  %v9880_v5 = vld [vmem:[%s10597_s17 + $0x254] ss:$216 sps:$4 sm:$0xff]  }
 0x1d3   : > { %7179 = vmatprep.mubr.bf16.mxu0 %v9793_v7  ;;  %v9805_v6 = vld [vmem:[%s13181_s1 + $0x824] ss:$8 sps:$4 sm:$0xff]  }
 0x1d4   : > { %6465 = vmatpush1.bf16.msra.mxu1 %v9701_v8  ;;  %v9808_v7 = vld [vmem:[%s13181_s1 + $0x1524] ss:$8 sps:$4 sm:$0xff]   ;;  %v9885_v8 = vld [vmem:[%s10597_s17 + $0x1e8] ss:$216 sps:$4 sm:$0xff]  }
 0x1d5   : > { %7154 = vmatpush1.bf16.msra.mxu0 %v9704_v9  ;;  %6466 = vmatprep.subr.bf16.mxu1 %v9709_v10  ;;  %v9886_v9 = vld [vmem:[%s10597_s17 + $0x250] ss:$216 sps:$4 sm:$0xff]  }
 0x1d6   : > { %7155 = vmatprep.subr.bf16.mxu0 %v9712_v11  ;;  %v9803_v10 = vld [vmem:[%s13181_s1 + $0x820] ss:$8 sps:$4 sm:$0xff]  }
 0x1d7   : > { %v9806_v11 = vld [vmem:[%s13181_s1 + $0x1520] ss:$8 sps:$4 sm:$0xff]  }
 0x1d8   : > { %6467 = vmatpush1.bf16.msra.mxu1 %v9707_v12  ;;  %v9811_v12 = vld [vmem:[%s13181_s1 + $0x834] ss:$8 sps:$4 sm:$0xff]  }
 0x1d9   : > { %7156 = vmatpush1.bf16.msra.mxu0 %v9710_v13  ;;  %6468 = vmatprep.subr.bf16.mxu1 %v9715_v14  ;;  %v9814_v13 = vld [vmem:[%s13181_s1 + $0x1534] ss:$8 sps:$4 sm:$0xff]  }
 0x1da   : > { %7157 = vmatprep.subr.bf16.mxu0 %v9718_v15  ;;  %v9895_v14 = vld [vmem:[%s10597_s17 + $0x44] ss:$216 sps:$4 sm:$0xff]  }
 0x1db   : > { %v9901_v15 = vld [vmem:[%s10597_s17 + $0xac] ss:$216 sps:$4 sm:$0xff]  }
 0x1dc   : > { %6469 = vmatpush1.bf16.msra.mxu1 %v9713_v16  ;;  %v9809_v16 = vld [vmem:[%s13181_s1 + $0x830] ss:$8 sps:$4 sm:$0xff]  }
 0x1dd   : > { %7158 = vmatpush1.bf16.msra.mxu0 %v9716_v17  ;;  %6470 = vmatprep.subr.bf16.mxu1 %v9721_v18  ;;  %v9812_v17 = vld [vmem:[%s13181_s1 + $0x1530] ss:$8 sps:$4 sm:$0xff]   ;;  %v9817_v18 = vld [vmem:[%s13181_s1 + $0x844] ss:$8 sps:$4 sm:$0xff]  }
 0x1de   : > { %7159 = vmatprep.subr.bf16.mxu0 %v9724_v19  ;;  %v9820_v19 = vld [vmem:[%s13181_s1 + $0x1544] ss:$8 sps:$4 sm:$0xff]  }
 0x1e0   : > { %6471 = vmatpush1.bf16.msra.mxu1 %v9719_v20  ;;  %v9815_v20 = vld [vmem:[%s13181_s1 + $0x840] ss:$8 sps:$4 sm:$0xff]  }
 0x1e1   : > { %7160 = vmatpush1.bf16.msra.mxu0 %v9722_v21  ;;  %6472 = vmatprep.subr.bf16.mxu1 %v9727_v22  ;;  %v9818_v21 = vld [vmem:[%s13181_s1 + $0x1540] ss:$8 sps:$4 sm:$0xff]   ;;  %v9823_v22 = vld [vmem:[%s13181_s1 + $0x854] ss:$8 sps:$4 sm:$0xff]  }
 0x1e2   : > { %7161 = vmatprep.subr.bf16.mxu0 %v9730_v23  ;;  %v9826_v23 = vld [vmem:[%s13181_s1 + $0x1554] ss:$8 sps:$4 sm:$0xff]  }
 0x1e4   : > { %6473 = vmatpush1.bf16.msra.mxu1 %v9725_v24  ;;  %v9821_v24 = vld [vmem:[%s13181_s1 + $0x850] ss:$8 sps:$4 sm:$0xff]  }
 0x1e5   : > { %7162 = vmatpush1.bf16.msra.mxu0 %v9728_v25  ;;  %6474 = vmatprep.subr.bf16.mxu1 %v9733_v26  ;;  %v9824_v25 = vld [vmem:[%s13181_s1 + $0x1550] ss:$8 sps:$4 sm:$0xff]   ;;  %v9829_v26 = vld [vmem:[%s13181_s1 + $0x864] ss:$8 sps:$4 sm:$0xff]  }
 0x1e6   : > { %7163 = vmatprep.subr.bf16.mxu0 %v9736_v27  ;;  %v9832_v27 = vld [vmem:[%s13181_s1 + $0x1564] ss:$8 sps:$4 sm:$0xff]  }
 0x1e8   : > { %6475 = vmatpush1.bf16.msra.mxu1 %v9731_v28  ;;  %v9827_v28 = vld [vmem:[%s13181_s1 + $0x860] ss:$8 sps:$4 sm:$0xff]  }
 0x1e9   : > { %7164 = vmatpush1.bf16.msra.mxu0 %v9734_v29  ;;  %6476 = vmatprep.subr.bf16.mxu1 %v9739_v30  ;;  %v9830_v29 = vld [vmem:[%s13181_s1 + $0x1560] ss:$8 sps:$4 sm:$0xff]   ;;  %v9835_v30 = vld [vmem:[%s13181_s1 + $0x874] ss:$8 sps:$4 sm:$0xff]  }
 0x1ea   : > { %7165 = vmatprep.subr.bf16.mxu0 %v9742_v31  ;;  %v9838_v31 = vld [vmem:[%s13181_s1 + $0x1574] ss:$8 sps:$4 sm:$0xff]  }
 0x1ec   : > { %6477 = vmatpush1.bf16.msra.mxu1 %v9737_v32  ;;  %v9833_v32 = vld [vmem:[%s13181_s1 + $0x870] ss:$8 sps:$4 sm:$0xff]  }
 0x1ed   : > { %7166 = vmatpush1.bf16.msra.mxu0 %v9740_v33  ;;  %6478 = vmatprep.subr.bf16.mxu1 %v9745_v34  ;;  %v9836_v33 = vld [vmem:[%s13181_s1 + $0x1570] ss:$8 sps:$4 sm:$0xff]   ;;  %v9841_v34 = vld [vmem:[%s13181_s1 + $0x884] ss:$8 sps:$4 sm:$0xff]  }
 0x1ee   : > { %7167 = vmatprep.subr.bf16.mxu0 %v9748_v35  ;;  %v9844_v35 = vld [vmem:[%s13181_s1 + $0x1584] ss:$8 sps:$4 sm:$0xff]  }
 0x1f0   : > { %6479 = vmatpush1.bf16.msra.mxu1 %v9743_v36  ;;  %v9839_v36 = vld [vmem:[%s13181_s1 + $0x880] ss:$8 sps:$4 sm:$0xff]  }
 0x1f1   : > { %7168 = vmatpush1.bf16.msra.mxu0 %v9746_v37  ;;  %6480 = vmatprep.subr.bf16.mxu1 %v9751_v38  ;;  %v9842_v37 = vld [vmem:[%s13181_s1 + $0x1580] ss:$8 sps:$4 sm:$0xff]   ;;  %v9847_v38 = vld [vmem:[%s13181_s1 + $0x894] ss:$8 sps:$4 sm:$0xff]  }
 0x1f2   : > { %7169 = vmatprep.subr.bf16.mxu0 %v9754_v39  ;;  %v9850_v39 = vld [vmem:[%s13181_s1 + $0x1594] ss:$8 sps:$4 sm:$0xff]  }
 0x1f4   : > { %6481 = vmatpush1.bf16.msra.mxu1 %v9749_v40  ;;  %v9845_v40 = vld [vmem:[%s13181_s1 + $0x890] ss:$8 sps:$4 sm:$0xff]  }
 0x1f5   : > { %7170 = vmatpush1.bf16.msra.mxu0 %v9752_v41  ;;  %6482 = vmatprep.subr.bf16.mxu1 %v9757_v42  ;;  %v9848_v41 = vld [vmem:[%s13181_s1 + $0x1590] ss:$8 sps:$4 sm:$0xff]   ;;  %v9853_v42 = vld [vmem:[%s13181_s1 + $0x8a4] ss:$8 sps:$4 sm:$0xff]  }
 0x1f6   : > { %7171 = vmatprep.subr.bf16.mxu0 %v9760_v43  ;;  %v9856_v43 = vld [vmem:[%s13181_s1 + $0x15a4] ss:$8 sps:$4 sm:$0xff]  }
 0x1f8   : > { %6483 = vmatpush1.bf16.msra.mxu1 %v9755_v44  ;;  %v9851_v44 = vld [vmem:[%s13181_s1 + $0x8a0] ss:$8 sps:$4 sm:$0xff]  }
 0x1f9   : > { %7172 = vmatpush1.bf16.msra.mxu0 %v9758_v45  ;;  %6484 = vmatprep.subr.bf16.mxu1 %v9763_v46  ;;  %v9854_v45 = vld [vmem:[%s13181_s1 + $0x15a0] ss:$8 sps:$4 sm:$0xff]   ;;  %v9859_v46 = vld [vmem:[%s13181_s1 + $0x8b4] ss:$8 sps:$4 sm:$0xff]  }
 0x1fa   : > { %7173 = vmatprep.subr.bf16.mxu0 %v9766_v47  ;;  %v9862_v47 = vld [vmem:[%s13181_s1 + $0x15b4] ss:$8 sps:$4 sm:$0xff]  }
 0x1fc   : > { %6485 = vmatpush1.bf16.msra.mxu1 %v9761_v48  ;;  %v9857_v48 = vld [vmem:[%s13181_s1 + $0x8b0] ss:$8 sps:$4 sm:$0xff]  }
 0x1fd   : > { %7174 = vmatpush1.bf16.msra.mxu0 %v9764_v49  ;;  %6486 = vmatprep.subr.bf16.mxu1 %v9771_v50  ;;  %v9860_v49 = vld [vmem:[%s13181_s1 + $0x15b0] ss:$8 sps:$4 sm:$0xff]   ;;  %v9865_v50 = vld [vmem:[%s13181_s1 + $0x8c4] ss:$8 sps:$4 sm:$0xff]  }
 0x1fe   : > { %7175 = vmatprep.subr.bf16.mxu0 %v9776_v51  ;;  %v9868_v51 = vld [vmem:[%s13181_s1 + $0x15c4] ss:$8 sps:$4 sm:$0xff]  }
 0x200   : > { %6487 = vmatpush1.bf16.msra.mxu1 %v9769_v52  ;;  %v9863_v52 = vld [vmem:[%s13181_s1 + $0x8c0] ss:$8 sps:$4 sm:$0xff]  }
 0x201   : > { %7176 = vmatpush1.bf16.msra.mxu0 %v9774_v53  ;;  %6488 = vmatprep.subr.bf16.mxu1 %v9781_v54  ;;  %v9866_v53 = vld [vmem:[%s13181_s1 + $0x15c0] ss:$8 sps:$4 sm:$0xff]   ;;  %v9871_v54 = vld [vmem:[%s13181_s1 + $0x8d4] ss:$8 sps:$4 sm:$0xff]  }
 0x202   : > { %7177 = vmatprep.subr.bf16.mxu0 %v9784_v55  ;;  %v9874_v55 = vld [vmem:[%s13181_s1 + $0x15d4] ss:$8 sps:$4 sm:$0xff]  }
 0x204   : > { %6489 = vmatpush1.bf16.msra.mxu1 %v9779_v56  ;;  %v9869_v56 = vld [vmem:[%s13181_s1 + $0x8d0] ss:$8 sps:$4 sm:$0xff]  }
 0x205   : > { %7178 = vmatpush1.bf16.msra.mxu0 %v9782_v57  ;;  %6511 = vmatprep.subr.bf16.mxu1 %v9790_v58  ;;  %v9872_v57 = vld [vmem:[%s13181_s1 + $0x15d0] ss:$8 sps:$4 sm:$0xff]   ;;  %v9879_v58 = vld [vmem:[%s13181_s1 + $0x8e4] ss:$8 sps:$4 sm:$0xff]  }
 0x206   : > { %7200 = vmatprep.subr.bf16.mxu0 %v9796_v61  ;;  %v9882_v61 = vld [vmem:[%s13181_s1 + $0x15e0] ss:$8 sps:$4 sm:$0xff]  }
 0x207   : > { %6491 = vmatmul.mubr.bf16.vlgmr.msra.gmra.mrb[0].mxu1 %v9785_v59  ;;  %v9884_v59 = vld [vmem:[%s13181_s1 + $0x15e4] ss:$8 sps:$4 sm:$0xff]  }
 0x208   : > { %7180 = vmatmul.mubr.bf16.vlgmr.msra.gmra.mrb[0].mxu0 %v9791_v60  ;;  %6512 = vmatpush1.bf16.msra.mxu1 %v9788_v62  ;;  %v9877_v60 = vld [vmem:[%s13181_s1 + $0x8e0] ss:$8 sps:$4 sm:$0xff]   ;;  %v9889_v62 = vld [vmem:[%s13181_s1 + $0x8f4] ss:$8 sps:$4 sm:$0xff]  }
 0x209   : > { %7201 = vmatpush1.bf16.msra.mxu0 %v9794_v63  ;;  %6513 = vmatprep.subr.bf16.mxu1 %v9799_v0  ;;  %v9892_v63 = vld [vmem:[%s13181_s1 + $0x15f4] ss:$8 sps:$4 sm:$0xff]   ;;  %v9887_v0 = vld [vmem:[%s13181_s1 + $0x8f0] ss:$8 sps:$4 sm:$0xff]  }
 0x20a   : > { %7202 = vmatprep.subr.bf16.mxu0 %v9802_v1  ;;  %6500 = vmatprep.mubr.bf16.mxu1 %v9875_v4  ;;  %v9890_v1 = vld [vmem:[%s13181_s1 + $0x15f0] ss:$8 sps:$4 sm:$0xff]   ;;  %v9899_v4 = vld [vmem:[%s10597_s17 + $0xa8] ss:$216 sps:$4 sm:$0xff]  }
 0x20b   : > { %7189 = vmatprep.mubr.bf16.mxu0 %v9880_v5  ;;  %v9904_v5 = vld [vmem:[%s13181_s1 + $0x1604] ss:$8 sps:$4 sm:$0xff]  }
 0x20c   : > { %6514 = vmatpush1.bf16.msra.mxu1 %v9797_v2  ;;  %v9898_v2 = vld [vmem:[%s13181_s1 + $0x904] ss:$8 sps:$4 sm:$0xff]  }
 0x20d   : > { %7203 = vmatpush1.bf16.msra.mxu0 %v9800_v3  ;;  %6515 = vmatprep.subr.bf16.mxu1 %v9805_v6  ;;  %v9893_v3 = vld [vmem:[%s10597_s17 + $0x40] ss:$216 sps:$4 sm:$0xff]  }
 0x20e   : > { %7204 = vmatprep.subr.bf16.mxu0 %v9808_v7  ;;  %v9896_v6 = vld [vmem:[%s13181_s1 + $0x900] ss:$8 sps:$4 sm:$0xff]  }
 0x20f   : > { %6501 = vmatmul.mubr.bf16.gmra.mrb[4].mxu1 %v9885_v8  ;;  %v9902_v7 = vld [vmem:[%s13181_s1 + $0x1600] ss:$8 sps:$4 sm:$0xff]   ;;  %v9907_v8 = vld [vmem:[%s13181_s1 + $0x914] ss:$8 sps:$4 sm:$0xff]  }
 0x210   : > { %7190 = vmatmul.mubr.bf16.gmra.mrb[4].mxu0 %v9886_v9  ;;  %6516 = vmatpush1.bf16.msra.mxu1 %v9803_v10  ;;  %v9910_v9 = vld [vmem:[%s13181_s1 + $0x1614] ss:$8 sps:$4 sm:$0xff]   ;;  %v9905_v10 = vld [vmem:[%s13181_s1 + $0x910] ss:$8 sps:$4 sm:$0xff]  }
 0x211   : > { %7205 = vmatpush1.bf16.msra.mxu0 %v9806_v11  ;;  %6517 = vmatprep.subr.bf16.mxu1 %v9811_v12  ;;  %v9908_v11 = vld [vmem:[%s13181_s1 + $0x1610] ss:$8 sps:$4 sm:$0xff]   ;;  %v9983_v12 = vld [vmem:[%s10597_s17 + $0x1f4] ss:$216 sps:$4 sm:$0xff]  }
 0x212   : > { %7206 = vmatprep.subr.bf16.mxu0 %v9814_v13  ;;  %6543 = vmatprep.mubr.bf16.mxu1 %v9895_v14  ;;  %v9988_v13 = vld [vmem:[%s10597_s17 + $0x25c] ss:$216 sps:$4 sm:$0xff]   ;;  %v9913_v14 = vld [vmem:[%s13181_s1 + $0x924] ss:$8 sps:$4 sm:$0xff]  }
 0x213   : > { %7232 = vmatprep.mubr.bf16.mxu0 %v9901_v15  ;;  %v9916_v15 = vld [vmem:[%s13181_s1 + $0x1624] ss:$8 sps:$4 sm:$0xff]  }
 0x214   : > { %6518 = vmatpush1.bf16.msra.mxu1 %v9809_v16  ;;  %v9993_v16 = vld [vmem:[%s10597_s17 + $0x1f0] ss:$216 sps:$4 sm:$0xff]  }
 0x215   : > { %7207 = vmatpush1.bf16.msra.mxu0 %v9812_v17  ;;  %6519 = vmatprep.subr.bf16.mxu1 %v9817_v18  ;;  %v9994_v17 = vld [vmem:[%s10597_s17 + $0x258] ss:$216 sps:$4 sm:$0xff]   ;;  %v9911_v18 = vld [vmem:[%s13181_s1 + $0x920] ss:$8 sps:$4 sm:$0xff]  }
 0x216   : > { %7208 = vmatprep.subr.bf16.mxu0 %v9820_v19  ;;  %v9914_v19 = vld [vmem:[%s13181_s1 + $0x1620] ss:$8 sps:$4 sm:$0xff]  }
 0x218   : > { %6520 = vmatpush1.bf16.msra.mxu1 %v9815_v20  ;;  %v9919_v20 = vld [vmem:[%s13181_s1 + $0x934] ss:$8 sps:$4 sm:$0xff]  }
 0x219   : > { %7209 = vmatpush1.bf16.msra.mxu0 %v9818_v21  ;;  %6521 = vmatprep.subr.bf16.mxu1 %v9823_v22  ;;  %v9922_v21 = vld [vmem:[%s13181_s1 + $0x1634] ss:$8 sps:$4 sm:$0xff]   ;;  %v10003_v22 = vld [vmem:[%s10597_s17 + $0x4c] ss:$216 sps:$4 sm:$0xff]  }
 0x21a   : > { %7210 = vmatprep.subr.bf16.mxu0 %v9826_v23  ;;  %v10009_v23 = vld [vmem:[%s10597_s17 + $0xb4] ss:$216 sps:$4 sm:$0xff]  }
 0x21c   : > { %6522 = vmatpush1.bf16.msra.mxu1 %v9821_v24  ;;  %v9917_v24 = vld [vmem:[%s13181_s1 + $0x930] ss:$8 sps:$4 sm:$0xff]  }
 0x21d   : > { %7211 = vmatpush1.bf16.msra.mxu0 %v9824_v25  ;;  %6523 = vmatprep.subr.bf16.mxu1 %v9829_v26  ;;  %v9920_v25 = vld [vmem:[%s13181_s1 + $0x1630] ss:$8 sps:$4 sm:$0xff]   ;;  %v9925_v26 = vld [vmem:[%s13181_s1 + $0x944] ss:$8 sps:$4 sm:$0xff]  }
 0x21e   : > { %7212 = vmatprep.subr.bf16.mxu0 %v9832_v27  ;;  %v9928_v27 = vld [vmem:[%s13181_s1 + $0x1644] ss:$8 sps:$4 sm:$0xff]  }
 0x220   : > { %6524 = vmatpush1.bf16.msra.mxu1 %v9827_v28  ;;  %v9923_v28 = vld [vmem:[%s13181_s1 + $0x940] ss:$8 sps:$4 sm:$0xff]  }
 0x221   : > { %7213 = vmatpush1.bf16.msra.mxu0 %v9830_v29  ;;  %6525 = vmatprep.subr.bf16.mxu1 %v9835_v30  ;;  %v9926_v29 = vld [vmem:[%s13181_s1 + $0x1640] ss:$8 sps:$4 sm:$0xff]   ;;  %v9931_v30 = vld [vmem:[%s13181_s1 + $0x954] ss:$8 sps:$4 sm:$0xff]  }
 0x222   : > { %7214 = vmatprep.subr.bf16.mxu0 %v9838_v31  ;;  %v9934_v31 = vld [vmem:[%s13181_s1 + $0x1654] ss:$8 sps:$4 sm:$0xff]  }
 0x224   : > { %6526 = vmatpush1.bf16.msra.mxu1 %v9833_v32  ;;  %v9929_v32 = vld [vmem:[%s13181_s1 + $0x950] ss:$8 sps:$4 sm:$0xff]  }
 0x225   : > { %7215 = vmatpush1.bf16.msra.mxu0 %v9836_v33  ;;  %6527 = vmatprep.subr.bf16.mxu1 %v9841_v34  ;;  %v9932_v33 = vld [vmem:[%s13181_s1 + $0x1650] ss:$8 sps:$4 sm:$0xff]   ;;  %v9937_v34 = vld [vmem:[%s13181_s1 + $0x964] ss:$8 sps:$4 sm:$0xff]  }
 0x226   : > { %7216 = vmatprep.subr.bf16.mxu0 %v9844_v35  ;;  %v9940_v35 = vld [vmem:[%s13181_s1 + $0x1664] ss:$8 sps:$4 sm:$0xff]  }
 0x228   : > { %6528 = vmatpush1.bf16.msra.mxu1 %v9839_v36  ;;  %v9935_v36 = vld [vmem:[%s13181_s1 + $0x960] ss:$8 sps:$4 sm:$0xff]  }
 0x229   : > { %7217 = vmatpush1.bf16.msra.mxu0 %v9842_v37  ;;  %6529 = vmatprep.subr.bf16.mxu1 %v9847_v38  ;;  %v9938_v37 = vld [vmem:[%s13181_s1 + $0x1660] ss:$8 sps:$4 sm:$0xff]   ;;  %v9943_v38 = vld [vmem:[%s13181_s1 + $0x974] ss:$8 sps:$4 sm:$0xff]  }
 0x22a   : > { %7218 = vmatprep.subr.bf16.mxu0 %v9850_v39  ;;  %v9946_v39 = vld [vmem:[%s13181_s1 + $0x1674] ss:$8 sps:$4 sm:$0xff]  }
 0x22c   : > { %6530 = vmatpush1.bf16.msra.mxu1 %v9845_v40  ;;  %v9941_v40 = vld [vmem:[%s13181_s1 + $0x970] ss:$8 sps:$4 sm:$0xff]  }
 0x22d   : > { %7219 = vmatpush1.bf16.msra.mxu0 %v9848_v41  ;;  %6531 = vmatprep.subr.bf16.mxu1 %v9853_v42  ;;  %v9944_v41 = vld [vmem:[%s13181_s1 + $0x1670] ss:$8 sps:$4 sm:$0xff]   ;;  %v9949_v42 = vld [vmem:[%s13181_s1 + $0x984] ss:$8 sps:$4 sm:$0xff]  }
 0x22e   : > { %7220 = vmatprep.subr.bf16.mxu0 %v9856_v43  ;;  %v9952_v43 = vld [vmem:[%s13181_s1 + $0x1684] ss:$8 sps:$4 sm:$0xff]  }
 0x230   : > { %6532 = vmatpush1.bf16.msra.mxu1 %v9851_v44  ;;  %v9947_v44 = vld [vmem:[%s13181_s1 + $0x980] ss:$8 sps:$4 sm:$0xff]  }
 0x231   : > { %7221 = vmatpush1.bf16.msra.mxu0 %v9854_v45  ;;  %6533 = vmatprep.subr.bf16.mxu1 %v9859_v46  ;;  %v9950_v45 = vld [vmem:[%s13181_s1 + $0x1680] ss:$8 sps:$4 sm:$0xff]   ;;  %v9955_v46 = vld [vmem:[%s13181_s1 + $0x994] ss:$8 sps:$4 sm:$0xff]  }
 0x232   : > { %7222 = vmatprep.subr.bf16.mxu0 %v9862_v47  ;;  %v9958_v47 = vld [vmem:[%s13181_s1 + $0x1694] ss:$8 sps:$4 sm:$0xff]  }
 0x234   : > { %6534 = vmatpush1.bf16.msra.mxu1 %v9857_v48  ;;  %v9953_v48 = vld [vmem:[%s13181_s1 + $0x990] ss:$8 sps:$4 sm:$0xff]  }
 0x235   : > { %7223 = vmatpush1.bf16.msra.mxu0 %v9860_v49  ;;  %6535 = vmatprep.subr.bf16.mxu1 %v9865_v50  ;;  %v9956_v49 = vld [vmem:[%s13181_s1 + $0x1690] ss:$8 sps:$4 sm:$0xff]   ;;  %v9961_v50 = vld [vmem:[%s13181_s1 + $0x9a4] ss:$8 sps:$4 sm:$0xff]  }
 0x236   : > { %7224 = vmatprep.subr.bf16.mxu0 %v9868_v51  ;;  %v9964_v51 = vld [vmem:[%s13181_s1 + $0x16a4] ss:$8 sps:$4 sm:$0xff]  }
 0x238   : > { %6536 = vmatpush1.bf16.msra.mxu1 %v9863_v52  ;;  %v9959_v52 = vld [vmem:[%s13181_s1 + $0x9a0] ss:$8 sps:$4 sm:$0xff]  }
 0x239   : > { %7225 = vmatpush1.bf16.msra.mxu0 %v9866_v53  ;;  %6537 = vmatprep.subr.bf16.mxu1 %v9871_v54  ;;  %v9962_v53 = vld [vmem:[%s13181_s1 + $0x16a0] ss:$8 sps:$4 sm:$0xff]   ;;  %v9967_v54 = vld [vmem:[%s13181_s1 + $0x9b4] ss:$8 sps:$4 sm:$0xff]  }
 0x23a   : > { %7226 = vmatprep.subr.bf16.mxu0 %v9874_v55  ;;  %v9970_v55 = vld [vmem:[%s13181_s1 + $0x16b4] ss:$8 sps:$4 sm:$0xff]  }
 0x23c   : > { %6538 = vmatpush1.bf16.msra.mxu1 %v9869_v56  ;;  %v9965_v56 = vld [vmem:[%s13181_s1 + $0x9b0] ss:$8 sps:$4 sm:$0xff]  }
 0x23d   : > { %7227 = vmatpush1.bf16.msra.mxu0 %v9872_v57  ;;  %6539 = vmatprep.subr.bf16.mxu1 %v9879_v58  ;;  %v9968_v57 = vld [vmem:[%s13181_s1 + $0x16b0] ss:$8 sps:$4 sm:$0xff]   ;;  %v9973_v58 = vld [vmem:[%s13181_s1 + $0x9c4] ss:$8 sps:$4 sm:$0xff]  }
 0x23e   : > { %7228 = vmatprep.subr.bf16.mxu0 %v9884_v59  ;;  %v9976_v59 = vld [vmem:[%s13181_s1 + $0x16c4] ss:$8 sps:$4 sm:$0xff]  }
 0x240   : > { %6540 = vmatpush1.bf16.msra.mxu1 %v9877_v60  ;;  %v9971_v60 = vld [vmem:[%s13181_s1 + $0x9c0] ss:$8 sps:$4 sm:$0xff]  }
 0x241   : > { %7229 = vmatpush1.bf16.msra.mxu0 %v9882_v61  ;;  %6541 = vmatprep.subr.bf16.mxu1 %v9889_v62  ;;  %v9974_v61 = vld [vmem:[%s13181_s1 + $0x16c0] ss:$8 sps:$4 sm:$0xff]   ;;  %v9979_v62 = vld [vmem:[%s13181_s1 + $0x9d4] ss:$8 sps:$4 sm:$0xff]  }
 0x242   : > { %7230 = vmatprep.subr.bf16.mxu0 %v9892_v63  ;;  %v9982_v63 = vld [vmem:[%s13181_s1 + $0x16d4] ss:$8 sps:$4 sm:$0xff]  }
 0x244   : > { %6542 = vmatpush1.bf16.msra.mxu1 %v9887_v0  ;;  %v9977_v0 = vld [vmem:[%s13181_s1 + $0x9d0] ss:$8 sps:$4 sm:$0xff]  }
 0x245   : > { %7231 = vmatpush1.bf16.msra.mxu0 %v9890_v1  ;;  %6564 = vmatprep.subr.bf16.mxu1 %v9898_v2  ;;  %v9980_v1 = vld [vmem:[%s13181_s1 + $0x16d0] ss:$8 sps:$4 sm:$0xff]   ;;  %v9987_v2 = vld [vmem:[%s13181_s1 + $0x9e4] ss:$8 sps:$4 sm:$0xff]  }
 0x246   : > { %7253 = vmatprep.subr.bf16.mxu0 %v9904_v5  ;;  %v9990_v5 = vld [vmem:[%s13181_s1 + $0x16e0] ss:$8 sps:$4 sm:$0xff]  }
 0x247   : > { %6544 = vmatmul.mubr.bf16.vlgmr.msra.gmra.mrb[0].mxu1 %v9893_v3  ;;  %v9992_v3 = vld [vmem:[%s13181_s1 + $0x16e4] ss:$8 sps:$4 sm:$0xff]  }
 0x248   : > { %7233 = vmatmul.mubr.bf16.vlgmr.msra.gmra.mrb[0].mxu0 %v9899_v4  ;;  %6565 = vmatpush1.bf16.msra.mxu1 %v9896_v6  ;;  %v9985_v4 = vld [vmem:[%s13181_s1 + $0x9e0] ss:$8 sps:$4 sm:$0xff]   ;;  %v9997_v6 = vld [vmem:[%s13181_s1 + $0x9f4] ss:$8 sps:$4 sm:$0xff]  }
 0x249   : > { %7254 = vmatpush1.bf16.msra.mxu0 %v9902_v7  ;;  %6566 = vmatprep.subr.bf16.mxu1 %v9907_v8  ;;  %v10000_v7 = vld [vmem:[%s13181_s1 + $0x16f4] ss:$8 sps:$4 sm:$0xff]   ;;  %v9995_v8 = vld [vmem:[%s13181_s1 + $0x9f0] ss:$8 sps:$4 sm:$0xff]  }
 0x24a   : > { %7255 = vmatprep.subr.bf16.mxu0 %v9910_v9  ;;  %6553 = vmatprep.mubr.bf16.mxu1 %v9983_v12  ;;  %v9998_v9 = vld [vmem:[%s13181_s1 + $0x16f0] ss:$8 sps:$4 sm:$0xff]   ;;  %v10001_v12 = vld [vmem:[%s10597_s17 + $0x48] ss:$216 sps:$4 sm:$0xff]  }
 0x24b   : > { %7242 = vmatprep.mubr.bf16.mxu0 %v9988_v13  ;;  %v10007_v13 = vld [vmem:[%s10597_s17 + $0xb0] ss:$216 sps:$4 sm:$0xff]  }
 0x24c   : > { %6567 = vmatpush1.bf16.msra.mxu1 %v9905_v10  ;;  %v10006_v10 = vld [vmem:[%s13181_s1 + $0xa04] ss:$8 sps:$4 sm:$0xff]  }
 0x24d   : > { %7256 = vmatpush1.bf16.msra.mxu0 %v9908_v11  ;;  %6568 = vmatprep.subr.bf16.mxu1 %v9913_v14  ;;  %v10012_v11 = vld [vmem:[%s13181_s1 + $0x1704] ss:$8 sps:$4 sm:$0xff]   ;;  %v10004_v14 = vld [vmem:[%s13181_s1 + $0xa00] ss:$8 sps:$4 sm:$0xff]  }
 0x24e   : > { %7257 = vmatprep.subr.bf16.mxu0 %v9916_v15  ;;  %v10010_v15 = vld [vmem:[%s13181_s1 + $0x1700] ss:$8 sps:$4 sm:$0xff]  }
 0x24f   : > { %6554 = vmatmul.mubr.bf16.gmra.mrb[4].mxu1 %v9993_v16  ;;  %v10015_v16 = vld [vmem:[%s13181_s1 + $0xa14] ss:$8 sps:$4 sm:$0xff]  }
 0x250   : > { %7243 = vmatmul.mubr.bf16.gmra.mrb[4].mxu0 %v9994_v17  ;;  %6569 = vmatpush1.bf16.msra.mxu1 %v9911_v18  ;;  %v10018_v17 = vld [vmem:[%s13181_s1 + $0x1714] ss:$8 sps:$4 sm:$0xff]  }
 0x251   : > { %7258 = vmatpush1.bf16.msra.mxu0 %v9914_v19  ;;  %6570 = vmatprep.subr.bf16.mxu1 %v9919_v20  ;;  %v10091_v18 = vld [vmem:[%s10597_s17 + $0x1fc] ss:$216 sps:$4 sm:$0xff]   ;;  %v10013_v20 = vld [vmem:[%s13181_s1 + $0xa10] ss:$8 sps:$4 sm:$0xff]  }
 0x252   : > { %7259 = vmatprep.subr.bf16.mxu0 %v9922_v21  ;;  %6596 = vmatprep.mubr.bf16.mxu1 %v10003_v22  ;;  %v10096_v19 = vld [vmem:[%s10597_s17 + $0x264] ss:$216 sps:$4 sm:$0xff]   ;;  %v10016_v21 = vld [vmem:[%s13181_s1 + $0x1710] ss:$8 sps:$4 sm:$0xff]  }
 0x253   : > { %7285 = vmatprep.mubr.bf16.mxu0 %v10009_v23  ;;  %v10021_v22 = vld [vmem:[%s13181_s1 + $0xa24] ss:$8 sps:$4 sm:$0xff]  }
 0x254   : > { %6571 = vmatpush1.bf16.msra.mxu1 %v9917_v24  ;;  %v10024_v23 = vld [vmem:[%s13181_s1 + $0x1724] ss:$8 sps:$4 sm:$0xff]   ;;  %v10101_v24 = vld [vmem:[%s10597_s17 + $0x1f8] ss:$216 sps:$4 sm:$0xff]  }
 0x255   : > { %7260 = vmatpush1.bf16.msra.mxu0 %v9920_v25  ;;  %6572 = vmatprep.subr.bf16.mxu1 %v9925_v26  ;;  %v10102_v25 = vld [vmem:[%s10597_s17 + $0x260] ss:$216 sps:$4 sm:$0xff]  }
 0x256   : > { %7261 = vmatprep.subr.bf16.mxu0 %v9928_v27  ;;  %v10019_v26 = vld [vmem:[%s13181_s1 + $0xa20] ss:$8 sps:$4 sm:$0xff]  }
 0x257   : > { %v10022_v27 = vld [vmem:[%s13181_s1 + $0x1720] ss:$8 sps:$4 sm:$0xff]  }
 0x258   : > { %6573 = vmatpush1.bf16.msra.mxu1 %v9923_v28  ;;  %v10027_v28 = vld [vmem:[%s13181_s1 + $0xa34] ss:$8 sps:$4 sm:$0xff]  }
 0x259   : > { %7262 = vmatpush1.bf16.msra.mxu0 %v9926_v29  ;;  %6574 = vmatprep.subr.bf16.mxu1 %v9931_v30  ;;  %v10030_v29 = vld [vmem:[%s13181_s1 + $0x1734] ss:$8 sps:$4 sm:$0xff]  }
 0x25a   : > { %7263 = vmatprep.subr.bf16.mxu0 %v9934_v31  ;;  %v10111_v30 = vld [vmem:[%s10597_s17 + $0x54] ss:$216 sps:$4 sm:$0xff]  }
 0x25b   : > { %v10117_v31 = vld [vmem:[%s10597_s17 + $0xbc] ss:$216 sps:$4 sm:$0xff]  }
 0x25c   : > { %6575 = vmatpush1.bf16.msra.mxu1 %v9929_v32  ;;  %v10025_v32 = vld [vmem:[%s13181_s1 + $0xa30] ss:$8 sps:$4 sm:$0xff]  }
 0x25d   : > { %7264 = vmatpush1.bf16.msra.mxu0 %v9932_v33  ;;  %6576 = vmatprep.subr.bf16.mxu1 %v9937_v34  ;;  %v10028_v33 = vld [vmem:[%s13181_s1 + $0x1730] ss:$8 sps:$4 sm:$0xff]   ;;  %v10033_v34 = vld [vmem:[%s13181_s1 + $0xa44] ss:$8 sps:$4 sm:$0xff]  }
 0x25e   : > { %7265 = vmatprep.subr.bf16.mxu0 %v9940_v35  ;;  %v10036_v35 = vld [vmem:[%s13181_s1 + $0x1744] ss:$8 sps:$4 sm:$0xff]  }
 0x260   : > { %6577 = vmatpush1.bf16.msra.mxu1 %v9935_v36  ;;  %v10031_v36 = vld [vmem:[%s13181_s1 + $0xa40] ss:$8 sps:$4 sm:$0xff]  }
 0x261   : > { %7266 = vmatpush1.bf16.msra.mxu0 %v9938_v37  ;;  %6578 = vmatprep.subr.bf16.mxu1 %v9943_v38  ;;  %v10034_v37 = vld [vmem:[%s13181_s1 + $0x1740] ss:$8 sps:$4 sm:$0xff]   ;;  %v10039_v38 = vld [vmem:[%s13181_s1 + $0xa54] ss:$8 sps:$4 sm:$0xff]  }
 0x262   : > { %7267 = vmatprep.subr.bf16.mxu0 %v9946_v39  ;;  %v10042_v39 = vld [vmem:[%s13181_s1 + $0x1754] ss:$8 sps:$4 sm:$0xff]  }
 0x264   : > { %6579 = vmatpush1.bf16.msra.mxu1 %v9941_v40  ;;  %v10037_v40 = vld [vmem:[%s13181_s1 + $0xa50] ss:$8 sps:$4 sm:$0xff]  }
 0x265   : > { %7268 = vmatpush1.bf16.msra.mxu0 %v9944_v41  ;;  %6580 = vmatprep.subr.bf16.mxu1 %v9949_v42  ;;  %v10040_v41 = vld [vmem:[%s13181_s1 + $0x1750] ss:$8 sps:$4 sm:$0xff]   ;;  %v10045_v42 = vld [vmem:[%s13181_s1 + $0xa64] ss:$8 sps:$4 sm:$0xff]  }
 0x266   : > { %7269 = vmatprep.subr.bf16.mxu0 %v9952_v43  ;;  %v10048_v43 = vld [vmem:[%s13181_s1 + $0x1764] ss:$8 sps:$4 sm:$0xff]  }
 0x268   : > { %6581 = vmatpush1.bf16.msra.mxu1 %v9947_v44  ;;  %v10043_v44 = vld [vmem:[%s13181_s1 + $0xa60] ss:$8 sps:$4 sm:$0xff]  }
 0x269   : > { %7270 = vmatpush1.bf16.msra.mxu0 %v9950_v45  ;;  %6582 = vmatprep.subr.bf16.mxu1 %v9955_v46  ;;  %v10046_v45 = vld [vmem:[%s13181_s1 + $0x1760] ss:$8 sps:$4 sm:$0xff]   ;;  %v10051_v46 = vld [vmem:[%s13181_s1 + $0xa74] ss:$8 sps:$4 sm:$0xff]  }
 0x26a   : > { %7271 = vmatprep.subr.bf16.mxu0 %v9958_v47  ;;  %v10054_v47 = vld [vmem:[%s13181_s1 + $0x1774] ss:$8 sps:$4 sm:$0xff]  }
 0x26c   : > { %6583 = vmatpush1.bf16.msra.mxu1 %v9953_v48  ;;  %v10049_v48 = vld [vmem:[%s13181_s1 + $0xa70] ss:$8 sps:$4 sm:$0xff]  }
 0x26d   : > { %7272 = vmatpush1.bf16.msra.mxu0 %v9956_v49  ;;  %6584 = vmatprep.subr.bf16.mxu1 %v9961_v50  ;;  %v10052_v49 = vld [vmem:[%s13181_s1 + $0x1770] ss:$8 sps:$4 sm:$0xff]   ;;  %v10057_v50 = vld [vmem:[%s13181_s1 + $0xa84] ss:$8 sps:$4 sm:$0xff]  }
 0x26e   : > { %7273 = vmatprep.subr.bf16.mxu0 %v9964_v51  ;;  %v10060_v51 = vld [vmem:[%s13181_s1 + $0x1784] ss:$8 sps:$4 sm:$0xff]  }
 0x270   : > { %6585 = vmatpush1.bf16.msra.mxu1 %v9959_v52  ;;  %v10055_v52 = vld [vmem:[%s13181_s1 + $0xa80] ss:$8 sps:$4 sm:$0xff]  }
 0x271   : > { %7274 = vmatpush1.bf16.msra.mxu0 %v9962_v53  ;;  %6586 = vmatprep.subr.bf16.mxu1 %v9967_v54  ;;  %v10058_v53 = vld [vmem:[%s13181_s1 + $0x1780] ss:$8 sps:$4 sm:$0xff]   ;;  %v10063_v54 = vld [vmem:[%s13181_s1 + $0xa94] ss:$8 sps:$4 sm:$0xff]  }
 0x272   : > { %7275 = vmatprep.subr.bf16.mxu0 %v9970_v55  ;;  %v10066_v55 = vld [vmem:[%s13181_s1 + $0x1794] ss:$8 sps:$4 sm:$0xff]  }
 0x274   : > { %6587 = vmatpush1.bf16.msra.mxu1 %v9965_v56  ;;  %v10061_v56 = vld [vmem:[%s13181_s1 + $0xa90] ss:$8 sps:$4 sm:$0xff]  }
 0x275   : > { %7276 = vmatpush1.bf16.msra.mxu0 %v9968_v57  ;;  %6588 = vmatprep.subr.bf16.mxu1 %v9973_v58  ;;  %v10064_v57 = vld [vmem:[%s13181_s1 + $0x1790] ss:$8 sps:$4 sm:$0xff]   ;;  %v10069_v58 = vld [vmem:[%s13181_s1 + $0xaa4] ss:$8 sps:$4 sm:$0xff]  }
 0x276   : > { %7277 = vmatprep.subr.bf16.mxu0 %v9976_v59  ;;  %v10072_v59 = vld [vmem:[%s13181_s1 + $0x17a4] ss:$8 sps:$4 sm:$0xff]  }
 0x278   : > { %6589 = vmatpush1.bf16.msra.mxu1 %v9971_v60  ;;  %v10067_v60 = vld [vmem:[%s13181_s1 + $0xaa0] ss:$8 sps:$4 sm:$0xff]  }
 0x279   : > { %7278 = vmatpush1.bf16.msra.mxu0 %v9974_v61  ;;  %6590 = vmatprep.subr.bf16.mxu1 %v9979_v62  ;;  %v10070_v61 = vld [vmem:[%s13181_s1 + $0x17a0] ss:$8 sps:$4 sm:$0xff]   ;;  %v10075_v62 = vld [vmem:[%s13181_s1 + $0xab4] ss:$8 sps:$4 sm:$0xff]  }
 0x27a   : > { %7279 = vmatprep.subr.bf16.mxu0 %v9982_v63  ;;  %v10078_v63 = vld [vmem:[%s13181_s1 + $0x17b4] ss:$8 sps:$4 sm:$0xff]  }
 0x27c   : > { %6591 = vmatpush1.bf16.msra.mxu1 %v9977_v0  ;;  %v10073_v0 = vld [vmem:[%s13181_s1 + $0xab0] ss:$8 sps:$4 sm:$0xff]  }
 0x27d   : > { %7280 = vmatpush1.bf16.msra.mxu0 %v9980_v1  ;;  %6592 = vmatprep.subr.bf16.mxu1 %v9987_v2  ;;  %v10076_v1 = vld [vmem:[%s13181_s1 + $0x17b0] ss:$8 sps:$4 sm:$0xff]   ;;  %v10081_v2 = vld [vmem:[%s13181_s1 + $0xac4] ss:$8 sps:$4 sm:$0xff]  }
 0x27e   : > { %7281 = vmatprep.subr.bf16.mxu0 %v9992_v3  ;;  %v10084_v3 = vld [vmem:[%s13181_s1 + $0x17c4] ss:$8 sps:$4 sm:$0xff]  }
 0x280   : > { %6593 = vmatpush1.bf16.msra.mxu1 %v9985_v4  ;;  %v10079_v4 = vld [vmem:[%s13181_s1 + $0xac0] ss:$8 sps:$4 sm:$0xff]  }
 0x281   : > { %7282 = vmatpush1.bf16.msra.mxu0 %v9990_v5  ;;  %6594 = vmatprep.subr.bf16.mxu1 %v9997_v6  ;;  %v10082_v5 = vld [vmem:[%s13181_s1 + $0x17c0] ss:$8 sps:$4 sm:$0xff]   ;;  %v10087_v6 = vld [vmem:[%s13181_s1 + $0xad4] ss:$8 sps:$4 sm:$0xff]  }
 0x282   : > { %7283 = vmatprep.subr.bf16.mxu0 %v10000_v7  ;;  %v10090_v7 = vld [vmem:[%s13181_s1 + $0x17d4] ss:$8 sps:$4 sm:$0xff]  }
 0x284   : > { %6595 = vmatpush1.bf16.msra.mxu1 %v9995_v8  ;;  %v10085_v8 = vld [vmem:[%s13181_s1 + $0xad0] ss:$8 sps:$4 sm:$0xff]  }
 0x285   : > { %7284 = vmatpush1.bf16.msra.mxu0 %v9998_v9  ;;  %6617 = vmatprep.subr.bf16.mxu1 %v10006_v10  ;;  %v10088_v9 = vld [vmem:[%s13181_s1 + $0x17d0] ss:$8 sps:$4 sm:$0xff]   ;;  %v10095_v10 = vld [vmem:[%s13181_s1 + $0xae4] ss:$8 sps:$4 sm:$0xff]  }
 0x286   : > { %7306 = vmatprep.subr.bf16.mxu0 %v10012_v11  ;;  %v10100_v11 = vld [vmem:[%s13181_s1 + $0x17e4] ss:$8 sps:$4 sm:$0xff]  }
 0x287   : > { %6597 = vmatmul.mubr.bf16.vlgmr.msra.gmra.mrb[0].mxu1 %v10001_v12  ;;  %v10093_v12 = vld [vmem:[%s13181_s1 + $0xae0] ss:$8 sps:$4 sm:$0xff]  }
 0x288   : > { %7286 = vmatmul.mubr.bf16.vlgmr.msra.gmra.mrb[0].mxu0 %v10007_v13  ;;  %6618 = vmatpush1.bf16.msra.mxu1 %v10004_v14  ;;  %v10098_v13 = vld [vmem:[%s13181_s1 + $0x17e0] ss:$8 sps:$4 sm:$0xff]   ;;  %v10105_v14 = vld [vmem:[%s13181_s1 + $0xaf4] ss:$8 sps:$4 sm:$0xff]  }
 0x289   : > { %7307 = vmatpush1.bf16.msra.mxu0 %v10010_v15  ;;  %6619 = vmatprep.subr.bf16.mxu1 %v10015_v16  ;;  %v10108_v15 = vld [vmem:[%s13181_s1 + $0x17f4] ss:$8 sps:$4 sm:$0xff]   ;;  %v10103_v16 = vld [vmem:[%s13181_s1 + $0xaf0] ss:$8 sps:$4 sm:$0xff]  }
 0x28a   : > { %7308 = vmatprep.subr.bf16.mxu0 %v10018_v17  ;;  %6606 = vmatprep.mubr.bf16.mxu1 %v10091_v18  ;;  %v10106_v17 = vld [vmem:[%s13181_s1 + $0x17f0] ss:$8 sps:$4 sm:$0xff]   ;;  %v10114_v18 = vld [vmem:[%s13181_s1 + $0xb04] ss:$8 sps:$4 sm:$0xff]  }
 0x28b   : > { %7295 = vmatprep.mubr.bf16.mxu0 %v10096_v19  ;;  %v10120_v19 = vld [vmem:[%s13181_s1 + $0x1804] ss:$8 sps:$4 sm:$0xff]  }
 0x28c   : > { %6620 = vmatpush1.bf16.msra.mxu1 %v10013_v20  ;;  %v10109_v20 = vld [vmem:[%s10597_s17 + $0x50] ss:$216 sps:$4 sm:$0xff]  }
 0x28d   : > { %7309 = vmatpush1.bf16.msra.mxu0 %v10016_v21  ;;  %6621 = vmatprep.subr.bf16.mxu1 %v10021_v22  ;;  %v10115_v21 = vld [vmem:[%s10597_s17 + $0xb8] ss:$216 sps:$4 sm:$0xff]   ;;  %v10112_v22 = vld [vmem:[%s13181_s1 + $0xb00] ss:$8 sps:$4 sm:$0xff]  }
 0x28e   : > { %7310 = vmatprep.subr.bf16.mxu0 %v10024_v23  ;;  %v10118_v23 = vld [vmem:[%s13181_s1 + $0x1800] ss:$8 sps:$4 sm:$0xff]  }
 0x28f   : > { %6607 = vmatmul.mubr.bf16.gmra.mrb[4].mxu1 %v10101_v24  ;;  %v10123_v24 = vld [vmem:[%s13181_s1 + $0xb14] ss:$8 sps:$4 sm:$0xff]  }
 0x290   : > { %7296 = vmatmul.mubr.bf16.gmra.mrb[4].mxu0 %v10102_v25  ;;  %6622 = vmatpush1.bf16.msra.mxu1 %v10019_v26  ;;  %v10126_v25 = vld [vmem:[%s13181_s1 + $0x1814] ss:$8 sps:$4 sm:$0xff]  }
 0x291   : > { %7311 = vmatpush1.bf16.msra.mxu0 %v10022_v27  ;;  %6623 = vmatprep.subr.bf16.mxu1 %v10027_v28  ;;  %v10199_v26 = vld [vmem:[%s10597_s17 + $0x204] ss:$216 sps:$4 sm:$0xff]   ;;  %v10121_v28 = vld [vmem:[%s13181_s1 + $0xb10] ss:$8 sps:$4 sm:$0xff]  }
 0x292   : > { %7312 = vmatprep.subr.bf16.mxu0 %v10030_v29  ;;  %6649 = vmatprep.mubr.bf16.mxu1 %v10111_v30  ;;  %v10204_v27 = vld [vmem:[%s10597_s17 + $0x26c] ss:$216 sps:$4 sm:$0xff]   ;;  %v10124_v29 = vld [vmem:[%s13181_s1 + $0x1810] ss:$8 sps:$4 sm:$0xff]  }
 0x293   : > { %7338 = vmatprep.mubr.bf16.mxu0 %v10117_v31  ;;  %v10129_v30 = vld [vmem:[%s13181_s1 + $0xb24] ss:$8 sps:$4 sm:$0xff]  }
 0x294   : > { %6624 = vmatpush1.bf16.msra.mxu1 %v10025_v32  ;;  %v10132_v31 = vld [vmem:[%s13181_s1 + $0x1824] ss:$8 sps:$4 sm:$0xff]   ;;  %v10209_v32 = vld [vmem:[%s10597_s17 + $0x200] ss:$216 sps:$4 sm:$0xff]  }
 0x295   : > { %7313 = vmatpush1.bf16.msra.mxu0 %v10028_v33  ;;  %6625 = vmatprep.subr.bf16.mxu1 %v10033_v34  ;;  %v10210_v33 = vld [vmem:[%s10597_s17 + $0x268] ss:$216 sps:$4 sm:$0xff]  }
 0x296   : > { %7314 = vmatprep.subr.bf16.mxu0 %v10036_v35  ;;  %v10127_v34 = vld [vmem:[%s13181_s1 + $0xb20] ss:$8 sps:$4 sm:$0xff]  }
 0x297   : > { %v10130_v35 = vld [vmem:[%s13181_s1 + $0x1820] ss:$8 sps:$4 sm:$0xff]  }
 0x298   : > { %6626 = vmatpush1.bf16.msra.mxu1 %v10031_v36  ;;  %v10135_v36 = vld [vmem:[%s13181_s1 + $0xb34] ss:$8 sps:$4 sm:$0xff]  }
 0x299   : > { %7315 = vmatpush1.bf16.msra.mxu0 %v10034_v37  ;;  %6627 = vmatprep.subr.bf16.mxu1 %v10039_v38  ;;  %v10138_v37 = vld [vmem:[%s13181_s1 + $0x1834] ss:$8 sps:$4 sm:$0xff]  }
 0x29a   : > { %7316 = vmatprep.subr.bf16.mxu0 %v10042_v39  ;;  %v10219_v38 = vld [vmem:[%s10597_s17 + $0x5c] ss:$216 sps:$4 sm:$0xff]  }
 0x29b   : > { %v10225_v39 = vld [vmem:[%s10597_s17 + $0xc4] ss:$216 sps:$4 sm:$0xff]  }
 0x29c   : > { %6628 = vmatpush1.bf16.msra.mxu1 %v10037_v40  ;;  %v10133_v40 = vld [vmem:[%s13181_s1 + $0xb30] ss:$8 sps:$4 sm:$0xff]  }
 0x29d   : > { %7317 = vmatpush1.bf16.msra.mxu0 %v10040_v41  ;;  %6629 = vmatprep.subr.bf16.mxu1 %v10045_v42  ;;  %v10136_v41 = vld [vmem:[%s13181_s1 + $0x1830] ss:$8 sps:$4 sm:$0xff]   ;;  %v10141_v42 = vld [vmem:[%s13181_s1 + $0xb44] ss:$8 sps:$4 sm:$0xff]  }
 0x29e   : > { %7318 = vmatprep.subr.bf16.mxu0 %v10048_v43  ;;  %v10144_v43 = vld [vmem:[%s13181_s1 + $0x1844] ss:$8 sps:$4 sm:$0xff]  }
 0x2a0   : > { %6630 = vmatpush1.bf16.msra.mxu1 %v10043_v44  ;;  %v10139_v44 = vld [vmem:[%s13181_s1 + $0xb40] ss:$8 sps:$4 sm:$0xff]  }
 0x2a1   : > { %7319 = vmatpush1.bf16.msra.mxu0 %v10046_v45  ;;  %6631 = vmatprep.subr.bf16.mxu1 %v10051_v46  ;;  %v10142_v45 = vld [vmem:[%s13181_s1 + $0x1840] ss:$8 sps:$4 sm:$0xff]   ;;  %v10147_v46 = vld [vmem:[%s13181_s1 + $0xb54] ss:$8 sps:$4 sm:$0xff]  }
 0x2a2   : > { %7320 = vmatprep.subr.bf16.mxu0 %v10054_v47  ;;  %v10150_v47 = vld [vmem:[%s13181_s1 + $0x1854] ss:$8 sps:$4 sm:$0xff]  }
 0x2a4   : > { %6632 = vmatpush1.bf16.msra.mxu1 %v10049_v48  ;;  %v10145_v48 = vld [vmem:[%s13181_s1 + $0xb50] ss:$8 sps:$4 sm:$0xff]  }
 0x2a5   : > { %7321 = vmatpush1.bf16.msra.mxu0 %v10052_v49  ;;  %6633 = vmatprep.subr.bf16.mxu1 %v10057_v50  ;;  %v10148_v49 = vld [vmem:[%s13181_s1 + $0x1850] ss:$8 sps:$4 sm:$0xff]   ;;  %v10153_v50 = vld [vmem:[%s13181_s1 + $0xb64] ss:$8 sps:$4 sm:$0xff]  }
 0x2a6   : > { %7322 = vmatprep.subr.bf16.mxu0 %v10060_v51  ;;  %v10156_v51 = vld [vmem:[%s13181_s1 + $0x1864] ss:$8 sps:$4 sm:$0xff]  }
 0x2a8   : > { %6634 = vmatpush1.bf16.msra.mxu1 %v10055_v52  ;;  %v10151_v52 = vld [vmem:[%s13181_s1 + $0xb60] ss:$8 sps:$4 sm:$0xff]  }
 0x2a9   : > { %7323 = vmatpush1.bf16.msra.mxu0 %v10058_v53  ;;  %6635 = vmatprep.subr.bf16.mxu1 %v10063_v54  ;;  %v10154_v53 = vld [vmem:[%s13181_s1 + $0x1860] ss:$8 sps:$4 sm:$0xff]   ;;  %v10159_v54 = vld [vmem:[%s13181_s1 + $0xb74] ss:$8 sps:$4 sm:$0xff]  }
 0x2aa   : > { %7324 = vmatprep.subr.bf16.mxu0 %v10066_v55  ;;  %v10162_v55 = vld [vmem:[%s13181_s1 + $0x1874] ss:$8 sps:$4 sm:$0xff]  }
 0x2ac   : > { %6636 = vmatpush1.bf16.msra.mxu1 %v10061_v56  ;;  %v10157_v56 = vld [vmem:[%s13181_s1 + $0xb70] ss:$8 sps:$4 sm:$0xff]  }
 0x2ad   : > { %7325 = vmatpush1.bf16.msra.mxu0 %v10064_v57  ;;  %6637 = vmatprep.subr.bf16.mxu1 %v10069_v58  ;;  %v10160_v57 = vld [vmem:[%s13181_s1 + $0x1870] ss:$8 sps:$4 sm:$0xff]   ;;  %v10165_v58 = vld [vmem:[%s13181_s1 + $0xb84] ss:$8 sps:$4 sm:$0xff]  }
 0x2ae   : > { %7326 = vmatprep.subr.bf16.mxu0 %v10072_v59  ;;  %v10168_v59 = vld [vmem:[%s13181_s1 + $0x1884] ss:$8 sps:$4 sm:$0xff]  }
 0x2b0   : > { %6638 = vmatpush1.bf16.msra.mxu1 %v10067_v60  ;;  %v10163_v60 = vld [vmem:[%s13181_s1 + $0xb80] ss:$8 sps:$4 sm:$0xff]  }
 0x2b1   : > { %7327 = vmatpush1.bf16.msra.mxu0 %v10070_v61  ;;  %6639 = vmatprep.subr.bf16.mxu1 %v10075_v62  ;;  %v10166_v61 = vld [vmem:[%s13181_s1 + $0x1880] ss:$8 sps:$4 sm:$0xff]   ;;  %v10171_v62 = vld [vmem:[%s13181_s1 + $0xb94] ss:$8 sps:$4 sm:$0xff]  }
 0x2b2   : > { %7328 = vmatprep.subr.bf16.mxu0 %v10078_v63  ;;  %v10174_v63 = vld [vmem:[%s13181_s1 + $0x1894] ss:$8 sps:$4 sm:$0xff]  }
 0x2b4   : > { %6640 = vmatpush1.bf16.msra.mxu1 %v10073_v0  ;;  %v10169_v0 = vld [vmem:[%s13181_s1 + $0xb90] ss:$8 sps:$4 sm:$0xff]  }
 0x2b5   : > { %7329 = vmatpush1.bf16.msra.mxu0 %v10076_v1  ;;  %6641 = vmatprep.subr.bf16.mxu1 %v10081_v2  ;;  %v10172_v1 = vld [vmem:[%s13181_s1 + $0x1890] ss:$8 sps:$4 sm:$0xff]   ;;  %v10177_v2 = vld [vmem:[%s13181_s1 + $0xba4] ss:$8 sps:$4 sm:$0xff]  }
 0x2b6   : > { %7330 = vmatprep.subr.bf16.mxu0 %v10084_v3  ;;  %v10180_v3 = vld [vmem:[%s13181_s1 + $0x18a4] ss:$8 sps:$4 sm:$0xff]  }
 0x2b8   : > { %6642 = vmatpush1.bf16.msra.mxu1 %v10079_v4  ;;  %v10175_v4 = vld [vmem:[%s13181_s1 + $0xba0] ss:$8 sps:$4 sm:$0xff]  }
 0x2b9   : > { %7331 = vmatpush1.bf16.msra.mxu0 %v10082_v5  ;;  %6643 = vmatprep.subr.bf16.mxu1 %v10087_v6  ;;  %v10178_v5 = vld [vmem:[%s13181_s1 + $0x18a0] ss:$8 sps:$4 sm:$0xff]   ;;  %v10183_v6 = vld [vmem:[%s13181_s1 + $0xbb4] ss:$8 sps:$4 sm:$0xff]  }
 0x2ba   : > { %7332 = vmatprep.subr.bf16.mxu0 %v10090_v7  ;;  %v10186_v7 = vld [vmem:[%s13181_s1 + $0x18b4] ss:$8 sps:$4 sm:$0xff]  }
 0x2bc   : > { %6644 = vmatpush1.bf16.msra.mxu1 %v10085_v8  ;;  %v10181_v8 = vld [vmem:[%s13181_s1 + $0xbb0] ss:$8 sps:$4 sm:$0xff]  }
 0x2bd   : > { %7333 = vmatpush1.bf16.msra.mxu0 %v10088_v9  ;;  %6645 = vmatprep.subr.bf16.mxu1 %v10095_v10  ;;  %v10184_v9 = vld [vmem:[%s13181_s1 + $0x18b0] ss:$8 sps:$4 sm:$0xff]   ;;  %v10189_v10 = vld [vmem:[%s13181_s1 + $0xbc4] ss:$8 sps:$4 sm:$0xff]  }
 0x2be   : > { %7334 = vmatprep.subr.bf16.mxu0 %v10100_v11  ;;  %v10192_v11 = vld [vmem:[%s13181_s1 + $0x18c4] ss:$8 sps:$4 sm:$0xff]  }
 0x2c0   : > { %6646 = vmatpush1.bf16.msra.mxu1 %v10093_v12  ;;  %v10187_v12 = vld [vmem:[%s13181_s1 + $0xbc0] ss:$8 sps:$4 sm:$0xff]  }
 0x2c1   : > { %7335 = vmatpush1.bf16.msra.mxu0 %v10098_v13  ;;  %6647 = vmatprep.subr.bf16.mxu1 %v10105_v14  ;;  %v10190_v13 = vld [vmem:[%s13181_s1 + $0x18c0] ss:$8 sps:$4 sm:$0xff]   ;;  %v10195_v14 = vld [vmem:[%s13181_s1 + $0xbd4] ss:$8 sps:$4 sm:$0xff]  }
 0x2c2   : > { %7336 = vmatprep.subr.bf16.mxu0 %v10108_v15  ;;  %v10198_v15 = vld [vmem:[%s13181_s1 + $0x18d4] ss:$8 sps:$4 sm:$0xff]  }
 0x2c4   : > { %6648 = vmatpush1.bf16.msra.mxu1 %v10103_v16  ;;  %v10193_v16 = vld [vmem:[%s13181_s1 + $0xbd0] ss:$8 sps:$4 sm:$0xff]  }
 0x2c5   : > { %7337 = vmatpush1.bf16.msra.mxu0 %v10106_v17  ;;  %6670 = vmatprep.subr.bf16.mxu1 %v10114_v18  ;;  %v10196_v17 = vld [vmem:[%s13181_s1 + $0x18d0] ss:$8 sps:$4 sm:$0xff]   ;;  %v10203_v18 = vld [vmem:[%s13181_s1 + $0xbe4] ss:$8 sps:$4 sm:$0xff]  }
 0x2c6   : > { %7359 = vmatprep.subr.bf16.mxu0 %v10120_v19  ;;  %v10208_v19 = vld [vmem:[%s13181_s1 + $0x18e4] ss:$8 sps:$4 sm:$0xff]  }
 0x2c7   : > { %6650 = vmatmul.mubr.bf16.vlgmr.msra.gmra.mrb[0].mxu1 %v10109_v20  ;;  %v10201_v20 = vld [vmem:[%s13181_s1 + $0xbe0] ss:$8 sps:$4 sm:$0xff]  }
 0x2c8   : > { %7339 = vmatmul.mubr.bf16.vlgmr.msra.gmra.mrb[0].mxu0 %v10115_v21  ;;  %6671 = vmatpush1.bf16.msra.mxu1 %v10112_v22  ;;  %v10206_v21 = vld [vmem:[%s13181_s1 + $0x18e0] ss:$8 sps:$4 sm:$0xff]   ;;  %v10213_v22 = vld [vmem:[%s13181_s1 + $0xbf4] ss:$8 sps:$4 sm:$0xff]  }
 0x2c9   : > { %7360 = vmatpush1.bf16.msra.mxu0 %v10118_v23  ;;  %6672 = vmatprep.subr.bf16.mxu1 %v10123_v24  ;;  %v10216_v23 = vld [vmem:[%s13181_s1 + $0x18f4] ss:$8 sps:$4 sm:$0xff]   ;;  %v10211_v24 = vld [vmem:[%s13181_s1 + $0xbf0] ss:$8 sps:$4 sm:$0xff]  }
 0x2ca   : > { %7361 = vmatprep.subr.bf16.mxu0 %v10126_v25  ;;  %6659 = vmatprep.mubr.bf16.mxu1 %v10199_v26  ;;  %v10214_v25 = vld [vmem:[%s13181_s1 + $0x18f0] ss:$8 sps:$4 sm:$0xff]   ;;  %v10222_v26 = vld [vmem:[%s13181_s1 + $0xc04] ss:$8 sps:$4 sm:$0xff]  }
 0x2cb   : > { %7348 = vmatprep.mubr.bf16.mxu0 %v10204_v27  ;;  %v10228_v27 = vld [vmem:[%s13181_s1 + $0x1904] ss:$8 sps:$4 sm:$0xff]  }
 0x2cc   : > { %6673 = vmatpush1.bf16.msra.mxu1 %v10121_v28  ;;  %v10217_v28 = vld [vmem:[%s10597_s17 + $0x58] ss:$216 sps:$4 sm:$0xff]  }
 0x2cd   : > { %7362 = vmatpush1.bf16.msra.mxu0 %v10124_v29  ;;  %6674 = vmatprep.subr.bf16.mxu1 %v10129_v30  ;;  %v10223_v29 = vld [vmem:[%s10597_s17 + $0xc0] ss:$216 sps:$4 sm:$0xff]  }
 0x2ce   : > { %7363 = vmatprep.subr.bf16.mxu0 %v10132_v31  ;;  %v10220_v30 = vld [vmem:[%s13181_s1 + $0xc00] ss:$8 sps:$4 sm:$0xff]  }
 0x2cf   : > { %6660 = vmatmul.mubr.bf16.gmra.mrb[4].mxu1 %v10209_v32  ;;  %v10226_v31 = vld [vmem:[%s13181_s1 + $0x1900] ss:$8 sps:$4 sm:$0xff]   ;;  %v10231_v32 = vld [vmem:[%s13181_s1 + $0xc14] ss:$8 sps:$4 sm:$0xff]  }
 0x2d0   : > { %7349 = vmatmul.mubr.bf16.gmra.mrb[4].mxu0 %v10210_v33  ;;  %6675 = vmatpush1.bf16.msra.mxu1 %v10127_v34  ;;  %v10234_v33 = vld [vmem:[%s13181_s1 + $0x1914] ss:$8 sps:$4 sm:$0xff]   ;;  %v10307_v34 = vld [vmem:[%s10597_s17 + $0x20c] ss:$216 sps:$4 sm:$0xff]  }
 0x2d1   : > { %7364 = vmatpush1.bf16.msra.mxu0 %v10130_v35  ;;  %6676 = vmatprep.subr.bf16.mxu1 %v10135_v36  ;;  %v10309_v35 = vld [vmem:[%s10597_s17 + $0x274] ss:$216 sps:$4 sm:$0xff]   ;;  %v10229_v36 = vld [vmem:[%s13181_s1 + $0xc10] ss:$8 sps:$4 sm:$0xff]  }
 0x2d2   : > { %7365 = vmatprep.subr.bf16.mxu0 %v10138_v37  ;;  %6702 = vmatprep.mubr.bf16.mxu1 %v10219_v38  ;;  %v10232_v37 = vld [vmem:[%s13181_s1 + $0x1910] ss:$8 sps:$4 sm:$0xff]   ;;  %v10237_v38 = vld [vmem:[%s13181_s1 + $0xc24] ss:$8 sps:$4 sm:$0xff]  }
 0x2d3   : > { %7391 = vmatprep.mubr.bf16.mxu0 %v10225_v39  ;;  %v10240_v39 = vld [vmem:[%s13181_s1 + $0x1924] ss:$8 sps:$4 sm:$0xff]  }
 0x2d4   : > { %6677 = vmatpush1.bf16.msra.mxu1 %v10133_v40  ;;  %v10311_v40 = vld [vmem:[%s10597_s17 + $0x208] ss:$216 sps:$4 sm:$0xff]  }
 0x2d5   : > { %7366 = vmatpush1.bf16.msra.mxu0 %v10136_v41  ;;  %6678 = vmatprep.subr.bf16.mxu1 %v10141_v42  ;;  %v10315_v41 = vld [vmem:[%s10597_s17 + $0x270] ss:$216 sps:$4 sm:$0xff]  }
 0x2d6   : > { %7367 = vmatprep.subr.bf16.mxu0 %v10144_v43  ;;  %v10235_v42 = vld [vmem:[%s13181_s1 + $0xc20] ss:$8 sps:$4 sm:$0xff]  }
 0x2d7   : > { %v10238_v43 = vld [vmem:[%s13181_s1 + $0x1920] ss:$8 sps:$4 sm:$0xff]  }
 0x2d8   : > { %6679 = vmatpush1.bf16.msra.mxu1 %v10139_v44  ;;  %v10243_v44 = vld [vmem:[%s13181_s1 + $0xc34] ss:$8 sps:$4 sm:$0xff]  }
 0x2d9   : > { %7368 = vmatpush1.bf16.msra.mxu0 %v10142_v45  ;;  %6680 = vmatprep.subr.bf16.mxu1 %v10147_v46  ;;  %v10246_v45 = vld [vmem:[%s13181_s1 + $0x1934] ss:$8 sps:$4 sm:$0xff]  }
 0x2da   : > { %7369 = vmatprep.subr.bf16.mxu0 %v10150_v47  ;;  %v10327_v46 = vld [vmem:[%s10597_s17 + $0x64] ss:$216 sps:$4 sm:$0xff]  }
 0x2db   : > { %v10330_v47 = vld [vmem:[%s10597_s17 + $0xcc] ss:$216 sps:$4 sm:$0xff]  }
 0x2dc   : > { %6681 = vmatpush1.bf16.msra.mxu1 %v10145_v48  ;;  %v10241_v48 = vld [vmem:[%s13181_s1 + $0xc30] ss:$8 sps:$4 sm:$0xff]  }
 0x2dd   : > { %7370 = vmatpush1.bf16.msra.mxu0 %v10148_v49  ;;  %6682 = vmatprep.subr.bf16.mxu1 %v10153_v50  ;;  %v10244_v49 = vld [vmem:[%s13181_s1 + $0x1930] ss:$8 sps:$4 sm:$0xff]   ;;  %v10249_v50 = vld [vmem:[%s13181_s1 + $0xc44] ss:$8 sps:$4 sm:$0xff]  }
 0x2de   : > { %7371 = vmatprep.subr.bf16.mxu0 %v10156_v51  ;;  %v10252_v51 = vld [vmem:[%s13181_s1 + $0x1944] ss:$8 sps:$4 sm:$0xff]  }
 0x2e0   : > { %6683 = vmatpush1.bf16.msra.mxu1 %v10151_v52  ;;  %v10247_v52 = vld [vmem:[%s13181_s1 + $0xc40] ss:$8 sps:$4 sm:$0xff]  }
 0x2e1   : > { %7372 = vmatpush1.bf16.msra.mxu0 %v10154_v53  ;;  %6684 = vmatprep.subr.bf16.mxu1 %v10159_v54  ;;  %v10250_v53 = vld [vmem:[%s13181_s1 + $0x1940] ss:$8 sps:$4 sm:$0xff]   ;;  %v10255_v54 = vld [vmem:[%s13181_s1 + $0xc54] ss:$8 sps:$4 sm:$0xff]  }
 0x2e2   : > { %7373 = vmatprep.subr.bf16.mxu0 %v10162_v55  ;;  %v10258_v55 = vld [vmem:[%s13181_s1 + $0x1954] ss:$8 sps:$4 sm:$0xff]  }
 0x2e4   : > { %6685 = vmatpush1.bf16.msra.mxu1 %v10157_v56  ;;  %v10253_v56 = vld [vmem:[%s13181_s1 + $0xc50] ss:$8 sps:$4 sm:$0xff]  }
 0x2e5   : > { %7374 = vmatpush1.bf16.msra.mxu0 %v10160_v57  ;;  %6686 = vmatprep.subr.bf16.mxu1 %v10165_v58  ;;  %v10256_v57 = vld [vmem:[%s13181_s1 + $0x1950] ss:$8 sps:$4 sm:$0xff]   ;;  %v10261_v58 = vld [vmem:[%s13181_s1 + $0xc64] ss:$8 sps:$4 sm:$0xff]  }
 0x2e6   : > { %7375 = vmatprep.subr.bf16.mxu0 %v10168_v59  ;;  %v10264_v59 = vld [vmem:[%s13181_s1 + $0x1964] ss:$8 sps:$4 sm:$0xff]  }
 0x2e8   : > { %6687 = vmatpush1.bf16.msra.mxu1 %v10163_v60  ;;  %v10259_v60 = vld [vmem:[%s13181_s1 + $0xc60] ss:$8 sps:$4 sm:$0xff]  }
 0x2e9   : > { %7376 = vmatpush1.bf16.msra.mxu0 %v10166_v61  ;;  %6688 = vmatprep.subr.bf16.mxu1 %v10171_v62  ;;  %v10262_v61 = vld [vmem:[%s13181_s1 + $0x1960] ss:$8 sps:$4 sm:$0xff]   ;;  %v10267_v62 = vld [vmem:[%s13181_s1 + $0xc74] ss:$8 sps:$4 sm:$0xff]  }
 0x2ea   : > { %7377 = vmatprep.subr.bf16.mxu0 %v10174_v63  ;;  %v10270_v63 = vld [vmem:[%s13181_s1 + $0x1974] ss:$8 sps:$4 sm:$0xff]  }
 0x2ec   : > { %6689 = vmatpush1.bf16.msra.mxu1 %v10169_v0  ;;  %v10265_v0 = vld [vmem:[%s13181_s1 + $0xc70] ss:$8 sps:$4 sm:$0xff]  }
 0x2ed   : > { %7378 = vmatpush1.bf16.msra.mxu0 %v10172_v1  ;;  %6690 = vmatprep.subr.bf16.mxu1 %v10177_v2  ;;  %v10268_v1 = vld [vmem:[%s13181_s1 + $0x1970] ss:$8 sps:$4 sm:$0xff]   ;;  %v10273_v2 = vld [vmem:[%s13181_s1 + $0xc84] ss:$8 sps:$4 sm:$0xff]  }
 0x2ee   : > { %7379 = vmatprep.subr.bf16.mxu0 %v10180_v3  ;;  %v10276_v3 = vld [vmem:[%s13181_s1 + $0x1984] ss:$8 sps:$4 sm:$0xff]  }
 0x2f0   : > { %6691 = vmatpush1.bf16.msra.mxu1 %v10175_v4  ;;  %v10271_v4 = vld [vmem:[%s13181_s1 + $0xc80] ss:$8 sps:$4 sm:$0xff]  }
 0x2f1   : > { %7380 = vmatpush1.bf16.msra.mxu0 %v10178_v5  ;;  %6692 = vmatprep.subr.bf16.mxu1 %v10183_v6  ;;  %v10274_v5 = vld [vmem:[%s13181_s1 + $0x1980] ss:$8 sps:$4 sm:$0xff]   ;;  %v10279_v6 = vld [vmem:[%s13181_s1 + $0xc94] ss:$8 sps:$4 sm:$0xff]  }
 0x2f2   : > { %7381 = vmatprep.subr.bf16.mxu0 %v10186_v7  ;;  %v10282_v7 = vld [vmem:[%s13181_s1 + $0x1994] ss:$8 sps:$4 sm:$0xff]  }
 0x2f4   : > { %6693 = vmatpush1.bf16.msra.mxu1 %v10181_v8  ;;  %v10277_v8 = vld [vmem:[%s13181_s1 + $0xc90] ss:$8 sps:$4 sm:$0xff]  }
 0x2f5   : > { %7382 = vmatpush1.bf16.msra.mxu0 %v10184_v9  ;;  %6694 = vmatprep.subr.bf16.mxu1 %v10189_v10  ;;  %v10280_v9 = vld [vmem:[%s13181_s1 + $0x1990] ss:$8 sps:$4 sm:$0xff]   ;;  %v10285_v10 = vld [vmem:[%s13181_s1 + $0xca4] ss:$8 sps:$4 sm:$0xff]  }
 0x2f6   : > { %7383 = vmatprep.subr.bf16.mxu0 %v10192_v11  ;;  %v10288_v11 = vld [vmem:[%s13181_s1 + $0x19a4] ss:$8 sps:$4 sm:$0xff]  }
 0x2f8   : > { %6695 = vmatpush1.bf16.msra.mxu1 %v10187_v12  ;;  %v10283_v12 = vld [vmem:[%s13181_s1 + $0xca0] ss:$8 sps:$4 sm:$0xff]  }
 0x2f9   : > { %7384 = vmatpush1.bf16.msra.mxu0 %v10190_v13  ;;  %6696 = vmatprep.subr.bf16.mxu1 %v10195_v14  ;;  %v10286_v13 = vld [vmem:[%s13181_s1 + $0x19a0] ss:$8 sps:$4 sm:$0xff]   ;;  %v10291_v14 = vld [vmem:[%s13181_s1 + $0xcb4] ss:$8 sps:$4 sm:$0xff]  }
 0x2fa   : > { %7385 = vmatprep.subr.bf16.mxu0 %v10198_v15  ;;  %v10294_v15 = vld [vmem:[%s13181_s1 + $0x19b4] ss:$8 sps:$4 sm:$0xff]  }
 0x2fc   : > { %6697 = vmatpush1.bf16.msra.mxu1 %v10193_v16  ;;  %v10289_v16 = vld [vmem:[%s13181_s1 + $0xcb0] ss:$8 sps:$4 sm:$0xff]  }
 0x2fd   : > { %7386 = vmatpush1.bf16.msra.mxu0 %v10196_v17  ;;  %6698 = vmatprep.subr.bf16.mxu1 %v10203_v18  ;;  %v10292_v17 = vld [vmem:[%s13181_s1 + $0x19b0] ss:$8 sps:$4 sm:$0xff]   ;;  %v10297_v18 = vld [vmem:[%s13181_s1 + $0xcc4] ss:$8 sps:$4 sm:$0xff]  }
 0x2fe   : > { %7387 = vmatprep.subr.bf16.mxu0 %v10208_v19  ;;  %v10300_v19 = vld [vmem:[%s13181_s1 + $0x19c4] ss:$8 sps:$4 sm:$0xff]  }
 0x300   : > { %6699 = vmatpush1.bf16.msra.mxu1 %v10201_v20  ;;  %v10295_v20 = vld [vmem:[%s13181_s1 + $0xcc0] ss:$8 sps:$4 sm:$0xff]  }
 0x301   : > { %7388 = vmatpush1.bf16.msra.mxu0 %v10206_v21  ;;  %6700 = vmatprep.subr.bf16.mxu1 %v10213_v22  ;;  %v10298_v21 = vld [vmem:[%s13181_s1 + $0x19c0] ss:$8 sps:$4 sm:$0xff]   ;;  %v10303_v22 = vld [vmem:[%s13181_s1 + $0xcd4] ss:$8 sps:$4 sm:$0xff]  }
 0x302   : > { %7389 = vmatprep.subr.bf16.mxu0 %v10216_v23  ;;  %v10306_v23 = vld [vmem:[%s13181_s1 + $0x19d4] ss:$8 sps:$4 sm:$0xff]  }
 0x304   : > { %6701 = vmatpush1.bf16.msra.mxu1 %v10211_v24  ;;  %v10301_v24 = vld [vmem:[%s13181_s1 + $0xcd0] ss:$8 sps:$4 sm:$0xff]  }
 0x305   : > { %7390 = vmatpush1.bf16.msra.mxu0 %v10214_v25  ;;  %6723 = vmatprep.subr.bf16.mxu1 %v10222_v26  ;;  %v10304_v25 = vld [vmem:[%s13181_s1 + $0x19d0] ss:$8 sps:$4 sm:$0xff]   ;;  %v10314_v26 = vld [vmem:[%s13181_s1 + $0xce4] ss:$8 sps:$4 sm:$0xff]  }
 0x306   : > { %7412 = vmatprep.subr.bf16.mxu0 %v10228_v27  ;;  %v10318_v27 = vld [vmem:[%s13181_s1 + $0x19e4] ss:$8 sps:$4 sm:$0xff]  }
 0x307   : > { %6703 = vmatmul.mubr.bf16.vlgmr.msra.gmra.mrb[0].mxu1 %v10217_v28  ;;  %v10312_v28 = vld [vmem:[%s13181_s1 + $0xce0] ss:$8 sps:$4 sm:$0xff]  }
 0x308   : > { %7392 = vmatmul.mubr.bf16.vlgmr.msra.gmra.mrb[0].mxu0 %v10223_v29  ;;  %6724 = vmatpush1.bf16.msra.mxu1 %v10220_v30  ;;  %v10316_v29 = vld [vmem:[%s13181_s1 + $0x19e0] ss:$8 sps:$4 sm:$0xff]   ;;  %v10321_v30 = vld [vmem:[%s13181_s1 + $0xcf4] ss:$8 sps:$4 sm:$0xff]  }
 0x309   : > { %7413 = vmatpush1.bf16.msra.mxu0 %v10226_v31  ;;  %6725 = vmatprep.subr.bf16.mxu1 %v10231_v32  ;;  %v10324_v31 = vld [vmem:[%s13181_s1 + $0x19f4] ss:$8 sps:$4 sm:$0xff]   ;;  %v10319_v32 = vld [vmem:[%s13181_s1 + $0xcf0] ss:$8 sps:$4 sm:$0xff]  }
 0x30a   : > { %7414 = vmatprep.subr.bf16.mxu0 %v10234_v33  ;;  %6712 = vmatprep.mubr.bf16.mxu1 %v10307_v34  ;;  %v10322_v33 = vld [vmem:[%s13181_s1 + $0x19f0] ss:$8 sps:$4 sm:$0xff]   ;;  %v10333_v34 = vld [vmem:[%s13181_s1 + $0x1a04] ss:$8 sps:$4 sm:$0xff]  }
 0x30b   : > { %7401 = vmatprep.mubr.bf16.mxu0 %v10309_v35  ;;  %v10325_v35 = vld [vmem:[%s10597_s17 + $0x60] ss:$216 sps:$4 sm:$0xff]  }
 0x30c   : > { %6726 = vmatpush1.bf16.msra.mxu1 %v10229_v36  ;;  %v10328_v36 = vld [vmem:[%s10597_s17 + $0xc8] ss:$216 sps:$4 sm:$0xff]  }
 0x30d   : > { %7415 = vmatpush1.bf16.msra.mxu0 %v10232_v37  ;;  %6727 = vmatprep.subr.bf16.mxu1 %v10237_v38  ;;  %v10331_v37 = vld [vmem:[%s13181_s1 + $0x1a00] ss:$8 sps:$4 sm:$0xff]   ;;  %v10336_v38 = vld [vmem:[%s13181_s1 + $0x1a14] ss:$8 sps:$4 sm:$0xff]  }
 0x30e   : > { %7416 = vmatprep.subr.bf16.mxu0 %v10240_v39  ;;  %v10337_v39 = vld [vmem:[%s10597_s17 + $0x214] ss:$216 sps:$4 sm:$0xff]  }
 0x30f   : > { %6713 = vmatmul.mubr.bf16.gmra.mrb[4].mxu1 %v10311_v40  ;;  %v10339_v40 = vld [vmem:[%s10597_s17 + $0x27c] ss:$216 sps:$4 sm:$0xff]  }
 0x310   : > { %7402 = vmatmul.mubr.bf16.gmra.mrb[4].mxu0 %v10315_v41  ;;  %6728 = vmatpush1.bf16.msra.mxu1 %v10235_v42  ;;  %v10334_v41 = vld [vmem:[%s13181_s1 + $0x1a10] ss:$8 sps:$4 sm:$0xff]   ;;  %v10345_v42 = vld [vmem:[%s13181_s1 + $0x1a24] ss:$8 sps:$4 sm:$0xff]  }
 0x311   : > { %7417 = vmatpush1.bf16.msra.mxu0 %v10238_v43  ;;  %6729 = vmatprep.subr.bf16.mxu1 %v10243_v44  ;;  %v10341_v43 = vld [vmem:[%s10597_s17 + $0x210] ss:$216 sps:$4 sm:$0xff]  }
 0x312   : > { %7418 = vmatprep.subr.bf16.mxu0 %v10246_v45  ;;  %6755 = vmatprep.mubr.bf16.mxu1 %v10327_v46  ;;  %v10342_v44 = vld [vmem:[%s10597_s17 + $0x278] ss:$216 sps:$4 sm:$0xff]   ;;  %v10343_v45 = vld [vmem:[%s13181_s1 + $0x1a20] ss:$8 sps:$4 sm:$0xff]   ;;  %v10348_v46 = vld [vmem:[%s13181_s1 + $0x1a34] ss:$8 sps:$4 sm:$0xff]  }
 0x313   : > { %7444 = vmatprep.mubr.bf16.mxu0 %v10330_v47  ;;  %v10387_v47 = vld [vmem:[%s10597_s17 + $0xd4] ss:$216 sps:$4 sm:$0xff]  }
 0x314   : > { %6730 = vmatpush1.bf16.msra.mxu1 %v10241_v48  ;;  %v10390_v48 = vld [vmem:[%s10597_s17 + $0x284] ss:$216 sps:$4 sm:$0xff]  }
 0x315   : > { %7419 = vmatpush1.bf16.msra.mxu0 %v10244_v49  ;;  %6731 = vmatprep.subr.bf16.mxu1 %v10249_v50  ;;  %v10346_v49 = vld [vmem:[%s13181_s1 + $0x1a30] ss:$8 sps:$4 sm:$0xff]   ;;  %v10351_v50 = vld [vmem:[%s13181_s1 + $0x1a44] ss:$8 sps:$4 sm:$0xff]  }
 0x316   : > { %7420 = vmatprep.subr.bf16.mxu0 %v10252_v51  ;;  %v10349_v51 = vld [vmem:[%s13181_s1 + $0x1a40] ss:$8 sps:$4 sm:$0xff]  }
 0x318   : > { %6732 = vmatpush1.bf16.msra.mxu1 %v10247_v52  ;;  %v10354_v52 = vld [vmem:[%s13181_s1 + $0x1a54] ss:$8 sps:$4 sm:$0xff]  }
 0x319   : > { %7421 = vmatpush1.bf16.msra.mxu0 %v10250_v53  ;;  %6733 = vmatprep.subr.bf16.mxu1 %v10255_v54  ;;  %v10352_v53 = vld [vmem:[%s13181_s1 + $0x1a50] ss:$8 sps:$4 sm:$0xff]   ;;  %v10357_v54 = vld [vmem:[%s13181_s1 + $0x1a64] ss:$8 sps:$4 sm:$0xff]  }
 0x31a   : > { %7422 = vmatprep.subr.bf16.mxu0 %v10258_v55  ;;  %v10355_v55 = vld [vmem:[%s13181_s1 + $0x1a60] ss:$8 sps:$4 sm:$0xff]  }
 0x31c   : > { %6734 = vmatpush1.bf16.msra.mxu1 %v10253_v56  ;;  %v10360_v56 = vld [vmem:[%s13181_s1 + $0x1a74] ss:$8 sps:$4 sm:$0xff]  }
 0x31d   : > { %7423 = vmatpush1.bf16.msra.mxu0 %v10256_v57  ;;  %6735 = vmatprep.subr.bf16.mxu1 %v10261_v58  ;;  %v10358_v57 = vld [vmem:[%s13181_s1 + $0x1a70] ss:$8 sps:$4 sm:$0xff]   ;;  %v10363_v58 = vld [vmem:[%s13181_s1 + $0x1a84] ss:$8 sps:$4 sm:$0xff]  }
 0x31e   : > { %7424 = vmatprep.subr.bf16.mxu0 %v10264_v59  ;;  %v10361_v59 = vld [vmem:[%s13181_s1 + $0x1a80] ss:$8 sps:$4 sm:$0xff]  }
 0x320   : > { %6736 = vmatpush1.bf16.msra.mxu1 %v10259_v60  ;;  %v10366_v60 = vld [vmem:[%s13181_s1 + $0x1a94] ss:$8 sps:$4 sm:$0xff]  }
 0x321   : > { %7425 = vmatpush1.bf16.msra.mxu0 %v10262_v61  ;;  %6737 = vmatprep.subr.bf16.mxu1 %v10267_v62  ;;  %v10364_v61 = vld [vmem:[%s13181_s1 + $0x1a90] ss:$8 sps:$4 sm:$0xff]   ;;  %v10369_v62 = vld [vmem:[%s13181_s1 + $0x1aa4] ss:$8 sps:$4 sm:$0xff]  }
 0x322   : > { %7426 = vmatprep.subr.bf16.mxu0 %v10270_v63  ;;  %v10367_v63 = vld [vmem:[%s13181_s1 + $0x1aa0] ss:$8 sps:$4 sm:$0xff]  }
 0x324   : > { %6738 = vmatpush1.bf16.msra.mxu1 %v10265_v0  ;;  %v10372_v0 = vld [vmem:[%s13181_s1 + $0x1ab4] ss:$8 sps:$4 sm:$0xff]  }
 0x325   : > { %7427 = vmatpush1.bf16.msra.mxu0 %v10268_v1  ;;  %6739 = vmatprep.subr.bf16.mxu1 %v10273_v2  ;;  %v10370_v1 = vld [vmem:[%s13181_s1 + $0x1ab0] ss:$8 sps:$4 sm:$0xff]   ;;  %v10375_v2 = vld [vmem:[%s13181_s1 + $0x1ac4] ss:$8 sps:$4 sm:$0xff]  }
 0x326   : > { %7428 = vmatprep.subr.bf16.mxu0 %v10276_v3  ;;  %v10373_v3 = vld [vmem:[%s13181_s1 + $0x1ac0] ss:$8 sps:$4 sm:$0xff]  }
 0x328   : > { %6740 = vmatpush1.bf16.msra.mxu1 %v10271_v4  ;;  %v10378_v4 = vld [vmem:[%s13181_s1 + $0x1ad4] ss:$8 sps:$4 sm:$0xff]  }
 0x329   : > { %7429 = vmatpush1.bf16.msra.mxu0 %v10274_v5  ;;  %6741 = vmatprep.subr.bf16.mxu1 %v10279_v6  ;;  %v10376_v5 = vld [vmem:[%s13181_s1 + $0x1ad0] ss:$8 sps:$4 sm:$0xff]   ;;  %v10381_v6 = vld [vmem:[%s13181_s1 + $0x1ae4] ss:$8 sps:$4 sm:$0xff]  }
 0x32a   : > { %7430 = vmatprep.subr.bf16.mxu0 %v10282_v7  ;;  %v10379_v7 = vld [vmem:[%s13181_s1 + $0x1ae0] ss:$8 sps:$4 sm:$0xff]  }
 0x32c   : > { %6742 = vmatpush1.bf16.msra.mxu1 %v10277_v8  ;;  %v10384_v8 = vld [vmem:[%s13181_s1 + $0x1af4] ss:$8 sps:$4 sm:$0xff]  }
 0x32d   : > { %7431 = vmatpush1.bf16.msra.mxu0 %v10280_v9  ;;  %6743 = vmatprep.subr.bf16.mxu1 %v10285_v10  ;;  %v10382_v9 = vld [vmem:[%s13181_s1 + $0x1af0] ss:$8 sps:$4 sm:$0xff]  }
 0x32e   : > { %7432 = vmatprep.subr.bf16.mxu0 %v10288_v11  ;;  %v10385_v10 = vld [vmem:[%s10597_s17 + $0xd0] ss:$216 sps:$4 sm:$0xff]   ;;  %v10388_v11 = vld [vmem:[%s10597_s17 + $0x280] ss:$216 sps:$4 sm:$0xff]   ;;  %s8655_s17 = sshll.u32 %s13189_s30, 3 }
 0x32f   : > { %s240_s6 = scalar_lea.vmem %s13183_s3, %s8655_s17 }
 0x330   : > { %6744 = vmatpush1.bf16.msra.mxu1 %v10283_v12  ;;  %v1217_v12 = vlaneseq }
 0x331   : > { %7433 = vmatpush1.bf16.msra.mxu0 %v10286_v13  ;;  %6745 = vmatprep.subr.bf16.mxu1 %v10291_v14 }
 0x332   : > { %7434 = vmatprep.subr.bf16.mxu0 %v10294_v15  ;;  %v1218_v13 = vshrl.u32 %v1217_v12, 7 }
 0x334   : > { %6746 = vmatpush1.bf16.msra.mxu1 %v10289_v16 }
 0x335   : > { %7435 = vmatpush1.bf16.msra.mxu0 %v10292_v17  ;;  %6747 = vmatprep.subr.bf16.mxu1 %v10297_v18  ;;  %v1219_v17 = vsub.s32 0, %v1218_v13 }
 0x336   : > { %7436 = vmatprep.subr.bf16.mxu0 %v10300_v19  ;;  %v1215_v19 = vld [vmem:[%s13182_s2] sm:$0x3] }
 0x338   : > { %6748 = vmatpush1.bf16.msra.mxu1 %v10295_v20  ;;  %v1223_v20 = vsub.s32 1, %v1218_v13 }
 0x339   : > { %7437 = vmatpush1.bf16.msra.mxu0 %v10298_v21  ;;  %6749 = vmatprep.subr.bf16.mxu1 %v10303_v22  ;;  %v1220_v21 = vrot.slane %v1215_v19, %v1219_v17 }
 0x33a   : > { %7438 = vmatprep.subr.bf16.mxu0 %v10306_v23  ;;  %v1224_v22 = vrot.slane %v1215_v19, %v1223_v20 }
 0x33c   : > { %6750 = vmatpush1.bf16.msra.mxu1 %v10301_v24 }
 0x33d   : > { %7439 = vmatpush1.bf16.msra.mxu0 %v10304_v25  ;;  %6751 = vmatprep.subr.bf16.mxu1 %v10314_v26 }
 0x33e   : > { %7440 = vmatprep.subr.bf16.mxu0 %v10318_v27 }
 0x340   : > { %6752 = vmatpush1.bf16.msra.mxu1 %v10312_v28 }
 0x341   : > { %7441 = vmatpush1.bf16.msra.mxu0 %v10316_v29  ;;  %6753 = vmatprep.subr.bf16.mxu1 %v10321_v30 }
 0x342   : > { %7442 = vmatprep.subr.bf16.mxu0 %v10324_v31 }
 0x344   : > { %6754 = vmatpush1.bf16.msra.mxu1 %v10319_v32 }
 0x345   : > { %7443 = vmatpush1.bf16.msra.mxu0 %v10322_v33  ;;  %8660 = vmatprep.subr.bf16.mxu1 %v10333_v34 }
 0x346   : > { %7465 = vmatprep.subr.bf16.mxu0 %v10333_v34 }
 0x347   : > { %6756 = vmatmul.mubr.bf16.vlgmr.msra.gmra.mrb[0].mxu1 %v10325_v35 }
 0x348   : > { %7445 = vmatmul.mubr.bf16.vlgmr.msra.gmra.mrb[0].mxu0 %v10328_v36  ;;  %8676 = vmatpush1.bf16.msra.mxu1 %v10331_v37 }
 0x349   : > { %7466 = vmatpush1.bf16.msra.mxu0 %v10331_v37  ;;  %8661 = vmatprep.subr.bf16.mxu1 %v10336_v38 }
 0x34a   : > { %7467 = vmatprep.subr.bf16.mxu0 %v10336_v38  ;;  %6765 = vmatprep.mubr.bf16.mxu1 %v10337_v39 }
 0x34b   : > { %7454 = vmatprep.mubr.bf16.mxu0 %v10339_v40 }
 0x34c   : > { %8677 = vmatpush1.bf16.msra.mxu1 %v10334_v41 }
 0x34d   : > { %7468 = vmatpush1.bf16.msra.mxu0 %v10334_v41  ;;  %8662 = vmatprep.subr.bf16.mxu1 %v10345_v42 }
 0x34e   : > { %7469 = vmatprep.subr.bf16.mxu0 %v10345_v42 }
 0x34f   : > { %6766 = vmatmul.mubr.bf16.gmra.mrb[4].mxu1 %v10341_v43 }
 0x350   : > { %7455 = vmatmul.mubr.bf16.gmra.mrb[4].mxu0 %v10342_v44  ;;  %8678 = vmatpush1.bf16.msra.mxu1 %v10343_v45 }
 0x351   : > { %7470 = vmatpush1.bf16.msra.mxu0 %v10343_v45  ;;  %8663 = vmatprep.subr.bf16.mxu1 %v10348_v46 }
 0x352   : > { %7471 = vmatprep.subr.bf16.mxu0 %v10348_v46  ;;  %7497 = vmatprep.mubr.bf16.mxu0 %v10387_v47 }
 0x353   : > { %7507 = vmatprep.mubr.bf16.mxu1 %v10390_v48 }
 0x354   : > { %8679 = vmatpush1.bf16.msra.mxu1 %v10346_v49 }
 0x355   : > { %7472 = vmatpush1.bf16.msra.mxu0 %v10346_v49  ;;  %8664 = vmatprep.subr.bf16.mxu1 %v10351_v50 }
 0x356   : > { %7473 = vmatprep.subr.bf16.mxu0 %v10351_v50 }
 0x358   : > { %8680 = vmatpush1.bf16.msra.mxu1 %v10349_v51 }
 0x359   : > { %7474 = vmatpush1.bf16.msra.mxu0 %v10349_v51  ;;  %8665 = vmatprep.subr.bf16.mxu1 %v10354_v52 }
 0x35a   : > { %7475 = vmatprep.subr.bf16.mxu0 %v10354_v52 }
 0x35c   : > { %8681 = vmatpush1.bf16.msra.mxu1 %v10352_v53 }
 0x35d   : > { %7476 = vmatpush1.bf16.msra.mxu0 %v10352_v53  ;;  %8666 = vmatprep.subr.bf16.mxu1 %v10357_v54 }
 0x35e   : > { %7477 = vmatprep.subr.bf16.mxu0 %v10357_v54 }
 0x360   : > { %8682 = vmatpush1.bf16.msra.mxu1 %v10355_v55 }
 0x361   : > { %7478 = vmatpush1.bf16.msra.mxu0 %v10355_v55  ;;  %8667 = vmatprep.subr.bf16.mxu1 %v10360_v56 }
 0x362   : > { %7479 = vmatprep.subr.bf16.mxu0 %v10360_v56 }
 0x364   : > { %8683 = vmatpush1.bf16.msra.mxu1 %v10358_v57 }
 0x365   : > { %7480 = vmatpush1.bf16.msra.mxu0 %v10358_v57  ;;  %8668 = vmatprep.subr.bf16.mxu1 %v10363_v58 }
 0x366   : > { %7481 = vmatprep.subr.bf16.mxu0 %v10363_v58 }
 0x368   : > { %8684 = vmatpush1.bf16.msra.mxu1 %v10361_v59 }
 0x369   : > { %7482 = vmatpush1.bf16.msra.mxu0 %v10361_v59  ;;  %8669 = vmatprep.subr.bf16.mxu1 %v10366_v60 }
 0x36a   : > { %7483 = vmatprep.subr.bf16.mxu0 %v10366_v60 }
 0x36c   : > { %8685 = vmatpush1.bf16.msra.mxu1 %v10364_v61 }
 0x36d   : > { %7484 = vmatpush1.bf16.msra.mxu0 %v10364_v61  ;;  %8670 = vmatprep.subr.bf16.mxu1 %v10369_v62 }
 0x36e   : > { %7485 = vmatprep.subr.bf16.mxu0 %v10369_v62 }
 0x370   : > { %8686 = vmatpush1.bf16.msra.mxu1 %v10367_v63 }
 0x371   : > { %7486 = vmatpush1.bf16.msra.mxu0 %v10367_v63  ;;  %8671 = vmatprep.subr.bf16.mxu1 %v10372_v0 }
 0x372   : > { %7487 = vmatprep.subr.bf16.mxu0 %v10372_v0 }
 0x374   : > { %8687 = vmatpush1.bf16.msra.mxu1 %v10370_v1 }
 0x375   : > { %7488 = vmatpush1.bf16.msra.mxu0 %v10370_v1  ;;  %8672 = vmatprep.subr.bf16.mxu1 %v10375_v2 }
 0x376   : > { %7489 = vmatprep.subr.bf16.mxu0 %v10375_v2 }
 0x378   : > { %8688 = vmatpush1.bf16.msra.mxu1 %v10373_v3 }
 0x379   : > { %7490 = vmatpush1.bf16.msra.mxu0 %v10373_v3  ;;  %8673 = vmatprep.subr.bf16.mxu1 %v10378_v4 }
 0x37a   : > { %7491 = vmatprep.subr.bf16.mxu0 %v10378_v4 }
 0x37c   : > { %8689 = vmatpush1.bf16.msra.mxu1 %v10376_v5 }
 0x37d   : > { %7492 = vmatpush1.bf16.msra.mxu0 %v10376_v5  ;;  %8674 = vmatprep.subr.bf16.mxu1 %v10381_v6 }
 0x37e   : > { %7493 = vmatprep.subr.bf16.mxu0 %v10381_v6 }
 0x380   : > { %8690 = vmatpush1.bf16.msra.mxu1 %v10379_v7 }
 0x381   : > { %7494 = vmatpush1.bf16.msra.mxu0 %v10379_v7  ;;  %8675 = vmatprep.subr.bf16.mxu1 %v10384_v8 }
 0x382   : > { %7495 = vmatprep.subr.bf16.mxu0 %v10384_v8 }
 0x384   : > { %8691 = vmatpush1.bf16.msra.mxu1 %v10382_v9 }
 0x385   : > { %7496 = vmatpush1.bf16.msra.mxu0 %v10382_v9 }
 0x387   : > { %7508 = vmatmul.mubr.bf16.vlgmr.msra.gmra.mrb[8].mxu1 %v10388_v11 }
 0x388   : > { %7498 = vmatmul.mubr.bf16.vlgmr.msra.gmra.mrb[0].mxu0 %v10385_v10 }
 0x41a   : > { %v6757_v14 = vpop.f32.mrb[0].mxu1 }
 0x41b   : > { %v6759_v15 = vpop.f32.mrb[1].mxu1  ;;  %v8692_v39 = vadd.f32 %v6757_v14, %v1220_v21 }
 0x41c   : > { %v6761_v16 = vpop.f32.mrb[2].mxu1  ;;  %v8694_v40 = vadd.f32 %v6759_v15, %v1224_v22 }
 0x41d   : > { %v6763_v18 = vpop.f32.mrb[3].mxu1  ;;  %v8696_v43 = vadd.f32 %v6761_v16, %v1220_v21 }
 0x41e   : > { %v8698_v48 = vadd.f32 %v6763_v18, %v1224_v22 }
 0x422   : > { %v6767_v23 = vpop.f32.mrb[4].mxu1 }
 0x423   : > { %v7456_v24 = vpop.f32.mrb[4].mxu0  ;;  %v8700_v25 = vadd.f32 %v6767_v23, %v1220_v21  ;;  %v6769_v26 = vpop.f32.mrb[5].mxu1 }
 0x424   : > { %v7458_v27 = vpop.f32.mrb[5].mxu0  ;;  %v8703_v28 = vadd.f32 %v6769_v26, %v1224_v22  ;;  %v6771_v29 = vpop.f32.mrb[6].mxu1 }
 0x425   : > { %v7460_v30 = vpop.f32.mrb[6].mxu0  ;;  %v8701_v31 = vadd.f32 %v8700_v25, %v7456_v24  ;;  %v8706_v32 = vadd.f32 %v6771_v29, %v1220_v21  ;;  %v6773_v33 = vpop.f32.mrb[7].mxu1 }
 0x426   : > { %v7462_v34 = vpop.f32.mrb[7].mxu0  ;;  %v8704_v35 = vadd.f32 %v8703_v28, %v7458_v27  ;;  %v8709_v36 = vadd.f32 %v6773_v33, %v1224_v22 }
 0x427   : > { %v8707_v37 = vadd.f32 %v8706_v32, %v7460_v30 }
 0x428   : > { %v8710_v38 = vadd.f32 %v8709_v36, %v7462_v34 }
 0x45a   : > { %v7509_v42 = vpop.f32.mrb[8].mxu1 }
 0x45b   : > { %v7499_v41 = vpop.f32.mrb[0].mxu0  ;;  %v8702_v45 = vadd.f32 %v8701_v31, %v7509_v42  ;;  %v7511_v47 = vpop.f32.mrb[9].mxu1 }
 0x45c   : > { %v8693_v44 = vadd.f32 %v8692_v39, %v7499_v41  ;;  %v7501_v46 = vpop.f32.mrb[1].mxu0  ;;  %v8705_v50 = vadd.f32 %v8704_v35, %v7511_v47  ;;  %v7513_v52 = vpop.f32.mrb[10].mxu1 }
 0x45d   : > { %v8695_v49 = vadd.f32 %v8694_v40, %v7501_v46  ;;  %v7503_v51 = vpop.f32.mrb[2].mxu0  ;;  %v7522_v54 = vmax.f32 %v8702_v45, 0.0  ;;  %v8708_v56 = vadd.f32 %v8707_v37, %v7513_v52  ;;  %v7515_v58 = vpop.f32.mrb[11].mxu1 }
 0x45e   : > { %v7518_v53 = vmax.f32 %v8693_v44, 0.0  ;;  %v8697_v55 = vadd.f32 %v8696_v43, %v7503_v51  ;;  %v7505_v57 = vpop.f32.mrb[3].mxu0  ;;  %v7523_v60 = vmax.f32 %v8705_v50, 0.0  ;;  %v8711_v62 = vadd.f32 %v8710_v38, %v7515_v58 }
 0x45f   : > { %v7519_v59 = vmax.f32 %v8695_v49, 0.0  ;;  %v8699_v61 = vadd.f32 %v8698_v48, %v7505_v57  ;;  %v7524_v0 = vmax.f32 %v8708_v56, 0.0 }
 0x460   : > { %v7520_v63 = vmax.f32 %v8697_v55, 0.0  ;;  %v8658_v2 = vpack.c.bf16 %v7523_v60, %v7522_v54  ;;  %v7525_v4 = vmax.f32 %v8711_v62, 0.0 }
 0x461   : > { %v8656_v1 = vpack.c.bf16 %v7519_v59, %v7518_v53  ;;  %v7521_v3 = vmax.f32 %v8699_v61, 0.0 }
 0x462   : > { %v8659_v6 = vpack.c.bf16 %v7525_v4, %v7524_v0  ;;  %7552 = vst [vmem:[%s240_s6 + $0x10] sm:$0xff] %v8658_v2 }
 0x463   : > { %7550 = vst [vmem:[%s240_s6] sm:$0xff] %v8656_v1  ;;  %v8657_v5 = vpack.c.bf16 %v7521_v3, %v7520_v63 }
 0x464   : > { %7553 = vst [vmem:[%s240_s6 + $0x18] sm:$0xff] %v8659_v6 }
 0x465   : > { %7551 = vst [vmem:[%s240_s6 + $0x8] sm:$0xff] %v8657_v5 }
 0x466 PF: > { %s13_s14 = sadd.s32 1, %s10413_s14   ;;  %s13184_s12 = smov %s10409_s13 }
 0x467   : > { %p10_p5 = scmp.ge.s32.totalorder %s13_s14, 4   ;;  %s13185_s13 = smov %s13187_s15 }
 0x469   :  { %12 = sbr.rel (!%p10_p5) target bundleno = 2 (0x2), region = 68 }

// kernel: _lambda_.11
= control target key start
LH: loop header
LB: loop body
LE: loop exit
PB: predicated region body
PF: predicated region fallthrough
CT: control target
= control target key end

     0   :  { %vm9_vm0 = vcmask 523264   ;;  %s50_s0 = inlined_call_operand.vmem [shape: f32[8,64], index: 0, kind: input, shape index: {}]   ;;  %s51_s1 = inlined_call_operand.vmem [shape: f32[8,64], index: 1, kind: output, shape index: {}]  }
   0x1   :  { %v8_v0 = vld [vmem:[%s50_s0] sm:$0xff] }
   0x2   :  { %v10_v1 = vsel %vm9_vm0, %v8_v0, -inf }
   0x3   :  { %11 = vmax.xlane.f32.xlu0 %v10_v1 }
  0x90   :  { %v12_v2 = vpop.xlane.xlu0 %11 }
  0x91   :  { %v13_v3 = vsub.f32 %v8_v0, %v12_v2 }
  0x93   :  { %v14_v4 = vmul.f32 1.442695, %v13_v3 }
  0x95   :  { %27 = vpow2.f32 %v14_v4 }
  0x9f   :  { %v28_v5 = vpop.eup %27 }
  0xa0   :  { %v16_v6 = vsel %vm9_vm0, %v28_v5, 0.0 }
  0xa1   :  { %17 = vadd.xlane.f32.xlu0 %v16_v6 }
 0x12e   :  { %v18_v7 = vpop.xlane.xlu0 %17 }
 0x12f   :  { %29 = vlog2.f32 %v18_v7 }
 0x139   :  { %v30_v8 = vpop.eup %29 }
 0x13a   :  { %v20_v9 = vmul.f32 0.6931472, %v30_v8 }
 0x13c   :  { %v21_v10 = vsub.f32 %v13_v3, %v20_v9 }
 0x13e   :  { %22 = vst.msk [vmem:[%s51_s1] sm:$0xff] %vm9_vm0, %v21_v10 }

// kernel: _lambda_.10
= control target key start
LH: loop header
LB: loop body
LE: loop exit
PB: predicated region body
PF: predicated region fallthrough
CT: control target
= control target key end

     0   :  { %s7762_s12 = smov 0   ;;  %s7764_s13 = smov 0   ;;  %s9292_s0 = inlined_call_operand.vmem [shape: bf16[64,6912], index: 0, kind: input, shape index: {}]   ;;  %s9293_s1 = inlined_call_operand.vmem [shape: bf16[6912,128], index: 1, kind: input, shape index: {}]   ;;  %s9294_s2 = inlined_call_operand.vmem [shape: f32[1,128], index: 2, kind: input, shape index: {}]   ;;  %s9295_s3 = inlined_call_operand.vmem [shape: f32[64,128], index: 3, kind: output, shape index: {}]  }
   0x1   :  { %s7766_s14 = smov 0  }
   0x2 LB: > { %s25_s15 = sadd.s32 1, %s7736_s13  ;;  %p5779_p0 = scmp.ge.s32.totalorder %s7740_s14, 1  ;;  %s7740_s14 = sphi %s7766_s14, %s13_s14   ;;  %s7736_s13 = sphi %s7764_s13, %s9297_s13   ;;  %s7732_s12 = sphi %s7762_s12, %s9296_s12  }
   0x3   : > { %p27_p1 = scmp.ge.s32.totalorder %s25_s15, 2  ;;  %p170_p2 = scmp.lt.s32.totalorder %s7740_s14, 3 }
   0x5   : > { %s9299_s15 = smov (%p27_p1, %s25_s15), 0  ;;  %p171_p3 = pnand %p5779_p0, %p170_p2 }
   0x6   : > { %v7124_v0 = vld [vmem:[%s9293_s1 + $0x40] sm:$0xff] (!%p171_p3)   ;;  %v7128_v4 = vld [vmem:[%s9293_s1 + $0x48] sm:$0xff] (!%p171_p3)   ;;  %v7132_v8 = vld [vmem:[%s9293_s1 + $0x50] sm:$0xff] (!%p171_p3)   ;;  %s5780_s23 = sshll.u32 (!%p171_p3), %s7732_s12, 2 }
   0x7   : > { %174 = sbr.rel (%p171_p3) target bundleno = 707 (0x2c3), region = 32  ;;  %v7125_v1 = vld [vmem:[%s9293_s1 + $0xc0] sm:$0xff] (!%p171_p3)   ;;  %6327 = vmatprep.subr.bf16.mxu0 (!%p171_p3), %v7124_v0  ;;  %v7129_v5 = vld [vmem:[%s9293_s1 + $0xc8] sm:$0xff] (!%p171_p3)   ;;  %v7133_v9 = vld [vmem:[%s9293_s1 + $0xd0] sm:$0xff] (!%p171_p3)   ;;  %p206_p4 = scmp.lt.s32.totalorder (!%p171_p3), %s5780_s23, 7 }
   0x8   : > { %v7126_v2 = vld [vmem:[%s9293_s1] sm:$0xff] (!%p171_p3)   ;;  %6355 = vmatprep.subr.bf16.mxu1 (!%p171_p3), %v7125_v1  ;;  %v7130_v6 = vld [vmem:[%s9293_s1 + $0x8] sm:$0xff] (!%p171_p3)   ;;  %v7134_v10 = vld [vmem:[%s9293_s1 + $0x10] sm:$0xff] (!%p171_p3)  }
   0x9   : > { %v7127_v3 = vld [vmem:[%s9293_s1 + $0x80] sm:$0xff] (!%p171_p3)   ;;  %6328 = vmatpush3.bf16.msra.mxu0 (!%p171_p3), %v7126_v2  ;;  %v7131_v7 = vld [vmem:[%s9293_s1 + $0x88] sm:$0xff] (!%p171_p3)   ;;  %v7135_v11 = vld [vmem:[%s9293_s1 + $0x90] sm:$0xff] (!%p171_p3)  }
   0xa   : > { %6356 = vmatpush3.bf16.msra.mxu1 (!%p171_p3), %v7127_v3  ;;  %6329 = vmatprep.subr.bf16.mxu0 (!%p171_p3), %v7128_v4  ;;  %v7136_v12 = vld [vmem:[%s9293_s1 + $0x58] sm:$0xff] (!%p171_p3)   ;;  %v7140_v16 = vld [vmem:[%s9293_s1 + $0x60] sm:$0xff] (!%p171_p3)   ;;  %v7144_v20 = vld [vmem:[%s9293_s1 + $0x68] sm:$0xff] (!%p171_p3)  }
   0xb   : > { %6357 = vmatprep.subr.bf16.mxu1 (!%p171_p3), %v7129_v5  ;;  %v7137_v13 = vld [vmem:[%s9293_s1 + $0xd8] sm:$0xff] (!%p171_p3)   ;;  %v7141_v17 = vld [vmem:[%s9293_s1 + $0xe0] sm:$0xff] (!%p171_p3)   ;;  %v7145_v21 = vld [vmem:[%s9293_s1 + $0xe8] sm:$0xff] (!%p171_p3)  }
   0xc   : > { %v7138_v14 = vld [vmem:[%s9293_s1 + $0x18] sm:$0xff] (!%p171_p3)   ;;  %v7142_v18 = vld [vmem:[%s9293_s1 + $0x20] sm:$0xff] (!%p171_p3)   ;;  %v7146_v22 = vld [vmem:[%s9293_s1 + $0x28] sm:$0xff] (!%p171_p3)  }
   0xd   : > { %6330 = vmatpush3.bf16.msra.mxu0 (!%p171_p3), %v7130_v6  ;;  %v7139_v15 = vld [vmem:[%s9293_s1 + $0x98] sm:$0xff] (!%p171_p3)   ;;  %v7143_v19 = vld [vmem:[%s9293_s1 + $0xa0] sm:$0xff] (!%p171_p3)   ;;  %v7147_v23 = vld [vmem:[%s9293_s1 + $0xa8] sm:$0xff] (!%p171_p3)  }
   0xe   : > { %6358 = vmatpush3.bf16.msra.mxu1 %v7131_v7  ;;  %6331 = vmatprep.subr.bf16.mxu0 %v7132_v8  ;;  %s9301_s23 = smov (!%p206_p4, %s5780_s23), 7  ;;  %v7148_v24 = vld [vmem:[%s9293_s1 + $0x70] sm:$0xff]   ;;  %v7152_v28 = vld [vmem:[%s9293_s1 + $0x78] sm:$0xff]   ;;  %v7162_v36 = vld [vmem:[%s9293_s1 + $0x140] sm:$0xff]  }
   0xf   : > { %6359 = vmatprep.subr.bf16.mxu1 %v7133_v9  ;;  %v7149_v25 = vld [vmem:[%s9293_s1 + $0xf0] sm:$0xff]   ;;  %s7099_s22 = smul.u32 216, %s9301_s23  ;;  %v7153_v29 = vld [vmem:[%s9293_s1 + $0xf8] sm:$0xff]   ;;  %v7163_v37 = vld [vmem:[%s9293_s1 + $0x1c0] sm:$0xff]  }
  0x10   : > { %v7150_v26 = vld [vmem:[%s9293_s1 + $0x30] sm:$0xff]   ;;  %v7154_v30 = vld [vmem:[%s9293_s1 + $0x38] sm:$0xff]   ;;  %v7164_v38 = vld [vmem:[%s9293_s1 + $0x100] sm:$0xff]  }
  0x11   : > { %6332 = vmatpush3.bf16.msra.mxu0 %v7134_v10  ;;  %v7151_v27 = vld [vmem:[%s9293_s1 + $0xb0] sm:$0xff]   ;;  %s7879_s6 = scalar_lea.vmem %s9292_s0, %s7099_s22  ;;  %v7155_v31 = vld [vmem:[%s9293_s1 + $0xb8] sm:$0xff]   ;;  %v7165_v39 = vld [vmem:[%s9293_s1 + $0x180] sm:$0xff]  }
  0x12   : > { %6360 = vmatpush3.bf16.msra.mxu1 %v7135_v11  ;;  %6333 = vmatprep.subr.bf16.mxu0 %v7136_v12  ;;  %v7156_v32 = vld [vmem:[%s7879_s6] ss:$216 sps:$4 sm:$0xff]   ;;  %v7158_v33 = vld [vmem:[%s7879_s6 + $0x4] ss:$216 sps:$4 sm:$0xff]   ;;  %v7166_v40 = vld [vmem:[%s9293_s1 + $0x148] sm:$0xff]  }
  0x13   : > { %6361 = vmatprep.subr.bf16.mxu1 %v7137_v13  ;;  %v7159_v34 = vld [vmem:[%s7879_s6 + $0x8] ss:$216 sps:$4 sm:$0xff]   ;;  %v7161_v35 = vld [vmem:[%s7879_s6 + $0xc] ss:$216 sps:$4 sm:$0xff]   ;;  %4372 = vmatprep.mubr.bf16.mxu0 %v7158_v33  ;;  %v7170_v44 = vld [vmem:[%s9293_s1 + $0x150] sm:$0xff]  }
  0x14   : > { %4421 = vmatprep.mubr.bf16.mxu1 %v7161_v35  ;;  %v7167_v41 = vld [vmem:[%s9293_s1 + $0x1c8] sm:$0xff]   ;;  %v7171_v45 = vld [vmem:[%s9293_s1 + $0x1d0] sm:$0xff]   ;;  %v7174_v48 = vld [vmem:[%s9293_s1 + $0x158] sm:$0xff]  }
  0x15   : > { %6334 = vmatpush3.bf16.msra.mxu0 %v7138_v14  ;;  %v7168_v42 = vld [vmem:[%s9293_s1 + $0x108] sm:$0xff]   ;;  %v7172_v46 = vld [vmem:[%s9293_s1 + $0x110] sm:$0xff]   ;;  %v7175_v49 = vld [vmem:[%s9293_s1 + $0x1d8] sm:$0xff]  }
  0x16   : > { %6362 = vmatpush3.bf16.msra.mxu1 %v7139_v15  ;;  %6335 = vmatprep.subr.bf16.mxu0 %v7140_v16  ;;  %v7169_v43 = vld [vmem:[%s9293_s1 + $0x188] sm:$0xff]   ;;  %v7173_v47 = vld [vmem:[%s9293_s1 + $0x190] sm:$0xff]   ;;  %v7176_v50 = vld [vmem:[%s9293_s1 + $0x118] sm:$0xff]  }
  0x17   : > { %6363 = vmatprep.subr.bf16.mxu1 %v7141_v17  ;;  %v7177_v51 = vld [vmem:[%s9293_s1 + $0x198] sm:$0xff]   ;;  %v7178_v52 = vld [vmem:[%s9293_s1 + $0x160] sm:$0xff]   ;;  %v7182_v56 = vld [vmem:[%s9293_s1 + $0x168] sm:$0xff]  }
  0x18   : > { %v7179_v53 = vld [vmem:[%s9293_s1 + $0x1e0] sm:$0xff]   ;;  %v7183_v57 = vld [vmem:[%s9293_s1 + $0x1e8] sm:$0xff]   ;;  %v7189_v62 = vld [vmem:[%s7879_s6 + $0x1bc] ss:$216 sps:$4 sm:$0xff]  }
  0x19   : > { %6336 = vmatpush3.bf16.msra.mxu0 %v7142_v18  ;;  %v7180_v54 = vld [vmem:[%s9293_s1 + $0x120] sm:$0xff]   ;;  %v7184_v58 = vld [vmem:[%s7879_s6 + $0x1b4] ss:$216 sps:$4 sm:$0xff]   ;;  %v7188_v61 = vld [vmem:[%s7879_s6 + $0x1b0] ss:$216 sps:$4 sm:$0xff]  }
  0x1a   : > { %6364 = vmatpush3.bf16.msra.mxu1 %v7143_v19  ;;  %6337 = vmatprep.subr.bf16.mxu0 %v7144_v20  ;;  %v7181_v55 = vld [vmem:[%s9293_s1 + $0x1a0] sm:$0xff]   ;;  %v7186_v59 = vld [vmem:[%s9293_s1 + $0x128] sm:$0xff]   ;;  %v7191_v63 = vld [vmem:[%s7879_s6 + $0x1b8] ss:$216 sps:$4 sm:$0xff]  }
  0x1b   : > { %6365 = vmatprep.subr.bf16.mxu1 %v7145_v21  ;;  %v7187_v60 = vld [vmem:[%s9293_s1 + $0x1a8] sm:$0xff]   ;;  %v7192_v0 = vld [vmem:[%s9293_s1 + $0x170] sm:$0xff]   ;;  %v7196_v4 = vld [vmem:[%s9293_s1 + $0x178] sm:$0xff]  }
  0x1c   : > { %v7193_v1 = vld [vmem:[%s9293_s1 + $0x1f0] sm:$0xff]   ;;  %v7197_v5 = vld [vmem:[%s9293_s1 + $0x1f8] sm:$0xff]   ;;  %v7206_v12 = vld [vmem:[%s9293_s1 + $0x240] sm:$0xff]  }
  0x1d   : > { %6338 = vmatpush3.bf16.msra.mxu0 %v7146_v22  ;;  %v7194_v2 = vld [vmem:[%s9293_s1 + $0x130] sm:$0xff]   ;;  %v7198_v6 = vld [vmem:[%s9293_s1 + $0x138] sm:$0xff]   ;;  %v7207_v13 = vld [vmem:[%s9293_s1 + $0x2c0] sm:$0xff]  }
  0x1e   : > { %6366 = vmatpush3.bf16.msra.mxu1 %v7147_v23  ;;  %6339 = vmatprep.subr.bf16.mxu0 %v7148_v24  ;;  %v7195_v3 = vld [vmem:[%s9293_s1 + $0x1b0] sm:$0xff]   ;;  %v7199_v7 = vld [vmem:[%s9293_s1 + $0x1b8] sm:$0xff]   ;;  %v7208_v14 = vld [vmem:[%s9293_s1 + $0x200] sm:$0xff]  }
  0x1f   : > { %6367 = vmatprep.subr.bf16.mxu1 %v7149_v25  ;;  %v7200_v8 = vld [vmem:[%s7879_s6 + $0x10] ss:$216 sps:$4 sm:$0xff]   ;;  %v7202_v9 = vld [vmem:[%s7879_s6 + $0x14] ss:$216 sps:$4 sm:$0xff]   ;;  %v7209_v15 = vld [vmem:[%s9293_s1 + $0x280] sm:$0xff]  }
  0x20   : > { %v7203_v10 = vld [vmem:[%s7879_s6 + $0x18] ss:$216 sps:$4 sm:$0xff]   ;;  %v7205_v11 = vld [vmem:[%s7879_s6 + $0x1c] ss:$216 sps:$4 sm:$0xff]   ;;  %v7210_v16 = vld [vmem:[%s9293_s1 + $0x248] sm:$0xff]  }
  0x21   : > { %6340 = vmatpush3.bf16.msra.mxu0 %v7150_v26  ;;  %v7211_v17 = vld [vmem:[%s9293_s1 + $0x2c8] sm:$0xff]   ;;  %v7214_v20 = vld [vmem:[%s7879_s6 + $0x1c4] ss:$216 sps:$4 sm:$0xff]   ;;  %v7216_v21 = vld [vmem:[%s7879_s6 + $0x1c0] ss:$216 sps:$4 sm:$0xff]  }
  0x22   : > { %6368 = vmatpush3.bf16.msra.mxu1 %v7151_v27  ;;  %6341 = vmatprep.subr.bf16.mxu0 %v7152_v28  ;;  %v7212_v18 = vld [vmem:[%s9293_s1 + $0x208] sm:$0xff]   ;;  %v7217_v22 = vld [vmem:[%s9293_s1 + $0x250] sm:$0xff]   ;;  %v7224_v28 = vld [vmem:[%s9293_s1 + $0x258] sm:$0xff]  }
  0x23   : > { %6369 = vmatprep.subr.bf16.mxu1 %v7153_v29  ;;  %v7213_v19 = vld [vmem:[%s9293_s1 + $0x288] sm:$0xff]   ;;  %v7218_v23 = vld [vmem:[%s9293_s1 + $0x2d0] sm:$0xff]   ;;  %v7225_v29 = vld [vmem:[%s9293_s1 + $0x2d8] sm:$0xff]  }
  0x24   : > { %v7219_v24 = vld [vmem:[%s7879_s6 + $0x1cc] ss:$216 sps:$4 sm:$0xff]   ;;  %v7221_v25 = vld [vmem:[%s9293_s1 + $0x210] sm:$0xff]   ;;  %v7223_v27 = vld [vmem:[%s7879_s6 + $0x1c8] ss:$216 sps:$4 sm:$0xff]  }
  0x25   : > { %6342 = vmatpush3.bf16.msra.mxu0 %v7154_v30  ;;  %v7222_v26 = vld [vmem:[%s9293_s1 + $0x290] sm:$0xff]   ;;  %v7226_v30 = vld [vmem:[%s9293_s1 + $0x218] sm:$0xff]   ;;  %v7229_v33 = vld [vmem:[%s9293_s1 + $0x2e0] sm:$0xff]  }
  0x26   : > { %6370 = vmatpush3.bf16.msra.mxu1 %v7155_v31  ;;  %6383 = vmatprep.subr.bf16.mxu0 %v7162_v36  ;;  %v7227_v31 = vld [vmem:[%s9293_s1 + $0x298] sm:$0xff]   ;;  %v7231_v35 = vld [vmem:[%s9293_s1 + $0x2a0] sm:$0xff]   ;;  %v7232_v36 = vld [vmem:[%s9293_s1 + $0x268] sm:$0xff]  }
  0x27   : > { %6411 = vmatprep.subr.bf16.mxu1 %v7163_v37  ;;  %v7233_v37 = vld [vmem:[%s9293_s1 + $0x2e8] sm:$0xff]  }
  0x28   : > { %4373 = vmatmul.mubr.bf16.vlgmr.msra.gmra.mrb[0].mxu0 %v7156_v32  ;;  %v7228_v32 = vld [vmem:[%s9293_s1 + $0x260] sm:$0xff]  }
  0x29   : > { %4422 = vmatmul.mubr.bf16.vlgmr.msra.gmra.mrb[0].mxu1 %v7159_v34  ;;  %6384 = vmatpush3.bf16.msra.mxu0 %v7164_v38  ;;  %v7230_v34 = vld [vmem:[%s9293_s1 + $0x220] sm:$0xff]   ;;  %v7234_v38 = vld [vmem:[%s9293_s1 + $0x228] sm:$0xff]  }
  0x2a   : > { %6412 = vmatpush3.bf16.msra.mxu1 %v7165_v39  ;;  %6385 = vmatprep.subr.bf16.mxu0 %v7166_v40  ;;  %v7235_v39 = vld [vmem:[%s9293_s1 + $0x2a8] sm:$0xff]   ;;  %v7236_v40 = vld [vmem:[%s9293_s1 + $0x270] sm:$0xff]  }
  0x2b   : > { %6413 = vmatprep.subr.bf16.mxu1 %v7167_v41  ;;  %4380 = vmatprep.mubr.bf16.mxu0 %v7184_v58  ;;  %v7237_v41 = vld [vmem:[%s9293_s1 + $0x2f0] sm:$0xff]   ;;  %v7256_v58 = vld [vmem:[%s9293_s1 + $0x308] sm:$0xff]  }
  0x2c   : > { %4429 = vmatprep.mubr.bf16.mxu1 %v7189_v62  ;;  %v7261_v62 = vld [vmem:[%s9293_s1 + $0x350] sm:$0xff]  }
  0x2d   : > { %6386 = vmatpush3.bf16.msra.mxu0 %v7168_v42  ;;  %v7238_v42 = vld [vmem:[%s9293_s1 + $0x230] sm:$0xff]  }
  0x2e   : > { %6414 = vmatpush3.bf16.msra.mxu1 %v7169_v43  ;;  %6387 = vmatprep.subr.bf16.mxu0 %v7170_v44  ;;  %v7239_v43 = vld [vmem:[%s9293_s1 + $0x2b0] sm:$0xff]   ;;  %v7240_v44 = vld [vmem:[%s9293_s1 + $0x278] sm:$0xff]  }
  0x2f   : > { %6415 = vmatprep.subr.bf16.mxu1 %v7171_v45  ;;  %v7241_v45 = vld [vmem:[%s9293_s1 + $0x2f8] sm:$0xff]  }
  0x30   : > { %4381 = vmatmul.mubr.bf16.gmra.mrb[4].mxu0 %v7188_v61  ;;  %v7260_v61 = vld [vmem:[%s7879_s6 + $0x1d0] ss:$216 sps:$4 sm:$0xff]  }
  0x31   : > { %6388 = vmatpush3.bf16.msra.mxu0 %v7172_v46  ;;  %4430 = vmatmul.mubr.bf16.gmra.mrb[4].mxu1 %v7191_v63  ;;  %v7242_v46 = vld [vmem:[%s9293_s1 + $0x238] sm:$0xff]   ;;  %v7262_v63 = vld [vmem:[%s9293_s1 + $0x3d0] sm:$0xff]  }
  0x32   : > { %6416 = vmatpush3.bf16.msra.mxu1 %v7173_v47  ;;  %6389 = vmatprep.subr.bf16.mxu0 %v7174_v48  ;;  %v7243_v47 = vld [vmem:[%s9293_s1 + $0x2b8] sm:$0xff]  }
  0x33   : > { %6417 = vmatprep.subr.bf16.mxu1 %v7175_v49  ;;  %4470 = vmatprep.mubr.bf16.mxu0 %v7202_v9  ;;  %v7244_v48 = vld [vmem:[%s7879_s6 + $0x20] ss:$216 sps:$4 sm:$0xff]   ;;  %v7246_v49 = vld [vmem:[%s7879_s6 + $0x24] ss:$216 sps:$4 sm:$0xff]  }
  0x34   : > { %4519 = vmatprep.mubr.bf16.mxu1 %v7205_v11  ;;  %v7273_v9 = vld [vmem:[%s9293_s1 + $0x3e0] sm:$0xff]  }
  0x35   : > { %6390 = vmatpush3.bf16.msra.mxu0 %v7176_v50  ;;  %v7247_v50 = vld [vmem:[%s7879_s6 + $0x28] ss:$216 sps:$4 sm:$0xff]  }
  0x36   : > { %6418 = vmatpush3.bf16.msra.mxu1 %v7177_v51  ;;  %6391 = vmatprep.subr.bf16.mxu0 %v7178_v52  ;;  %v7249_v51 = vld [vmem:[%s7879_s6 + $0x2c] ss:$216 sps:$4 sm:$0xff]  }
  0x37   : > { %6419 = vmatprep.subr.bf16.mxu1 %v7179_v53  ;;  %v7250_v52 = vld [vmem:[%s9293_s1 + $0x340] sm:$0xff]  }
  0x38   : > { %v7251_v53 = vld [vmem:[%s9293_s1 + $0x3c0] sm:$0xff]  }
  0x39   : > { %6392 = vmatpush3.bf16.msra.mxu0 %v7180_v54  ;;  %v7252_v54 = vld [vmem:[%s9293_s1 + $0x300] sm:$0xff]  }
  0x3a   : > { %6420 = vmatpush3.bf16.msra.mxu1 %v7181_v55  ;;  %6393 = vmatprep.subr.bf16.mxu0 %v7182_v56  ;;  %v7253_v55 = vld [vmem:[%s9293_s1 + $0x380] sm:$0xff]   ;;  %v7254_v56 = vld [vmem:[%s9293_s1 + $0x348] sm:$0xff]  }
  0x3b   : > { %6421 = vmatprep.subr.bf16.mxu1 %v7183_v57  ;;  %v7255_v57 = vld [vmem:[%s9293_s1 + $0x3c8] sm:$0xff]   ;;  %v7275_v11 = vld [vmem:[%s9293_s1 + $0x3a0] sm:$0xff]  }
  0x3d   : > { %6394 = vmatpush3.bf16.msra.mxu0 %v7186_v59  ;;  %v7257_v59 = vld [vmem:[%s9293_s1 + $0x388] sm:$0xff]  }
  0x3e   : > { %6422 = vmatpush3.bf16.msra.mxu1 %v7187_v60  ;;  %6395 = vmatprep.subr.bf16.mxu0 %v7192_v0  ;;  %v7258_v60 = vld [vmem:[%s7879_s6 + $0x1d4] ss:$216 sps:$4 sm:$0xff]  }
  0x3f   : > { %6423 = vmatprep.subr.bf16.mxu1 %v7193_v1  ;;  %v7263_v0 = vld [vmem:[%s7879_s6 + $0x1dc] ss:$216 sps:$4 sm:$0xff]  }
  0x40   : > { %v7265_v1 = vld [vmem:[%s9293_s1 + $0x310] sm:$0xff]  }
  0x41   : > { %6396 = vmatpush3.bf16.msra.mxu0 %v7194_v2  ;;  %v7266_v2 = vld [vmem:[%s9293_s1 + $0x390] sm:$0xff]  }
  0x42   : > { %6424 = vmatpush3.bf16.msra.mxu1 %v7195_v3  ;;  %6397 = vmatprep.subr.bf16.mxu0 %v7196_v4  ;;  %v7267_v3 = vld [vmem:[%s7879_s6 + $0x1d8] ss:$216 sps:$4 sm:$0xff]  }
  0x43   : > { %6425 = vmatprep.subr.bf16.mxu1 %v7197_v5  ;;  %v7268_v4 = vld [vmem:[%s9293_s1 + $0x358] sm:$0xff]  }
  0x44   : > { %v7269_v5 = vld [vmem:[%s9293_s1 + $0x3d8] sm:$0xff]  }
  0x45   : > { %6398 = vmatpush3.bf16.msra.mxu0 %v7198_v6  ;;  %v7270_v6 = vld [vmem:[%s9293_s1 + $0x318] sm:$0xff]  }
  0x46   : > { %6426 = vmatpush3.bf16.msra.mxu1 %v7199_v7  ;;  %6439 = vmatprep.subr.bf16.mxu0 %v7206_v12  ;;  %v7271_v7 = vld [vmem:[%s9293_s1 + $0x398] sm:$0xff]   ;;  %v7276_v12 = vld [vmem:[%s9293_s1 + $0x368] sm:$0xff]  }
  0x47   : > { %6467 = vmatprep.subr.bf16.mxu1 %v7207_v13  ;;  %v7277_v13 = vld [vmem:[%s9293_s1 + $0x3e8] sm:$0xff]  }
  0x48   : > { %4471 = vmatmul.mubr.bf16.vlgmr.msra.gmra.mrb[8].mxu0 %v7200_v8  ;;  %v7272_v8 = vld [vmem:[%s9293_s1 + $0x360] sm:$0xff]  }
  0x49   : > { %4520 = vmatmul.mubr.bf16.vlgmr.msra.gmra.mrb[8].mxu1 %v7203_v10  ;;  %6440 = vmatpush3.bf16.msra.mxu0 %v7208_v14  ;;  %v7274_v10 = vld [vmem:[%s9293_s1 + $0x320] sm:$0xff]   ;;  %v7278_v14 = vld [vmem:[%s9293_s1 + $0x328] sm:$0xff]  }
  0x4a   : > { %6468 = vmatpush3.bf16.msra.mxu1 %v7209_v15  ;;  %6441 = vmatprep.subr.bf16.mxu0 %v7210_v16  ;;  %v7279_v15 = vld [vmem:[%s9293_s1 + $0x3a8] sm:$0xff]   ;;  %v7280_v16 = vld [vmem:[%s9293_s1 + $0x370] sm:$0xff]  }
  0x4b   : > { %6469 = vmatprep.subr.bf16.mxu1 %v7211_v17  ;;  %4478 = vmatprep.mubr.bf16.mxu0 %v7214_v20  ;;  %v7281_v17 = vld [vmem:[%s9293_s1 + $0x3f0] sm:$0xff]   ;;  %v7284_v20 = vld [vmem:[%s9293_s1 + $0x378] sm:$0xff]  }
  0x4c   : > { %4527 = vmatprep.mubr.bf16.mxu1 %v7219_v24  ;;  %v7288_v24 = vld [vmem:[%s7879_s6 + $0x30] ss:$216 sps:$4 sm:$0xff]  }
  0x4d   : > { %6442 = vmatpush3.bf16.msra.mxu0 %v7212_v18  ;;  %v7282_v18 = vld [vmem:[%s9293_s1 + $0x330] sm:$0xff]  }
  0x4e   : > { %6470 = vmatpush3.bf16.msra.mxu1 %v7213_v19  ;;  %6443 = vmatprep.subr.bf16.mxu0 %v7217_v22  ;;  %v7283_v19 = vld [vmem:[%s9293_s1 + $0x3b0] sm:$0xff]   ;;  %v7286_v22 = vld [vmem:[%s9293_s1 + $0x338] sm:$0xff]  }
  0x4f   : > { %6471 = vmatprep.subr.bf16.mxu1 %v7218_v23  ;;  %v7287_v23 = vld [vmem:[%s9293_s1 + $0x3b8] sm:$0xff]  }
  0x50   : > { %4479 = vmatmul.mubr.bf16.gmra.mrb[12].mxu0 %v7216_v21  ;;  %v7285_v21 = vld [vmem:[%s9293_s1 + $0x3f8] sm:$0xff]  }
  0x51   : > { %6444 = vmatpush3.bf16.msra.mxu0 %v7221_v25  ;;  %4528 = vmatmul.mubr.bf16.gmra.mrb[12].mxu1 %v7223_v27  ;;  %v7290_v25 = vld [vmem:[%s7879_s6 + $0x34] ss:$216 sps:$4 sm:$0xff]  }
  0x52   : > { %6472 = vmatpush3.bf16.msra.mxu1 %v7222_v26  ;;  %6445 = vmatprep.subr.bf16.mxu0 %v7224_v28  ;;  %v7291_v26 = vld [vmem:[%s7879_s6 + $0x38] ss:$216 sps:$4 sm:$0xff]   ;;  %v7293_v27 = vld [vmem:[%s7879_s6 + $0x3c] ss:$216 sps:$4 sm:$0xff]   ;;  %v7294_v28 = vld [vmem:[%s9293_s1 + $0x440] sm:$0xff]  }
  0x53   : > { %6473 = vmatprep.subr.bf16.mxu1 %v7225_v29  ;;  %4568 = vmatprep.mubr.bf16.mxu0 %v7246_v49  ;;  %v7295_v29 = vld [vmem:[%s9293_s1 + $0x4c0] sm:$0xff]  }
  0x54   : > { %4617 = vmatprep.mubr.bf16.mxu1 %v7249_v51  ;;  %v7317_v49 = vld [vmem:[%s9293_s1 + $0x4e0] sm:$0xff]  }
  0x55   : > { %6446 = vmatpush3.bf16.msra.mxu0 %v7226_v30  ;;  %v7296_v30 = vld [vmem:[%s9293_s1 + $0x400] sm:$0xff]  }
  0x56   : > { %6474 = vmatpush3.bf16.msra.mxu1 %v7227_v31  ;;  %6447 = vmatprep.subr.bf16.mxu0 %v7228_v32  ;;  %v7297_v31 = vld [vmem:[%s9293_s1 + $0x480] sm:$0xff]   ;;  %v7298_v32 = vld [vmem:[%s9293_s1 + $0x448] sm:$0xff]  }
  0x57   : > { %6475 = vmatprep.subr.bf16.mxu1 %v7229_v33  ;;  %v7299_v33 = vld [vmem:[%s9293_s1 + $0x4c8] sm:$0xff]   ;;  %v7319_v51 = vld [vmem:[%s9293_s1 + $0x4a0] sm:$0xff]  }
  0x59   : > { %6448 = vmatpush3.bf16.msra.mxu0 %v7230_v34  ;;  %v7300_v34 = vld [vmem:[%s9293_s1 + $0x408] sm:$0xff]  }
  0x5a   : > { %6476 = vmatpush3.bf16.msra.mxu1 %v7231_v35  ;;  %6449 = vmatprep.subr.bf16.mxu0 %v7232_v36  ;;  %v7301_v35 = vld [vmem:[%s9293_s1 + $0x488] sm:$0xff]   ;;  %v7302_v36 = vld [vmem:[%s7879_s6 + $0x1e4] ss:$216 sps:$4 sm:$0xff]  }
  0x5b   : > { %6477 = vmatprep.subr.bf16.mxu1 %v7233_v37  ;;  %v7304_v37 = vld [vmem:[%s7879_s6 + $0x1e0] ss:$216 sps:$4 sm:$0xff]  }
  0x5d   : > { %6450 = vmatpush3.bf16.msra.mxu0 %v7234_v38  ;;  %v7305_v38 = vld [vmem:[%s9293_s1 + $0x450] sm:$0xff]  }
  0x5e   : > { %6478 = vmatpush3.bf16.msra.mxu1 %v7235_v39  ;;  %6451 = vmatprep.subr.bf16.mxu0 %v7236_v40  ;;  %v7306_v39 = vld [vmem:[%s9293_s1 + $0x4d0] sm:$0xff]   ;;  %v7307_v40 = vld [vmem:[%s7879_s6 + $0x1ec] ss:$216 sps:$4 sm:$0xff]  }
  0x5f   : > { %6479 = vmatprep.subr.bf16.mxu1 %v7237_v41  ;;  %v7309_v41 = vld [vmem:[%s9293_s1 + $0x410] sm:$0xff]  }
  0x61   : > { %6452 = vmatpush3.bf16.msra.mxu0 %v7238_v42  ;;  %v7310_v42 = vld [vmem:[%s9293_s1 + $0x490] sm:$0xff]  }
  0x62   : > { %6480 = vmatpush3.bf16.msra.mxu1 %v7239_v43  ;;  %6453 = vmatprep.subr.bf16.mxu0 %v7240_v44  ;;  %v7311_v43 = vld [vmem:[%s7879_s6 + $0x1e8] ss:$216 sps:$4 sm:$0xff]   ;;  %v7312_v44 = vld [vmem:[%s9293_s1 + $0x458] sm:$0xff]  }
  0x63   : > { %6481 = vmatprep.subr.bf16.mxu1 %v7241_v45  ;;  %v7313_v45 = vld [vmem:[%s9293_s1 + $0x4d8] sm:$0xff]  }
  0x65   : > { %6454 = vmatpush3.bf16.msra.mxu0 %v7242_v46  ;;  %v7314_v46 = vld [vmem:[%s9293_s1 + $0x418] sm:$0xff]  }
  0x66   : > { %6482 = vmatpush3.bf16.msra.mxu1 %v7243_v47  ;;  %6495 = vmatprep.subr.bf16.mxu0 %v7250_v52  ;;  %v7315_v47 = vld [vmem:[%s9293_s1 + $0x498] sm:$0xff]   ;;  %v7320_v52 = vld [vmem:[%s9293_s1 + $0x468] sm:$0xff]  }
  0x67   : > { %6523 = vmatprep.subr.bf16.mxu1 %v7251_v53  ;;  %v7321_v53 = vld [vmem:[%s9293_s1 + $0x4e8] sm:$0xff]  }
  0x68   : > { %4569 = vmatmul.mubr.bf16.vlgmr.msra.gmra.mrb[16].mxu0 %v7244_v48  ;;  %v7316_v48 = vld [vmem:[%s9293_s1 + $0x460] sm:$0xff]  }
  0x69   : > { %4618 = vmatmul.mubr.bf16.vlgmr.msra.gmra.mrb[16].mxu1 %v7247_v50  ;;  %6496 = vmatpush3.bf16.msra.mxu0 %v7252_v54  ;;  %v7318_v50 = vld [vmem:[%s9293_s1 + $0x420] sm:$0xff]   ;;  %v7322_v54 = vld [vmem:[%s9293_s1 + $0x428] sm:$0xff]  }
  0x6a   : > { %6524 = vmatpush3.bf16.msra.mxu1 %v7253_v55  ;;  %6497 = vmatprep.subr.bf16.mxu0 %v7254_v56  ;;  %v7323_v55 = vld [vmem:[%s9293_s1 + $0x4a8] sm:$0xff]   ;;  %v7324_v56 = vld [vmem:[%s9293_s1 + $0x470] sm:$0xff]  }
  0x6b   : > { %6525 = vmatprep.subr.bf16.mxu1 %v7255_v57  ;;  %4576 = vmatprep.mubr.bf16.mxu0 %v7258_v60  ;;  %v7325_v57 = vld [vmem:[%s9293_s1 + $0x4f0] sm:$0xff]   ;;  %v7328_v60 = vld [vmem:[%s9293_s1 + $0x478] sm:$0xff]  }
  0x6c   : > { %4625 = vmatprep.mubr.bf16.mxu1 %v7263_v0  ;;  %v7332_v0 = vld [vmem:[%s7879_s6 + $0x40] ss:$216 sps:$4 sm:$0xff]  }
  0x6d   : > { %6498 = vmatpush3.bf16.msra.mxu0 %v7256_v58  ;;  %v7326_v58 = vld [vmem:[%s9293_s1 + $0x430] sm:$0xff]  }
  0x6e   : > { %6526 = vmatpush3.bf16.msra.mxu1 %v7257_v59  ;;  %6499 = vmatprep.subr.bf16.mxu0 %v7261_v62  ;;  %v7327_v59 = vld [vmem:[%s9293_s1 + $0x4b0] sm:$0xff]   ;;  %v7330_v62 = vld [vmem:[%s9293_s1 + $0x438] sm:$0xff]  }
  0x6f   : > { %6527 = vmatprep.subr.bf16.mxu1 %v7262_v63  ;;  %v7331_v63 = vld [vmem:[%s9293_s1 + $0x4b8] sm:$0xff]  }
  0x70   : > { %4577 = vmatmul.mubr.bf16.gmra.mrb[20].mxu0 %v7260_v61  ;;  %v7329_v61 = vld [vmem:[%s9293_s1 + $0x4f8] sm:$0xff]  }
  0x71   : > { %6500 = vmatpush3.bf16.msra.mxu0 %v7265_v1  ;;  %4626 = vmatmul.mubr.bf16.gmra.mrb[20].mxu1 %v7267_v3  ;;  %v7334_v1 = vld [vmem:[%s7879_s6 + $0x44] ss:$216 sps:$4 sm:$0xff]  }
  0x72   : > { %6528 = vmatpush3.bf16.msra.mxu1 %v7266_v2  ;;  %6501 = vmatprep.subr.bf16.mxu0 %v7268_v4  ;;  %v7335_v2 = vld [vmem:[%s7879_s6 + $0x48] ss:$216 sps:$4 sm:$0xff]   ;;  %v7337_v3 = vld [vmem:[%s7879_s6 + $0x4c] ss:$216 sps:$4 sm:$0xff]  }
  0x73   : > { %6529 = vmatprep.subr.bf16.mxu1 %v7269_v5  ;;  %4666 = vmatprep.mubr.bf16.mxu0 %v7290_v25  ;;  %v7338_v4 = vld [vmem:[%s9293_s1 + $0x540] sm:$0xff]  }
  0x74   : > { %4715 = vmatprep.mubr.bf16.mxu1 %v7293_v27  ;;  %v7339_v5 = vld [vmem:[%s9293_s1 + $0x5c0] sm:$0xff]  }
  0x75   : > { %6502 = vmatpush3.bf16.msra.mxu0 %v7270_v6  ;;  %v7340_v6 = vld [vmem:[%s9293_s1 + $0x500] sm:$0xff]  }
  0x76   : > { %6530 = vmatpush3.bf16.msra.mxu1 %v7271_v7  ;;  %6503 = vmatprep.subr.bf16.mxu0 %v7272_v8  ;;  %v7341_v7 = vld [vmem:[%s9293_s1 + $0x580] sm:$0xff]   ;;  %v7342_v8 = vld [vmem:[%s9293_s1 + $0x548] sm:$0xff]  }
  0x77   : > { %6531 = vmatprep.subr.bf16.mxu1 %v7273_v9  ;;  %v7343_v9 = vld [vmem:[%s9293_s1 + $0x5c8] sm:$0xff]   ;;  %v7361_v25 = vld [vmem:[%s9293_s1 + $0x5e0] sm:$0xff]  }
  0x78   : > { %v7363_v27 = vld [vmem:[%s9293_s1 + $0x5a0] sm:$0xff]  }
  0x79   : > { %6504 = vmatpush3.bf16.msra.mxu0 %v7274_v10  ;;  %v7344_v10 = vld [vmem:[%s9293_s1 + $0x508] sm:$0xff]  }
  0x7a   : > { %6532 = vmatpush3.bf16.msra.mxu1 %v7275_v11  ;;  %6505 = vmatprep.subr.bf16.mxu0 %v7276_v12  ;;  %v7345_v11 = vld [vmem:[%s9293_s1 + $0x588] sm:$0xff]  }
  0x7b   : > { %6533 = vmatprep.subr.bf16.mxu1 %v7277_v13  ;;  %v7346_v12 = vld [vmem:[%s7879_s6 + $0x1f4] ss:$216 sps:$4 sm:$0xff]   ;;  %v7348_v13 = vld [vmem:[%s7879_s6 + $0x1f0] ss:$216 sps:$4 sm:$0xff]  }
  0x7d   : > { %6506 = vmatpush3.bf16.msra.mxu0 %v7278_v14  ;;  %v7349_v14 = vld [vmem:[%s9293_s1 + $0x550] sm:$0xff]  }
  0x7e   : > { %6534 = vmatpush3.bf16.msra.mxu1 %v7279_v15  ;;  %6507 = vmatprep.subr.bf16.mxu0 %v7280_v16  ;;  %v7350_v15 = vld [vmem:[%s9293_s1 + $0x5d0] sm:$0xff]  }
  0x7f   : > { %6535 = vmatprep.subr.bf16.mxu1 %v7281_v17  ;;  %v7351_v16 = vld [vmem:[%s7879_s6 + $0x1fc] ss:$216 sps:$4 sm:$0xff]  }
  0x80   : > { %v7353_v17 = vld [vmem:[%s9293_s1 + $0x510] sm:$0xff]  }
  0x81   : > { %6508 = vmatpush3.bf16.msra.mxu0 %v7282_v18  ;;  %v7354_v18 = vld [vmem:[%s9293_s1 + $0x590] sm:$0xff]  }
  0x82   : > { %6536 = vmatpush3.bf16.msra.mxu1 %v7283_v19  ;;  %6509 = vmatprep.subr.bf16.mxu0 %v7284_v20  ;;  %v7355_v19 = vld [vmem:[%s7879_s6 + $0x1f8] ss:$216 sps:$4 sm:$0xff]  }
  0x83   : > { %6537 = vmatprep.subr.bf16.mxu1 %v7285_v21  ;;  %v7356_v20 = vld [vmem:[%s9293_s1 + $0x558] sm:$0xff]  }
  0x84   : > { %v7357_v21 = vld [vmem:[%s9293_s1 + $0x5d8] sm:$0xff]  }
  0x85   : > { %6510 = vmatpush3.bf16.msra.mxu0 %v7286_v22  ;;  %v7358_v22 = vld [vmem:[%s9293_s1 + $0x518] sm:$0xff]  }
  0x86   : > { %6538 = vmatpush3.bf16.msra.mxu1 %v7287_v23  ;;  %6551 = vmatprep.subr.bf16.mxu0 %v7294_v28  ;;  %v7359_v23 = vld [vmem:[%s9293_s1 + $0x598] sm:$0xff]   ;;  %v7364_v28 = vld [vmem:[%s9293_s1 + $0x568] sm:$0xff]  }
  0x87   : > { %6579 = vmatprep.subr.bf16.mxu1 %v7295_v29  ;;  %v7365_v29 = vld [vmem:[%s9293_s1 + $0x5e8] sm:$0xff]  }
  0x88   : > { %4667 = vmatmul.mubr.bf16.vlgmr.msra.gmra.mrb[24].mxu0 %v7288_v24  ;;  %v7360_v24 = vld [vmem:[%s9293_s1 + $0x560] sm:$0xff]  }
  0x89   : > { %4716 = vmatmul.mubr.bf16.vlgmr.msra.gmra.mrb[24].mxu1 %v7291_v26  ;;  %6552 = vmatpush3.bf16.msra.mxu0 %v7296_v30  ;;  %v7362_v26 = vld [vmem:[%s9293_s1 + $0x520] sm:$0xff]   ;;  %v7366_v30 = vld [vmem:[%s9293_s1 + $0x528] sm:$0xff]  }
  0x8a   : > { %6580 = vmatpush3.bf16.msra.mxu1 %v7297_v31  ;;  %6553 = vmatprep.subr.bf16.mxu0 %v7298_v32  ;;  %v7367_v31 = vld [vmem:[%s9293_s1 + $0x5a8] sm:$0xff]   ;;  %v7368_v32 = vld [vmem:[%s9293_s1 + $0x570] sm:$0xff]  }
  0x8b   : > { %6581 = vmatprep.subr.bf16.mxu1 %v7299_v33  ;;  %4674 = vmatprep.mubr.bf16.mxu0 %v7302_v36  ;;  %v7369_v33 = vld [vmem:[%s9293_s1 + $0x5f0] sm:$0xff]   ;;  %v7372_v36 = vld [vmem:[%s9293_s1 + $0x578] sm:$0xff]  }
  0x8c   : > { %4723 = vmatprep.mubr.bf16.mxu1 %v7307_v40  ;;  %v7376_v40 = vld [vmem:[%s7879_s6 + $0x50] ss:$216 sps:$4 sm:$0xff]  }
  0x8d   : > { %6554 = vmatpush3.bf16.msra.mxu0 %v7300_v34  ;;  %v7370_v34 = vld [vmem:[%s9293_s1 + $0x530] sm:$0xff]  }
  0x8e   : > { %6582 = vmatpush3.bf16.msra.mxu1 %v7301_v35  ;;  %6555 = vmatprep.subr.bf16.mxu0 %v7305_v38  ;;  %v7371_v35 = vld [vmem:[%s9293_s1 + $0x5b0] sm:$0xff]   ;;  %v7374_v38 = vld [vmem:[%s9293_s1 + $0x538] sm:$0xff]  }
  0x8f   : > { %6583 = vmatprep.subr.bf16.mxu1 %v7306_v39  ;;  %v7375_v39 = vld [vmem:[%s9293_s1 + $0x5b8] sm:$0xff]  }
  0x90   : > { %4675 = vmatmul.mubr.bf16.gmra.mrb[28].mxu0 %v7304_v37  ;;  %v7373_v37 = vld [vmem:[%s9293_s1 + $0x5f8] sm:$0xff]  }
  0x91   : > { %6556 = vmatpush3.bf16.msra.mxu0 %v7309_v41  ;;  %4724 = vmatmul.mubr.bf16.gmra.mrb[28].mxu1 %v7311_v43  ;;  %v7378_v41 = vld [vmem:[%s7879_s6 + $0x54] ss:$216 sps:$4 sm:$0xff]  }
  0x92   : > { %6584 = vmatpush3.bf16.msra.mxu1 %v7310_v42  ;;  %6557 = vmatprep.subr.bf16.mxu0 %v7312_v44  ;;  %v7379_v42 = vld [vmem:[%s7879_s6 + $0x58] ss:$216 sps:$4 sm:$0xff]   ;;  %v7381_v43 = vld [vmem:[%s7879_s6 + $0x5c] ss:$216 sps:$4 sm:$0xff]   ;;  %v7382_v44 = vld [vmem:[%s9293_s1 + $0x640] sm:$0xff]  }
  0x93   : > { %6585 = vmatprep.subr.bf16.mxu1 %v7313_v45  ;;  %4764 = vmatprep.mubr.bf16.mxu0 %v7334_v1  ;;  %v7383_v45 = vld [vmem:[%s9293_s1 + $0x6c0] sm:$0xff]  }
  0x94   : > { %4813 = vmatprep.mubr.bf16.mxu1 %v7337_v3  ;;  %v7405_v1 = vld [vmem:[%s9293_s1 + $0x6e0] sm:$0xff]  }
  0x95   : > { %6558 = vmatpush3.bf16.msra.mxu0 %v7314_v46  ;;  %v7384_v46 = vld [vmem:[%s9293_s1 + $0x600] sm:$0xff]  }
  0x96   : > { %6586 = vmatpush3.bf16.msra.mxu1 %v7315_v47  ;;  %6559 = vmatprep.subr.bf16.mxu0 %v7316_v48  ;;  %v7385_v47 = vld [vmem:[%s9293_s1 + $0x680] sm:$0xff]   ;;  %v7386_v48 = vld [vmem:[%s9293_s1 + $0x648] sm:$0xff]  }
  0x97   : > { %6587 = vmatprep.subr.bf16.mxu1 %v7317_v49  ;;  %v7387_v49 = vld [vmem:[%s9293_s1 + $0x6c8] sm:$0xff]   ;;  %v7407_v3 = vld [vmem:[%s9293_s1 + $0x6a0] sm:$0xff]  }
  0x99   : > { %6560 = vmatpush3.bf16.msra.mxu0 %v7318_v50  ;;  %v7388_v50 = vld [vmem:[%s9293_s1 + $0x608] sm:$0xff]  }
  0x9a   : > { %6588 = vmatpush3.bf16.msra.mxu1 %v7319_v51  ;;  %6561 = vmatprep.subr.bf16.mxu0 %v7320_v52  ;;  %v7389_v51 = vld [vmem:[%s9293_s1 + $0x688] sm:$0xff]   ;;  %v7390_v52 = vld [vmem:[%s7879_s6 + $0x204] ss:$216 sps:$4 sm:$0xff]  }
  0x9b   : > { %6589 = vmatprep.subr.bf16.mxu1 %v7321_v53  ;;  %v7392_v53 = vld [vmem:[%s7879_s6 + $0x200] ss:$216 sps:$4 sm:$0xff]  }
  0x9d   : > { %6562 = vmatpush3.bf16.msra.mxu0 %v7322_v54  ;;  %v7393_v54 = vld [vmem:[%s9293_s1 + $0x650] sm:$0xff]  }
  0x9e   : > { %6590 = vmatpush3.bf16.msra.mxu1 %v7323_v55  ;;  %6563 = vmatprep.subr.bf16.mxu0 %v7324_v56  ;;  %v7394_v55 = vld [vmem:[%s9293_s1 + $0x6d0] sm:$0xff]   ;;  %v7395_v56 = vld [vmem:[%s7879_s6 + $0x20c] ss:$216 sps:$4 sm:$0xff]  }
  0x9f   : > { %6591 = vmatprep.subr.bf16.mxu1 %v7325_v57  ;;  %v7397_v57 = vld [vmem:[%s9293_s1 + $0x610] sm:$0xff]  }
  0xa1   : > { %6564 = vmatpush3.bf16.msra.mxu0 %v7326_v58  ;;  %v7398_v58 = vld [vmem:[%s9293_s1 + $0x690] sm:$0xff]  }
  0xa2   : > { %6592 = vmatpush3.bf16.msra.mxu1 %v7327_v59  ;;  %6565 = vmatprep.subr.bf16.mxu0 %v7328_v60  ;;  %v7399_v59 = vld [vmem:[%s7879_s6 + $0x208] ss:$216 sps:$4 sm:$0xff]   ;;  %v7400_v60 = vld [vmem:[%s9293_s1 + $0x658] sm:$0xff]  }
  0xa3   : > { %6593 = vmatprep.subr.bf16.mxu1 %v7329_v61  ;;  %v7401_v61 = vld [vmem:[%s9293_s1 + $0x6d8] sm:$0xff]  }
  0xa5   : > { %6566 = vmatpush3.bf16.msra.mxu0 %v7330_v62  ;;  %v7402_v62 = vld [vmem:[%s9293_s1 + $0x618] sm:$0xff]  }
  0xa6   : > { %6594 = vmatpush3.bf16.msra.mxu1 %v7331_v63  ;;  %6607 = vmatprep.subr.bf16.mxu0 %v7338_v4  ;;  %v7403_v63 = vld [vmem:[%s9293_s1 + $0x698] sm:$0xff]   ;;  %v7408_v4 = vld [vmem:[%s9293_s1 + $0x668] sm:$0xff]  }
  0xa7   : > { %6635 = vmatprep.subr.bf16.mxu1 %v7339_v5  ;;  %v7409_v5 = vld [vmem:[%s9293_s1 + $0x6e8] sm:$0xff]  }
  0xa8   : > { %4765 = vmatmul.mubr.bf16.vlgmr.msra.gmra.mrb[32].mxu0 %v7332_v0  ;;  %v7404_v0 = vld [vmem:[%s9293_s1 + $0x660] sm:$0xff]  }
  0xa9   : > { %4814 = vmatmul.mubr.bf16.vlgmr.msra.gmra.mrb[32].mxu1 %v7335_v2  ;;  %6608 = vmatpush3.bf16.msra.mxu0 %v7340_v6  ;;  %v7406_v2 = vld [vmem:[%s9293_s1 + $0x620] sm:$0xff]   ;;  %v7410_v6 = vld [vmem:[%s9293_s1 + $0x628] sm:$0xff]  }
  0xaa   : > { %6636 = vmatpush3.bf16.msra.mxu1 %v7341_v7  ;;  %6609 = vmatprep.subr.bf16.mxu0 %v7342_v8  ;;  %v7411_v7 = vld [vmem:[%s9293_s1 + $0x6a8] sm:$0xff]  }
  0xab   : > { %6637 = vmatprep.subr.bf16.mxu1 %v7343_v9  ;;  %4772 = vmatprep.mubr.bf16.mxu0 %v7346_v12  ;;  %v7412_v9 = vld [vmem:[%s9293_s1 + $0x670] sm:$0xff]  }
  0xac   : > { %4821 = vmatprep.mubr.bf16.mxu1 %v7351_v16  ;;  %v7415_v16 = vld [vmem:[%s9293_s1 + $0x6b0] sm:$0xff]  }
  0xad   : > { %6610 = vmatpush3.bf16.msra.mxu0 %v7344_v10 }
  0xae   : > { %6638 = vmatpush3.bf16.msra.mxu1 %v7345_v11  ;;  %6611 = vmatprep.subr.bf16.mxu0 %v7349_v14  ;;  %v7413_v11 = vld [vmem:[%s9293_s1 + $0x6f0] sm:$0xff]  }
  0xaf   : > { %6639 = vmatprep.subr.bf16.mxu1 %v7350_v15 }
  0xb0   : > { %4773 = vmatmul.mubr.bf16.gmra.mrb[36].mxu0 %v7348_v13  ;;  %v7414_v13 = vld [vmem:[%s9293_s1 + $0x630] sm:$0xff]  }
  0xb1   : > { %6612 = vmatpush3.bf16.msra.mxu0 %v7353_v17  ;;  %4822 = vmatmul.mubr.bf16.gmra.mrb[36].mxu1 %v7355_v19  ;;  %v7416_v19 = vld [vmem:[%s9293_s1 + $0x678] sm:$0xff]  }
  0xb2   : > { %6640 = vmatpush3.bf16.msra.mxu1 %v7354_v18  ;;  %6613 = vmatprep.subr.bf16.mxu0 %v7356_v20 }
  0xb3   : > { %6641 = vmatprep.subr.bf16.mxu1 %v7357_v21  ;;  %4862 = vmatprep.mubr.bf16.mxu0 %v7378_v41  ;;  %v7417_v21 = vld [vmem:[%s9293_s1 + $0x6f8] sm:$0xff]   ;;  %v7436_v41 = vld [vmem:[%s7879_s6 + $0x210] ss:$216 sps:$4 sm:$0xff]  }
  0xb4   : > { %4911 = vmatprep.mubr.bf16.mxu1 %v7381_v43  ;;  %v7438_v43 = vld [vmem:[%s9293_s1 + $0x7d0] sm:$0xff]  }
  0xb5   : > { %6614 = vmatpush3.bf16.msra.mxu0 %v7358_v22 }
  0xb6   : > { %6642 = vmatpush3.bf16.msra.mxu1 %v7359_v23  ;;  %6615 = vmatprep.subr.bf16.mxu0 %v7360_v24  ;;  %v7418_v23 = vld [vmem:[%s9293_s1 + $0x638] sm:$0xff]  }
  0xb7   : > { %6643 = vmatprep.subr.bf16.mxu1 %v7361_v25 }
  0xb9   : > { %6616 = vmatpush3.bf16.msra.mxu0 %v7362_v26  ;;  %v7419_v26 = vld [vmem:[%s9293_s1 + $0x6b8] sm:$0xff]  }
  0xba   : > { %6644 = vmatpush3.bf16.msra.mxu1 %v7363_v27  ;;  %6617 = vmatprep.subr.bf16.mxu0 %v7364_v28  ;;  %v7420_v28 = vld [vmem:[%s7879_s6 + $0x60] ss:$216 sps:$4 sm:$0xff]  }
  0xbb   : > { %6645 = vmatprep.subr.bf16.mxu1 %v7365_v29  ;;  %v7422_v29 = vld [vmem:[%s7879_s6 + $0x64] ss:$216 sps:$4 sm:$0xff]  }
  0xbd   : > { %6618 = vmatpush3.bf16.msra.mxu0 %v7366_v30  ;;  %v7423_v30 = vld [vmem:[%s7879_s6 + $0x68] ss:$216 sps:$4 sm:$0xff]  }
  0xbe   : > { %6646 = vmatpush3.bf16.msra.mxu1 %v7367_v31  ;;  %6619 = vmatprep.subr.bf16.mxu0 %v7368_v32  ;;  %v7425_v31 = vld [vmem:[%s7879_s6 + $0x6c] ss:$216 sps:$4 sm:$0xff]  }
  0xbf   : > { %6647 = vmatprep.subr.bf16.mxu1 %v7369_v33  ;;  %v7426_v32 = vld [vmem:[%s9293_s1 + $0x740] sm:$0xff]  }
  0xc0   : > { %v7427_v33 = vld [vmem:[%s9293_s1 + $0x7c0] sm:$0xff]  }
  0xc1   : > { %6620 = vmatpush3.bf16.msra.mxu0 %v7370_v34  ;;  %v7428_v34 = vld [vmem:[%s9293_s1 + $0x700] sm:$0xff]  }
  0xc2   : > { %6648 = vmatpush3.bf16.msra.mxu1 %v7371_v35  ;;  %6621 = vmatprep.subr.bf16.mxu0 %v7372_v36  ;;  %v7429_v35 = vld [vmem:[%s9293_s1 + $0x780] sm:$0xff]   ;;  %v7430_v36 = vld [vmem:[%s9293_s1 + $0x748] sm:$0xff]  }
  0xc3   : > { %6649 = vmatprep.subr.bf16.mxu1 %v7373_v37  ;;  %v7431_v37 = vld [vmem:[%s9293_s1 + $0x7c8] sm:$0xff]  }
  0xc5   : > { %6622 = vmatpush3.bf16.msra.mxu0 %v7374_v38  ;;  %v7432_v38 = vld [vmem:[%s9293_s1 + $0x708] sm:$0xff]  }
  0xc6   : > { %6650 = vmatpush3.bf16.msra.mxu1 %v7375_v39  ;;  %6663 = vmatprep.subr.bf16.mxu0 %v7382_v44  ;;  %v7433_v39 = vld [vmem:[%s9293_s1 + $0x788] sm:$0xff]   ;;  %v7439_v44 = vld [vmem:[%s7879_s6 + $0x21c] ss:$216 sps:$4 sm:$0xff]  }
  0xc7   : > { %6691 = vmatprep.subr.bf16.mxu1 %v7383_v45  ;;  %v7441_v45 = vld [vmem:[%s9293_s1 + $0x710] sm:$0xff]  }
  0xc8   : > { %4863 = vmatmul.mubr.bf16.vlgmr.msra.gmra.mrb[40].mxu0 %v7376_v40  ;;  %v7434_v40 = vld [vmem:[%s7879_s6 + $0x214] ss:$216 sps:$4 sm:$0xff]  }
  0xc9   : > { %4912 = vmatmul.mubr.bf16.vlgmr.msra.gmra.mrb[40].mxu1 %v7379_v42  ;;  %6664 = vmatpush3.bf16.msra.mxu0 %v7384_v46  ;;  %v7437_v42 = vld [vmem:[%s9293_s1 + $0x750] sm:$0xff]  }
  0xca   : > { %6692 = vmatpush3.bf16.msra.mxu1 %v7385_v47  ;;  %6665 = vmatprep.subr.bf16.mxu0 %v7386_v48  ;;  %v7442_v46 = vld [vmem:[%s9293_s1 + $0x790] sm:$0xff]  }
  0xcb   : > { %6693 = vmatprep.subr.bf16.mxu1 %v7387_v49  ;;  %4870 = vmatprep.mubr.bf16.mxu0 %v7390_v52  ;;  %v7443_v48 = vld [vmem:[%s7879_s6 + $0x218] ss:$216 sps:$4 sm:$0xff]  }
  0xcc   : > { %4919 = vmatprep.mubr.bf16.mxu1 %v7395_v56  ;;  %v7444_v49 = vld [vmem:[%s9293_s1 + $0x758] sm:$0xff]  }
  0xcd   : > { %6666 = vmatpush3.bf16.msra.mxu0 %v7388_v50  ;;  %v7447_v56 = vld [vmem:[%s9293_s1 + $0x798] sm:$0xff]  }
  0xce   : > { %6694 = vmatpush3.bf16.msra.mxu1 %v7389_v51  ;;  %6667 = vmatprep.subr.bf16.mxu0 %v7393_v54  ;;  %v7445_v51 = vld [vmem:[%s9293_s1 + $0x7d8] sm:$0xff]  }
  0xcf   : > { %6695 = vmatprep.subr.bf16.mxu1 %v7394_v55  ;;  %v7446_v54 = vld [vmem:[%s9293_s1 + $0x718] sm:$0xff]  }
  0xd0   : > { %4871 = vmatmul.mubr.bf16.gmra.mrb[44].mxu0 %v7392_v53 }
  0xd1   : > { %6668 = vmatpush3.bf16.msra.mxu0 %v7397_v57  ;;  %4920 = vmatmul.mubr.bf16.gmra.mrb[44].mxu1 %v7399_v59 }
  0xd2   : > { %6696 = vmatpush3.bf16.msra.mxu1 %v7398_v58  ;;  %6669 = vmatprep.subr.bf16.mxu0 %v7400_v60  ;;  %v7448_v58 = vld [vmem:[%s9293_s1 + $0x760] sm:$0xff]  }
  0xd3   : > { %6697 = vmatprep.subr.bf16.mxu1 %v7401_v61  ;;  %4960 = vmatprep.mubr.bf16.mxu0 %v7422_v29  ;;  %v7449_v61 = vld [vmem:[%s9293_s1 + $0x7e0] sm:$0xff]  }
  0xd4   : > { %5009 = vmatprep.mubr.bf16.mxu1 %v7425_v31 }
  0xd5   : > { %6670 = vmatpush3.bf16.msra.mxu0 %v7402_v62 }
  0xd6   : > { %6698 = vmatpush3.bf16.msra.mxu1 %v7403_v63  ;;  %6671 = vmatprep.subr.bf16.mxu0 %v7404_v0  ;;  %v7450_v0 = vld [vmem:[%s9293_s1 + $0x720] sm:$0xff]  }
  0xd7   : > { %6699 = vmatprep.subr.bf16.mxu1 %v7405_v1 }
  0xd9   : > { %6672 = vmatpush3.bf16.msra.mxu0 %v7406_v2  ;;  %v7451_v2 = vld [vmem:[%s9293_s1 + $0x7a0] sm:$0xff]  }
  0xda   : > { %6700 = vmatpush3.bf16.msra.mxu1 %v7407_v3  ;;  %6673 = vmatprep.subr.bf16.mxu0 %v7408_v4  ;;  %v5784_v3 = vld [vmem:[%s9294_s2] ss:$0 sm:$0xff] }
  0xdb   : > { %6701 = vmatprep.subr.bf16.mxu1 %v7409_v5 }
  0xdd   : > { %6674 = vmatpush3.bf16.msra.mxu0 %v7410_v6  ;;  %v7452_v6 = vld [vmem:[%s9293_s1 + $0x768] sm:$0xff]  }
  0xde   : > { %6702 = vmatpush3.bf16.msra.mxu1 %v7411_v7  ;;  %6675 = vmatprep.subr.bf16.mxu0 %v7412_v9 }
  0xdf   : > { %6703 = vmatprep.subr.bf16.mxu1 %v7413_v11 }
  0xe1   : > { %6676 = vmatpush3.bf16.msra.mxu0 %v7414_v13 }
  0xe2   : > { %6704 = vmatpush3.bf16.msra.mxu1 %v7415_v16  ;;  %6677 = vmatprep.subr.bf16.mxu0 %v7416_v19 }
  0xe3   : > { %6705 = vmatprep.subr.bf16.mxu1 %v7417_v21  ;;  %v7457_v21 = vld [vmem:[%s9293_s1 + $0x7f0] sm:$0xff]  }
  0xe5   : > { %6678 = vmatpush3.bf16.msra.mxu0 %v7418_v23 }
  0xe6   : > { %6706 = vmatpush3.bf16.msra.mxu1 %v7419_v26  ;;  %6719 = vmatprep.subr.bf16.mxu0 %v7426_v32  ;;  %v7461_v32 = vld [vmem:[%s9293_s1 + $0x7f8] sm:$0xff]  }
  0xe7   : > { %6747 = vmatprep.subr.bf16.mxu1 %v7427_v33 }
  0xe8   : > { %4961 = vmatmul.mubr.bf16.vlgmr.msra.gmra.mrb[48].mxu0 %v7420_v28 }
  0xe9   : > { %5010 = vmatmul.mubr.bf16.vlgmr.msra.gmra.mrb[48].mxu1 %v7423_v30  ;;  %6720 = vmatpush3.bf16.msra.mxu0 %v7428_v34  ;;  %v7460_v30 = vld [vmem:[%s9293_s1 + $0x778] sm:$0xff]  }
  0xea   : > { %6748 = vmatpush3.bf16.msra.mxu1 %v7429_v35  ;;  %6721 = vmatprep.subr.bf16.mxu0 %v7430_v36  ;;  %v7462_v36 = vld [vmem:[%s9293_s1 + $0x738] sm:$0xff]  }
  0xeb   : > { %6749 = vmatprep.subr.bf16.mxu1 %v7431_v37  ;;  %4968 = vmatprep.mubr.bf16.mxu0 %v7434_v40  ;;  %v7464_v40 = vld [vmem:[%s7879_s6 + $0x70] ss:$216 sps:$4 sm:$0xff]  }
  0xec   : > { %5017 = vmatprep.mubr.bf16.mxu1 %v7439_v44 }
  0xed   : > { %6722 = vmatpush3.bf16.msra.mxu0 %v7432_v38  ;;  %v7463_v38 = vld [vmem:[%s9293_s1 + $0x7b8] sm:$0xff]  }
  0xee   : > { %6750 = vmatpush3.bf16.msra.mxu1 %v7433_v39  ;;  %6723 = vmatprep.subr.bf16.mxu0 %v7437_v42 }
  0xef   : > { %6751 = vmatprep.subr.bf16.mxu1 %v7438_v43  ;;  %v7467_v43 = vld [vmem:[%s7879_s6 + $0x78] ss:$216 sps:$4 sm:$0xff]  }
  0xf0   : > { %4969 = vmatmul.mubr.bf16.gmra.mrb[52].mxu0 %v7436_v41  ;;  %v7466_v41 = vld [vmem:[%s7879_s6 + $0x74] ss:$216 sps:$4 sm:$0xff]  }
  0xf1   : > { %6724 = vmatpush3.bf16.msra.mxu0 %v7441_v45  ;;  %5018 = vmatmul.mubr.bf16.gmra.mrb[52].mxu1 %v7443_v48  ;;  %v7470_v48 = vld [vmem:[%s9293_s1 + $0x840] sm:$0xff]  }
  0xf2   : > { %6752 = vmatpush3.bf16.msra.mxu1 %v7442_v46  ;;  %6725 = vmatprep.subr.bf16.mxu0 %v7444_v49  ;;  %v7469_v46 = vld [vmem:[%s7879_s6 + $0x7c] ss:$216 sps:$4 sm:$0xff]  }
  0xf3   : > { %6753 = vmatprep.subr.bf16.mxu1 %v7445_v51  ;;  %5058 = vmatprep.mubr.bf16.mxu0 %v7466_v41 }
  0xf4   : > { %5107 = vmatprep.mubr.bf16.mxu1 %v7469_v46 }
  0xf5   : > { %6726 = vmatpush3.bf16.msra.mxu0 %v7446_v54 }
  0xf6   : > { %6754 = vmatpush3.bf16.msra.mxu1 %v7447_v56  ;;  %6727 = vmatprep.subr.bf16.mxu0 %v7448_v58 }
  0xf7   : > { %6755 = vmatprep.subr.bf16.mxu1 %v7449_v61 }
  0xf9   : > { %6728 = vmatpush3.bf16.msra.mxu0 %v7450_v0 }
  0xfa   : > { %6756 = vmatpush3.bf16.msra.mxu1 %v7451_v2  ;;  %6729 = vmatprep.subr.bf16.mxu0 %v7452_v6  ;;  %v7481_v6 = vld [vmem:[%s9293_s1 + $0x850] sm:$0xff]  }
  0xfb   : > { %v6343_v8 = vpop.f32.mrb[0].mxu0 }
  0xfc   : > { %v6371_v10 = vpop.f32.mrb[0].mxu1  ;;  %v6344_v12 = vpop.f32.mrb[1].mxu0 }
  0xfd   : > { %v8496_v14 = vadd.f32 %v6344_v12, %v6343_v8  ;;  %v6372_v15 = vpop.f32.mrb[1].mxu1  ;;  %v6346_v18 = vpop.f32.mrb[2].mxu0  ;;  %v7454_v12 = vld [vmem:[%s9293_s1 + $0x728] sm:$0xff]  }
  0xfe   : > { %v8501_v17 = vadd.f32 %v6372_v15, %v6371_v10  ;;  %v6374_v20 = vpop.f32.mrb[2].mxu1  ;;  %v6347_v22 = vpop.f32.mrb[3].mxu0  ;;  %v7453_v10 = vld [vmem:[%s9293_s1 + $0x7e8] sm:$0xff]   ;;  %6730 = vmatpush3.bf16.msra.mxu0 %v7454_v12 }
  0xff   : > { %v8512_v24 = vadd.f32 %v6347_v22, %v6346_v18  ;;  %v6375_v25 = vpop.f32.mrb[3].mxu1  ;;  %v4375_v5 = vadd.f32 %v8496_v14, %v5784_v3  ;;  %6757 = vmatprep.subr.bf16.mxu1 %v7453_v10  ;;  %v7455_v18 = vld [vmem:[%s9293_s1 + $0x7a8] sm:$0xff]   ;;  %v7485_v10 = vld [vmem:[%s9293_s1 + $0x810] sm:$0xff]  }
 0x100   : > { %v8517_v27 = vadd.f32 %v6375_v25, %v6374_v20  ;;  %6758 = vmatpush3.bf16.msra.mxu1 %v7455_v18  ;;  %v7487_v12 = vld [vmem:[%s7879_s6 + $0x228] ss:$216 sps:$4 sm:$0xff]  }
 0x101   : > { %v4378_v7 = vadd.f32 %v8512_v24, %v5784_v3  ;;  %v4424_v11 = vadd.f32 %v8501_v17, %v4375_v5  ;;  %v7456_v17 = vld [vmem:[%s9293_s1 + $0x770] sm:$0xff]   ;;  %6759 = vmatprep.subr.bf16.mxu1 %v7457_v21  ;;  %v7480_v5 = vld [vmem:[%s7879_s6 + $0x220] ss:$216 sps:$4 sm:$0xff]   ;;  %v7496_v21 = vld [vmem:[%s9293_s1 + $0x868] sm:$0xff]  }
 0x102   : > { %6731 = vmatprep.subr.bf16.mxu0 %v7456_v17  ;;  %v7458_v24 = vld [vmem:[%s9293_s1 + $0x730] sm:$0xff]   ;;  %v7492_v18 = vld [vmem:[%s9293_s1 + $0x860] sm:$0xff]  }
 0x103   : > { %v6349_v47 = vpop.f32.mrb[4].mxu0  ;;  %v4427_v13 = vadd.f32 %v8517_v27, %v4378_v7  ;;  %v7459_v27 = vld [vmem:[%s9293_s1 + $0x7b0] sm:$0xff]   ;;  %6732 = vmatpush3.bf16.msra.mxu0 %v7458_v24  ;;  %v7494_v17 = vld [vmem:[%s9293_s1 + $0x820] sm:$0xff]  }
 0x104   : > { %v6350_v50 = vpop.f32.mrb[5].mxu0  ;;  %v6377_v55 = vpop.f32.mrb[4].mxu1  ;;  %6760 = vmatpush3.bf16.msra.mxu1 %v7459_v27  ;;  %6733 = vmatprep.subr.bf16.mxu0 %v7460_v30  ;;  %v7500_v27 = vld [vmem:[%s9293_s1 + $0x870] sm:$0xff]  }
 0x105   : > { %v6351_v52 = vadd.f32 %v6350_v50, %v6349_v47  ;;  %v6352_v53 = vpop.f32.mrb[6].mxu0  ;;  %v6378_v60 = vpop.f32.mrb[5].mxu1  ;;  %6761 = vmatprep.subr.bf16.mxu1 %v7461_v32  ;;  %v7471_v50 = vld [vmem:[%s9293_s1 + $0x8c0] sm:$0xff]   ;;  %v7501_v30 = vld [vmem:[%s9293_s1 + $0x8f0] sm:$0xff]  }
 0x106   : > { %v6353_v57 = vpop.f32.mrb[7].mxu0  ;;  %v6379_v62 = vadd.f32 %v6378_v60, %v6377_v55  ;;  %v6380_v63 = vpop.f32.mrb[6].mxu1  ;;  %v7473_v55 = vld [vmem:[%s9293_s1 + $0x880] sm:$0xff]   ;;  %v7475_v60 = vld [vmem:[%s9293_s1 + $0x8c8] sm:$0xff]   ;;  %v7502_v32 = vld [vmem:[%s9293_s1 + $0x830] sm:$0xff]  }
 0x107   : > { %v6354_v59 = vadd.f32 %v6353_v57, %v6352_v53  ;;  %v6381_v1 = vpop.f32.mrb[7].mxu1  ;;  %v4383_v8 = vadd.f32 %v6351_v52, %v5784_v3  ;;  %6734 = vmatpush3.bf16.msra.mxu0 %v7462_v36  ;;  %v7472_v53 = vld [vmem:[%s9293_s1 + $0x800] sm:$0xff]   ;;  %v7474_v57 = vld [vmem:[%s9293_s1 + $0x848] sm:$0xff]  }
 0x108   : > { %v6382_v4 = vadd.f32 %v6381_v1, %v6380_v63  ;;  %6762 = vmatpush3.bf16.msra.mxu1 %v7463_v38  ;;  %6775 = vmatprep.subr.bf16.mxu0 %v7470_v48  ;;  %v7476_v63 = vld [vmem:[%s9293_s1 + $0x808] sm:$0xff]  }
 0x109   : > { %v4386_v9 = vadd.f32 %v6354_v59, %v5784_v3  ;;  %v4432_v14 = vadd.f32 %v6379_v62, %v4383_v8  ;;  %6803 = vmatprep.subr.bf16.mxu1 %v7471_v50  ;;  %v7477_v1 = vld [vmem:[%s9293_s1 + $0x888] sm:$0xff]   ;;  %v7482_v8 = vld [vmem:[%s9293_s1 + $0x8d0] sm:$0xff]   ;;  %v7510_v50 = vld [vmem:[%s7879_s6 + $0x84] ss:$216 sps:$4 sm:$0xff]  }
 0x10a   : > { %5059 = vmatmul.mubr.bf16.vlgmr.msra.gmra.mrb[56].mxu0 %v7464_v40 }
 0x10b   : > { %v4435_v15 = vadd.f32 %v6382_v4, %v4386_v9  ;;  %5108 = vmatmul.mubr.bf16.vlgmr.msra.gmra.mrb[56].mxu1 %v7467_v43  ;;  %6776 = vmatpush3.bf16.msra.mxu0 %v7472_v53  ;;  %v7478_v4 = vld [vmem:[%s7879_s6 + $0x224] ss:$216 sps:$4 sm:$0xff]   ;;  %v7511_v53 = vld [vmem:[%s7879_s6 + $0x88] ss:$216 sps:$4 sm:$0xff]  }
 0x10c   : > { %6804 = vmatpush3.bf16.msra.mxu1 %v7473_v55  ;;  %6777 = vmatprep.subr.bf16.mxu0 %v7474_v57  ;;  %v7483_v9 = vld [vmem:[%s7879_s6 + $0x22c] ss:$216 sps:$4 sm:$0xff]  }
 0x10d   : > { %6805 = vmatprep.subr.bf16.mxu1 %v7475_v60  ;;  %5066 = vmatprep.mubr.bf16.mxu0 %v7478_v4  ;;  %v7514_v55 = vld [vmem:[%s9293_s1 + $0x940] sm:$0xff]   ;;  %v7519_v4 = vld [vmem:[%s9293_s1 + $0x9c8] sm:$0xff]  }
 0x10e   : > { %5115 = vmatprep.mubr.bf16.mxu1 %v7483_v9 }
 0x10f   : > { %6778 = vmatpush3.bf16.msra.mxu0 %v7476_v63 }
 0x110   : > { %6806 = vmatpush3.bf16.msra.mxu1 %v7477_v1  ;;  %6779 = vmatprep.subr.bf16.mxu0 %v7481_v6  ;;  %v7518_v1 = vld [vmem:[%s9293_s1 + $0x948] sm:$0xff]  }
 0x111   : > { %6807 = vmatprep.subr.bf16.mxu1 %v7482_v8 }
 0x112   : > { %5067 = vmatmul.mubr.bf16.gmra.mrb[60].mxu0 %v7480_v5 }
 0x113   : > { %6780 = vmatpush3.bf16.msra.mxu0 %v7485_v10  ;;  %5116 = vmatmul.mubr.bf16.gmra.mrb[60].mxu1 %v7487_v12  ;;  %v7521_v10 = vld [vmem:[%s9293_s1 + $0x988] sm:$0xff]  }
 0x114   : > { %5156 = vmatprep.mubr.bf16.mxu0 %v7510_v50  ;;  %v7549_v50 = vld [vmem:[%s9293_s1 + $0x9f8] sm:$0xff]  }
 0x11b   : > { %v6399_v16 = vpop.f32.mrb[8].mxu0 }
 0x11c   : > { %v6427_v19 = vpop.f32.mrb[8].mxu1  ;;  %v6400_v20 = vpop.f32.mrb[9].mxu0 }
 0x11d   : > { %v6401_v22 = vadd.f32 %v6400_v20, %v6399_v16  ;;  %v6428_v23 = vpop.f32.mrb[9].mxu1  ;;  %v6402_v26 = vpop.f32.mrb[10].mxu0  ;;  %v7491_v16 = vld [vmem:[%s9293_s1 + $0x898] sm:$0xff]   ;;  %v7495_v20 = vld [vmem:[%s9293_s1 + $0x8a0] sm:$0xff]  }
 0x11e   : > { %v6429_v25 = vadd.f32 %v6428_v23, %v6427_v19  ;;  %v6430_v29 = vpop.f32.mrb[10].mxu1  ;;  %v6403_v31 = vpop.f32.mrb[11].mxu0  ;;  %v7493_v19 = vld [vmem:[%s9293_s1 + $0x8e0] sm:$0xff]   ;;  %v7498_v23 = vld [vmem:[%s9293_s1 + $0x828] sm:$0xff]  }
 0x11f   : > { %v4473_v28 = vadd.f32 %v6401_v22, %v4424_v11  ;;  %v6404_v34 = vadd.f32 %v6403_v31, %v6402_v26  ;;  %v6431_v35 = vpop.f32.mrb[11].mxu1  ;;  %v7486_v11 = vld [vmem:[%s9293_s1 + $0x890] sm:$0xff]   ;;  %v7497_v22 = vld [vmem:[%s9293_s1 + $0x8e8] sm:$0xff]  }
 0x120   : > { %v6432_v37 = vadd.f32 %v6431_v35, %v6430_v29  ;;  %6808 = vmatpush3.bf16.msra.mxu1 %v7486_v11 }
 0x121   : > { %v8624_v33 = vadd.f32 %v6429_v25, %v4473_v28  ;;  %v4476_v39 = vadd.f32 %v6404_v34, %v4427_v13  ;;  %v7488_v13 = vld [vmem:[%s9293_s1 + $0x858] sm:$0xff]   ;;  %v7499_v25 = vld [vmem:[%s9293_s1 + $0x8a8] sm:$0xff]  }
 0x122   : > { %6781 = vmatprep.subr.bf16.mxu0 %v7488_v13  ;;  %v7524_v13 = vld [vmem:[%s7879_s6 + $0x230] ss:$216 sps:$4 sm:$0xff]  }
 0x123   : > { %v6405_v42 = vpop.f32.mrb[12].mxu0  ;;  %v8635_v44 = vadd.f32 %v6432_v37, %v4476_v39  ;;  %v7503_v37 = vld [vmem:[%s9293_s1 + $0x8b0] sm:$0xff]   ;;  %v7504_v39 = vld [vmem:[%s9293_s1 + $0x878] sm:$0xff]  }
 0x124   : > { %v6406_v45 = vpop.f32.mrb[13].mxu0  ;;  %v6433_v56 = vpop.f32.mrb[12].mxu1 }
 0x125   : > { %v6407_v47 = vadd.f32 %v6406_v45, %v6405_v42  ;;  %v6408_v49 = vpop.f32.mrb[14].mxu0  ;;  %v6434_v59 = vpop.f32.mrb[13].mxu1  ;;  %v7506_v45 = vld [vmem:[%s9293_s1 + $0x838] sm:$0xff]  }
 0x126   : > { %v6409_v52 = vpop.f32.mrb[15].mxu0  ;;  %v6435_v61 = vadd.f32 %v6434_v59, %v6433_v56  ;;  %v6436_v62 = vpop.f32.mrb[14].mxu1  ;;  %v7516_v59 = vld [vmem:[%s9293_s1 + $0x900] sm:$0xff]  }
 0x127   : > { %v4481_v51 = vadd.f32 %v6407_v47, %v4432_v14  ;;  %v6410_v54 = vadd.f32 %v6409_v52, %v6408_v49  ;;  %v6437_v0 = vpop.f32.mrb[15].mxu1  ;;  %v7489_v14 = vld [vmem:[%s9293_s1 + $0x8d8] sm:$0xff]  }
 0x128   : > { %v6438_v3 = vadd.f32 %v6437_v0, %v6436_v62  ;;  %6809 = vmatprep.subr.bf16.mxu1 %v7489_v14  ;;  %v7507_v47 = vld [vmem:[%s9293_s1 + $0x8b8] sm:$0xff]   ;;  %v7525_v14 = vld [vmem:[%s9293_s1 + $0x950] sm:$0xff]  }
 0x129   : > { %v4484_v58 = vadd.f32 %v6410_v54, %v4435_v15  ;;  %v8662_v2 = vadd.f32 %v6435_v61, %v4481_v51  ;;  %v7490_v15 = vld [vmem:[%s9293_s1 + $0x818] sm:$0xff]   ;;  %6810 = vmatpush3.bf16.msra.mxu1 %v7491_v16  ;;  %v7513_v54 = vld [vmem:[%s7879_s6 + $0x8c] ss:$216 sps:$4 sm:$0xff]   ;;  %v7526_v16 = vld [vmem:[%s9293_s1 + $0x9d0] sm:$0xff]  }
 0x12a   : > { %6782 = vmatpush3.bf16.msra.mxu0 %v7490_v15  ;;  %6811 = vmatprep.subr.bf16.mxu1 %v7493_v19  ;;  %v7508_v49 = vld [vmem:[%s7879_s6 + $0x80] ss:$216 sps:$4 sm:$0xff]   ;;  %v7529_v19 = vld [vmem:[%s9293_s1 + $0x910] sm:$0xff]  }
 0x12b   : > { %v8669_v7 = vadd.f32 %v6438_v3, %v4484_v58  ;;  %6783 = vmatprep.subr.bf16.mxu0 %v7492_v18  ;;  %5205 = vmatprep.mubr.bf16.mxu1 %v7513_v54  ;;  %v7517_v61 = vld [vmem:[%s9293_s1 + $0x980] sm:$0xff]   ;;  %v7527_v18 = vld [vmem:[%s7879_s6 + $0x23c] ss:$216 sps:$4 sm:$0xff]  }
 0x12c   : > { %v7550_v54 = vld [vmem:[%s9293_s1 + $0x938] sm:$0xff]  }
 0x12d   : > { %6812 = vmatpush3.bf16.msra.mxu1 %v7495_v20  ;;  %v7531_v20 = vld [vmem:[%s7879_s6 + $0x238] ss:$216 sps:$4 sm:$0xff]  }
 0x12e   : > { %6784 = vmatpush3.bf16.msra.mxu0 %v7494_v17  ;;  %6813 = vmatprep.subr.bf16.mxu1 %v7497_v22  ;;  %v7530_v17 = vld [vmem:[%s9293_s1 + $0x990] sm:$0xff]   ;;  %v7533_v22 = vld [vmem:[%s9293_s1 + $0x9d8] sm:$0xff]  }
 0x12f   : > { %6785 = vmatprep.subr.bf16.mxu0 %v7496_v21  ;;  %v7532_v21 = vld [vmem:[%s9293_s1 + $0x958] sm:$0xff]  }
 0x131   : > { %6814 = vmatpush3.bf16.msra.mxu1 %v7499_v25  ;;  %v7536_v25 = vld [vmem:[%s9293_s1 + $0x960] sm:$0xff]  }
 0x132   : > { %6786 = vmatpush3.bf16.msra.mxu0 %v7498_v23  ;;  %6815 = vmatprep.subr.bf16.mxu1 %v7501_v30  ;;  %v7534_v23 = vld [vmem:[%s9293_s1 + $0x918] sm:$0xff]   ;;  %v7541_v30 = vld [vmem:[%s9293_s1 + $0x9e8] sm:$0xff]  }
 0x133   : > { %6787 = vmatprep.subr.bf16.mxu0 %v7500_v27  ;;  %v7538_v27 = vld [vmem:[%s9293_s1 + $0x920] sm:$0xff]  }
 0x135   : > { %6816 = vmatpush3.bf16.msra.mxu1 %v7503_v37 }
 0x136   : > { %6788 = vmatpush3.bf16.msra.mxu0 %v7502_v32 }
 0x137   : > { %6789 = vmatprep.subr.bf16.mxu0 %v7504_v39 }
 0x13a   : > { %6790 = vmatpush3.bf16.msra.mxu0 %v7506_v45  ;;  %v7547_v45 = vld [vmem:[%s9293_s1 + $0x9b0] sm:$0xff]  }
 0x13b   : > { %v6455_v24 = vpop.f32.mrb[16].mxu0  ;;  %6831 = vmatprep.subr.bf16.mxu0 %v7514_v55 }
 0x13c   : > { %v6456_v26 = vpop.f32.mrb[17].mxu0  ;;  %v6483_v28 = vpop.f32.mrb[16].mxu1 }
 0x13d   : > { %v6457_v29 = vadd.f32 %v6456_v26, %v6455_v24  ;;  %v6484_v31 = vpop.f32.mrb[17].mxu1  ;;  %v6458_v36 = vpop.f32.mrb[18].mxu0  ;;  %5157 = vmatmul.mubr.bf16.vlgmr.msra.gmra.mrb[64].mxu0 %v7508_v49  ;;  %v7535_v24 = vld [vmem:[%s9293_s1 + $0x998] sm:$0xff]   ;;  %v7537_v26 = vld [vmem:[%s9293_s1 + $0x9e0] sm:$0xff]  }
 0x13e   : > { %v6485_v35 = vadd.f32 %v6484_v31, %v6483_v28  ;;  %v6486_v38 = vpop.f32.mrb[18].mxu1  ;;  %v6459_v41 = vpop.f32.mrb[19].mxu0  ;;  %6832 = vmatpush3.bf16.msra.mxu0 %v7516_v59  ;;  %v7539_v28 = vld [vmem:[%s9293_s1 + $0x9a0] sm:$0xff]   ;;  %v7542_v31 = vld [vmem:[%s9293_s1 + $0x928] sm:$0xff]  }
 0x13f   : > { %v4571_v34 = vadd.f32 %v6457_v29, %v8624_v33  ;;  %v7505_v33 = vld [vmem:[%s9293_s1 + $0x8f8] sm:$0xff]   ;;  %v6460_v42 = vadd.f32 %v6459_v41, %v6458_v36  ;;  %v6487_v43 = vpop.f32.mrb[19].mxu1  ;;  %6833 = vmatprep.subr.bf16.mxu0 %v7518_v1  ;;  %v7540_v29 = vld [vmem:[%s9293_s1 + $0x968] sm:$0xff]   ;;  %v7544_v36 = vld [vmem:[%s9293_s1 + $0x970] sm:$0xff]  }
 0x140   : > { %v6488_v46 = vadd.f32 %v6487_v43, %v6486_v38  ;;  %6817 = vmatprep.subr.bf16.mxu1 %v7505_v33  ;;  %v7545_v38 = vld [vmem:[%s9293_s1 + $0x9f0] sm:$0xff]  }
 0x141   : > { %v8734_v40 = vadd.f32 %v6485_v35, %v4571_v34  ;;  %v4574_v48 = vadd.f32 %v6460_v42, %v8635_v44  ;;  %6818 = vmatpush3.bf16.msra.mxu1 %v7507_v47  ;;  %v7515_v44 = vld [vmem:[%s9293_s1 + $0x9c0] sm:$0xff]   ;;  %v7543_v34 = vld [vmem:[%s9293_s1 + $0x9a8] sm:$0xff]   ;;  %v7546_v33 = vld [vmem:[%s9293_s1 + $0x930] sm:$0xff]  }
 0x142   : > { %6859 = vmatprep.subr.bf16.mxu1 %v7515_v44 }
 0x143   : > { %v8748_v51 = vadd.f32 %v6488_v46, %v4574_v48  ;;  %v6461_v52 = vpop.f32.mrb[20].mxu0  ;;  %v7548_v48 = vld [vmem:[%s9293_s1 + $0x978] sm:$0xff]  }
 0x144   : > { %v6462_v56 = vpop.f32.mrb[21].mxu0  ;;  %5206 = vmatmul.mubr.bf16.vlgmr.msra.gmra.mrb[64].mxu1 %v7511_v53  ;;  %v6489_v63 = vpop.f32.mrb[20].mxu1 }
 0x145   : > { %v6463_v57 = vadd.f32 %v6462_v56, %v6461_v52  ;;  %v6464_v58 = vpop.f32.mrb[22].mxu0  ;;  %v6490_v3 = vpop.f32.mrb[21].mxu1  ;;  %6860 = vmatpush3.bf16.msra.mxu1 %v7517_v61  ;;  %5213 = vmatprep.mubr.bf16.mxu1 %v7527_v18  ;;  %v7551_v56 = vld [vmem:[%s9293_s1 + $0x9b8] sm:$0xff]  }
 0x146   : > { %v6465_v60 = vpop.f32.mrb[23].mxu0  ;;  %v6491_v6 = vadd.f32 %v6490_v3, %v6489_v63  ;;  %v6492_v8 = vpop.f32.mrb[22].mxu1  ;;  %6861 = vmatprep.subr.bf16.mxu1 %v7519_v4  ;;  %v7557_v61 = vld [vmem:[%s7879_s6 + $0x9c] ss:$216 sps:$4 sm:$0xff]  }
 0x147   : > { %v4579_v62 = vadd.f32 %v6463_v57, %v8662_v2  ;;  %v6466_v0 = vadd.f32 %v6465_v60, %v6464_v58  ;;  %v7520_v2 = vld [vmem:[%s9293_s1 + $0x908] sm:$0xff]   ;;  %v6493_v9 = vpop.f32.mrb[23].mxu1  ;;  %v7555_v60 = vld [vmem:[%s7879_s6 + $0x98] ss:$216 sps:$4 sm:$0xff]  }
 0x148   : > { %v6494_v12 = vadd.f32 %v6493_v9, %v6492_v8  ;;  %6834 = vmatpush3.bf16.msra.mxu0 %v7520_v2  ;;  %v7552_v57 = vld [vmem:[%s7879_s6 + $0x90] ss:$216 sps:$4 sm:$0xff]   ;;  %v7554_v58 = vld [vmem:[%s7879_s6 + $0x94] ss:$216 sps:$4 sm:$0xff]   ;;  %v7561_v2 = vld [vmem:[%s9293_s1 + $0xa80] sm:$0xff]  }
 0x149   : > { %v4582_v5 = vadd.f32 %v6466_v0, %v8669_v7  ;;  %v8778_v11 = vadd.f32 %v6491_v6, %v4579_v62  ;;  %v7522_v7 = vld [vmem:[%s7879_s6 + $0x234] ss:$216 sps:$4 sm:$0xff]   ;;  %6862 = vmatpush3.bf16.msra.mxu1 %v7521_v10  ;;  %6835 = vmatprep.subr.bf16.mxu0 %v7525_v14  ;;  %v7558_v0 = vld [vmem:[%s9293_s1 + $0xa40] sm:$0xff]  }
 0x14a   : > { %5164 = vmatprep.mubr.bf16.mxu0 %v7522_v7  ;;  %6863 = vmatprep.subr.bf16.mxu1 %v7526_v16  ;;  %v7562_v10 = vld [vmem:[%s9293_s1 + $0xa48] sm:$0xff]  }
 0x14b   : > { %v8785_v15 = vadd.f32 %v6494_v12, %v4582_v5  ;;  %5165 = vmatmul.mubr.bf16.gmra.mrb[68].mxu0 %v7524_v13  ;;  %v7560_v5 = vld [vmem:[%s9293_s1 + $0xa00] sm:$0xff]   ;;  %v7564_v16 = vld [vmem:[%s9293_s1 + $0xa08] sm:$0xff]  }
 0x14c   : > { %6836 = vmatpush3.bf16.msra.mxu0 %v7529_v19  ;;  %5214 = vmatmul.mubr.bf16.gmra.mrb[68].mxu1 %v7531_v20  ;;  %v7566_v20 = vld [vmem:[%s7879_s6 + $0x244] ss:$216 sps:$4 sm:$0xff]  }
 0x14d   : > { %6864 = vmatpush3.bf16.msra.mxu1 %v7530_v17  ;;  %6837 = vmatprep.subr.bf16.mxu0 %v7532_v21  ;;  %v7568_v21 = vld [vmem:[%s7879_s6 + $0x240] ss:$216 sps:$4 sm:$0xff]  }
 0x14e   : > { %6865 = vmatprep.subr.bf16.mxu1 %v7533_v22  ;;  %5254 = vmatprep.mubr.bf16.mxu0 %v7554_v58  ;;  %v7593_v58 = vld [vmem:[%s9293_s1 + $0xaf8] sm:$0xff]  }
 0x14f   : > { %5303 = vmatprep.mubr.bf16.mxu1 %v7557_v61 }
 0x150   : > { %6838 = vmatpush3.bf16.msra.mxu0 %v7534_v23  ;;  %v7569_v23 = vld [vmem:[%s9293_s1 + $0xa50] sm:$0xff]  }
 0x151   : > { %6866 = vmatpush3.bf16.msra.mxu1 %v7535_v24  ;;  %6839 = vmatprep.subr.bf16.mxu0 %v7536_v25  ;;  %v7570_v24 = vld [vmem:[%s9293_s1 + $0xad0] sm:$0xff]   ;;  %v7571_v25 = vld [vmem:[%s7879_s6 + $0x24c] ss:$216 sps:$4 sm:$0xff]  }
 0x152   : > { %6867 = vmatprep.subr.bf16.mxu1 %v7537_v26  ;;  %v7573_v26 = vld [vmem:[%s9293_s1 + $0xa10] sm:$0xff]  }
 0x154   : > { %6840 = vmatpush3.bf16.msra.mxu0 %v7538_v27  ;;  %v7574_v27 = vld [vmem:[%s9293_s1 + $0xa90] sm:$0xff]  }
 0x155   : > { %6868 = vmatpush3.bf16.msra.mxu1 %v7539_v28  ;;  %6841 = vmatprep.subr.bf16.mxu0 %v7540_v29  ;;  %v7575_v28 = vld [vmem:[%s7879_s6 + $0x248] ss:$216 sps:$4 sm:$0xff]   ;;  %v7576_v29 = vld [vmem:[%s9293_s1 + $0xa58] sm:$0xff]  }
 0x156   : > { %6869 = vmatprep.subr.bf16.mxu1 %v7541_v30  ;;  %v7577_v30 = vld [vmem:[%s9293_s1 + $0xad8] sm:$0xff]  }
 0x158   : > { %6842 = vmatpush3.bf16.msra.mxu0 %v7542_v31  ;;  %v7578_v31 = vld [vmem:[%s9293_s1 + $0xa18] sm:$0xff]  }
 0x159   : > { %6870 = vmatpush3.bf16.msra.mxu1 %v7543_v34  ;;  %6843 = vmatprep.subr.bf16.mxu0 %v7544_v36  ;;  %v7580_v34 = vld [vmem:[%s9293_s1 + $0xa60] sm:$0xff]  }
 0x15a   : > { %6871 = vmatprep.subr.bf16.mxu1 %v7545_v38  ;;  %v7582_v36 = vld [vmem:[%s9293_s1 + $0xa20] sm:$0xff]   ;;  %v7584_v38 = vld [vmem:[%s9293_s1 + $0xa68] sm:$0xff]  }
 0x15b   : > { %v6511_v32 = vpop.f32.mrb[24].mxu0 }
 0x15c   : > { %v6539_v35 = vpop.f32.mrb[24].mxu1  ;;  %v6512_v37 = vpop.f32.mrb[25].mxu0  ;;  %6844 = vmatpush3.bf16.msra.mxu0 %v7546_v33 }
 0x15d   : > { %v6513_v39 = vadd.f32 %v6512_v37, %v6511_v32  ;;  %v6540_v41 = vpop.f32.mrb[25].mxu1  ;;  %v6514_v43 = vpop.f32.mrb[26].mxu0  ;;  %6872 = vmatpush3.bf16.msra.mxu1 %v7547_v45  ;;  %6845 = vmatprep.subr.bf16.mxu0 %v7548_v48  ;;  %v7579_v32 = vld [vmem:[%s9293_s1 + $0xa98] sm:$0xff]   ;;  %v7583_v37 = vld [vmem:[%s9293_s1 + $0xaa0] sm:$0xff]   ;;  %v7588_v45 = vld [vmem:[%s9293_s1 + $0xa70] sm:$0xff]  }
 0x15e   : > { %v6541_v42 = vadd.f32 %v6540_v41, %v6539_v35  ;;  %v6542_v47 = vpop.f32.mrb[26].mxu1  ;;  %v6515_v49 = vpop.f32.mrb[27].mxu0  ;;  %6873 = vmatprep.subr.bf16.mxu1 %v7549_v50  ;;  %v7581_v35 = vld [vmem:[%s9293_s1 + $0xae0] sm:$0xff]   ;;  %v7586_v41 = vld [vmem:[%s9293_s1 + $0xa28] sm:$0xff]   ;;  %v7590_v50 = vld [vmem:[%s9293_s1 + $0xa30] sm:$0xff]  }
 0x15f   : > { %v4669_v46 = vadd.f32 %v6513_v39, %v8734_v40  ;;  %v6516_v53 = vadd.f32 %v6515_v49, %v6514_v43  ;;  %v6543_v40 = vpop.f32.mrb[27].mxu1  ;;  %v7585_v39 = vld [vmem:[%s9293_s1 + $0xae8] sm:$0xff]  }
 0x160   : > { %v6544_v55 = vadd.f32 %v6543_v40, %v6542_v47  ;;  %6846 = vmatpush3.bf16.msra.mxu0 %v7550_v54  ;;  %v7589_v47 = vld [vmem:[%s9293_s1 + $0xaf0] sm:$0xff]  }
 0x161   : > { %v8853_v52 = vadd.f32 %v6541_v42, %v4669_v46  ;;  %v4672_v44 = vadd.f32 %v6516_v53, %v8748_v51  ;;  %6874 = vmatpush3.bf16.msra.mxu1 %v7551_v56  ;;  %v7559_v51 = vld [vmem:[%s9293_s1 + $0xac0] sm:$0xff]   ;;  %6887 = vmatprep.subr.bf16.mxu0 %v7558_v0  ;;  %v7587_v42 = vld [vmem:[%s9293_s1 + $0xaa8] sm:$0xff]   ;;  %v7591_v54 = vld [vmem:[%s9293_s1 + $0xab0] sm:$0xff]  }
 0x162   : > { %6915 = vmatprep.subr.bf16.mxu1 %v7559_v51  ;;  %v7595_v0 = vld [vmem:[%s9293_s1 + $0xab8] sm:$0xff]  }
 0x163   : > { %v6517_v59 = vpop.f32.mrb[28].mxu0  ;;  %v8866_v62 = vadd.f32 %v6544_v55, %v4672_v44  ;;  %5255 = vmatmul.mubr.bf16.vlgmr.msra.gmra.mrb[72].mxu0 %v7552_v57  ;;  %v7592_v44 = vld [vmem:[%s9293_s1 + $0xa78] sm:$0xff]  }
 0x164   : > { %v6518_v63 = vpop.f32.mrb[29].mxu0  ;;  %5304 = vmatmul.mubr.bf16.vlgmr.msra.gmra.mrb[72].mxu1 %v7555_v60  ;;  %v6545_v9 = vpop.f32.mrb[28].mxu1  ;;  %6888 = vmatpush3.bf16.msra.mxu0 %v7560_v5  ;;  %v7598_v51 = vld [vmem:[%s7879_s6 + $0xa4] ss:$216 sps:$4 sm:$0xff]   ;;  %v7599_v5 = vld [vmem:[%s7879_s6 + $0xa8] ss:$216 sps:$4 sm:$0xff]  }
 0x165   : > { %v6519_v1 = vadd.f32 %v6518_v63, %v6517_v59  ;;  %v6520_v3 = vpop.f32.mrb[30].mxu0  ;;  %v6546_v7 = vpop.f32.mrb[29].mxu1  ;;  %6916 = vmatpush3.bf16.msra.mxu1 %v7561_v2  ;;  %6889 = vmatprep.subr.bf16.mxu0 %v7562_v10  ;;  %v7601_v2 = vld [vmem:[%s7879_s6 + $0xac] ss:$216 sps:$4 sm:$0xff]  }
 0x166   : > { %v6521_v4 = vpop.f32.mrb[31].mxu0  ;;  %v6547_v13 = vadd.f32 %v6546_v7, %v6545_v9  ;;  %v6548_v14 = vpop.f32.mrb[30].mxu1  ;;  %5262 = vmatprep.mubr.bf16.mxu0 %v7566_v20  ;;  %5311 = vmatprep.mubr.bf16.mxu1 %v7571_v25  ;;  %v7602_v10 = vld [vmem:[%s9293_s1 + $0xb40] sm:$0xff]   ;;  %v7607_v20 = vld [vmem:[%s9293_s1 + $0xbc8] sm:$0xff]  }
 0x167   : > { %v4677_v6 = vadd.f32 %v6519_v1, %v8778_v11  ;;  %v6522_v8 = vadd.f32 %v6521_v4, %v6520_v3  ;;  %v7563_v11 = vld [vmem:[%s9293_s1 + $0xac8] sm:$0xff]   ;;  %v6549_v18 = vpop.f32.mrb[31].mxu1  ;;  %v7596_v3 = vld [vmem:[%s7879_s6 + $0xa0] ss:$216 sps:$4 sm:$0xff]  }
 0x168   : > { %6917 = vmatprep.subr.bf16.mxu1 %v7563_v11  ;;  %v6550_v17 = vadd.f32 %v6549_v18, %v6548_v14  ;;  %6890 = vmatpush3.bf16.msra.mxu0 %v7564_v16  ;;  %v7605_v16 = vld [vmem:[%s9293_s1 + $0xb80] sm:$0xff]  }
 0x169   : > { %v4680_v12 = vadd.f32 %v6522_v8, %v8785_v15  ;;  %v7565_v15 = vld [vmem:[%s9293_s1 + $0xa88] sm:$0xff]   ;;  %v8894_v19 = vadd.f32 %v6547_v13, %v4677_v6  ;;  %6891 = vmatprep.subr.bf16.mxu0 %v7569_v23  ;;  %v7604_v13 = vld [vmem:[%s9293_s1 + $0xb00] sm:$0xff]  }
 0x16a   : > { %6918 = vmatpush3.bf16.msra.mxu1 %v7565_v15  ;;  %v7606_v15 = vld [vmem:[%s9293_s1 + $0xb48] sm:$0xff]  }
 0x16b   : > { %v8898_v22 = vadd.f32 %v6550_v17, %v4680_v12  ;;  %5263 = vmatmul.mubr.bf16.gmra.mrb[76].mxu0 %v7568_v21  ;;  %6919 = vmatprep.subr.bf16.mxu1 %v7570_v24  ;;  %v7608_v24 = vld [vmem:[%s9293_s1 + $0xb08] sm:$0xff]  }
 0x16c   : > { %6892 = vmatpush3.bf16.msra.mxu0 %v7573_v26  ;;  %5312 = vmatmul.mubr.bf16.gmra.mrb[76].mxu1 %v7575_v28  ;;  %v7610_v28 = vld [vmem:[%s7879_s6 + $0x254] ss:$216 sps:$4 sm:$0xff]  }
 0x16d   : > { %6893 = vmatprep.subr.bf16.mxu0 %v7576_v29  ;;  %5352 = vmatprep.mubr.bf16.mxu0 %v7598_v51  ;;  %v7612_v29 = vld [vmem:[%s7879_s6 + $0x250] ss:$216 sps:$4 sm:$0xff]  }
 0x16e   : > { %6920 = vmatpush3.bf16.msra.mxu1 %v7574_v27  ;;  %5401 = vmatprep.mubr.bf16.mxu1 %v7601_v2 }
 0x16f   : > { %6921 = vmatprep.subr.bf16.mxu1 %v7577_v30  ;;  %v7613_v30 = vld [vmem:[%s9293_s1 + $0xb50] sm:$0xff]  }
 0x170   : > { %6894 = vmatpush3.bf16.msra.mxu0 %v7578_v31 }
 0x171   : > { %6895 = vmatprep.subr.bf16.mxu0 %v7580_v34  ;;  %v7615_v34 = vld [vmem:[%s7879_s6 + $0x25c] ss:$216 sps:$4 sm:$0xff]  }
 0x172   : > { %6922 = vmatpush3.bf16.msra.mxu1 %v7579_v32  ;;  %v7614_v32 = vld [vmem:[%s9293_s1 + $0xbd0] sm:$0xff]  }
 0x173   : > { %6923 = vmatprep.subr.bf16.mxu1 %v7581_v35  ;;  %v7617_v35 = vld [vmem:[%s9293_s1 + $0xb10] sm:$0xff]  }
 0x174   : > { %6896 = vmatpush3.bf16.msra.mxu0 %v7582_v36  ;;  %v7618_v36 = vld [vmem:[%s9293_s1 + $0xb90] sm:$0xff]  }
 0x175   : > { %6897 = vmatprep.subr.bf16.mxu0 %v7584_v38  ;;  %v7620_v38 = vld [vmem:[%s9293_s1 + $0xb58] sm:$0xff]  }
 0x176   : > { %6924 = vmatpush3.bf16.msra.mxu1 %v7583_v37  ;;  %v7619_v37 = vld [vmem:[%s7879_s6 + $0x258] ss:$216 sps:$4 sm:$0xff]  }
 0x177   : > { %6925 = vmatprep.subr.bf16.mxu1 %v7585_v39  ;;  %v7621_v39 = vld [vmem:[%s9293_s1 + $0xbd8] sm:$0xff]  }
 0x178   : > { %6898 = vmatpush3.bf16.msra.mxu0 %v7586_v41  ;;  %v7622_v41 = vld [vmem:[%s9293_s1 + $0xb18] sm:$0xff]  }
 0x179   : > { %6899 = vmatprep.subr.bf16.mxu0 %v7588_v45  ;;  %v7626_v45 = vld [vmem:[%s9293_s1 + $0xb20] sm:$0xff]  }
 0x17a   : > { %6926 = vmatpush3.bf16.msra.mxu1 %v7587_v42  ;;  %v7624_v42 = vld [vmem:[%s9293_s1 + $0xb60] sm:$0xff]  }
 0x17b   : > { %v6567_v33 = vpop.f32.mrb[32].mxu0  ;;  %6927 = vmatprep.subr.bf16.mxu1 %v7589_v47  ;;  %v7628_v47 = vld [vmem:[%s9293_s1 + $0xb68] sm:$0xff]  }
 0x17c   : > { %v6595_v43 = vpop.f32.mrb[32].mxu1  ;;  %v6568_v46 = vpop.f32.mrb[33].mxu0  ;;  %6900 = vmatpush3.bf16.msra.mxu0 %v7590_v50 }
 0x17d   : > { %v6569_v48 = vadd.f32 %v6568_v46, %v6567_v33  ;;  %v6596_v49 = vpop.f32.mrb[33].mxu1  ;;  %v6570_v40 = vpop.f32.mrb[34].mxu0  ;;  %6901 = vmatprep.subr.bf16.mxu0 %v7592_v44  ;;  %v7623_v33 = vld [vmem:[%s9293_s1 + $0xb98] sm:$0xff]   ;;  %v7627_v46 = vld [vmem:[%s9293_s1 + $0xba0] sm:$0xff]   ;;  %v7633_v44 = vld [vmem:[%s9293_s1 + $0xbf0] sm:$0xff]  }
 0x17e   : > { %v6597_v53 = vadd.f32 %v6596_v49, %v6595_v43  ;;  %v6598_v56 = vpop.f32.mrb[34].mxu1  ;;  %v6571_v57 = vpop.f32.mrb[35].mxu0  ;;  %6928 = vmatpush3.bf16.msra.mxu1 %v7591_v54  ;;  %v7625_v43 = vld [vmem:[%s9293_s1 + $0xbe0] sm:$0xff]   ;;  %v7630_v49 = vld [vmem:[%s9293_s1 + $0xb28] sm:$0xff]   ;;  %v7632_v54 = vld [vmem:[%s9293_s1 + $0xb70] sm:$0xff]  }
 0x17f   : > { %v4767_v55 = vadd.f32 %v6569_v48, %v8853_v52  ;;  %v6572_v60 = vadd.f32 %v6571_v57, %v6570_v40  ;;  %v6599_v61 = vpop.f32.mrb[35].mxu1  ;;  %v7594_v52 = vld [vmem:[%s9293_s1 + $0xa38] sm:$0xff]   ;;  %6929 = vmatprep.subr.bf16.mxu1 %v7593_v58  ;;  %v7629_v48 = vld [vmem:[%s9293_s1 + $0xbe8] sm:$0xff]   ;;  %v7634_v58 = vld [vmem:[%s9293_s1 + $0xb30] sm:$0xff]  }
 0x180   : > { %v6600_v63 = vadd.f32 %v6599_v61, %v6598_v56  ;;  %6902 = vmatpush3.bf16.msra.mxu0 %v7594_v52 }
 0x181   : > { %v8969_v59 = vadd.f32 %v6597_v53, %v4767_v55  ;;  %v4770_v1 = vadd.f32 %v6572_v60, %v8866_v62  ;;  %v7603_v62 = vld [vmem:[%s9293_s1 + $0xbc0] sm:$0xff]   ;;  %6943 = vmatprep.subr.bf16.mxu0 %v7602_v10  ;;  %v7631_v53 = vld [vmem:[%s9293_s1 + $0xba8] sm:$0xff]  }
 0x182   : > { %6930 = vmatpush3.bf16.msra.mxu1 %v7595_v0 }
 0x183   : > { %v6573_v4 = vpop.f32.mrb[36].mxu0  ;;  %v8981_v6 = vadd.f32 %v6600_v63, %v4770_v1  ;;  %5353 = vmatmul.mubr.bf16.vlgmr.msra.gmra.mrb[80].mxu0 %v7596_v3  ;;  %6971 = vmatprep.subr.bf16.mxu1 %v7603_v62  ;;  %v7635_v63 = vld [vmem:[%s9293_s1 + $0xbb0] sm:$0xff]   ;;  %v7636_v1 = vld [vmem:[%s9293_s1 + $0xb78] sm:$0xff]  }
 0x184   : > { %v6574_v8 = vpop.f32.mrb[37].mxu0  ;;  %v6601_v18 = vpop.f32.mrb[36].mxu1  ;;  %6944 = vmatpush3.bf16.msra.mxu0 %v7604_v13  ;;  %5360 = vmatprep.mubr.bf16.mxu0 %v7610_v28  ;;  %v7642_v62 = vld [vmem:[%s7879_s6 + $0xb4] ss:$216 sps:$4 sm:$0xff]   ;;  %v7643_v13 = vld [vmem:[%s7879_s6 + $0xb8] ss:$216 sps:$4 sm:$0xff]  }
 0x185   : > { %v6575_v9 = vadd.f32 %v6574_v8, %v6573_v4  ;;  %v6576_v12 = vpop.f32.mrb[38].mxu0  ;;  %5402 = vmatmul.mubr.bf16.vlgmr.msra.gmra.mrb[80].mxu1 %v7599_v5  ;;  %v6602_v17 = vpop.f32.mrb[37].mxu1  ;;  %6945 = vmatprep.subr.bf16.mxu0 %v7606_v15  ;;  %v7638_v8 = vld [vmem:[%s9293_s1 + $0xb38] sm:$0xff]   ;;  %v7651_v28 = vld [vmem:[%s9293_s1 + $0xcc8] sm:$0xff]  }
 0x186   : > { %v6577_v11 = vpop.f32.mrb[39].mxu0  ;;  %6972 = vmatpush3.bf16.msra.mxu1 %v7605_v16  ;;  %v6603_v21 = vadd.f32 %v6602_v17, %v6601_v18  ;;  %v6604_v23 = vpop.f32.mrb[38].mxu1  ;;  %5409 = vmatprep.mubr.bf16.mxu1 %v7615_v34  ;;  %v7646_v16 = vld [vmem:[%s9293_s1 + $0xc40] sm:$0xff]  }
 0x187   : > { %v4775_v7 = vadd.f32 %v6575_v9, %v8894_v19  ;;  %v6578_v14 = vadd.f32 %v6577_v11, %v6576_v12  ;;  %v6605_v25 = vpop.f32.mrb[39].mxu1  ;;  %6973 = vmatprep.subr.bf16.mxu1 %v7607_v20  ;;  %v7639_v9 = vld [vmem:[%s9293_s1 + $0xbb8] sm:$0xff]   ;;  %v7640_v12 = vld [vmem:[%s7879_s6 + $0xb0] ss:$216 sps:$4 sm:$0xff]   ;;  %v7648_v17 = vld [vmem:[%s9293_s1 + $0xc00] sm:$0xff]  }
 0x188   : > { %v6606_v27 = vadd.f32 %v6605_v25, %v6604_v23  ;;  %6946 = vmatpush3.bf16.msra.mxu0 %v7608_v24 }
 0x189   : > { %v4778_v19 = vadd.f32 %v6578_v14, %v8898_v22  ;;  %v7609_v22 = vld [vmem:[%s9293_s1 + $0xb88] sm:$0xff]   ;;  %v9010_v26 = vadd.f32 %v6603_v21, %v4775_v7  ;;  %6947 = vmatprep.subr.bf16.mxu0 %v7613_v30  ;;  %v7645_v14 = vld [vmem:[%s7879_s6 + $0xbc] ss:$216 sps:$4 sm:$0xff]   ;;  %v7649_v21 = vld [vmem:[%s9293_s1 + $0xc80] sm:$0xff]  }
 0x18a   : > { %6974 = vmatpush3.bf16.msra.mxu1 %v7609_v22  ;;  %v7650_v22 = vld [vmem:[%s9293_s1 + $0xc48] sm:$0xff]  }
 0x18b   : > { %v9017_v31 = vadd.f32 %v6606_v27, %v4778_v19  ;;  %5361 = vmatmul.mubr.bf16.gmra.mrb[84].mxu0 %v7612_v29  ;;  %6975 = vmatprep.subr.bf16.mxu1 %v7614_v32 }
 0x18c   : > { %6948 = vmatpush3.bf16.msra.mxu0 %v7617_v35  ;;  %5450 = vmatprep.mubr.bf16.mxu0 %v7642_v62  ;;  %v7653_v35 = vld [vmem:[%s9293_s1 + $0xc88] sm:$0xff]   ;;  %v7681_v62 = vld [vmem:[%s9293_s1 + $0xcf8] sm:$0xff]  }
 0x18d   : > { %5410 = vmatmul.mubr.bf16.gmra.mrb[84].mxu1 %v7619_v37  ;;  %6949 = vmatprep.subr.bf16.mxu0 %v7620_v38  ;;  %v7656_v38 = vld [vmem:[%s7879_s6 + $0x260] ss:$216 sps:$4 sm:$0xff]  }
 0x18e   : > { %6976 = vmatpush3.bf16.msra.mxu1 %v7618_v36  ;;  %5499 = vmatprep.mubr.bf16.mxu1 %v7645_v14  ;;  %v7682_v14 = vld [vmem:[%s9293_s1 + $0xc38] sm:$0xff]  }
 0x18f   : > { %6977 = vmatprep.subr.bf16.mxu1 %v7621_v39  ;;  %v7657_v39 = vld [vmem:[%s9293_s1 + $0xc50] sm:$0xff]  }
 0x190   : > { %6950 = vmatpush3.bf16.msra.mxu0 %v7622_v41 }
 0x191   : > { %6951 = vmatprep.subr.bf16.mxu0 %v7624_v42  ;;  %v7659_v42 = vld [vmem:[%s7879_s6 + $0x26c] ss:$216 sps:$4 sm:$0xff]  }
 0x192   : > { %6978 = vmatpush3.bf16.msra.mxu1 %v7623_v33  ;;  %v7658_v33 = vld [vmem:[%s9293_s1 + $0xcd0] sm:$0xff]  }
 0x193   : > { %6979 = vmatprep.subr.bf16.mxu1 %v7625_v43  ;;  %v7661_v43 = vld [vmem:[%s9293_s1 + $0xc10] sm:$0xff]  }
 0x194   : > { %6952 = vmatpush3.bf16.msra.mxu0 %v7626_v45  ;;  %v7662_v45 = vld [vmem:[%s9293_s1 + $0xc90] sm:$0xff]  }
 0x195   : > { %6953 = vmatprep.subr.bf16.mxu0 %v7628_v47  ;;  %v7664_v47 = vld [vmem:[%s9293_s1 + $0xc58] sm:$0xff]  }
 0x196   : > { %6980 = vmatpush3.bf16.msra.mxu1 %v7627_v46  ;;  %v7663_v46 = vld [vmem:[%s7879_s6 + $0x268] ss:$216 sps:$4 sm:$0xff]  }
 0x197   : > { %6981 = vmatprep.subr.bf16.mxu1 %v7629_v48  ;;  %v7665_v48 = vld [vmem:[%s9293_s1 + $0xcd8] sm:$0xff]  }
 0x198   : > { %6954 = vmatpush3.bf16.msra.mxu0 %v7630_v49  ;;  %v7666_v49 = vld [vmem:[%s9293_s1 + $0xc18] sm:$0xff]  }
 0x199   : > { %6955 = vmatprep.subr.bf16.mxu0 %v7632_v54  ;;  %v7670_v54 = vld [vmem:[%s9293_s1 + $0xc20] sm:$0xff]  }
 0x19a   : > { %6982 = vmatpush3.bf16.msra.mxu1 %v7631_v53  ;;  %v7668_v53 = vld [vmem:[%s9293_s1 + $0xc60] sm:$0xff]  }
 0x19b   : > { %v6623_v50 = vpop.f32.mrb[40].mxu0  ;;  %6983 = vmatprep.subr.bf16.mxu1 %v7633_v44  ;;  %v7673_v44 = vld [vmem:[%s9293_s1 + $0xce8] sm:$0xff]  }
 0x19c   : > { %v6624_v40 = vpop.f32.mrb[41].mxu0  ;;  %v6651_v55 = vpop.f32.mrb[40].mxu1  ;;  %6956 = vmatpush3.bf16.msra.mxu0 %v7634_v58 }
 0x19d   : > { %v6625_v56 = vadd.f32 %v6624_v40, %v6623_v50  ;;  %v6652_v57 = vpop.f32.mrb[41].mxu1  ;;  %v6626_v52 = vpop.f32.mrb[42].mxu0  ;;  %6957 = vmatprep.subr.bf16.mxu0 %v7636_v1  ;;  %v7667_v50 = vld [vmem:[%s9293_s1 + $0xc98] sm:$0xff]   ;;  %v7669_v40 = vld [vmem:[%s9293_s1 + $0xce0] sm:$0xff]  }
 0x19e   : > { %v6653_v61 = vadd.f32 %v6652_v57, %v6651_v55  ;;  %v6654_v0 = vpop.f32.mrb[42].mxu1  ;;  %v6627_v51 = vpop.f32.mrb[43].mxu0  ;;  %6984 = vmatpush3.bf16.msra.mxu1 %v7635_v63  ;;  %v7671_v55 = vld [vmem:[%s9293_s1 + $0xca0] sm:$0xff]   ;;  %v7674_v57 = vld [vmem:[%s9293_s1 + $0xc28] sm:$0xff]  }
 0x19f   : > { %v4865_v60 = vadd.f32 %v6625_v56, %v8969_v59  ;;  %v7637_v59 = vld [vmem:[%s9293_s1 + $0xbf8] sm:$0xff]   ;;  %v6628_v4 = vadd.f32 %v6627_v51, %v6626_v52  ;;  %v6655_v5 = vpop.f32.mrb[43].mxu1  ;;  %v7672_v56 = vld [vmem:[%s9293_s1 + $0xc68] sm:$0xff]   ;;  %v7676_v52 = vld [vmem:[%s9293_s1 + $0xc70] sm:$0xff]  }
 0x1a0   : > { %v6656_v2 = vadd.f32 %v6655_v5, %v6654_v0  ;;  %6985 = vmatprep.subr.bf16.mxu1 %v7637_v59  ;;  %6958 = vmatpush3.bf16.msra.mxu0 %v7638_v8  ;;  %v7677_v0 = vld [vmem:[%s9293_s1 + $0xcf0] sm:$0xff]  }
 0x1a1   : > { %v9082_v3 = vadd.f32 %v6653_v61, %v4865_v60  ;;  %v4868_v10 = vadd.f32 %v6628_v4, %v8981_v6  ;;  %v7647_v6 = vld [vmem:[%s9293_s1 + $0xcc0] sm:$0xff]   ;;  %6999 = vmatprep.subr.bf16.mxu0 %v7646_v16  ;;  %v7675_v60 = vld [vmem:[%s9293_s1 + $0xca8] sm:$0xff]   ;;  %v7678_v59 = vld [vmem:[%s9293_s1 + $0xc30] sm:$0xff]  }
 0x1a2   : > { %6986 = vmatpush3.bf16.msra.mxu1 %v7639_v9  ;;  %v7679_v8 = vld [vmem:[%s9293_s1 + $0xcb0] sm:$0xff]  }
 0x1a3   : > { %v9096_v7 = vadd.f32 %v6656_v2, %v4868_v10  ;;  %v6629_v11 = vpop.f32.mrb[44].mxu0  ;;  %5451 = vmatmul.mubr.bf16.vlgmr.msra.gmra.mrb[88].mxu0 %v7640_v12  ;;  %7027 = vmatprep.subr.bf16.mxu1 %v7647_v6  ;;  %v7680_v10 = vld [vmem:[%s9293_s1 + $0xc78] sm:$0xff]  }
 0x1a4   : > { %v6630_v18 = vpop.f32.mrb[45].mxu0  ;;  %v6657_v24 = vpop.f32.mrb[44].mxu1  ;;  %7000 = vmatpush3.bf16.msra.mxu0 %v7648_v17 }
 0x1a5   : > { %v6631_v15 = vadd.f32 %v6630_v18, %v6629_v11  ;;  %v6632_v19 = vpop.f32.mrb[46].mxu0  ;;  %5500 = vmatmul.mubr.bf16.vlgmr.msra.gmra.mrb[88].mxu1 %v7643_v13  ;;  %v6658_v27 = vpop.f32.mrb[45].mxu1  ;;  %7001 = vmatprep.subr.bf16.mxu0 %v7650_v22  ;;  %v7683_v18 = vld [vmem:[%s9293_s1 + $0xcb8] sm:$0xff]  }
 0x1a6   : > { %v6633_v20 = vpop.f32.mrb[47].mxu0  ;;  %7028 = vmatpush3.bf16.msra.mxu1 %v7649_v21  ;;  %v6659_v30 = vadd.f32 %v6658_v27, %v6657_v24  ;;  %v6660_v32 = vpop.f32.mrb[46].mxu1  ;;  %5507 = vmatprep.mubr.bf16.mxu1 %v7659_v42  ;;  %v7689_v21 = vld [vmem:[%s7879_s6 + $0xcc] ss:$216 sps:$4 sm:$0xff]   ;;  %v7698_v42 = vld [vmem:[%s7879_s6 + $0x27c] ss:$216 sps:$4 sm:$0xff]  }
 0x1a7   : > { %v4873_v23 = vadd.f32 %v6631_v15, %v9010_v26  ;;  %v6634_v25 = vadd.f32 %v6633_v20, %v6632_v19  ;;  %v7652_v26 = vld [vmem:[%s9293_s1 + $0xc08] sm:$0xff]   ;;  %v6661_v34 = vpop.f32.mrb[47].mxu1  ;;  %7029 = vmatprep.subr.bf16.mxu1 %v7651_v28  ;;  %v7684_v15 = vld [vmem:[%s7879_s6 + $0xc0] ss:$216 sps:$4 sm:$0xff]   ;;  %v7686_v19 = vld [vmem:[%s7879_s6 + $0xc4] ss:$216 sps:$4 sm:$0xff]  }
 0x1a8   : > { %v6662_v37 = vadd.f32 %v6661_v34, %v6660_v32  ;;  %7002 = vmatpush3.bf16.msra.mxu0 %v7652_v26  ;;  %v7687_v20 = vld [vmem:[%s7879_s6 + $0xc8] ss:$216 sps:$4 sm:$0xff]  }
 0x1a9   : > { %v4876_v29 = vadd.f32 %v6634_v25, %v9017_v31  ;;  %v9126_v36 = vadd.f32 %v6659_v30, %v4873_v23  ;;  %v7654_v31 = vld [vmem:[%s7879_s6 + $0x264] ss:$216 sps:$4 sm:$0xff]   ;;  %7003 = vmatprep.subr.bf16.mxu0 %v7657_v39  ;;  %v7693_v26 = vld [vmem:[%s9293_s1 + $0xd08] sm:$0xff]  }
 0x1aa   : > { %7030 = vmatpush3.bf16.msra.mxu1 %v7653_v35  ;;  %5458 = vmatprep.mubr.bf16.mxu0 %v7654_v31  ;;  %v7690_v25 = vld [vmem:[%s9293_s1 + $0xd40] sm:$0xff]   ;;  %v7694_v35 = vld [vmem:[%s7879_s6 + $0x274] ss:$216 sps:$4 sm:$0xff]  }
 0x1ab   : > { %v9133_v41 = vadd.f32 %v6662_v37, %v4876_v29  ;;  %5459 = vmatmul.mubr.bf16.gmra.mrb[92].mxu0 %v7656_v38  ;;  %7031 = vmatprep.subr.bf16.mxu1 %v7658_v33  ;;  %v7692_v29 = vld [vmem:[%s9293_s1 + $0xd48] sm:$0xff]  }
 0x1ac   : > { %7004 = vmatpush3.bf16.msra.mxu0 %v7661_v43  ;;  %5548 = vmatprep.mubr.bf16.mxu0 %v7686_v19  ;;  %v7696_v38 = vld [vmem:[%s7879_s6 + $0x270] ss:$216 sps:$4 sm:$0xff]  }
 0x1ad   : > { %5508 = vmatmul.mubr.bf16.gmra.mrb[92].mxu1 %v7663_v46  ;;  %7005 = vmatprep.subr.bf16.mxu0 %v7664_v47  ;;  %v7702_v47 = vld [vmem:[%s9293_s1 + $0xd58] sm:$0xff]  }
 0x1ae   : > { %7032 = vmatpush3.bf16.msra.mxu1 %v7662_v45  ;;  %5597 = vmatprep.mubr.bf16.mxu1 %v7689_v21  ;;  %v7701_v45 = vld [vmem:[%s7879_s6 + $0x278] ss:$216 sps:$4 sm:$0xff]  }
 0x1af   : > { %7033 = vmatprep.subr.bf16.mxu1 %v7665_v48 }
 0x1b0   : > { %7006 = vmatpush3.bf16.msra.mxu0 %v7666_v49  ;;  %v7703_v49 = vld [vmem:[%s9293_s1 + $0xd18] sm:$0xff]  }
 0x1b1   : > { %7007 = vmatprep.subr.bf16.mxu0 %v7668_v53  ;;  %v7704_v53 = vld [vmem:[%s9293_s1 + $0xd60] sm:$0xff]  }
 0x1b2   : > { %7034 = vmatpush3.bf16.msra.mxu1 %v7667_v50 }
 0x1b3   : > { %7035 = vmatprep.subr.bf16.mxu1 %v7669_v40  ;;  %v7705_v40 = vld [vmem:[%s9293_s1 + $0xd20] sm:$0xff]  }
 0x1b4   : > { %7008 = vmatpush3.bf16.msra.mxu0 %v7670_v54  ;;  %v7706_v54 = vld [vmem:[%s9293_s1 + $0xd68] sm:$0xff]  }
 0x1b5   : > { %7009 = vmatprep.subr.bf16.mxu0 %v7672_v56  ;;  %v7714_v56 = vld [vmem:[%s7879_s6 + $0xd4] ss:$216 sps:$4 sm:$0xff]  }
 0x1b6   : > { %7036 = vmatpush3.bf16.msra.mxu1 %v7671_v55  ;;  %v7707_v55 = vld [vmem:[%s9293_s1 + $0xd28] sm:$0xff]  }
 0x1b7   : > { %7037 = vmatprep.subr.bf16.mxu1 %v7673_v44  ;;  %v7708_v44 = vld [vmem:[%s9293_s1 + $0xd70] sm:$0xff]  }
 0x1b8   : > { %7010 = vmatpush3.bf16.msra.mxu0 %v7674_v57  ;;  %v7717_v57 = vld [vmem:[%s7879_s6 + $0x284] ss:$216 sps:$4 sm:$0xff]  }
 0x1b9   : > { %7011 = vmatprep.subr.bf16.mxu0 %v7676_v52 }
 0x1ba   : > { %7038 = vmatpush3.bf16.msra.mxu1 %v7675_v60  ;;  %v7710_v60 = vld [vmem:[%s9293_s1 + $0xd78] sm:$0xff]  }
 0x1bb   : > { %v6679_v58 = vpop.f32.mrb[48].mxu0  ;;  %7039 = vmatprep.subr.bf16.mxu1 %v7677_v0 }
 0x1bc   : > { %v6707_v61 = vpop.f32.mrb[48].mxu1  ;;  %v6680_v63 = vpop.f32.mrb[49].mxu0  ;;  %7012 = vmatpush3.bf16.msra.mxu0 %v7678_v59 }
 0x1bd   : > { %v6681_v1 = vadd.f32 %v6680_v63, %v6679_v58  ;;  %v6708_v51 = vpop.f32.mrb[49].mxu1  ;;  %v6682_v5 = vpop.f32.mrb[50].mxu0  ;;  %7013 = vmatprep.subr.bf16.mxu0 %v7680_v10  ;;  %v7709_v58 = vld [vmem:[%s9293_s1 + $0xd30] sm:$0xff]   ;;  %v7711_v63 = vld [vmem:[%s9293_s1 + $0xd38] sm:$0xff]  }
 0x1be   : > { %v6709_v4 = vadd.f32 %v6708_v51, %v6707_v61  ;;  %v6710_v9 = vpop.f32.mrb[50].mxu1  ;;  %v6683_v12 = vpop.f32.mrb[51].mxu0  ;;  %7040 = vmatpush3.bf16.msra.mxu1 %v7679_v8  ;;  %v7712_v10 = vld [vmem:[%s7879_s6 + $0xd0] ss:$216 sps:$4 sm:$0xff]  }
 0x1bf   : > { %v4963_v2 = vadd.f32 %v6681_v1, %v9082_v3  ;;  %v6684_v13 = vadd.f32 %v6683_v12, %v6682_v5  ;;  %v6711_v3 = vpop.f32.mrb[51].mxu1  ;;  %7041 = vmatprep.subr.bf16.mxu1 %v7681_v62  ;;  %v7715_v62 = vld [vmem:[%s7879_s6 + $0x280] ss:$216 sps:$4 sm:$0xff]   ;;  %s5783_s6 = sshll.u32 %s9301_s23, 3 }
 0x1c0   : > { %v6712_v16 = vadd.f32 %v6711_v3, %v6710_v9  ;;  %7014 = vmatpush3.bf16.msra.mxu0 %v7682_v14  ;;  %s226_s28 = scalar_lea.vmem %s9295_s3, %s5783_s6 }
 0x1c1   : > { %v9201_v11 = vadd.f32 %v6709_v4, %v4963_v2  ;;  %v4966_v6 = vadd.f32 %v6684_v13, %v9096_v7  ;;  %v7691_v7 = vld [vmem:[%s9293_s1 + $0xd00] sm:$0xff]   ;;  %7055 = vmatprep.subr.bf16.mxu0 %v7690_v25 }
 0x1c2   : > { %7042 = vmatpush3.bf16.msra.mxu1 %v7683_v18 }
 0x1c3   : > { %v6685_v17 = vpop.f32.mrb[52].mxu0  ;;  %v9214_v23 = vadd.f32 %v6712_v16, %v4966_v6  ;;  %5549 = vmatmul.mubr.bf16.vlgmr.msra.gmra.mrb[96].mxu0 %v7684_v15  ;;  %7083 = vmatprep.subr.bf16.mxu1 %v7690_v25 }
 0x1c4   : > { %v6686_v24 = vpop.f32.mrb[53].mxu0  ;;  %7056 = vmatpush3.bf16.msra.mxu0 %v7691_v7  ;;  %v6713_v34 = vpop.f32.mrb[52].mxu1  ;;  %5556 = vmatprep.mubr.bf16.mxu0 %v7694_v35 }
 0x1c5   : > { %v6687_v22 = vadd.f32 %v6686_v24, %v6685_v17  ;;  %v6688_v27 = vpop.f32.mrb[54].mxu0  ;;  %5598 = vmatmul.mubr.bf16.vlgmr.msra.gmra.mrb[96].mxu1 %v7687_v20  ;;  %7057 = vmatprep.subr.bf16.mxu0 %v7692_v29  ;;  %v6714_v31 = vpop.f32.mrb[53].mxu1 }
 0x1c6   : > { %v6689_v28 = vpop.f32.mrb[55].mxu0  ;;  %7091 = vmatpush3.bf16.msra.mxu1 %v7691_v7  ;;  %v6715_v39 = vadd.f32 %v6714_v31, %v6713_v34  ;;  %v6716_v33 = vpop.f32.mrb[54].mxu1  ;;  %5605 = vmatprep.mubr.bf16.mxu1 %v7698_v42 }
 0x1c7   : > { %v4971_v30 = vadd.f32 %v6687_v22, %v9126_v36  ;;  %v6690_v32 = vadd.f32 %v6689_v28, %v6688_v27  ;;  %7084 = vmatprep.subr.bf16.mxu1 %v7692_v29  ;;  %v7697_v36 = vld [vmem:[%s9293_s1 + $0xd50] sm:$0xff]   ;;  %v6717_v46 = vpop.f32.mrb[55].mxu1 }
 0x1c8   : > { %7058 = vmatpush3.bf16.msra.mxu0 %v7693_v26  ;;  %v6718_v48 = vadd.f32 %v6717_v46, %v6716_v33 }
 0x1c9   : > { %v4974_v37 = vadd.f32 %v6690_v32, %v9133_v41  ;;  %v9236_v43 = vadd.f32 %v6715_v39, %v4971_v30  ;;  %7059 = vmatprep.subr.bf16.mxu0 %v7697_v36  ;;  %v7700_v41 = vld [vmem:[%s9293_s1 + $0xd10] sm:$0xff]  }
 0x1ca   : > { %7092 = vmatpush3.bf16.msra.mxu1 %v7693_v26 }
 0x1cb   : > { %5557 = vmatmul.mubr.bf16.gmra.mrb[100].mxu0 %v7696_v38  ;;  %7085 = vmatprep.subr.bf16.mxu1 %v7697_v36  ;;  %v5023_v50 = vadd.f32 %v6718_v48, %v4974_v37 }
 0x1cc   : > { %7060 = vmatpush3.bf16.msra.mxu0 %v7700_v41  ;;  %5646 = vmatprep.mubr.bf16.mxu0 %v7714_v56 }
 0x1cd   : > { %5606 = vmatmul.mubr.bf16.gmra.mrb[100].mxu1 %v7701_v45  ;;  %7061 = vmatprep.subr.bf16.mxu0 %v7702_v47 }
 0x1ce   : > { %7093 = vmatpush3.bf16.msra.mxu1 %v7700_v41  ;;  %5654 = vmatprep.mubr.bf16.mxu1 %v7717_v57 }
 0x1cf   : > { %7086 = vmatprep.subr.bf16.mxu1 %v7702_v47 }
 0x1d0   : > { %7062 = vmatpush3.bf16.msra.mxu0 %v7703_v49 }
 0x1d1   : > { %7063 = vmatprep.subr.bf16.mxu0 %v7704_v53 }
 0x1d2   : > { %7094 = vmatpush3.bf16.msra.mxu1 %v7703_v49 }
 0x1d3   : > { %7087 = vmatprep.subr.bf16.mxu1 %v7704_v53 }
 0x1d4   : > { %7064 = vmatpush3.bf16.msra.mxu0 %v7705_v40 }
 0x1d5   : > { %7065 = vmatprep.subr.bf16.mxu0 %v7706_v54 }
 0x1d6   : > { %7095 = vmatpush3.bf16.msra.mxu1 %v7705_v40 }
 0x1d7   : > { %7088 = vmatprep.subr.bf16.mxu1 %v7706_v54 }
 0x1d8   : > { %7066 = vmatpush3.bf16.msra.mxu0 %v7707_v55 }
 0x1d9   : > { %7067 = vmatprep.subr.bf16.mxu0 %v7708_v44 }
 0x1da   : > { %7096 = vmatpush3.bf16.msra.mxu1 %v7707_v55 }
 0x1db   : > { %7089 = vmatprep.subr.bf16.mxu1 %v7708_v44 }
 0x1dc   : > { %7068 = vmatpush3.bf16.msra.mxu0 %v7709_v58 }
 0x1dd   : > { %v6735_v61 = vpop.f32.mrb[56].mxu0  ;;  %7069 = vmatprep.subr.bf16.mxu0 %v7710_v60 }
 0x1de   : > { %v6736_v52 = vpop.f32.mrb[57].mxu0  ;;  %v6763_v0 = vpop.f32.mrb[56].mxu1  ;;  %7097 = vmatpush3.bf16.msra.mxu1 %v7709_v58 }
 0x1df   : > { %v6737_v1 = vadd.f32 %v6736_v52, %v6735_v61  ;;  %v6738_v51 = vpop.f32.mrb[58].mxu0  ;;  %v6764_v59 = vpop.f32.mrb[57].mxu1  ;;  %7090 = vmatprep.subr.bf16.mxu1 %v7710_v60 }
 0x1e0   : > { %v6739_v4 = vpop.f32.mrb[59].mxu0  ;;  %v6765_v8 = vadd.f32 %v6764_v59, %v6763_v0  ;;  %v6766_v2 = vpop.f32.mrb[58].mxu1  ;;  %7070 = vmatpush3.bf16.msra.mxu0 %v7711_v63 }
 0x1e1   : > { %v5061_v5 = vadd.f32 %v6737_v1, %v9201_v11  ;;  %v6740_v9 = vadd.f32 %v6739_v4, %v6738_v51  ;;  %v6767_v12 = vpop.f32.mrb[59].mxu1 }
 0x1e2   : > { %v6768_v14 = vadd.f32 %v6767_v12, %v6766_v2  ;;  %7098 = vmatpush3.bf16.msra.mxu1 %v7711_v63 }
 0x1e3   : > { %v5110_v13 = vadd.f32 %v6765_v8, %v5061_v5  ;;  %v5064_v3 = vadd.f32 %v6740_v9, %v9214_v23  ;;  %5647 = vmatmul.mubr.bf16.vlgmr.msra.gmra.mrb[104].mxu0 %v7712_v10 }
 0x1e5   : > { %v5113_v16 = vadd.f32 %v6768_v14, %v5064_v3  ;;  %5655 = vmatmul.mubr.bf16.vlgmr.msra.gmra.mrb[104].mxu1 %v7715_v62  ;;  %v6741_v18 = vpop.f32.mrb[60].mxu0 }
 0x1e6   : > { %v6742_v6 = vpop.f32.mrb[61].mxu0  ;;  %v6769_v21 = vpop.f32.mrb[60].mxu1 }
 0x1e7   : > { %v6743_v15 = vadd.f32 %v6742_v6, %v6741_v18  ;;  %v6744_v19 = vpop.f32.mrb[62].mxu0  ;;  %v6770_v25 = vpop.f32.mrb[61].mxu1 }
 0x1e8   : > { %v6745_v11 = vpop.f32.mrb[63].mxu0  ;;  %v6771_v22 = vadd.f32 %v6770_v25, %v6769_v21  ;;  %v6772_v27 = vpop.f32.mrb[62].mxu1 }
 0x1e9   : > { %v5069_v17 = vadd.f32 %v6743_v15, %v9236_v43  ;;  %v6746_v20 = vadd.f32 %v6745_v11, %v6744_v19  ;;  %v6773_v7 = vpop.f32.mrb[63].mxu1 }
 0x1ea   : > { %v6774_v28 = vadd.f32 %v6773_v7, %v6772_v27 }
 0x1eb   : > { %v5072_v24 = vadd.f32 %v6746_v20, %v5023_v50  ;;  %v5118_v23 = vadd.f32 %v6771_v22, %v5069_v17 }
 0x1ed   : > { %v5121_v29 = vadd.f32 %v6774_v28, %v5072_v24 }
 0x210   : > { %v6791_v30 = vpop.f32.mrb[64].mxu0 }
 0x211   : > { %v6792_v26 = vpop.f32.mrb[65].mxu0 }
 0x212   : > { %v6793_v34 = vadd.f32 %v6792_v26, %v6791_v30  ;;  %v6794_v37 = vpop.f32.mrb[66].mxu0 }
 0x213   : > { %v6795_v39 = vpop.f32.mrb[67].mxu0 }
 0x214   : > { %v5159_v36 = vadd.f32 %v6793_v34, %v5110_v13  ;;  %v6796_v33 = vadd.f32 %v6795_v39, %v6794_v37 }
 0x216   : > { %v5162_v45 = vadd.f32 %v6796_v33, %v5113_v16 }
 0x217   : > { %v6819_v32 = vpop.f32.mrb[64].mxu1 }
 0x218   : > { %v6820_v35 = vpop.f32.mrb[65].mxu1 }
 0x219   : > { %v6821_v31 = vadd.f32 %v6820_v35, %v6819_v32  ;;  %v6822_v38 = vpop.f32.mrb[66].mxu1 }
 0x21a   : > { %v6823_v42 = vpop.f32.mrb[67].mxu1 }
 0x21b   : > { %v6824_v43 = vadd.f32 %v6823_v42, %v6822_v38  ;;  %v5208_v41 = vadd.f32 %v6821_v31, %v5159_v36 }
 0x21d   : > { %v5211_v46 = vadd.f32 %v6824_v43, %v5162_v45 }
 0x21e   : > { %v6797_v47 = vpop.f32.mrb[68].mxu0 }
 0x21f   : > { %v6798_v48 = vpop.f32.mrb[69].mxu0  ;;  %v6825_v55 = vpop.f32.mrb[68].mxu1 }
 0x220   : > { %v6799_v49 = vadd.f32 %v6798_v48, %v6797_v47  ;;  %v6800_v50 = vpop.f32.mrb[70].mxu0  ;;  %v6826_v44 = vpop.f32.mrb[69].mxu1 }
 0x221   : > { %v6801_v53 = vpop.f32.mrb[71].mxu0  ;;  %v6827_v57 = vadd.f32 %v6826_v44, %v6825_v55  ;;  %v6828_v58 = vpop.f32.mrb[70].mxu1 }
 0x222   : > { %v5167_v40 = vadd.f32 %v6799_v49, %v5118_v23  ;;  %v6802_v54 = vadd.f32 %v6801_v53, %v6800_v50  ;;  %v6829_v60 = vpop.f32.mrb[71].mxu1 }
 0x223   : > { %v6830_v52 = vadd.f32 %v6829_v60, %v6828_v58 }
 0x224   : > { %v5170_v56 = vadd.f32 %v6802_v54, %v5121_v29  ;;  %v5216_v61 = vadd.f32 %v6827_v57, %v5167_v40 }
 0x226   : > { %v5219_v63 = vadd.f32 %v6830_v52, %v5170_v56 }
 0x236   : > { %v6847_v0 = vpop.f32.mrb[72].mxu0 }
 0x237   : > { %v6875_v1 = vpop.f32.mrb[72].mxu1  ;;  %v6848_v51 = vpop.f32.mrb[73].mxu0 }
 0x238   : > { %v6849_v59 = vadd.f32 %v6848_v51, %v6847_v0  ;;  %v6876_v4 = vpop.f32.mrb[73].mxu1  ;;  %v6850_v5 = vpop.f32.mrb[74].mxu0 }
 0x239   : > { %v6877_v8 = vadd.f32 %v6876_v4, %v6875_v1  ;;  %v6878_v2 = vpop.f32.mrb[74].mxu1  ;;  %v6851_v9 = vpop.f32.mrb[75].mxu0 }
 0x23a   : > { %v5257_v10 = vadd.f32 %v6849_v59, %v5208_v41  ;;  %v6852_v12 = vadd.f32 %v6851_v9, %v6850_v5  ;;  %v6879_v62 = vpop.f32.mrb[75].mxu1 }
 0x23b   : > { %v6880_v13 = vadd.f32 %v6879_v62, %v6878_v2 }
 0x23c   : > { %v5306_v3 = vadd.f32 %v6877_v8, %v5257_v10  ;;  %v5260_v14 = vadd.f32 %v6852_v12, %v5211_v46 }
 0x23e   : > { %v5309_v16 = vadd.f32 %v6880_v13, %v5260_v14  ;;  %v6853_v18 = vpop.f32.mrb[76].mxu0 }
 0x23f   : > { %v6854_v6 = vpop.f32.mrb[77].mxu0  ;;  %v6881_v21 = vpop.f32.mrb[76].mxu1 }
 0x240   : > { %v6855_v15 = vadd.f32 %v6854_v6, %v6853_v18  ;;  %v6856_v19 = vpop.f32.mrb[78].mxu0  ;;  %v6882_v25 = vpop.f32.mrb[77].mxu1 }
 0x241   : > { %v6857_v11 = vpop.f32.mrb[79].mxu0  ;;  %v6883_v22 = vadd.f32 %v6882_v25, %v6881_v21  ;;  %v6884_v27 = vpop.f32.mrb[78].mxu1 }
 0x242   : > { %v5265_v17 = vadd.f32 %v6855_v15, %v5216_v61  ;;  %v6858_v20 = vadd.f32 %v6857_v11, %v6856_v19  ;;  %v6885_v7 = vpop.f32.mrb[79].mxu1 }
 0x243   : > { %v6886_v28 = vadd.f32 %v6885_v7, %v6884_v27 }
 0x244   : > { %v5268_v24 = vadd.f32 %v6858_v20, %v5219_v63  ;;  %v5314_v23 = vadd.f32 %v6883_v22, %v5265_v17 }
 0x246   : > { %v5317_v29 = vadd.f32 %v6886_v28, %v5268_v24 }
 0x256   : > { %v6903_v30 = vpop.f32.mrb[80].mxu0 }
 0x257   : > { %v6904_v32 = vpop.f32.mrb[81].mxu0 }
 0x258   : > { %v6931_v26 = vpop.f32.mrb[80].mxu1  ;;  %v6905_v34 = vadd.f32 %v6904_v32, %v6903_v30  ;;  %v6906_v35 = vpop.f32.mrb[82].mxu0 }
 0x259   : > { %v6932_v37 = vpop.f32.mrb[81].mxu1  ;;  %v6907_v31 = vpop.f32.mrb[83].mxu0 }
 0x25a   : > { %v5355_v38 = vadd.f32 %v6905_v34, %v5306_v3  ;;  %v6933_v39 = vadd.f32 %v6932_v37, %v6931_v26  ;;  %v6934_v36 = vpop.f32.mrb[82].mxu1  ;;  %v6908_v33 = vadd.f32 %v6907_v31, %v6906_v35 }
 0x25b   : > { %v6935_v42 = vpop.f32.mrb[83].mxu1 }
 0x25c   : > { %v5404_v43 = vadd.f32 %v6933_v39, %v5355_v38  ;;  %v5358_v41 = vadd.f32 %v6908_v33, %v5309_v16  ;;  %v6936_v45 = vadd.f32 %v6935_v42, %v6934_v36 }
 0x25e   : > { %v5407_v46 = vadd.f32 %v6936_v45, %v5358_v41  ;;  %v6909_v47 = vpop.f32.mrb[84].mxu0 }
 0x25f   : > { %v6910_v48 = vpop.f32.mrb[85].mxu0 }
 0x260   : > { %v6911_v49 = vadd.f32 %v6910_v48, %v6909_v47  ;;  %v6912_v50 = vpop.f32.mrb[86].mxu0  ;;  %v6937_v55 = vpop.f32.mrb[84].mxu1 }
 0x261   : > { %v6913_v53 = vpop.f32.mrb[87].mxu0  ;;  %v6938_v44 = vpop.f32.mrb[85].mxu1 }
 0x262   : > { %v5363_v40 = vadd.f32 %v6911_v49, %v5314_v23  ;;  %v6914_v54 = vadd.f32 %v6913_v53, %v6912_v50  ;;  %v6939_v57 = vadd.f32 %v6938_v44, %v6937_v55  ;;  %v6940_v58 = vpop.f32.mrb[86].mxu1 }
 0x263   : > { %v6941_v60 = vpop.f32.mrb[87].mxu1 }
 0x264   : > { %v5366_v56 = vadd.f32 %v6914_v54, %v5317_v29  ;;  %v5412_v61 = vadd.f32 %v6939_v57, %v5363_v40  ;;  %v6942_v52 = vadd.f32 %v6941_v60, %v6940_v58 }
 0x266   : > { %v5415_v63 = vadd.f32 %v6942_v52, %v5366_v56 }
 0x276   : > { %v6959_v0 = vpop.f32.mrb[88].mxu0 }
 0x277   : > { %v6960_v51 = vpop.f32.mrb[89].mxu0 }
 0x278   : > { %v6987_v1 = vpop.f32.mrb[88].mxu1  ;;  %v6961_v59 = vadd.f32 %v6960_v51, %v6959_v0  ;;  %v6962_v5 = vpop.f32.mrb[90].mxu0 }
 0x279   : > { %v6988_v4 = vpop.f32.mrb[89].mxu1  ;;  %v6963_v9 = vpop.f32.mrb[91].mxu0 }
 0x27a   : > { %v6989_v8 = vadd.f32 %v6988_v4, %v6987_v1  ;;  %v6990_v2 = vpop.f32.mrb[90].mxu1  ;;  %v5453_v10 = vadd.f32 %v6961_v59, %v5404_v43  ;;  %v6964_v12 = vadd.f32 %v6963_v9, %v6962_v5 }
 0x27b   : > { %v6991_v62 = vpop.f32.mrb[91].mxu1 }
 0x27c   : > { %v6992_v13 = vadd.f32 %v6991_v62, %v6990_v2  ;;  %v5502_v3 = vadd.f32 %v6989_v8, %v5453_v10  ;;  %v5456_v14 = vadd.f32 %v6964_v12, %v5407_v46 }
 0x27e   : > { %v5505_v16 = vadd.f32 %v6992_v13, %v5456_v14  ;;  %v6965_v18 = vpop.f32.mrb[92].mxu0 }
 0x27f   : > { %v6966_v6 = vpop.f32.mrb[93].mxu0 }
 0x280   : > { %v6967_v15 = vadd.f32 %v6966_v6, %v6965_v18  ;;  %v6968_v19 = vpop.f32.mrb[94].mxu0  ;;  %v6993_v21 = vpop.f32.mrb[92].mxu1 }
 0x281   : > { %v6969_v11 = vpop.f32.mrb[95].mxu0  ;;  %v6994_v25 = vpop.f32.mrb[93].mxu1 }
 0x282   : > { %v5461_v17 = vadd.f32 %v6967_v15, %v5412_v61  ;;  %v6970_v20 = vadd.f32 %v6969_v11, %v6968_v19  ;;  %v6995_v22 = vadd.f32 %v6994_v25, %v6993_v21  ;;  %v6996_v27 = vpop.f32.mrb[94].mxu1 }
 0x283   : > { %v6997_v7 = vpop.f32.mrb[95].mxu1 }
 0x284   : > { %v5464_v24 = vadd.f32 %v6970_v20, %v5415_v63  ;;  %v5510_v23 = vadd.f32 %v6995_v22, %v5461_v17  ;;  %v6998_v28 = vadd.f32 %v6997_v7, %v6996_v27 }
 0x286   : > { %v5513_v29 = vadd.f32 %v6998_v28, %v5464_v24 }
 0x296   : > { %v7015_v30 = vpop.f32.mrb[96].mxu0 }
 0x297   : > { %v7016_v26 = vpop.f32.mrb[97].mxu0 }
 0x298   : > { %v7043_v32 = vpop.f32.mrb[96].mxu1  ;;  %v7017_v34 = vadd.f32 %v7016_v26, %v7015_v30  ;;  %v7018_v37 = vpop.f32.mrb[98].mxu0 }
 0x299   : > { %v7044_v35 = vpop.f32.mrb[97].mxu1  ;;  %v7019_v39 = vpop.f32.mrb[99].mxu0 }
 0x29a   : > { %v7045_v31 = vadd.f32 %v7044_v35, %v7043_v32  ;;  %v7046_v38 = vpop.f32.mrb[98].mxu1  ;;  %v5551_v36 = vadd.f32 %v7017_v34, %v5502_v3  ;;  %v7020_v33 = vadd.f32 %v7019_v39, %v7018_v37 }
 0x29b   : > { %v7047_v42 = vpop.f32.mrb[99].mxu1 }
 0x29c   : > { %v7048_v43 = vadd.f32 %v7047_v42, %v7046_v38  ;;  %v5600_v41 = vadd.f32 %v7045_v31, %v5551_v36  ;;  %v5554_v45 = vadd.f32 %v7020_v33, %v5505_v16 }
 0x29e   : > { %v5603_v46 = vadd.f32 %v7048_v43, %v5554_v45  ;;  %v7021_v47 = vpop.f32.mrb[100].mxu0 }
 0x29f   : > { %v7022_v48 = vpop.f32.mrb[101].mxu0 }
 0x2a0   : > { %v7023_v49 = vadd.f32 %v7022_v48, %v7021_v47  ;;  %v7024_v50 = vpop.f32.mrb[102].mxu0  ;;  %v7049_v53 = vpop.f32.mrb[100].mxu1 }
 0x2a1   : > { %v7025_v40 = vpop.f32.mrb[103].mxu0  ;;  %v7050_v54 = vpop.f32.mrb[101].mxu1 }
 0x2a2   : > { %v5559_v55 = vadd.f32 %v7023_v49, %v5510_v23  ;;  %v7026_v56 = vadd.f32 %v7025_v40, %v7024_v50  ;;  %v7051_v44 = vadd.f32 %v7050_v54, %v7049_v53  ;;  %v7052_v57 = vpop.f32.mrb[102].mxu1 }
 0x2a3   : > { %v7053_v58 = vpop.f32.mrb[103].mxu1 }
 0x2a4   : > { %v5562_v60 = vadd.f32 %v7026_v56, %v5513_v29  ;;  %v5608_v61 = vadd.f32 %v7051_v44, %v5559_v55  ;;  %v7054_v52 = vadd.f32 %v7053_v58, %v7052_v57 }
 0x2a6   : > { %v5611_v63 = vadd.f32 %v7054_v52, %v5562_v60 }
 0x2b6   : > { %v7071_v0 = vpop.f32.mrb[104].mxu0 }
 0x2b7   : > { %v7072_v51 = vpop.f32.mrb[105].mxu0 }
 0x2b8   : > { %v7077_v1 = vpop.f32.mrb[104].mxu1  ;;  %v7073_v59 = vadd.f32 %v7072_v51, %v7071_v0  ;;  %v7074_v5 = vpop.f32.mrb[106].mxu0 }
 0x2b9   : > { %v7078_v4 = vpop.f32.mrb[105].mxu1  ;;  %v7075_v9 = vpop.f32.mrb[107].mxu0 }
 0x2ba   : > { %v7079_v8 = vadd.f32 %v7078_v4, %v7077_v1  ;;  %v7080_v2 = vpop.f32.mrb[106].mxu1  ;;  %v5649_v10 = vadd.f32 %v7073_v59, %v5600_v41  ;;  %v7076_v12 = vadd.f32 %v7075_v9, %v7074_v5 }
 0x2bb   : > { %v7081_v62 = vpop.f32.mrb[107].mxu1 }
 0x2bc   : > { %v5657_v13 = vadd.f32 %v7079_v8, %v5608_v61  ;;  %v7082_v3 = vadd.f32 %v7081_v62, %v7080_v2  ;;  %v5663_v14 = vmax.f32 %v5649_v10, 0.0  ;;  %v5652_v16 = vadd.f32 %v7076_v12, %v5603_v46 }
 0x2be   : > { %v5660_v18 = vadd.f32 %v7082_v3, %v5611_v63  ;;  %5667 = vst [vmem:[%s226_s28] sm:$0xff] %v5663_v14  ;;  %v5664_v6 = vmax.f32 %v5652_v16, 0.0  ;;  %v5665_v15 = vmax.f32 %v5657_v13, 0.0 }
 0x2c0   : > { %5668 = vst [vmem:[%s226_s28 + $0x8] sm:$0xff] %v5664_v6  ;;  %v5666_v19 = vmax.f32 %v5660_v18, 0.0  ;;  %5669 = vst [vmem:[%s226_s28 + $0x10] sm:$0xff] %v5665_v15 }
 0x2c2   : > { %5670 = vst [vmem:[%s226_s28 + $0x18] sm:$0xff] %v5666_v19 }
 0x2c3 PF: > { %s13_s14 = sadd.s32 1, %s7740_s14   ;;  %s9296_s12 = smov %s7736_s13 }
 0x2c4   : > { %p10_p5 = scmp.ge.s32.totalorder %s13_s14, 4   ;;  %s9297_s13 = smov %s9299_s15 }
 0x2c6   :  { %12 = sbr.rel (!%p10_p5) target bundleno = 2 (0x2), region = 68 }

</bundles_post_ra>
